<compile_context>
chip_gen: v7x
topology: tpu7x:2x2x1
jax: 0.10.0
libtpu: 0.0.40
codegen_flags: <defaults>
</compile_context>

<pallas_src>
import jax
import jax.numpy as jnp
from jax import lax
from jax.experimental import pallas as pl
from jax.experimental.pallas import tpu as pltpu


# ----------------------------- parameter init ------------------------------

def init_params(key, input_img_size=(3, 32, 32)):
    """PyTorch-style uniform(-1/sqrt(fan_in), 1/sqrt(fan_in)) init."""
    C, H, W = input_img_size
    assert C == 3
    ks = jax.random.split(key, 10)

    def u(k, shape, fan_in):
        bound = 1.0 / float(fan_in) ** 0.5
        return jax.random.uniform(k, shape, jnp.float32, -bound, bound)

    h1, w1 = (H - 4) // 2, (W - 4) // 2        # after conv1(5x5) + pool(2)
    h2, w2 = (h1 - 4) // 2, (w1 - 4) // 2      # after conv2(5x5) + pool(2)
    nfeat = 16 * h2 * w2                       # == myCNN.num_features_2fc

    params = {
        "w1": u(ks[0], (5, 5, 3, 6), 3 * 25),     # (KH, KW, Cin, Cout)
        "b1": u(ks[1], (6,), 3 * 25),
        "w2": u(ks[2], (5, 5, 6, 16), 6 * 25),
        "b2": u(ks[3], (16,), 6 * 25),
        "wf1": u(ks[4], (nfeat, 120), nfeat),     # (in, out)
        "bf1": u(ks[5], (120,), nfeat),
        "wf2": u(ks[6], (120, 84), 120),
        "bf2": u(ks[7], (84,), 120),
        "wf3": u(ks[8], (84, 2), 84),
        "bf3": u(ks[9], (2,), 84),
    }
    return params, nfeat


# --------------------------- fused forward builder --------------------------

def build_mycnn_forward(params, input_img_size):
    Cin, H, W = input_img_size
    K = 5
    C1, C2 = 6, 16
    H1, W1 = H - K + 1, W - K + 1              # conv1 output
    assert H1 % 2 == 0 and W1 % 2 == 0
    H1p, W1p = H1 // 2, W1 // 2                # pool1 output
    H2, W2 = H1p - K + 1, W1p - K + 1          # conv2 output
    assert H2 % 2 == 0 and W2 % 2 == 0
    H2p, W2p = H2 // 2, W2 // 2                # pool2 output
    NCLS = params["wf3"].shape[1]
    f32 = jnp.float32

    # ------- one-time weight transforms (layout plumbing kept out of kernel) -------
    # 5x5 conv taps -> block-diagonal GEMM operands:
    #   window (Ho, Wo*Cin) @ BD(tap) -> (Ho, Wo*Cout)
    def blockdiag_taps(w, wo):
        kh, kw, cin, cout = w.shape
        taps = w.reshape(kh * kw, cin, cout)
        eye = jnp.eye(wo, dtype=f32)
        return jnp.stack([jnp.kron(eye, taps[k]) for k in range(kh * kw)])

    bd1 = blockdiag_taps(params["w1"], W1)        # (25, W1*Cin, W1*C1)
    bd2 = blockdiag_taps(params["w2"], W2)        # (25, W2*C1,  W2*C2)
    b1t = jnp.tile(params["b1"], W1)[None, :]     # (1, W1*C1)
    b2t = jnp.tile(params["b2"], W2)[None, :]     # (1, W2*C2)

    # 2x2 max-pool as even/odd selection matmuls.
    def col_sel(w_out, c, parity):
        sel = (jnp.arange(w_out)[:, None] ==
               2 * jnp.arange(w_out // 2)[None, :] + parity).astype(f32)
        return jnp.kron(sel, jnp.eye(c, dtype=f32))       # (w_out*c, (w_out//2)*c)

    def row_sel(h_out, parity):
        return (2 * jnp.arange(h_out // 2)[:, None] + parity ==
                jnp.arange(h_out)[None, :]).astype(f32)   # (h_out//2, h_out)

    p1ce, p1co = col_sel(W1, C1, 0), col_sel(W1, C1, 1)
    p1re, p1ro = row_sel(H1, 0), row_sel(H1, 1)
    p2ce, p2co = col_sel(W2, C2, 0), col_sel(W2, C2, 1)
    p2re, p2ro = row_sel(H2, 0), row_sel(H2, 1)

    # fc1 weight regrouped so PyTorch's NCHW flatten (c*H*W + y*W + x) is folded
    # into the weight: wf1s[y, x*C2 + c, :] == wf1[c*H2p*W2p + y*W2p + x, :]
    wf1s = jnp.transpose(params["wf1"].reshape(C2, H2p, W2p, -1),
                         (1, 2, 0, 3)).reshape(H2p, W2p * C2, -1)

    operands = (bd1, b1t, p1ce, p1co, p1re, p1ro,
                bd2, b2t, p2ce, p2co, p2re, p2ro,
                wf1s, params["bf1"][None, :],
                params["wf2"], params["bf2"][None, :],
                params["wf3"], params["bf3"][None, :])

    # --------------------------------- kernel ---------------------------------
    def kernel(x_ref, bd1_ref, b1_ref, p1ce_ref, p1co_ref, p1re_ref, p1ro_ref,
               bd2_ref, b2_ref, p2ce_ref, p2co_ref, p2re_ref, p2ro_ref,
               wf1_ref, bf1_ref, wf2_ref, bf2_ref, wf3_ref, bf3_ref, o_ref):
        # conv1 + ReLU: 25 shifted-window GEMMs accumulated in registers;
        # activations stay as a lane-dense (H1, W1*C1) slab in VMEM/vregs.
        acc1 = jnp.zeros((H1, W1 * C1), dtype=f32)
        for i in range(K):
            for j in range(K):
                win = x_ref[0, i:i + H1, j * Cin:(j + W1) * Cin]       # (H1, W1*Cin)
                acc1 = acc1 + jnp.dot(win, bd1_ref[i * K + j],
                                      preferred_element_type=f32)
        h1 = jnp.maximum(acc1 + b1_ref[...], 0.0)                      # (H1, W1*C1)

        # 2x2 max-pool (even/odd column selectors, then even/odd row selectors)
        cmax = jnp.maximum(jnp.dot(h1, p1ce_ref[...], preferred_element_type=f32),
                           jnp.dot(h1, p1co_ref[...], preferred_element_type=f32))
        p1 = jnp.maximum(jnp.dot(p1re_ref[...], cmax, preferred_element_type=f32),
                         jnp.dot(p1ro_ref[...], cmax, preferred_element_type=f32))
        # p1: (H1p, W1p*C1)

        # conv2 + ReLU
        acc2 = jnp.zeros((H2, W2 * C2), dtype=f32)
        for i in range(K):
            for j in range(K):
                win = p1[i:i + H2, j * C1:(j + W2) * C1]               # (H2, W2*C1)
                acc2 = acc2 + jnp.dot(win, bd2_ref[i * K + j],
                                      preferred_element_type=f32)
        h2 = jnp.maximum(acc2 + b2_ref[...], 0.0)                      # (H2, W2*C2)

        # 2x2 max-pool
        cmax = jnp.maximum(jnp.dot(h2, p2ce_ref[...], preferred_element_type=f32),
                           jnp.dot(h2, p2co_ref[...], preferred_element_type=f32))
        p2 = jnp.maximum(jnp.dot(p2re_ref[...], cmax, preferred_element_type=f32),
                         jnp.dot(p2ro_ref[...], cmax, preferred_element_type=f32))
        # p2: (H2p, W2p*C2)

        # fc1 (+ReLU): NCHW flatten already folded into wf1s -> sum of row GEMMs,
        # no activation transpose / reshape needed.
        h = bf1_ref[...]                                               # (1, 120)
        for y in range(H2p):
            h = h + jnp.dot(p2[y:y + 1, :], wf1_ref[y],
                            preferred_element_type=f32)
        h = jnp.maximum(h, 0.0)
        h = jnp.maximum(jnp.dot(h, wf2_ref[...], preferred_element_type=f32)
                        + bf2_ref[...], 0.0)                           # (1, 84)
        logits = (jnp.dot(h, wf3_ref[...], preferred_element_type=f32)
                  + bf3_ref[...])                                      # (1, NCLS)

        # log_softmax over classes
        m = jnp.max(logits, axis=-1, keepdims=True)
        z = logits - m
        lse = jnp.log(jnp.sum(jnp.exp(z), axis=-1, keepdims=True))
        o_ref[0] = z - lse

    # ------------------------------- pallas_call -------------------------------
    def _const_index_map(nd):
        return lambda b: (0,) * nd

    def _const_spec(a):
        return pl.BlockSpec(a.shape, _const_index_map(a.ndim))

    def forward(x_nchw):
        n = x_nchw.shape[0]
        # NCHW -> lane-dense (N, H, W*Cin) slabs; only input-side glue left to XLA.
        x2d = jnp.transpose(x_nchw, (0, 2, 3, 1)).reshape(n, H, W * Cin)
        out = pl.pallas_call(
            kernel,
            out_shape=jax.ShapeDtypeStruct((n, 1, NCLS), jnp.float32),
            grid=(n,),
            in_specs=[pl.BlockSpec((1, H, W * Cin), lambda b: (b, 0, 0))]
                     + [_const_spec(a) for a in operands],
            out_specs=pl.BlockSpec((1, 1, NCLS), lambda b: (b, 0, 0)),
            compiler_params=pltpu.CompilerParams(
                dimension_semantics=("parallel",),
                vmem_limit_bytes=32 * 1024 * 1024),
        )(x2d, *operands)
        return out.reshape(n, NCLS)

    return forward


# --------------------------- pure-JAX reference -----------------------------

def reference_forward(x_nchw, params):
    x = jnp.transpose(x_nchw, (0, 2, 3, 1))                    # NHWC
    dn = ("NHWC", "HWIO", "NHWC")

    def conv_relu(x, w, b):
        y = lax.conv_general_dilated(x, w, (1, 1), "VALID", dimension_numbers=dn,
                                     precision=lax.Precision.HIGHEST)
        return jnp.maximum(y + b, 0.0)

    def pool(x):
        return lax.reduce_window(x, -jnp.inf, lax.max,
                                 (1, 2, 2, 1), (1, 2, 2, 1), "VALID")

    x = pool(conv_relu(x, params["w1"], params["b1"]))
    x = pool(conv_relu(x, params["w2"], params["b2"]))
    n = x.shape[0]
    feat = jnp.transpose(x, (0, 3, 1, 2)).reshape(n, -1)       # PyTorch NCHW flatten
    hi = lax.Precision.HIGHEST
    h = jnp.maximum(jnp.dot(feat, params["wf1"], precision=hi) + params["bf1"], 0.0)
    h = jnp.maximum(jnp.dot(h, params["wf2"], precision=hi) + params["bf2"], 0.0)
    logits = jnp.dot(h, params["wf3"], precision=hi) + params["bf3"]
    return jax.nn.log_softmax(logits, axis=-1)


# ----------------------------------- main -----------------------------------

if __name__ == "__main__":
    key = jax.random.PRNGKey(0)
    k_params, k_x = jax.random.split(key)

    input_img_size = (3, 32, 32)   # LeNet-style: 32 -> 28 -> 14 -> 10 -> 5
    batch = 2

    params, nfeat = init_params(k_params, input_img_size)
    x = jax.random.normal(k_x, (batch,) + input_img_size, dtype=jnp.float32)

    fwd = jax.jit(build_mycnn_forward(params, input_img_size))
    out = jax.block_until_ready(fwd(x))

    assert out.shape == (batch, 2), out.shape
    assert bool(jnp.all(jnp.isfinite(out)))
    # log_softmax rows sum (in prob space) to ~1
    assert bool(jnp.allclose(jnp.sum(jnp.exp(out), axis=-1), 1.0, atol=1e-5))
    # matches a pure-JAX/XLA reference of the same PyTorch forward
    ref = reference_forward(x, params)
    assert bool(jnp.allclose(out, ref, atol=3e-2, rtol=3e-2)), \
        float(jnp.max(jnp.abs(out - ref)))
    print("KERNEL_OK")
</pallas_src>

<mosaic_0001>
module attributes {stable_mosaic.version = 11 : i64} {
  func.func @kernel(%arg0: i32, %arg1: memref<1x32x96xf32, #tpu.memory_space<vmem>>, %arg2: memref<25x84x168xf32, #tpu.memory_space<vmem>>, %arg3: memref<1x168xf32, #tpu.memory_space<vmem>>, %arg4: memref<168x84xf32, #tpu.memory_space<vmem>>, %arg5: memref<168x84xf32, #tpu.memory_space<vmem>>, %arg6: memref<14x28xf32, #tpu.memory_space<vmem>>, %arg7: memref<14x28xf32, #tpu.memory_space<vmem>>, %arg8: memref<25x60x160xf32, #tpu.memory_space<vmem>>, %arg9: memref<1x160xf32, #tpu.memory_space<vmem>>, %arg10: memref<160x80xf32, #tpu.memory_space<vmem>>, %arg11: memref<160x80xf32, #tpu.memory_space<vmem>>, %arg12: memref<5x10xf32, #tpu.memory_space<vmem>>, %arg13: memref<5x10xf32, #tpu.memory_space<vmem>>, %arg14: memref<5x80x120xf32, #tpu.memory_space<vmem>>, %arg15: memref<1x120xf32, #tpu.memory_space<vmem>>, %arg16: memref<120x84xf32, #tpu.memory_space<vmem>>, %arg17: memref<1x84xf32, #tpu.memory_space<vmem>>, %arg18: memref<84x2xf32, #tpu.memory_space<vmem>>, %arg19: memref<1x2xf32, #tpu.memory_space<vmem>>, %arg20: memref<1x1x2xf32, #tpu.memory_space<vmem>>) attributes {dimension_semantics = [#tpu.dimension_semantics<parallel>], iteration_bounds = array<i64: 2>, scalar_prefetch = 0 : i64, scratch_operands = 0 : i64, tpu.core_type = #tpu.core_type<tc>, window_params = [{transform_indices = @transform_0, window_bounds = array<i64: 1, 32, 96>}, {pipeline_mode = #tpu.pipeline_mode<synchronous>, transform_indices = @transform_1, window_bounds = array<i64: 25, 84, 168>}, {pipeline_mode = #tpu.pipeline_mode<synchronous>, transform_indices = @transform_2, window_bounds = array<i64: 1, 168>}, {pipeline_mode = #tpu.pipeline_mode<synchronous>, transform_indices = @transform_3, window_bounds = array<i64: 168, 84>}, {pipeline_mode = #tpu.pipeline_mode<synchronous>, transform_indices = @transform_4, window_bounds = array<i64: 168, 84>}, {pipeline_mode = #tpu.pipeline_mode<synchronous>, transform_indices = @transform_5, window_bounds = array<i64: 14, 28>}, {pipeline_mode = #tpu.pipeline_mode<synchronous>, transform_indices = @transform_6, window_bounds = array<i64: 14, 28>}, {pipeline_mode = #tpu.pipeline_mode<synchronous>, transform_indices = @transform_7, window_bounds = array<i64: 25, 60, 160>}, {pipeline_mode = #tpu.pipeline_mode<synchronous>, transform_indices = @transform_8, window_bounds = array<i64: 1, 160>}, {pipeline_mode = #tpu.pipeline_mode<synchronous>, transform_indices = @transform_9, window_bounds = array<i64: 160, 80>}, {pipeline_mode = #tpu.pipeline_mode<synchronous>, transform_indices = @transform_10, window_bounds = array<i64: 160, 80>}, {pipeline_mode = #tpu.pipeline_mode<synchronous>, transform_indices = @transform_11, window_bounds = array<i64: 5, 10>}, {pipeline_mode = #tpu.pipeline_mode<synchronous>, transform_indices = @transform_12, window_bounds = array<i64: 5, 10>}, {pipeline_mode = #tpu.pipeline_mode<synchronous>, transform_indices = @transform_13, window_bounds = array<i64: 5, 80, 120>}, {pipeline_mode = #tpu.pipeline_mode<synchronous>, transform_indices = @transform_14, window_bounds = array<i64: 1, 120>}, {pipeline_mode = #tpu.pipeline_mode<synchronous>, transform_indices = @transform_15, window_bounds = array<i64: 120, 84>}, {pipeline_mode = #tpu.pipeline_mode<synchronous>, transform_indices = @transform_16, window_bounds = array<i64: 1, 84>}, {pipeline_mode = #tpu.pipeline_mode<synchronous>, transform_indices = @transform_17, window_bounds = array<i64: 84, 2>}, {pipeline_mode = #tpu.pipeline_mode<synchronous>, transform_indices = @transform_18, window_bounds = array<i64: 1, 2>}, {transform_indices = @transform_19, window_bounds = array<i64: 1, 1, 2>}]} {
    %cst = arith.constant 0.000000e+00 : f32
    %0 = vector.broadcast %cst : f32 to vector<28x168xf32>
    %c0 = arith.constant 0 : index
    %c0_0 = arith.constant 0 : index
    %c0_1 = arith.constant 0 : index
    %1 = vector.load %arg1[%c0, %c0_0, %c0_1] : memref<1x32x96xf32, #tpu.memory_space<vmem>>, vector<1x28x84xf32>
    %2 = vector.shape_cast %1 : vector<1x28x84xf32> to vector<28x84xf32>
    %c0_2 = arith.constant 0 : index
    %c0_3 = arith.constant 0 : index
    %c0_4 = arith.constant 0 : index
    %3 = vector.load %arg2[%c0_2, %c0_3, %c0_4] : memref<25x84x168xf32, #tpu.memory_space<vmem>>, vector<1x84x168xf32>
    %4 = vector.shape_cast %3 : vector<1x84x168xf32> to vector<84x168xf32>
    %cst_5 = arith.constant dense<0.000000e+00> : vector<28x168xf32>
    %5 = tpu.matmul %2, %4, %cst_5 {dimension_numbers = #tpu.dot_dimension_numbers<[1], [0], [0], [1], [0, 0, 1, 1], [], []>} : vector<28x84xf32>, vector<84x168xf32>, vector<28x168xf32> -> vector<28x168xf32>
    %6 = arith.addf %0, %5 : vector<28x168xf32>
    %c0_6 = arith.constant 0 : index
    %c0_7 = arith.constant 0 : index
    %c3 = arith.constant 3 : index
    %7 = vector.load %arg1[%c0_6, %c0_7, %c3] : memref<1x32x96xf32, #tpu.memory_space<vmem>>, vector<1x28x84xf32>
    %8 = vector.shape_cast %7 : vector<1x28x84xf32> to vector<28x84xf32>
    %c1 = arith.constant 1 : index
    %c0_8 = arith.constant 0 : index
    %c0_9 = arith.constant 0 : index
    %9 = vector.load %arg2[%c1, %c0_8, %c0_9] : memref<25x84x168xf32, #tpu.memory_space<vmem>>, vector<1x84x168xf32>
    %10 = vector.shape_cast %9 : vector<1x84x168xf32> to vector<84x168xf32>
    %cst_10 = arith.constant dense<0.000000e+00> : vector<28x168xf32>
    %11 = tpu.matmul %8, %10, %cst_10 {dimension_numbers = #tpu.dot_dimension_numbers<[1], [0], [0], [1], [0, 0, 1, 1], [], []>} : vector<28x84xf32>, vector<84x168xf32>, vector<28x168xf32> -> vector<28x168xf32>
    %12 = arith.addf %6, %11 : vector<28x168xf32>
    %c0_11 = arith.constant 0 : index
    %c0_12 = arith.constant 0 : index
    %c6 = arith.constant 6 : index
    %13 = vector.load %arg1[%c0_11, %c0_12, %c6] : memref<1x32x96xf32, #tpu.memory_space<vmem>>, vector<1x28x84xf32>
    %14 = vector.shape_cast %13 : vector<1x28x84xf32> to vector<28x84xf32>
    %c2 = arith.constant 2 : index
    %c0_13 = arith.constant 0 : index
    %c0_14 = arith.constant 0 : index
    %15 = vector.load %arg2[%c2, %c0_13, %c0_14] : memref<25x84x168xf32, #tpu.memory_space<vmem>>, vector<1x84x168xf32>
    %16 = vector.shape_cast %15 : vector<1x84x168xf32> to vector<84x168xf32>
    %cst_15 = arith.constant dense<0.000000e+00> : vector<28x168xf32>
    %17 = tpu.matmul %14, %16, %cst_15 {dimension_numbers = #tpu.dot_dimension_numbers<[1], [0], [0], [1], [0, 0, 1, 1], [], []>} : vector<28x84xf32>, vector<84x168xf32>, vector<28x168xf32> -> vector<28x168xf32>
    %18 = arith.addf %12, %17 : vector<28x168xf32>
    %c0_16 = arith.constant 0 : index
    %c0_17 = arith.constant 0 : index
    %c9 = arith.constant 9 : index
    %19 = vector.load %arg1[%c0_16, %c0_17, %c9] : memref<1x32x96xf32, #tpu.memory_space<vmem>>, vector<1x28x84xf32>
    %20 = vector.shape_cast %19 : vector<1x28x84xf32> to vector<28x84xf32>
    %c3_18 = arith.constant 3 : index
    %c0_19 = arith.constant 0 : index
    %c0_20 = arith.constant 0 : index
    %21 = vector.load %arg2[%c3_18, %c0_19, %c0_20] : memref<25x84x168xf32, #tpu.memory_space<vmem>>, vector<1x84x168xf32>
    %22 = vector.shape_cast %21 : vector<1x84x168xf32> to vector<84x168xf32>
    %cst_21 = arith.constant dense<0.000000e+00> : vector<28x168xf32>
    %23 = tpu.matmul %20, %22, %cst_21 {dimension_numbers = #tpu.dot_dimension_numbers<[1], [0], [0], [1], [0, 0, 1, 1], [], []>} : vector<28x84xf32>, vector<84x168xf32>, vector<28x168xf32> -> vector<28x168xf32>
    %24 = arith.addf %18, %23 : vector<28x168xf32>
    %c0_22 = arith.constant 0 : index
    %c0_23 = arith.constant 0 : index
    %c12 = arith.constant 12 : index
    %25 = vector.load %arg1[%c0_22, %c0_23, %c12] : memref<1x32x96xf32, #tpu.memory_space<vmem>>, vector<1x28x84xf32>
    %26 = vector.shape_cast %25 : vector<1x28x84xf32> to vector<28x84xf32>
    %c4 = arith.constant 4 : index
    %c0_24 = arith.constant 0 : index
    %c0_25 = arith.constant 0 : index
    %27 = vector.load %arg2[%c4, %c0_24, %c0_25] : memref<25x84x168xf32, #tpu.memory_space<vmem>>, vector<1x84x168xf32>
    %28 = vector.shape_cast %27 : vector<1x84x168xf32> to vector<84x168xf32>
    %cst_26 = arith.constant dense<0.000000e+00> : vector<28x168xf32>
    %29 = tpu.matmul %26, %28, %cst_26 {dimension_numbers = #tpu.dot_dimension_numbers<[1], [0], [0], [1], [0, 0, 1, 1], [], []>} : vector<28x84xf32>, vector<84x168xf32>, vector<28x168xf32> -> vector<28x168xf32>
    %30 = arith.addf %24, %29 : vector<28x168xf32>
    %c0_27 = arith.constant 0 : index
    %c1_28 = arith.constant 1 : index
    %c0_29 = arith.constant 0 : index
    %31 = vector.load %arg1[%c0_27, %c1_28, %c0_29] : memref<1x32x96xf32, #tpu.memory_space<vmem>>, vector<1x28x84xf32>
    %32 = vector.shape_cast %31 : vector<1x28x84xf32> to vector<28x84xf32>
    %c5 = arith.constant 5 : index
    %c0_30 = arith.constant 0 : index
    %c0_31 = arith.constant 0 : index
    %33 = vector.load %arg2[%c5, %c0_30, %c0_31] : memref<25x84x168xf32, #tpu.memory_space<vmem>>, vector<1x84x168xf32>
    %34 = vector.shape_cast %33 : vector<1x84x168xf32> to vector<84x168xf32>
    %cst_32 = arith.constant dense<0.000000e+00> : vector<28x168xf32>
    %35 = tpu.matmul %32, %34, %cst_32 {dimension_numbers = #tpu.dot_dimension_numbers<[1], [0], [0], [1], [0, 0, 1, 1], [], []>} : vector<28x84xf32>, vector<84x168xf32>, vector<28x168xf32> -> vector<28x168xf32>
    %36 = arith.addf %30, %35 : vector<28x168xf32>
    %c0_33 = arith.constant 0 : index
    %c1_34 = arith.constant 1 : index
    %c3_35 = arith.constant 3 : index
    %37 = vector.load %arg1[%c0_33, %c1_34, %c3_35] : memref<1x32x96xf32, #tpu.memory_space<vmem>>, vector<1x28x84xf32>
    %38 = vector.shape_cast %37 : vector<1x28x84xf32> to vector<28x84xf32>
    %c6_36 = arith.constant 6 : index
    %c0_37 = arith.constant 0 : index
    %c0_38 = arith.constant 0 : index
    %39 = vector.load %arg2[%c6_36, %c0_37, %c0_38] : memref<25x84x168xf32, #tpu.memory_space<vmem>>, vector<1x84x168xf32>
    %40 = vector.shape_cast %39 : vector<1x84x168xf32> to vector<84x168xf32>
    %cst_39 = arith.constant dense<0.000000e+00> : vector<28x168xf32>
    %41 = tpu.matmul %38, %40, %cst_39 {dimension_numbers = #tpu.dot_dimension_numbers<[1], [0], [0], [1], [0, 0, 1, 1], [], []>} : vector<28x84xf32>, vector<84x168xf32>, vector<28x168xf32> -> vector<28x168xf32>
    %42 = arith.addf %36, %41 : vector<28x168xf32>
    %c0_40 = arith.constant 0 : index
    %c1_41 = arith.constant 1 : index
    %c6_42 = arith.constant 6 : index
    %43 = vector.load %arg1[%c0_40, %c1_41, %c6_42] : memref<1x32x96xf32, #tpu.memory_space<vmem>>, vector<1x28x84xf32>
    %44 = vector.shape_cast %43 : vector<1x28x84xf32> to vector<28x84xf32>
    %c7 = arith.constant 7 : index
    %c0_43 = arith.constant 0 : index
    %c0_44 = arith.constant 0 : index
    %45 = vector.load %arg2[%c7, %c0_43, %c0_44] : memref<25x84x168xf32, #tpu.memory_space<vmem>>, vector<1x84x168xf32>
    %46 = vector.shape_cast %45 : vector<1x84x168xf32> to vector<84x168xf32>
    %cst_45 = arith.constant dense<0.000000e+00> : vector<28x168xf32>
    %47 = tpu.matmul %44, %46, %cst_45 {dimension_numbers = #tpu.dot_dimension_numbers<[1], [0], [0], [1], [0, 0, 1, 1], [], []>} : vector<28x84xf32>, vector<84x168xf32>, vector<28x168xf32> -> vector<28x168xf32>
    %48 = arith.addf %42, %47 : vector<28x168xf32>
    %c0_46 = arith.constant 0 : index
    %c1_47 = arith.constant 1 : index
    %c9_48 = arith.constant 9 : index
    %49 = vector.load %arg1[%c0_46, %c1_47, %c9_48] : memref<1x32x96xf32, #tpu.memory_space<vmem>>, vector<1x28x84xf32>
    %50 = vector.shape_cast %49 : vector<1x28x84xf32> to vector<28x84xf32>
    %c8 = arith.constant 8 : index
    %c0_49 = arith.constant 0 : index
    %c0_50 = arith.constant 0 : index
    %51 = vector.load %arg2[%c8, %c0_49, %c0_50] : memref<25x84x168xf32, #tpu.memory_space<vmem>>, vector<1x84x168xf32>
    %52 = vector.shape_cast %51 : vector<1x84x168xf32> to vector<84x168xf32>
    %cst_51 = arith.constant dense<0.000000e+00> : vector<28x168xf32>
    %53 = tpu.matmul %50, %52, %cst_51 {dimension_numbers = #tpu.dot_dimension_numbers<[1], [0], [0], [1], [0, 0, 1, 1], [], []>} : vector<28x84xf32>, vector<84x168xf32>, vector<28x168xf32> -> vector<28x168xf32>
    %54 = arith.addf %48, %53 : vector<28x168xf32>
    %c0_52 = arith.constant 0 : index
    %c1_53 = arith.constant 1 : index
    %c12_54 = arith.constant 12 : index
    %55 = vector.load %arg1[%c0_52, %c1_53, %c12_54] : memref<1x32x96xf32, #tpu.memory_space<vmem>>, vector<1x28x84xf32>
    %56 = vector.shape_cast %55 : vector<1x28x84xf32> to vector<28x84xf32>
    %c9_55 = arith.constant 9 : index
    %c0_56 = arith.constant 0 : index
    %c0_57 = arith.constant 0 : index
    %57 = vector.load %arg2[%c9_55, %c0_56, %c0_57] : memref<25x84x168xf32, #tpu.memory_space<vmem>>, vector<1x84x168xf32>
    %58 = vector.shape_cast %57 : vector<1x84x168xf32> to vector<84x168xf32>
    %cst_58 = arith.constant dense<0.000000e+00> : vector<28x168xf32>
    %59 = tpu.matmul %56, %58, %cst_58 {dimension_numbers = #tpu.dot_dimension_numbers<[1], [0], [0], [1], [0, 0, 1, 1], [], []>} : vector<28x84xf32>, vector<84x168xf32>, vector<28x168xf32> -> vector<28x168xf32>
    %60 = arith.addf %54, %59 : vector<28x168xf32>
    %c0_59 = arith.constant 0 : index
    %c2_60 = arith.constant 2 : index
    %c0_61 = arith.constant 0 : index
    %61 = vector.load %arg1[%c0_59, %c2_60, %c0_61] : memref<1x32x96xf32, #tpu.memory_space<vmem>>, vector<1x28x84xf32>
    %62 = vector.shape_cast %61 : vector<1x28x84xf32> to vector<28x84xf32>
    %c10 = arith.constant 10 : index
    %c0_62 = arith.constant 0 : index
    %c0_63 = arith.constant 0 : index
    %63 = vector.load %arg2[%c10, %c0_62, %c0_63] : memref<25x84x168xf32, #tpu.memory_space<vmem>>, vector<1x84x168xf32>
    %64 = vector.shape_cast %63 : vector<1x84x168xf32> to vector<84x168xf32>
    %cst_64 = arith.constant dense<0.000000e+00> : vector<28x168xf32>
    %65 = tpu.matmul %62, %64, %cst_64 {dimension_numbers = #tpu.dot_dimension_numbers<[1], [0], [0], [1], [0, 0, 1, 1], [], []>} : vector<28x84xf32>, vector<84x168xf32>, vector<28x168xf32> -> vector<28x168xf32>
    %66 = arith.addf %60, %65 : vector<28x168xf32>
    %c0_65 = arith.constant 0 : index
    %c2_66 = arith.constant 2 : index
    %c3_67 = arith.constant 3 : index
    %67 = vector.load %arg1[%c0_65, %c2_66, %c3_67] : memref<1x32x96xf32, #tpu.memory_space<vmem>>, vector<1x28x84xf32>
    %68 = vector.shape_cast %67 : vector<1x28x84xf32> to vector<28x84xf32>
    %c11 = arith.constant 11 : index
    %c0_68 = arith.constant 0 : index
    %c0_69 = arith.constant 0 : index
    %69 = vector.load %arg2[%c11, %c0_68, %c0_69] : memref<25x84x168xf32, #tpu.memory_space<vmem>>, vector<1x84x168xf32>
    %70 = vector.shape_cast %69 : vector<1x84x168xf32> to vector<84x168xf32>
    %cst_70 = arith.constant dense<0.000000e+00> : vector<28x168xf32>
    %71 = tpu.matmul %68, %70, %cst_70 {dimension_numbers = #tpu.dot_dimension_numbers<[1], [0], [0], [1], [0, 0, 1, 1], [], []>} : vector<28x84xf32>, vector<84x168xf32>, vector<28x168xf32> -> vector<28x168xf32>
    %72 = arith.addf %66, %71 : vector<28x168xf32>
    %c0_71 = arith.constant 0 : index
    %c2_72 = arith.constant 2 : index
    %c6_73 = arith.constant 6 : index
    %73 = vector.load %arg1[%c0_71, %c2_72, %c6_73] : memref<1x32x96xf32, #tpu.memory_space<vmem>>, vector<1x28x84xf32>
    %74 = vector.shape_cast %73 : vector<1x28x84xf32> to vector<28x84xf32>
    %c12_74 = arith.constant 12 : index
    %c0_75 = arith.constant 0 : index
    %c0_76 = arith.constant 0 : index
    %75 = vector.load %arg2[%c12_74, %c0_75, %c0_76] : memref<25x84x168xf32, #tpu.memory_space<vmem>>, vector<1x84x168xf32>
    %76 = vector.shape_cast %75 : vector<1x84x168xf32> to vector<84x168xf32>
    %cst_77 = arith.constant dense<0.000000e+00> : vector<28x168xf32>
    %77 = tpu.matmul %74, %76, %cst_77 {dimension_numbers = #tpu.dot_dimension_numbers<[1], [0], [0], [1], [0, 0, 1, 1], [], []>} : vector<28x84xf32>, vector<84x168xf32>, vector<28x168xf32> -> vector<28x168xf32>
    %78 = arith.addf %72, %77 : vector<28x168xf32>
    %c0_78 = arith.constant 0 : index
    %c2_79 = arith.constant 2 : index
    %c9_80 = arith.constant 9 : index
    %79 = vector.load %arg1[%c0_78, %c2_79, %c9_80] : memref<1x32x96xf32, #tpu.memory_space<vmem>>, vector<1x28x84xf32>
    %80 = vector.shape_cast %79 : vector<1x28x84xf32> to vector<28x84xf32>
    %c13 = arith.constant 13 : index
    %c0_81 = arith.constant 0 : index
    %c0_82 = arith.constant 0 : index
    %81 = vector.load %arg2[%c13, %c0_81, %c0_82] : memref<25x84x168xf32, #tpu.memory_space<vmem>>, vector<1x84x168xf32>
    %82 = vector.shape_cast %81 : vector<1x84x168xf32> to vector<84x168xf32>
    %cst_83 = arith.constant dense<0.000000e+00> : vector<28x168xf32>
    %83 = tpu.matmul %80, %82, %cst_83 {dimension_numbers = #tpu.dot_dimension_numbers<[1], [0], [0], [1], [0, 0, 1, 1], [], []>} : vector<28x84xf32>, vector<84x168xf32>, vector<28x168xf32> -> vector<28x168xf32>
    %84 = arith.addf %78, %83 : vector<28x168xf32>
    %c0_84 = arith.constant 0 : index
    %c2_85 = arith.constant 2 : index
    %c12_86 = arith.constant 12 : index
    %85 = vector.load %arg1[%c0_84, %c2_85, %c12_86] : memref<1x32x96xf32, #tpu.memory_space<vmem>>, vector<1x28x84xf32>
    %86 = vector.shape_cast %85 : vector<1x28x84xf32> to vector<28x84xf32>
    %c14 = arith.constant 14 : index
    %c0_87 = arith.constant 0 : index
    %c0_88 = arith.constant 0 : index
    %87 = vector.load %arg2[%c14, %c0_87, %c0_88] : memref<25x84x168xf32, #tpu.memory_space<vmem>>, vector<1x84x168xf32>
    %88 = vector.shape_cast %87 : vector<1x84x168xf32> to vector<84x168xf32>
    %cst_89 = arith.constant dense<0.000000e+00> : vector<28x168xf32>
    %89 = tpu.matmul %86, %88, %cst_89 {dimension_numbers = #tpu.dot_dimension_numbers<[1], [0], [0], [1], [0, 0, 1, 1], [], []>} : vector<28x84xf32>, vector<84x168xf32>, vector<28x168xf32> -> vector<28x168xf32>
    %90 = arith.addf %84, %89 : vector<28x168xf32>
    %c0_90 = arith.constant 0 : index
    %c3_91 = arith.constant 3 : index
    %c0_92 = arith.constant 0 : index
    %91 = vector.load %arg1[%c0_90, %c3_91, %c0_92] : memref<1x32x96xf32, #tpu.memory_space<vmem>>, vector<1x28x84xf32>
    %92 = vector.shape_cast %91 : vector<1x28x84xf32> to vector<28x84xf32>
    %c15 = arith.constant 15 : index
    %c0_93 = arith.constant 0 : index
    %c0_94 = arith.constant 0 : index
    %93 = vector.load %arg2[%c15, %c0_93, %c0_94] : memref<25x84x168xf32, #tpu.memory_space<vmem>>, vector<1x84x168xf32>
    %94 = vector.shape_cast %93 : vector<1x84x168xf32> to vector<84x168xf32>
    %cst_95 = arith.constant dense<0.000000e+00> : vector<28x168xf32>
    %95 = tpu.matmul %92, %94, %cst_95 {dimension_numbers = #tpu.dot_dimension_numbers<[1], [0], [0], [1], [0, 0, 1, 1], [], []>} : vector<28x84xf32>, vector<84x168xf32>, vector<28x168xf32> -> vector<28x168xf32>
    %96 = arith.addf %90, %95 : vector<28x168xf32>
    %c0_96 = arith.constant 0 : index
    %c3_97 = arith.constant 3 : index
    %c3_98 = arith.constant 3 : index
    %97 = vector.load %arg1[%c0_96, %c3_97, %c3_98] : memref<1x32x96xf32, #tpu.memory_space<vmem>>, vector<1x28x84xf32>
    %98 = vector.shape_cast %97 : vector<1x28x84xf32> to vector<28x84xf32>
    %c16 = arith.constant 16 : index
    %c0_99 = arith.constant 0 : index
    %c0_100 = arith.constant 0 : index
    %99 = vector.load %arg2[%c16, %c0_99, %c0_100] : memref<25x84x168xf32, #tpu.memory_space<vmem>>, vector<1x84x168xf32>
    %100 = vector.shape_cast %99 : vector<1x84x168xf32> to vector<84x168xf32>
    %cst_101 = arith.constant dense<0.000000e+00> : vector<28x168xf32>
    %101 = tpu.matmul %98, %100, %cst_101 {dimension_numbers = #tpu.dot_dimension_numbers<[1], [0], [0], [1], [0, 0, 1, 1], [], []>} : vector<28x84xf32>, vector<84x168xf32>, vector<28x168xf32> -> vector<28x168xf32>
    %102 = arith.addf %96, %101 : vector<28x168xf32>
    %c0_102 = arith.constant 0 : index
    %c3_103 = arith.constant 3 : index
    %c6_104 = arith.constant 6 : index
    %103 = vector.load %arg1[%c0_102, %c3_103, %c6_104] : memref<1x32x96xf32, #tpu.memory_space<vmem>>, vector<1x28x84xf32>
    %104 = vector.shape_cast %103 : vector<1x28x84xf32> to vector<28x84xf32>
    %c17 = arith.constant 17 : index
    %c0_105 = arith.constant 0 : index
    %c0_106 = arith.constant 0 : index
    %105 = vector.load %arg2[%c17, %c0_105, %c0_106] : memref<25x84x168xf32, #tpu.memory_space<vmem>>, vector<1x84x168xf32>
    %106 = vector.shape_cast %105 : vector<1x84x168xf32> to vector<84x168xf32>
    %cst_107 = arith.constant dense<0.000000e+00> : vector<28x168xf32>
    %107 = tpu.matmul %104, %106, %cst_107 {dimension_numbers = #tpu.dot_dimension_numbers<[1], [0], [0], [1], [0, 0, 1, 1], [], []>} : vector<28x84xf32>, vector<84x168xf32>, vector<28x168xf32> -> vector<28x168xf32>
    %108 = arith.addf %102, %107 : vector<28x168xf32>
    %c0_108 = arith.constant 0 : index
    %c3_109 = arith.constant 3 : index
    %c9_110 = arith.constant 9 : index
    %109 = vector.load %arg1[%c0_108, %c3_109, %c9_110] : memref<1x32x96xf32, #tpu.memory_space<vmem>>, vector<1x28x84xf32>
    %110 = vector.shape_cast %109 : vector<1x28x84xf32> to vector<28x84xf32>
    %c18 = arith.constant 18 : index
    %c0_111 = arith.constant 0 : index
    %c0_112 = arith.constant 0 : index
    %111 = vector.load %arg2[%c18, %c0_111, %c0_112] : memref<25x84x168xf32, #tpu.memory_space<vmem>>, vector<1x84x168xf32>
    %112 = vector.shape_cast %111 : vector<1x84x168xf32> to vector<84x168xf32>
    %cst_113 = arith.constant dense<0.000000e+00> : vector<28x168xf32>
    %113 = tpu.matmul %110, %112, %cst_113 {dimension_numbers = #tpu.dot_dimension_numbers<[1], [0], [0], [1], [0, 0, 1, 1], [], []>} : vector<28x84xf32>, vector<84x168xf32>, vector<28x168xf32> -> vector<28x168xf32>
    %114 = arith.addf %108, %113 : vector<28x168xf32>
    %c0_114 = arith.constant 0 : index
    %c3_115 = arith.constant 3 : index
    %c12_116 = arith.constant 12 : index
    %115 = vector.load %arg1[%c0_114, %c3_115, %c12_116] : memref<1x32x96xf32, #tpu.memory_space<vmem>>, vector<1x28x84xf32>
    %116 = vector.shape_cast %115 : vector<1x28x84xf32> to vector<28x84xf32>
    %c19 = arith.constant 19 : index
    %c0_117 = arith.constant 0 : index
    %c0_118 = arith.constant 0 : index
    %117 = vector.load %arg2[%c19, %c0_117, %c0_118] : memref<25x84x168xf32, #tpu.memory_space<vmem>>, vector<1x84x168xf32>
    %118 = vector.shape_cast %117 : vector<1x84x168xf32> to vector<84x168xf32>
    %cst_119 = arith.constant dense<0.000000e+00> : vector<28x168xf32>
    %119 = tpu.matmul %116, %118, %cst_119 {dimension_numbers = #tpu.dot_dimension_numbers<[1], [0], [0], [1], [0, 0, 1, 1], [], []>} : vector<28x84xf32>, vector<84x168xf32>, vector<28x168xf32> -> vector<28x168xf32>
    %120 = arith.addf %114, %119 : vector<28x168xf32>
    %c0_120 = arith.constant 0 : index
    %c4_121 = arith.constant 4 : index
    %c0_122 = arith.constant 0 : index
    %121 = vector.load %arg1[%c0_120, %c4_121, %c0_122] : memref<1x32x96xf32, #tpu.memory_space<vmem>>, vector<1x28x84xf32>
    %122 = vector.shape_cast %121 : vector<1x28x84xf32> to vector<28x84xf32>
    %c20 = arith.constant 20 : index
    %c0_123 = arith.constant 0 : index
    %c0_124 = arith.constant 0 : index
    %123 = vector.load %arg2[%c20, %c0_123, %c0_124] : memref<25x84x168xf32, #tpu.memory_space<vmem>>, vector<1x84x168xf32>
    %124 = vector.shape_cast %123 : vector<1x84x168xf32> to vector<84x168xf32>
    %cst_125 = arith.constant dense<0.000000e+00> : vector<28x168xf32>
    %125 = tpu.matmul %122, %124, %cst_125 {dimension_numbers = #tpu.dot_dimension_numbers<[1], [0], [0], [1], [0, 0, 1, 1], [], []>} : vector<28x84xf32>, vector<84x168xf32>, vector<28x168xf32> -> vector<28x168xf32>
    %126 = arith.addf %120, %125 : vector<28x168xf32>
    %c0_126 = arith.constant 0 : index
    %c4_127 = arith.constant 4 : index
    %c3_128 = arith.constant 3 : index
    %127 = vector.load %arg1[%c0_126, %c4_127, %c3_128] : memref<1x32x96xf32, #tpu.memory_space<vmem>>, vector<1x28x84xf32>
    %128 = vector.shape_cast %127 : vector<1x28x84xf32> to vector<28x84xf32>
    %c21 = arith.constant 21 : index
    %c0_129 = arith.constant 0 : index
    %c0_130 = arith.constant 0 : index
    %129 = vector.load %arg2[%c21, %c0_129, %c0_130] : memref<25x84x168xf32, #tpu.memory_space<vmem>>, vector<1x84x168xf32>
    %130 = vector.shape_cast %129 : vector<1x84x168xf32> to vector<84x168xf32>
    %cst_131 = arith.constant dense<0.000000e+00> : vector<28x168xf32>
    %131 = tpu.matmul %128, %130, %cst_131 {dimension_numbers = #tpu.dot_dimension_numbers<[1], [0], [0], [1], [0, 0, 1, 1], [], []>} : vector<28x84xf32>, vector<84x168xf32>, vector<28x168xf32> -> vector<28x168xf32>
    %132 = arith.addf %126, %131 : vector<28x168xf32>
    %c0_132 = arith.constant 0 : index
    %c4_133 = arith.constant 4 : index
    %c6_134 = arith.constant 6 : index
    %133 = vector.load %arg1[%c0_132, %c4_133, %c6_134] : memref<1x32x96xf32, #tpu.memory_space<vmem>>, vector<1x28x84xf32>
    %134 = vector.shape_cast %133 : vector<1x28x84xf32> to vector<28x84xf32>
    %c22 = arith.constant 22 : index
    %c0_135 = arith.constant 0 : index
    %c0_136 = arith.constant 0 : index
    %135 = vector.load %arg2[%c22, %c0_135, %c0_136] : memref<25x84x168xf32, #tpu.memory_space<vmem>>, vector<1x84x168xf32>
    %136 = vector.shape_cast %135 : vector<1x84x168xf32> to vector<84x168xf32>
    %cst_137 = arith.constant dense<0.000000e+00> : vector<28x168xf32>
    %137 = tpu.matmul %134, %136, %cst_137 {dimension_numbers = #tpu.dot_dimension_numbers<[1], [0], [0], [1], [0, 0, 1, 1], [], []>} : vector<28x84xf32>, vector<84x168xf32>, vector<28x168xf32> -> vector<28x168xf32>
    %138 = arith.addf %132, %137 : vector<28x168xf32>
    %c0_138 = arith.constant 0 : index
    %c4_139 = arith.constant 4 : index
    %c9_140 = arith.constant 9 : index
    %139 = vector.load %arg1[%c0_138, %c4_139, %c9_140] : memref<1x32x96xf32, #tpu.memory_space<vmem>>, vector<1x28x84xf32>
    %140 = vector.shape_cast %139 : vector<1x28x84xf32> to vector<28x84xf32>
    %c23 = arith.constant 23 : index
    %c0_141 = arith.constant 0 : index
    %c0_142 = arith.constant 0 : index
    %141 = vector.load %arg2[%c23, %c0_141, %c0_142] : memref<25x84x168xf32, #tpu.memory_space<vmem>>, vector<1x84x168xf32>
    %142 = vector.shape_cast %141 : vector<1x84x168xf32> to vector<84x168xf32>
    %cst_143 = arith.constant dense<0.000000e+00> : vector<28x168xf32>
    %143 = tpu.matmul %140, %142, %cst_143 {dimension_numbers = #tpu.dot_dimension_numbers<[1], [0], [0], [1], [0, 0, 1, 1], [], []>} : vector<28x84xf32>, vector<84x168xf32>, vector<28x168xf32> -> vector<28x168xf32>
    %144 = arith.addf %138, %143 : vector<28x168xf32>
    %c0_144 = arith.constant 0 : index
    %c4_145 = arith.constant 4 : index
    %c12_146 = arith.constant 12 : index
    %145 = vector.load %arg1[%c0_144, %c4_145, %c12_146] : memref<1x32x96xf32, #tpu.memory_space<vmem>>, vector<1x28x84xf32>
    %146 = vector.shape_cast %145 : vector<1x28x84xf32> to vector<28x84xf32>
    %c24 = arith.constant 24 : index
    %c0_147 = arith.constant 0 : index
    %c0_148 = arith.constant 0 : index
    %147 = vector.load %arg2[%c24, %c0_147, %c0_148] : memref<25x84x168xf32, #tpu.memory_space<vmem>>, vector<1x84x168xf32>
    %148 = vector.shape_cast %147 : vector<1x84x168xf32> to vector<84x168xf32>
    %cst_149 = arith.constant dense<0.000000e+00> : vector<28x168xf32>
    %149 = tpu.matmul %146, %148, %cst_149 {dimension_numbers = #tpu.dot_dimension_numbers<[1], [0], [0], [1], [0, 0, 1, 1], [], []>} : vector<28x84xf32>, vector<84x168xf32>, vector<28x168xf32> -> vector<28x168xf32>
    %150 = arith.addf %144, %149 : vector<28x168xf32>
    %c0_150 = arith.constant 0 : index
    %c0_151 = arith.constant 0 : index
    %151 = vector.load %arg3[%c0_150, %c0_151] : memref<1x168xf32, #tpu.memory_space<vmem>>, vector<1x168xf32>
    %152 = vector.broadcast %151 : vector<1x168xf32> to vector<28x168xf32>
    %153 = arith.addf %150, %152 : vector<28x168xf32>
    %cst_152 = arith.constant 0.000000e+00 : f32
    %154 = vector.broadcast %cst_152 : f32 to vector<28x168xf32>
    %155 = arith.maximumf %153, %154 : vector<28x168xf32>
    %c0_153 = arith.constant 0 : index
    %c0_154 = arith.constant 0 : index
    %156 = vector.load %arg4[%c0_153, %c0_154] : memref<168x84xf32, #tpu.memory_space<vmem>>, vector<168x84xf32>
    %cst_155 = arith.constant dense<0.000000e+00> : vector<28x84xf32>
    %157 = tpu.matmul %155, %156, %cst_155 {dimension_numbers = #tpu.dot_dimension_numbers<[1], [0], [0], [1], [0, 0, 1, 1], [], []>} : vector<28x168xf32>, vector<168x84xf32>, vector<28x84xf32> -> vector<28x84xf32>
    %c0_156 = arith.constant 0 : index
    %c0_157 = arith.constant 0 : index
    %158 = vector.load %arg5[%c0_156, %c0_157] : memref<168x84xf32, #tpu.memory_space<vmem>>, vector<168x84xf32>
    %cst_158 = arith.constant dense<0.000000e+00> : vector<28x84xf32>
    %159 = tpu.matmul %155, %158, %cst_158 {dimension_numbers = #tpu.dot_dimension_numbers<[1], [0], [0], [1], [0, 0, 1, 1], [], []>} : vector<28x168xf32>, vector<168x84xf32>, vector<28x84xf32> -> vector<28x84xf32>
    %160 = arith.maximumf %157, %159 : vector<28x84xf32>
    %c0_159 = arith.constant 0 : index
    %c0_160 = arith.constant 0 : index
    %161 = vector.load %arg6[%c0_159, %c0_160] : memref<14x28xf32, #tpu.memory_space<vmem>>, vector<14x28xf32>
    %cst_161 = arith.constant dense<0.000000e+00> : vector<14x84xf32>
    %162 = tpu.matmul %161, %160, %cst_161 {dimension_numbers = #tpu.dot_dimension_numbers<[1], [0], [0], [1], [0, 0, 1, 1], [], []>} : vector<14x28xf32>, vector<28x84xf32>, vector<14x84xf32> -> vector<14x84xf32>
    %c0_162 = arith.constant 0 : index
    %c0_163 = arith.constant 0 : index
    %163 = vector.load %arg7[%c0_162, %c0_163] : memref<14x28xf32, #tpu.memory_space<vmem>>, vector<14x28xf32>
    %cst_164 = arith.constant dense<0.000000e+00> : vector<14x84xf32>
    %164 = tpu.matmul %163, %160, %cst_164 {dimension_numbers = #tpu.dot_dimension_numbers<[1], [0], [0], [1], [0, 0, 1, 1], [], []>} : vector<14x28xf32>, vector<28x84xf32>, vector<14x84xf32> -> vector<14x84xf32>
    %165 = arith.maximumf %162, %164 : vector<14x84xf32>
    %cst_165 = arith.constant 0.000000e+00 : f32
    %166 = vector.broadcast %cst_165 : f32 to vector<10x160xf32>
    %167 = vector.extract_strided_slice %165 {offsets = [0, 0], sizes = [10, 60], strides = [1, 1]} : vector<14x84xf32> to vector<10x60xf32>
    %c0_166 = arith.constant 0 : index
    %c0_167 = arith.constant 0 : index
    %c0_168 = arith.constant 0 : index
    %168 = vector.load %arg8[%c0_166, %c0_167, %c0_168] : memref<25x60x160xf32, #tpu.memory_space<vmem>>, vector<1x60x160xf32>
    %169 = vector.shape_cast %168 : vector<1x60x160xf32> to vector<60x160xf32>
    %cst_169 = arith.constant dense<0.000000e+00> : vector<10x160xf32>
    %170 = tpu.matmul %167, %169, %cst_169 {dimension_numbers = #tpu.dot_dimension_numbers<[1], [0], [0], [1], [0, 0, 1, 1], [], []>} : vector<10x60xf32>, vector<60x160xf32>, vector<10x160xf32> -> vector<10x160xf32>
    %171 = arith.addf %166, %170 : vector<10x160xf32>
    %172 = vector.extract_strided_slice %165 {offsets = [0, 6], sizes = [10, 60], strides = [1, 1]} : vector<14x84xf32> to vector<10x60xf32>
    %c1_170 = arith.constant 1 : index
    %c0_171 = arith.constant 0 : index
    %c0_172 = arith.constant 0 : index
    %173 = vector.load %arg8[%c1_170, %c0_171, %c0_172] : memref<25x60x160xf32, #tpu.memory_space<vmem>>, vector<1x60x160xf32>
    %174 = vector.shape_cast %173 : vector<1x60x160xf32> to vector<60x160xf32>
    %cst_173 = arith.constant dense<0.000000e+00> : vector<10x160xf32>
    %175 = tpu.matmul %172, %174, %cst_173 {dimension_numbers = #tpu.dot_dimension_numbers<[1], [0], [0], [1], [0, 0, 1, 1], [], []>} : vector<10x60xf32>, vector<60x160xf32>, vector<10x160xf32> -> vector<10x160xf32>
    %176 = arith.addf %171, %175 : vector<10x160xf32>
    %177 = vector.extract_strided_slice %165 {offsets = [0, 12], sizes = [10, 60], strides = [1, 1]} : vector<14x84xf32> to vector<10x60xf32>
    %c2_174 = arith.constant 2 : index
    %c0_175 = arith.constant 0 : index
    %c0_176 = arith.constant 0 : index
    %178 = vector.load %arg8[%c2_174, %c0_175, %c0_176] : memref<25x60x160xf32, #tpu.memory_space<vmem>>, vector<1x60x160xf32>
    %179 = vector.shape_cast %178 : vector<1x60x160xf32> to vector<60x160xf32>
    %cst_177 = arith.constant dense<0.000000e+00> : vector<10x160xf32>
    %180 = tpu.matmul %177, %179, %cst_177 {dimension_numbers = #tpu.dot_dimension_numbers<[1], [0], [0], [1], [0, 0, 1, 1], [], []>} : vector<10x60xf32>, vector<60x160xf32>, vector<10x160xf32> -> vector<10x160xf32>
    %181 = arith.addf %176, %180 : vector<10x160xf32>
    %182 = vector.extract_strided_slice %165 {offsets = [0, 18], sizes = [10, 60], strides = [1, 1]} : vector<14x84xf32> to vector<10x60xf32>
    %c3_178 = arith.constant 3 : index
    %c0_179 = arith.constant 0 : index
    %c0_180 = arith.constant 0 : index
    %183 = vector.load %arg8[%c3_178, %c0_179, %c0_180] : memref<25x60x160xf32, #tpu.memory_space<vmem>>, vector<1x60x160xf32>
    %184 = vector.shape_cast %183 : vector<1x60x160xf32> to vector<60x160xf32>
    %cst_181 = arith.constant dense<0.000000e+00> : vector<10x160xf32>
    %185 = tpu.matmul %182, %184, %cst_181 {dimension_numbers = #tpu.dot_dimension_numbers<[1], [0], [0], [1], [0, 0, 1, 1], [], []>} : vector<10x60xf32>, vector<60x160xf32>, vector<10x160xf32> -> vector<10x160xf32>
    %186 = arith.addf %181, %185 : vector<10x160xf32>
    %187 = vector.extract_strided_slice %165 {offsets = [0, 24], sizes = [10, 60], strides = [1, 1]} : vector<14x84xf32> to vector<10x60xf32>
    %c4_182 = arith.constant 4 : index
    %c0_183 = arith.constant 0 : index
    %c0_184 = arith.constant 0 : index
    %188 = vector.load %arg8[%c4_182, %c0_183, %c0_184] : memref<25x60x160xf32, #tpu.memory_space<vmem>>, vector<1x60x160xf32>
    %189 = vector.shape_cast %188 : vector<1x60x160xf32> to vector<60x160xf32>
    %cst_185 = arith.constant dense<0.000000e+00> : vector<10x160xf32>
    %190 = tpu.matmul %187, %189, %cst_185 {dimension_numbers = #tpu.dot_dimension_numbers<[1], [0], [0], [1], [0, 0, 1, 1], [], []>} : vector<10x60xf32>, vector<60x160xf32>, vector<10x160xf32> -> vector<10x160xf32>
    %191 = arith.addf %186, %190 : vector<10x160xf32>
    %192 = vector.extract_strided_slice %165 {offsets = [1, 0], sizes = [10, 60], strides = [1, 1]} : vector<14x84xf32> to vector<10x60xf32>
    %c5_186 = arith.constant 5 : index
    %c0_187 = arith.constant 0 : index
    %c0_188 = arith.constant 0 : index
    %193 = vector.load %arg8[%c5_186, %c0_187, %c0_188] : memref<25x60x160xf32, #tpu.memory_space<vmem>>, vector<1x60x160xf32>
    %194 = vector.shape_cast %193 : vector<1x60x160xf32> to vector<60x160xf32>
    %cst_189 = arith.constant dense<0.000000e+00> : vector<10x160xf32>
    %195 = tpu.matmul %192, %194, %cst_189 {dimension_numbers = #tpu.dot_dimension_numbers<[1], [0], [0], [1], [0, 0, 1, 1], [], []>} : vector<10x60xf32>, vector<60x160xf32>, vector<10x160xf32> -> vector<10x160xf32>
    %196 = arith.addf %191, %195 : vector<10x160xf32>
    %197 = vector.extract_strided_slice %165 {offsets = [1, 6], sizes = [10, 60], strides = [1, 1]} : vector<14x84xf32> to vector<10x60xf32>
    %c6_190 = arith.constant 6 : index
    %c0_191 = arith.constant 0 : index
    %c0_192 = arith.constant 0 : index
    %198 = vector.load %arg8[%c6_190, %c0_191, %c0_192] : memref<25x60x160xf32, #tpu.memory_space<vmem>>, vector<1x60x160xf32>
    %199 = vector.shape_cast %198 : vector<1x60x160xf32> to vector<60x160xf32>
    %cst_193 = arith.constant dense<0.000000e+00> : vector<10x160xf32>
    %200 = tpu.matmul %197, %199, %cst_193 {dimension_numbers = #tpu.dot_dimension_numbers<[1], [0], [0], [1], [0, 0, 1, 1], [], []>} : vector<10x60xf32>, vector<60x160xf32>, vector<10x160xf32> -> vector<10x160xf32>
    %201 = arith.addf %196, %200 : vector<10x160xf32>
    %202 = vector.extract_strided_slice %165 {offsets = [1, 12], sizes = [10, 60], strides = [1, 1]} : vector<14x84xf32> to vector<10x60xf32>
    %c7_194 = arith.constant 7 : index
    %c0_195 = arith.constant 0 : index
    %c0_196 = arith.constant 0 : index
    %203 = vector.load %arg8[%c7_194, %c0_195, %c0_196] : memref<25x60x160xf32, #tpu.memory_space<vmem>>, vector<1x60x160xf32>
    %204 = vector.shape_cast %203 : vector<1x60x160xf32> to vector<60x160xf32>
    %cst_197 = arith.constant dense<0.000000e+00> : vector<10x160xf32>
    %205 = tpu.matmul %202, %204, %cst_197 {dimension_numbers = #tpu.dot_dimension_numbers<[1], [0], [0], [1], [0, 0, 1, 1], [], []>} : vector<10x60xf32>, vector<60x160xf32>, vector<10x160xf32> -> vector<10x160xf32>
    %206 = arith.addf %201, %205 : vector<10x160xf32>
    %207 = vector.extract_strided_slice %165 {offsets = [1, 18], sizes = [10, 60], strides = [1, 1]} : vector<14x84xf32> to vector<10x60xf32>
    %c8_198 = arith.constant 8 : index
    %c0_199 = arith.constant 0 : index
    %c0_200 = arith.constant 0 : index
    %208 = vector.load %arg8[%c8_198, %c0_199, %c0_200] : memref<25x60x160xf32, #tpu.memory_space<vmem>>, vector<1x60x160xf32>
    %209 = vector.shape_cast %208 : vector<1x60x160xf32> to vector<60x160xf32>
    %cst_201 = arith.constant dense<0.000000e+00> : vector<10x160xf32>
    %210 = tpu.matmul %207, %209, %cst_201 {dimension_numbers = #tpu.dot_dimension_numbers<[1], [0], [0], [1], [0, 0, 1, 1], [], []>} : vector<10x60xf32>, vector<60x160xf32>, vector<10x160xf32> -> vector<10x160xf32>
    %211 = arith.addf %206, %210 : vector<10x160xf32>
    %212 = vector.extract_strided_slice %165 {offsets = [1, 24], sizes = [10, 60], strides = [1, 1]} : vector<14x84xf32> to vector<10x60xf32>
    %c9_202 = arith.constant 9 : index
    %c0_203 = arith.constant 0 : index
    %c0_204 = arith.constant 0 : index
    %213 = vector.load %arg8[%c9_202, %c0_203, %c0_204] : memref<25x60x160xf32, #tpu.memory_space<vmem>>, vector<1x60x160xf32>
    %214 = vector.shape_cast %213 : vector<1x60x160xf32> to vector<60x160xf32>
    %cst_205 = arith.constant dense<0.000000e+00> : vector<10x160xf32>
    %215 = tpu.matmul %212, %214, %cst_205 {dimension_numbers = #tpu.dot_dimension_numbers<[1], [0], [0], [1], [0, 0, 1, 1], [], []>} : vector<10x60xf32>, vector<60x160xf32>, vector<10x160xf32> -> vector<10x160xf32>
    %216 = arith.addf %211, %215 : vector<10x160xf32>
    %217 = vector.extract_strided_slice %165 {offsets = [2, 0], sizes = [10, 60], strides = [1, 1]} : vector<14x84xf32> to vector<10x60xf32>
    %c10_206 = arith.constant 10 : index
    %c0_207 = arith.constant 0 : index
    %c0_208 = arith.constant 0 : index
    %218 = vector.load %arg8[%c10_206, %c0_207, %c0_208] : memref<25x60x160xf32, #tpu.memory_space<vmem>>, vector<1x60x160xf32>
    %219 = vector.shape_cast %218 : vector<1x60x160xf32> to vector<60x160xf32>
    %cst_209 = arith.constant dense<0.000000e+00> : vector<10x160xf32>
    %220 = tpu.matmul %217, %219, %cst_209 {dimension_numbers = #tpu.dot_dimension_numbers<[1], [0], [0], [1], [0, 0, 1, 1], [], []>} : vector<10x60xf32>, vector<60x160xf32>, vector<10x160xf32> -> vector<10x160xf32>
    %221 = arith.addf %216, %220 : vector<10x160xf32>
    %222 = vector.extract_strided_slice %165 {offsets = [2, 6], sizes = [10, 60], strides = [1, 1]} : vector<14x84xf32> to vector<10x60xf32>
    %c11_210 = arith.constant 11 : index
    %c0_211 = arith.constant 0 : index
    %c0_212 = arith.constant 0 : index
    %223 = vector.load %arg8[%c11_210, %c0_211, %c0_212] : memref<25x60x160xf32, #tpu.memory_space<vmem>>, vector<1x60x160xf32>
    %224 = vector.shape_cast %223 : vector<1x60x160xf32> to vector<60x160xf32>
    %cst_213 = arith.constant dense<0.000000e+00> : vector<10x160xf32>
    %225 = tpu.matmul %222, %224, %cst_213 {dimension_numbers = #tpu.dot_dimension_numbers<[1], [0], [0], [1], [0, 0, 1, 1], [], []>} : vector<10x60xf32>, vector<60x160xf32>, vector<10x160xf32> -> vector<10x160xf32>
    %226 = arith.addf %221, %225 : vector<10x160xf32>
    %227 = vector.extract_strided_slice %165 {offsets = [2, 12], sizes = [10, 60], strides = [1, 1]} : vector<14x84xf32> to vector<10x60xf32>
    %c12_214 = arith.constant 12 : index
    %c0_215 = arith.constant 0 : index
    %c0_216 = arith.constant 0 : index
    %228 = vector.load %arg8[%c12_214, %c0_215, %c0_216] : memref<25x60x160xf32, #tpu.memory_space<vmem>>, vector<1x60x160xf32>
    %229 = vector.shape_cast %228 : vector<1x60x160xf32> to vector<60x160xf32>
    %cst_217 = arith.constant dense<0.000000e+00> : vector<10x160xf32>
    %230 = tpu.matmul %227, %229, %cst_217 {dimension_numbers = #tpu.dot_dimension_numbers<[1], [0], [0], [1], [0, 0, 1, 1], [], []>} : vector<10x60xf32>, vector<60x160xf32>, vector<10x160xf32> -> vector<10x160xf32>
    %231 = arith.addf %226, %230 : vector<10x160xf32>
    %232 = vector.extract_strided_slice %165 {offsets = [2, 18], sizes = [10, 60], strides = [1, 1]} : vector<14x84xf32> to vector<10x60xf32>
    %c13_218 = arith.constant 13 : index
    %c0_219 = arith.constant 0 : index
    %c0_220 = arith.constant 0 : index
    %233 = vector.load %arg8[%c13_218, %c0_219, %c0_220] : memref<25x60x160xf32, #tpu.memory_space<vmem>>, vector<1x60x160xf32>
    %234 = vector.shape_cast %233 : vector<1x60x160xf32> to vector<60x160xf32>
    %cst_221 = arith.constant dense<0.000000e+00> : vector<10x160xf32>
    %235 = tpu.matmul %232, %234, %cst_221 {dimension_numbers = #tpu.dot_dimension_numbers<[1], [0], [0], [1], [0, 0, 1, 1], [], []>} : vector<10x60xf32>, vector<60x160xf32>, vector<10x160xf32> -> vector<10x160xf32>
    %236 = arith.addf %231, %235 : vector<10x160xf32>
    %237 = vector.extract_strided_slice %165 {offsets = [2, 24], sizes = [10, 60], strides = [1, 1]} : vector<14x84xf32> to vector<10x60xf32>
    %c14_222 = arith.constant 14 : index
    %c0_223 = arith.constant 0 : index
    %c0_224 = arith.constant 0 : index
    %238 = vector.load %arg8[%c14_222, %c0_223, %c0_224] : memref<25x60x160xf32, #tpu.memory_space<vmem>>, vector<1x60x160xf32>
    %239 = vector.shape_cast %238 : vector<1x60x160xf32> to vector<60x160xf32>
    %cst_225 = arith.constant dense<0.000000e+00> : vector<10x160xf32>
    %240 = tpu.matmul %237, %239, %cst_225 {dimension_numbers = #tpu.dot_dimension_numbers<[1], [0], [0], [1], [0, 0, 1, 1], [], []>} : vector<10x60xf32>, vector<60x160xf32>, vector<10x160xf32> -> vector<10x160xf32>
    %241 = arith.addf %236, %240 : vector<10x160xf32>
    %242 = vector.extract_strided_slice %165 {offsets = [3, 0], sizes = [10, 60], strides = [1, 1]} : vector<14x84xf32> to vector<10x60xf32>
    %c15_226 = arith.constant 15 : index
    %c0_227 = arith.constant 0 : index
    %c0_228 = arith.constant 0 : index
    %243 = vector.load %arg8[%c15_226, %c0_227, %c0_228] : memref<25x60x160xf32, #tpu.memory_space<vmem>>, vector<1x60x160xf32>
    %244 = vector.shape_cast %243 : vector<1x60x160xf32> to vector<60x160xf32>
    %cst_229 = arith.constant dense<0.000000e+00> : vector<10x160xf32>
    %245 = tpu.matmul %242, %244, %cst_229 {dimension_numbers = #tpu.dot_dimension_numbers<[1], [0], [0], [1], [0, 0, 1, 1], [], []>} : vector<10x60xf32>, vector<60x160xf32>, vector<10x160xf32> -> vector<10x160xf32>
    %246 = arith.addf %241, %245 : vector<10x160xf32>
    %247 = vector.extract_strided_slice %165 {offsets = [3, 6], sizes = [10, 60], strides = [1, 1]} : vector<14x84xf32> to vector<10x60xf32>
    %c16_230 = arith.constant 16 : index
    %c0_231 = arith.constant 0 : index
    %c0_232 = arith.constant 0 : index
    %248 = vector.load %arg8[%c16_230, %c0_231, %c0_232] : memref<25x60x160xf32, #tpu.memory_space<vmem>>, vector<1x60x160xf32>
    %249 = vector.shape_cast %248 : vector<1x60x160xf32> to vector<60x160xf32>
    %cst_233 = arith.constant dense<0.000000e+00> : vector<10x160xf32>
    %250 = tpu.matmul %247, %249, %cst_233 {dimension_numbers = #tpu.dot_dimension_numbers<[1], [0], [0], [1], [0, 0, 1, 1], [], []>} : vector<10x60xf32>, vector<60x160xf32>, vector<10x160xf32> -> vector<10x160xf32>
    %251 = arith.addf %246, %250 : vector<10x160xf32>
    %252 = vector.extract_strided_slice %165 {offsets = [3, 12], sizes = [10, 60], strides = [1, 1]} : vector<14x84xf32> to vector<10x60xf32>
    %c17_234 = arith.constant 17 : index
    %c0_235 = arith.constant 0 : index
    %c0_236 = arith.constant 0 : index
    %253 = vector.load %arg8[%c17_234, %c0_235, %c0_236] : memref<25x60x160xf32, #tpu.memory_space<vmem>>, vector<1x60x160xf32>
    %254 = vector.shape_cast %253 : vector<1x60x160xf32> to vector<60x160xf32>
    %cst_237 = arith.constant dense<0.000000e+00> : vector<10x160xf32>
    %255 = tpu.matmul %252, %254, %cst_237 {dimension_numbers = #tpu.dot_dimension_numbers<[1], [0], [0], [1], [0, 0, 1, 1], [], []>} : vector<10x60xf32>, vector<60x160xf32>, vector<10x160xf32> -> vector<10x160xf32>
    %256 = arith.addf %251, %255 : vector<10x160xf32>
    %257 = vector.extract_strided_slice %165 {offsets = [3, 18], sizes = [10, 60], strides = [1, 1]} : vector<14x84xf32> to vector<10x60xf32>
    %c18_238 = arith.constant 18 : index
    %c0_239 = arith.constant 0 : index
    %c0_240 = arith.constant 0 : index
    %258 = vector.load %arg8[%c18_238, %c0_239, %c0_240] : memref<25x60x160xf32, #tpu.memory_space<vmem>>, vector<1x60x160xf32>
    %259 = vector.shape_cast %258 : vector<1x60x160xf32> to vector<60x160xf32>
    %cst_241 = arith.constant dense<0.000000e+00> : vector<10x160xf32>
    %260 = tpu.matmul %257, %259, %cst_241 {dimension_numbers = #tpu.dot_dimension_numbers<[1], [0], [0], [1], [0, 0, 1, 1], [], []>} : vector<10x60xf32>, vector<60x160xf32>, vector<10x160xf32> -> vector<10x160xf32>
    %261 = arith.addf %256, %260 : vector<10x160xf32>
    %262 = vector.extract_strided_slice %165 {offsets = [3, 24], sizes = [10, 60], strides = [1, 1]} : vector<14x84xf32> to vector<10x60xf32>
    %c19_242 = arith.constant 19 : index
    %c0_243 = arith.constant 0 : index
    %c0_244 = arith.constant 0 : index
    %263 = vector.load %arg8[%c19_242, %c0_243, %c0_244] : memref<25x60x160xf32, #tpu.memory_space<vmem>>, vector<1x60x160xf32>
    %264 = vector.shape_cast %263 : vector<1x60x160xf32> to vector<60x160xf32>
    %cst_245 = arith.constant dense<0.000000e+00> : vector<10x160xf32>
    %265 = tpu.matmul %262, %264, %cst_245 {dimension_numbers = #tpu.dot_dimension_numbers<[1], [0], [0], [1], [0, 0, 1, 1], [], []>} : vector<10x60xf32>, vector<60x160xf32>, vector<10x160xf32> -> vector<10x160xf32>
    %266 = arith.addf %261, %265 : vector<10x160xf32>
    %267 = vector.extract_strided_slice %165 {offsets = [4, 0], sizes = [10, 60], strides = [1, 1]} : vector<14x84xf32> to vector<10x60xf32>
    %c20_246 = arith.constant 20 : index
    %c0_247 = arith.constant 0 : index
    %c0_248 = arith.constant 0 : index
    %268 = vector.load %arg8[%c20_246, %c0_247, %c0_248] : memref<25x60x160xf32, #tpu.memory_space<vmem>>, vector<1x60x160xf32>
    %269 = vector.shape_cast %268 : vector<1x60x160xf32> to vector<60x160xf32>
    %cst_249 = arith.constant dense<0.000000e+00> : vector<10x160xf32>
    %270 = tpu.matmul %267, %269, %cst_249 {dimension_numbers = #tpu.dot_dimension_numbers<[1], [0], [0], [1], [0, 0, 1, 1], [], []>} : vector<10x60xf32>, vector<60x160xf32>, vector<10x160xf32> -> vector<10x160xf32>
    %271 = arith.addf %266, %270 : vector<10x160xf32>
    %272 = vector.extract_strided_slice %165 {offsets = [4, 6], sizes = [10, 60], strides = [1, 1]} : vector<14x84xf32> to vector<10x60xf32>
    %c21_250 = arith.constant 21 : index
    %c0_251 = arith.constant 0 : index
    %c0_252 = arith.constant 0 : index
    %273 = vector.load %arg8[%c21_250, %c0_251, %c0_252] : memref<25x60x160xf32, #tpu.memory_space<vmem>>, vector<1x60x160xf32>
    %274 = vector.shape_cast %273 : vector<1x60x160xf32> to vector<60x160xf32>
    %cst_253 = arith.constant dense<0.000000e+00> : vector<10x160xf32>
    %275 = tpu.matmul %272, %274, %cst_253 {dimension_numbers = #tpu.dot_dimension_numbers<[1], [0], [0], [1], [0, 0, 1, 1], [], []>} : vector<10x60xf32>, vector<60x160xf32>, vector<10x160xf32> -> vector<10x160xf32>
    %276 = arith.addf %271, %275 : vector<10x160xf32>
    %277 = vector.extract_strided_slice %165 {offsets = [4, 12], sizes = [10, 60], strides = [1, 1]} : vector<14x84xf32> to vector<10x60xf32>
    %c22_254 = arith.constant 22 : index
    %c0_255 = arith.constant 0 : index
    %c0_256 = arith.constant 0 : index
    %278 = vector.load %arg8[%c22_254, %c0_255, %c0_256] : memref<25x60x160xf32, #tpu.memory_space<vmem>>, vector<1x60x160xf32>
    %279 = vector.shape_cast %278 : vector<1x60x160xf32> to vector<60x160xf32>
    %cst_257 = arith.constant dense<0.000000e+00> : vector<10x160xf32>
    %280 = tpu.matmul %277, %279, %cst_257 {dimension_numbers = #tpu.dot_dimension_numbers<[1], [0], [0], [1], [0, 0, 1, 1], [], []>} : vector<10x60xf32>, vector<60x160xf32>, vector<10x160xf32> -> vector<10x160xf32>
    %281 = arith.addf %276, %280 : vector<10x160xf32>
    %282 = vector.extract_strided_slice %165 {offsets = [4, 18], sizes = [10, 60], strides = [1, 1]} : vector<14x84xf32> to vector<10x60xf32>
    %c23_258 = arith.constant 23 : index
    %c0_259 = arith.constant 0 : index
    %c0_260 = arith.constant 0 : index
    %283 = vector.load %arg8[%c23_258, %c0_259, %c0_260] : memref<25x60x160xf32, #tpu.memory_space<vmem>>, vector<1x60x160xf32>
    %284 = vector.shape_cast %283 : vector<1x60x160xf32> to vector<60x160xf32>
    %cst_261 = arith.constant dense<0.000000e+00> : vector<10x160xf32>
    %285 = tpu.matmul %282, %284, %cst_261 {dimension_numbers = #tpu.dot_dimension_numbers<[1], [0], [0], [1], [0, 0, 1, 1], [], []>} : vector<10x60xf32>, vector<60x160xf32>, vector<10x160xf32> -> vector<10x160xf32>
    %286 = arith.addf %281, %285 : vector<10x160xf32>
    %287 = vector.extract_strided_slice %165 {offsets = [4, 24], sizes = [10, 60], strides = [1, 1]} : vector<14x84xf32> to vector<10x60xf32>
    %c24_262 = arith.constant 24 : index
    %c0_263 = arith.constant 0 : index
    %c0_264 = arith.constant 0 : index
    %288 = vector.load %arg8[%c24_262, %c0_263, %c0_264] : memref<25x60x160xf32, #tpu.memory_space<vmem>>, vector<1x60x160xf32>
    %289 = vector.shape_cast %288 : vector<1x60x160xf32> to vector<60x160xf32>
    %cst_265 = arith.constant dense<0.000000e+00> : vector<10x160xf32>
    %290 = tpu.matmul %287, %289, %cst_265 {dimension_numbers = #tpu.dot_dimension_numbers<[1], [0], [0], [1], [0, 0, 1, 1], [], []>} : vector<10x60xf32>, vector<60x160xf32>, vector<10x160xf32> -> vector<10x160xf32>
    %291 = arith.addf %286, %290 : vector<10x160xf32>
    %c0_266 = arith.constant 0 : index
    %c0_267 = arith.constant 0 : index
    %292 = vector.load %arg9[%c0_266, %c0_267] : memref<1x160xf32, #tpu.memory_space<vmem>>, vector<1x160xf32>
    %293 = vector.broadcast %292 : vector<1x160xf32> to vector<10x160xf32>
    %294 = arith.addf %291, %293 : vector<10x160xf32>
    %cst_268 = arith.constant 0.000000e+00 : f32
    %295 = vector.broadcast %cst_268 : f32 to vector<10x160xf32>
    %296 = arith.maximumf %294, %295 : vector<10x160xf32>
    %c0_269 = arith.constant 0 : index
    %c0_270 = arith.constant 0 : index
    %297 = vector.load %arg10[%c0_269, %c0_270] : memref<160x80xf32, #tpu.memory_space<vmem>>, vector<160x80xf32>
    %cst_271 = arith.constant dense<0.000000e+00> : vector<10x80xf32>
    %298 = tpu.matmul %296, %297, %cst_271 {dimension_numbers = #tpu.dot_dimension_numbers<[1], [0], [0], [1], [0, 0, 1, 1], [], []>} : vector<10x160xf32>, vector<160x80xf32>, vector<10x80xf32> -> vector<10x80xf32>
    %c0_272 = arith.constant 0 : index
    %c0_273 = arith.constant 0 : index
    %299 = vector.load %arg11[%c0_272, %c0_273] : memref<160x80xf32, #tpu.memory_space<vmem>>, vector<160x80xf32>
    %cst_274 = arith.constant dense<0.000000e+00> : vector<10x80xf32>
    %300 = tpu.matmul %296, %299, %cst_274 {dimension_numbers = #tpu.dot_dimension_numbers<[1], [0], [0], [1], [0, 0, 1, 1], [], []>} : vector<10x160xf32>, vector<160x80xf32>, vector<10x80xf32> -> vector<10x80xf32>
    %301 = arith.maximumf %298, %300 : vector<10x80xf32>
    %c0_275 = arith.constant 0 : index
    %c0_276 = arith.constant 0 : index
    %302 = vector.load %arg12[%c0_275, %c0_276] : memref<5x10xf32, #tpu.memory_space<vmem>>, vector<5x10xf32>
    %cst_277 = arith.constant dense<0.000000e+00> : vector<5x80xf32>
    %303 = tpu.matmul %302, %301, %cst_277 {dimension_numbers = #tpu.dot_dimension_numbers<[1], [0], [0], [1], [0, 0, 1, 1], [], []>} : vector<5x10xf32>, vector<10x80xf32>, vector<5x80xf32> -> vector<5x80xf32>
    %c0_278 = arith.constant 0 : index
    %c0_279 = arith.constant 0 : index
    %304 = vector.load %arg13[%c0_278, %c0_279] : memref<5x10xf32, #tpu.memory_space<vmem>>, vector<5x10xf32>
    %cst_280 = arith.constant dense<0.000000e+00> : vector<5x80xf32>
    %305 = tpu.matmul %304, %301, %cst_280 {dimension_numbers = #tpu.dot_dimension_numbers<[1], [0], [0], [1], [0, 0, 1, 1], [], []>} : vector<5x10xf32>, vector<10x80xf32>, vector<5x80xf32> -> vector<5x80xf32>
    %306 = arith.maximumf %303, %305 : vector<5x80xf32>
    %c0_281 = arith.constant 0 : index
    %c0_282 = arith.constant 0 : index
    %307 = vector.load %arg15[%c0_281, %c0_282] : memref<1x120xf32, #tpu.memory_space<vmem>>, vector<1x120xf32>
    %308 = vector.extract_strided_slice %306 {offsets = [0, 0], sizes = [1, 80], strides = [1, 1]} : vector<5x80xf32> to vector<1x80xf32>
    %c0_283 = arith.constant 0 : index
    %c0_284 = arith.constant 0 : index
    %c0_285 = arith.constant 0 : index
    %309 = vector.load %arg14[%c0_283, %c0_284, %c0_285] : memref<5x80x120xf32, #tpu.memory_space<vmem>>, vector<1x80x120xf32>
    %310 = vector.shape_cast %309 : vector<1x80x120xf32> to vector<80x120xf32>
    %cst_286 = arith.constant dense<0.000000e+00> : vector<1x120xf32>
    %311 = tpu.matmul %308, %310, %cst_286 {dimension_numbers = #tpu.dot_dimension_numbers<[1], [0], [0], [1], [0, 0, 1, 1], [], []>} : vector<1x80xf32>, vector<80x120xf32>, vector<1x120xf32> -> vector<1x120xf32>
    %312 = arith.addf %307, %311 : vector<1x120xf32>
    %313 = vector.extract_strided_slice %306 {offsets = [1, 0], sizes = [1, 80], strides = [1, 1]} : vector<5x80xf32> to vector<1x80xf32>
    %c1_287 = arith.constant 1 : index
    %c0_288 = arith.constant 0 : index
    %c0_289 = arith.constant 0 : index
    %314 = vector.load %arg14[%c1_287, %c0_288, %c0_289] : memref<5x80x120xf32, #tpu.memory_space<vmem>>, vector<1x80x120xf32>
    %315 = vector.shape_cast %314 : vector<1x80x120xf32> to vector<80x120xf32>
    %cst_290 = arith.constant dense<0.000000e+00> : vector<1x120xf32>
    %316 = tpu.matmul %313, %315, %cst_290 {dimension_numbers = #tpu.dot_dimension_numbers<[1], [0], [0], [1], [0, 0, 1, 1], [], []>} : vector<1x80xf32>, vector<80x120xf32>, vector<1x120xf32> -> vector<1x120xf32>
    %317 = arith.addf %312, %316 : vector<1x120xf32>
    %318 = vector.extract_strided_slice %306 {offsets = [2, 0], sizes = [1, 80], strides = [1, 1]} : vector<5x80xf32> to vector<1x80xf32>
    %c2_291 = arith.constant 2 : index
    %c0_292 = arith.constant 0 : index
    %c0_293 = arith.constant 0 : index
    %319 = vector.load %arg14[%c2_291, %c0_292, %c0_293] : memref<5x80x120xf32, #tpu.memory_space<vmem>>, vector<1x80x120xf32>
    %320 = vector.shape_cast %319 : vector<1x80x120xf32> to vector<80x120xf32>
    %cst_294 = arith.constant dense<0.000000e+00> : vector<1x120xf32>
    %321 = tpu.matmul %318, %320, %cst_294 {dimension_numbers = #tpu.dot_dimension_numbers<[1], [0], [0], [1], [0, 0, 1, 1], [], []>} : vector<1x80xf32>, vector<80x120xf32>, vector<1x120xf32> -> vector<1x120xf32>
    %322 = arith.addf %317, %321 : vector<1x120xf32>
    %323 = vector.extract_strided_slice %306 {offsets = [3, 0], sizes = [1, 80], strides = [1, 1]} : vector<5x80xf32> to vector<1x80xf32>
    %c3_295 = arith.constant 3 : index
    %c0_296 = arith.constant 0 : index
    %c0_297 = arith.constant 0 : index
    %324 = vector.load %arg14[%c3_295, %c0_296, %c0_297] : memref<5x80x120xf32, #tpu.memory_space<vmem>>, vector<1x80x120xf32>
    %325 = vector.shape_cast %324 : vector<1x80x120xf32> to vector<80x120xf32>
    %cst_298 = arith.constant dense<0.000000e+00> : vector<1x120xf32>
    %326 = tpu.matmul %323, %325, %cst_298 {dimension_numbers = #tpu.dot_dimension_numbers<[1], [0], [0], [1], [0, 0, 1, 1], [], []>} : vector<1x80xf32>, vector<80x120xf32>, vector<1x120xf32> -> vector<1x120xf32>
    %327 = arith.addf %322, %326 : vector<1x120xf32>
    %328 = vector.extract_strided_slice %306 {offsets = [4, 0], sizes = [1, 80], strides = [1, 1]} : vector<5x80xf32> to vector<1x80xf32>
    %c4_299 = arith.constant 4 : index
    %c0_300 = arith.constant 0 : index
    %c0_301 = arith.constant 0 : index
    %329 = vector.load %arg14[%c4_299, %c0_300, %c0_301] : memref<5x80x120xf32, #tpu.memory_space<vmem>>, vector<1x80x120xf32>
    %330 = vector.shape_cast %329 : vector<1x80x120xf32> to vector<80x120xf32>
    %cst_302 = arith.constant dense<0.000000e+00> : vector<1x120xf32>
    %331 = tpu.matmul %328, %330, %cst_302 {dimension_numbers = #tpu.dot_dimension_numbers<[1], [0], [0], [1], [0, 0, 1, 1], [], []>} : vector<1x80xf32>, vector<80x120xf32>, vector<1x120xf32> -> vector<1x120xf32>
    %332 = arith.addf %327, %331 : vector<1x120xf32>
    %cst_303 = arith.constant 0.000000e+00 : f32
    %333 = vector.broadcast %cst_303 : f32 to vector<1x120xf32>
    %334 = arith.maximumf %332, %333 : vector<1x120xf32>
    %c0_304 = arith.constant 0 : index
    %c0_305 = arith.constant 0 : index
    %335 = vector.load %arg16[%c0_304, %c0_305] : memref<120x84xf32, #tpu.memory_space<vmem>>, vector<120x84xf32>
    %cst_306 = arith.constant dense<0.000000e+00> : vector<1x84xf32>
    %336 = tpu.matmul %334, %335, %cst_306 {dimension_numbers = #tpu.dot_dimension_numbers<[1], [0], [0], [1], [0, 0, 1, 1], [], []>} : vector<1x120xf32>, vector<120x84xf32>, vector<1x84xf32> -> vector<1x84xf32>
    %c0_307 = arith.constant 0 : index
    %c0_308 = arith.constant 0 : index
    %337 = vector.load %arg17[%c0_307, %c0_308] : memref<1x84xf32, #tpu.memory_space<vmem>>, vector<1x84xf32>
    %338 = arith.addf %336, %337 : vector<1x84xf32>
    %cst_309 = arith.constant 0.000000e+00 : f32
    %339 = vector.broadcast %cst_309 : f32 to vector<1x84xf32>
    %340 = arith.maximumf %338, %339 : vector<1x84xf32>
    %c0_310 = arith.constant 0 : index
    %c0_311 = arith.constant 0 : index
    %341 = vector.load %arg18[%c0_310, %c0_311] : memref<84x2xf32, #tpu.memory_space<vmem>>, vector<84x2xf32>
    %cst_312 = arith.constant dense<0.000000e+00> : vector<1x2xf32>
    %342 = tpu.matmul %340, %341, %cst_312 {dimension_numbers = #tpu.dot_dimension_numbers<[1], [0], [0], [1], [0, 0, 1, 1], [], []>} : vector<1x84xf32>, vector<84x2xf32>, vector<1x2xf32> -> vector<1x2xf32>
    %c0_313 = arith.constant 0 : index
    %c0_314 = arith.constant 0 : index
    %343 = vector.load %arg19[%c0_313, %c0_314] : memref<1x2xf32, #tpu.memory_space<vmem>>, vector<1x2xf32>
    %344 = arith.addf %342, %343 : vector<1x2xf32>
    %cst_315 = arith.constant dense<0xFF800000> : vector<1xf32>
    %345 = vector.multi_reduction <maximumf>, %344, %cst_315 [1] : vector<1x2xf32> to vector<1xf32>
    %346 = vector.shape_cast %345 : vector<1xf32> to vector<1x1xf32>
    %347 = vector.broadcast %346 : vector<1x1xf32> to vector<1x2xf32>
    %348 = arith.subf %344, %347 : vector<1x2xf32>
    %349 = math.exp %348 : vector<1x2xf32>
    %cst_316 = arith.constant dense<0.000000e+00> : vector<1xf32>
    %350 = vector.multi_reduction <add>, %349, %cst_316 [1] : vector<1x2xf32> to vector<1xf32>
    %351 = vector.shape_cast %350 : vector<1xf32> to vector<1x1xf32>
    %352 = math.log %351 : vector<1x1xf32>
    %353 = vector.broadcast %352 : vector<1x1xf32> to vector<1x2xf32>
    %354 = arith.subf %348, %353 : vector<1x2xf32>
    %c0_317 = arith.constant 0 : index
    %c0_318 = arith.constant 0 : index
    %c0_319 = arith.constant 0 : index
    %355 = vector.load %arg20[%c0_317, %c0_318, %c0_319] : memref<1x1x2xf32, #tpu.memory_space<vmem>>, vector<1x1x2xf32>
    %356 = vector.shape_cast %355 : vector<1x1x2xf32> to vector<1x2xf32>
    %357 = vector.shape_cast %354 : vector<1x2xf32> to vector<1x1x2xf32>
    tpu.vector_store %arg20[%c0_317, %c0_318, %c0_319], %357 {strides = array<i32>} : memref<1x1x2xf32, #tpu.memory_space<vmem>>, vector<1x1x2xf32>,
    return
  }
  func.func @transform_0(%arg0: i32) -> (i32, i32, i32) {
    %c0_i32 = arith.constant 0 : i32
    %c0_i32_0 = arith.constant 0 : i32
    %c0_i32_1 = arith.constant 0 : i32
    return %arg0, %c0_i32, %c0_i32_0 : i32, i32, i32
  }
  func.func @transform_1(%arg0: i32) -> (i32, i32, i32) {
    %c0_i32 = arith.constant 0 : i32
    %c0_i32_0 = arith.constant 0 : i32
    %c0_i32_1 = arith.constant 0 : i32
    %c0_i32_2 = arith.constant 0 : i32
    return %c0_i32, %c0_i32_0, %c0_i32_1 : i32, i32, i32
  }
  func.func @transform_2(%arg0: i32) -> (i32, i32) {
    %c0_i32 = arith.constant 0 : i32
    %c0_i32_0 = arith.constant 0 : i32
    %c0_i32_1 = arith.constant 0 : i32
    return %c0_i32, %c0_i32_0 : i32, i32
  }
  func.func @transform_3(%arg0: i32) -> (i32, i32) {
    %c0_i32 = arith.constant 0 : i32
    %c0_i32_0 = arith.constant 0 : i32
    %c0_i32_1 = arith.constant 0 : i32
    return %c0_i32, %c0_i32_0 : i32, i32
  }
  func.func @transform_4(%arg0: i32) -> (i32, i32) {
    %c0_i32 = arith.constant 0 : i32
    %c0_i32_0 = arith.constant 0 : i32
    %c0_i32_1 = arith.constant 0 : i32
    return %c0_i32, %c0_i32_0 : i32, i32
  }
  func.func @transform_5(%arg0: i32) -> (i32, i32) {
    %c0_i32 = arith.constant 0 : i32
    %c0_i32_0 = arith.constant 0 : i32
    %c0_i32_1 = arith.constant 0 : i32
    return %c0_i32, %c0_i32_0 : i32, i32
  }
  func.func @transform_6(%arg0: i32) -> (i32, i32) {
    %c0_i32 = arith.constant 0 : i32
    %c0_i32_0 = arith.constant 0 : i32
    %c0_i32_1 = arith.constant 0 : i32
    return %c0_i32, %c0_i32_0 : i32, i32
  }
  func.func @transform_7(%arg0: i32) -> (i32, i32, i32) {
    %c0_i32 = arith.constant 0 : i32
    %c0_i32_0 = arith.constant 0 : i32
    %c0_i32_1 = arith.constant 0 : i32
    %c0_i32_2 = arith.constant 0 : i32
    return %c0_i32, %c0_i32_0, %c0_i32_1 : i32, i32, i32
  }
  func.func @transform_8(%arg0: i32) -> (i32, i32) {
    %c0_i32 = arith.constant 0 : i32
    %c0_i32_0 = arith.constant 0 : i32
    %c0_i32_1 = arith.constant 0 : i32
    return %c0_i32, %c0_i32_0 : i32, i32
  }
  func.func @transform_9(%arg0: i32) -> (i32, i32) {
    %c0_i32 = arith.constant 0 : i32
    %c0_i32_0 = arith.constant 0 : i32
    %c0_i32_1 = arith.constant 0 : i32
    return %c0_i32, %c0_i32_0 : i32, i32
  }
  func.func @transform_10(%arg0: i32) -> (i32, i32) {
    %c0_i32 = arith.constant 0 : i32
    %c0_i32_0 = arith.constant 0 : i32
    %c0_i32_1 = arith.constant 0 : i32
    return %c0_i32, %c0_i32_0 : i32, i32
  }
  func.func @transform_11(%arg0: i32) -> (i32, i32) {
    %c0_i32 = arith.constant 0 : i32
    %c0_i32_0 = arith.constant 0 : i32
    %c0_i32_1 = arith.constant 0 : i32
    return %c0_i32, %c0_i32_0 : i32, i32
  }
  func.func @transform_12(%arg0: i32) -> (i32, i32) {
    %c0_i32 = arith.constant 0 : i32
    %c0_i32_0 = arith.constant 0 : i32
    %c0_i32_1 = arith.constant 0 : i32
    return %c0_i32, %c0_i32_0 : i32, i32
  }
  func.func @transform_13(%arg0: i32) -> (i32, i32, i32) {
    %c0_i32 = arith.constant 0 : i32
    %c0_i32_0 = arith.constant 0 : i32
    %c0_i32_1 = arith.constant 0 : i32
    %c0_i32_2 = arith.constant 0 : i32
    return %c0_i32, %c0_i32_0, %c0_i32_1 : i32, i32, i32
  }
  func.func @transform_14(%arg0: i32) -> (i32, i32) {
    %c0_i32 = arith.constant 0 : i32
    %c0_i32_0 = arith.constant 0 : i32
    %c0_i32_1 = arith.constant 0 : i32
    return %c0_i32, %c0_i32_0 : i32, i32
  }
  func.func @transform_15(%arg0: i32) -> (i32, i32) {
    %c0_i32 = arith.constant 0 : i32
    %c0_i32_0 = arith.constant 0 : i32
    %c0_i32_1 = arith.constant 0 : i32
    return %c0_i32, %c0_i32_0 : i32, i32
  }
  func.func @transform_16(%arg0: i32) -> (i32, i32) {
    %c0_i32 = arith.constant 0 : i32
    %c0_i32_0 = arith.constant 0 : i32
    %c0_i32_1 = arith.constant 0 : i32
    return %c0_i32, %c0_i32_0 : i32, i32
  }
  func.func @transform_17(%arg0: i32) -> (i32, i32) {
    %c0_i32 = arith.constant 0 : i32
    %c0_i32_0 = arith.constant 0 : i32
    %c0_i32_1 = arith.constant 0 : i32
    return %c0_i32, %c0_i32_0 : i32, i32
  }
  func.func @transform_18(%arg0: i32) -> (i32, i32) {
    %c0_i32 = arith.constant 0 : i32
    %c0_i32_0 = arith.constant 0 : i32
    %c0_i32_1 = arith.constant 0 : i32
    return %c0_i32, %c0_i32_0 : i32, i32
  }
  func.func @transform_19(%arg0: i32) -> (i32, i32, i32) {
    %c0_i32 = arith.constant 0 : i32
    %c0_i32_0 = arith.constant 0 : i32
    %c0_i32_1 = arith.constant 0 : i32
    return %arg0, %c0_i32, %c0_i32_0 : i32, i32, i32
  }
}

</mosaic_0001>

<bundles_post_ra>
// kernel: forward.1
= control target key start
LH: loop header
LB: loop body
LE: loop exit
PB: predicated region body
PF: predicated region fallthrough
CT: control target
= control target key end

     0   :  { %s13499_s0 = inlined_call_operand.vmem [shape: f32[2,32,96], index: 0, kind: input, shape index: {}]   ;;  %s13500_s1 = inlined_call_operand.hbm [shape: f32[25,84,168], index: 1, kind: input, shape index: {}]   ;;  %s13501_s2 = inlined_call_operand.hbm [shape: f32[1,168], index: 2, kind: input, shape index: {}]   ;;  %s13502_s3 = inlined_call_operand.hbm [shape: f32[168,84], index: 3, kind: input, shape index: {}]   ;;  %s13503_s4 = inlined_call_operand.hbm [shape: f32[168,84], index: 4, kind: input, shape index: {}]   ;;  %s13504_s5 = inlined_call_operand.hbm [shape: f32[14,28], index: 5, kind: input, shape index: {}]   ;;  %s13505_s6 = inlined_call_operand.hbm [shape: f32[14,28], index: 6, kind: input, shape index: {}]   ;;  %s13506_s7 = inlined_call_operand.hbm [shape: f32[25,60,160], index: 7, kind: input, shape index: {}]   ;;  %s13507_s8 = inlined_call_operand.hbm [shape: f32[1,160], index: 8, kind: input, shape index: {}]   ;;  %s13508_s9 = inlined_call_operand.hbm [shape: f32[160,80], index: 9, kind: input, shape index: {}]   ;;  %s13509_s10 = inlined_call_operand.hbm [shape: f32[160,80], index: 10, kind: input, shape index: {}]   ;;  %s13510_s11 = inlined_call_operand.hbm [shape: f32[5,10], index: 11, kind: input, shape index: {}]   ;;  %s13511_s12 = inlined_call_operand.hbm [shape: f32[5,10], index: 12, kind: input, shape index: {}]   ;;  %s13512_s13 = inlined_call_operand.hbm [shape: f32[5,80,120], index: 13, kind: input, shape index: {}]   ;;  %s13513_s14 = inlined_call_operand.hbm [shape: f32[1,120], index: 14, kind: input, shape index: {}]   ;;  %s13514_s15 = inlined_call_operand.hbm [shape: f32[120,84], index: 15, kind: input, shape index: {}]   ;;  %s13515_s16 = inlined_call_operand.hbm [shape: f32[1,84], index: 16, kind: input, shape index: {}]   ;;  %s13516_s17 = inlined_call_operand.hbm [shape: f32[84,2], index: 17, kind: input, shape index: {}]   ;;  %s13517_s18 = inlined_call_operand.hbm [shape: f32[1,2], index: 18, kind: input, shape index: {}]   ;;  %s13518_s19 = inlined_call_operand.hbm [shape: f32[2,1,2], index: 19, kind: output, shape index: {}]  }
   0x1   :  { %13543 = sst [smem:[#allocation53_spill]] %s13499_s0 }
   0x2   :  { %13544 = sst [smem:[#allocation54_spill]] %s13500_s1 }
   0x3   :  { %13545 = sst [smem:[#allocation55_spill]] %s13501_s2 }
   0x4   :  { %13546 = sst [smem:[#allocation56_spill]] %s13502_s3 }
   0x5   :  { %13547 = sst [smem:[#allocation57_spill]] %s13503_s4 }
   0x6   :  { %13548 = sst [smem:[#allocation58_spill]] %s13505_s6 }
   0x7   :  { %13549 = sst [smem:[#allocation59_spill]] %s13507_s8 }
   0x8   :  { %13550 = sst [smem:[#allocation60_spill]] %s13509_s10 }
   0x9   :  { %13551 = sst [smem:[#allocation61_spill]] %s13511_s12 }
   0xa   :  { %13552 = sst [smem:[#allocation62_spill]] %s13518_s19 }
   0xb   :  { %24 = vsyncpa [#allocation3], 0 }
   0xc   :  { %25 = vsyncpa [#allocation6], 0 }
   0xd   :  { %26 = vsyncpa [#allocation9], 0 }
   0xe   :  { %27 = vsyncpa [#allocation12], 0 }
   0xf   :  { %28 = vsyncpa [#allocation15], 0 }
  0x10   :  { %29 = vsyncpa [#allocation18], 0 }
  0x11   :  { %30 = vsyncpa [#allocation21], 0 }
  0x12   :  { %31 = vsyncpa [#allocation24], 0 }
  0x13   :  { %32 = vsyncpa [#allocation27], 0 }
  0x14   :  { %33 = vsyncpa [#allocation30], 0 }
  0x15   :  { %34 = vsyncpa [#allocation4], 0 }
  0x16   :  { %36 = vsyncpa [#allocation4 + $0x1], 0  ;;  %s11968_s0 = smov 0   ;;  %s11970_s30 = smov 0  }
  0x17   :  { %s11972_s20 = smov 0   ;;  %s11974_s21 = smov 0  }
  0x18 LB: > { %13553 = sst [smem:[#allocation43_spill]] %s11821_s0  ;;  %s11989_s1 = sadd.s32 4294967295, %s11833_s21   ;;  %s11833_s21 = sphi %s11974_s21, %s13613_s21   ;;  %s11829_s20 = sphi %s11972_s20, %s13616_s20   ;;  %s11825_s30 = sphi %s11970_s30, %s13615_s30   ;;  %s11821_s0 = sphi %s11968_s0, %s13614_s0  }
  0x19   : > { %13554 = sst [smem:[#allocation44_spill]] %s11825_s30  ;;  %s8836_s22 = sadd.s32 4294967294, %s11833_s21  }
  0x1a   : > { %13555 = sst [smem:[#allocation45_spill]] %s11829_s20  ;;  %s11993_s2 = sadd.s32 1, %s11833_s21  }
  0x1b   : > { %13556 = sst [smem:[#allocation46_spill]] %s11833_s21  ;;  %s453_s23 = sadd.s32 1, %s11829_s20 }
  0x1c   : > { %13557 = sst [smem:[#allocation47_spill]] %s11989_s1  ;;  %s450_s24 = ssub.s32 %s11833_s21, %s11993_s2 }
  0x1d   : > { %13558 = sst [smem:[#allocation48_spill]] %s11993_s2  ;;  %p463_p0 = scmp.ne.s32.totalorder %s11829_s20, %s11825_s30 }
  0x1e   : > { %p451_p1 = scmp.eq.s32.totalorder %s450_s24, 0  ;;  %p464_p2 = scmp.eq.s32.totalorder %s11989_s1, 1 }
  0x1f   : > { %p469_p3 = scmp.ne.s32.totalorder %s11825_s30, %s11821_s0  ;;  %p470_p4 = scmp.eq.s32.totalorder %s8836_s22, 1 }
  0x20   : > { %s12004_s25 = scalar_select %p451_p1, %s11829_s20, %s453_s23  }
  0x21   : > { %p12006_p5 = por %p464_p2, %p463_p0  ;;  %p12010_p6 = por %p470_p4, %p469_p3 }
  0x22   : > { %13559 = sst [smem:[#allocation49_spill]] %s12004_s25  ;;  %p8837_p7 = scmp.ge.s32.totalorder %s11833_s21, 1 }
  0x23   : > { %s13560_s3 = scalar_select %p12006_p5, 1, 0 }
  0x24   : > { %s13562_s26 = scalar_select %p12010_p6, 1, 0 }
  0x25   : > { %13561 = sst [smem:[#allocation50_spill]] %s13560_s3  ;;  %p477_p8 = scmp.lt.s32.totalorder %s11833_s21, 3 }
  0x26   : > { %13563 = sst [smem:[#allocation51_spill]] %s13562_s26  ;;  %p13532_p9 = scmp.eq.s32.totalorder %s11989_s1, 0 }
  0x27   : > { %p12017_p10 = pnand %p8837_p7, %p477_p8  ;;  %s11835_s28 = smov [#allocation5]  }
  0x28   : > { %s503_s29 = sshll.u32 %s11835_s28, 4  ;;  %s11836_s23 = smov [#allocation8]   ;;  %s504_s29 = int_to_ptr.vmem [resolvable:$true] %s503_s29 }
  0x29   : > { %s13564_s27 = scalar_select %p12017_p10, 1, 0 }
  0x2a   : > { %p11051_p11 = pneg %p12017_p10  ;;  %s526_s24 = sshll.u32 %s11836_s23, 4  ;;  %s12029_s24 = int_to_ptr.vmem [resolvable:$true] %s526_s24 }
  0x2b   : > { %13565 = sst [smem:[#allocation52_spill]] %s13564_s27  ;;  %s11837_s25 = smov [#allocation11]  }
  0x2c   : > { %p12025_p12 = pnand %p13532_p9, %p11051_p11  ;;  %s12031_s20 = sshll.u32 %s11837_s25, 4  ;;  %s553_s20 = int_to_ptr.vmem [resolvable:$true] %s12031_s20 }
  0x2d   : > { %s13567_s0 = sld [smem:[#allocation55_spill]] }
  0x2e   : > { %p12041_p0 = pneg %p12025_p12 }
  0x33   : > { %s13568_s19 = smov %s13567_s0  ;;  %s11227_s28 = scalar_lea.hbm %s13567_s0, 32 }
  0x34   : > { %p11228_p13 = scmp.ne.s32.totalorder %s13568_s19, %s11227_s28  ;;  %p11234_p3 = scmp.lt.u32.totalorder %s11227_s28, %s13568_s19 }
  0x36   : > { %p11230_p1 = pnand %p12041_p0, %p11228_p13 }
  0x38   : > { %p11231_p2 = pneg %p11230_p1 }
  0x3a   : > { %p11236_p4 = pnand %p11234_p3, %p11231_p2 }
  0x3c   : > { %11239 = shalt.err (!%p11236_p4)
}
  0x3d   : > { %s11240_s0 = scalar_lea.vmem %s504_s29, 32  ;;  %p11248_p9 = scmp.lt.s32.totalorder %s504_s29, %s504_s29 }
  0x3e   : > { %p11241_p7 = scmp.ne.s32.totalorder %s504_s29, %s11240_s0  ;;  %p11249_p6 = scmp.lt.s32.totalorder %s11240_s0, %s11240_s0 }
  0x40   : > { %p11243_p8 = pnand %p11241_p7, %p12041_p0  ;;  %p11250_p5 = por %p11249_p6, %p11248_p9 }
  0x42   : > { %p11244_p11 = pneg %p11243_p8 }
  0x44   : > { %p11251_p10 = pnand %p11250_p5, %p11244_p11 }
  0x46   : > { %11254 = shalt.err (!%p11251_p10)
}
  0x47   : > { %11057 = dma.hbm_to_vmem [thread:$0]  (!%p12025_p12), %s13568_s19, 32, %s504_s29, [#allocation6]  }
  0x48   : > { %s13570_s4 = sld [smem:[#allocation57_spill]] }
  0x4e   : > { %s11255_s28 = scalar_lea.hbm %s13570_s4, 2688 }
  0x4f   : > { %p11256_p13 = scmp.ne.s32.totalorder %s13570_s4, %s11255_s28  ;;  %p11262_p5 = scmp.lt.u32.totalorder %s11255_s28, %s13570_s4 }
  0x51   : > { %p11258_p1 = pnand %p11256_p13, %p12041_p0 }
  0x53   : > { %p11259_p6 = pneg %p11258_p1 }
  0x55   : > { %p11264_p9 = pnand %p11262_p5, %p11259_p6 }
  0x57   : > { %11267 = shalt.err (!%p11264_p9)
}
  0x58   : > { %s11268_s29 = scalar_lea.vmem %s12029_s24, 2688  ;;  %p11276_p4 = scmp.lt.s32.totalorder %s12029_s24, %s12029_s24 }
  0x59   : > { %p11269_p10 = scmp.ne.s32.totalorder %s12029_s24, %s11268_s29  ;;  %p11277_p7 = scmp.lt.s32.totalorder %s11268_s29, %s11268_s29 }
  0x5b   : > { %p11271_p2 = pnand %p11269_p10, %p12041_p0  ;;  %p11278_p8 = por %p11277_p7, %p11276_p4 }
  0x5d   : > { %p11272_p3 = pneg %p11271_p2 }
  0x5f   : > { %p11279_p11 = pnand %p11278_p8, %p11272_p3 }
  0x61   : > { %11282 = shalt.err (!%p11279_p11)
}
  0x62   : > { %s13541_s21 = smov 128   ;;  %s13539_s1 = smov 8  }
  0x63   : > { %11063 = dma.hbm_to_vmem [thread:$0]  (!%p12025_p12), %s13570_s4, 2688, %s12029_s24, [#allocation9], %s13541_s21, %s13541_s21, %s13539_s1  }
  0x64   : > { %s13571_s6 = sld [smem:[#allocation58_spill]] }
  0x6a   : > { %s11283_s23 = scalar_lea.hbm %s13571_s6, 256 }
  0x6b   : > { %p11284_p13 = scmp.ne.s32.totalorder %s13571_s6, %s11283_s23  ;;  %p11290_p5 = scmp.lt.u32.totalorder %s11283_s23, %s13571_s6 }
  0x6d   : > { %p11286_p1 = pnand %p11284_p13, %p12041_p0 }
  0x6f   : > { %p11287_p6 = pneg %p11286_p1 }
  0x71   : > { %p11292_p9 = pnand %p11290_p5, %p11287_p6 }
  0x73   : > { %11295 = shalt.err (!%p11292_p9)
}
  0x74   : > { %s11296_s2 = scalar_lea.vmem %s553_s20, 256  ;;  %p11304_p4 = scmp.lt.s32.totalorder %s553_s20, %s553_s20 }
  0x75   : > { %p11297_p10 = scmp.ne.s32.totalorder %s553_s20, %s11296_s2  ;;  %p11305_p7 = scmp.lt.s32.totalorder %s11296_s2, %s11296_s2 }
  0x77   : > { %p11299_p2 = pnand %p11297_p10, %p12041_p0  ;;  %p11306_p8 = por %p11305_p7, %p11304_p4 }
  0x79   : > { %p11300_p3 = pneg %p11299_p2 }
  0x7b   : > { %p11307_p11 = pnand %p11306_p8, %p11300_p3 }
  0x7d   : > { %11310 = shalt.err (!%p11307_p11)
}
  0x7e   : > { %11069 = dma.hbm_to_vmem [thread:$0]  (!%p12025_p12), %s13571_s6, 256, %s553_s20, [#allocation12], %s13541_s21, %s13541_s21, %s13539_s1  }
  0x7f   : > { %s11840_s3 = smov [#allocation14]   ;;  %s11841_s28 = smov [#allocation17]  }
  0x80   : > { %s579_s26 = sshll.u32 %s11840_s3, 4  ;;  %s602_s23 = sshll.u32 %s11841_s28, 4  ;;  %s580_s26 = int_to_ptr.vmem [resolvable:$true] %s579_s26  ;;  %s603_s23 = int_to_ptr.vmem [resolvable:$true] %s602_s23 }
  0x81   : > { %s13572_s8 = sld [smem:[#allocation59_spill]] }
  0x87   : > { %s11311_s29 = scalar_lea.hbm %s13572_s8, 32 }
  0x88   : > { %p11312_p13 = scmp.ne.s32.totalorder %s13572_s8, %s11311_s29  ;;  %p11318_p5 = scmp.lt.u32.totalorder %s11311_s29, %s13572_s8 }
  0x8a   : > { %p11314_p1 = pnand %p11312_p13, %p12041_p0 }
  0x8c   : > { %p11315_p6 = pneg %p11314_p1 }
  0x8e   : > { %p11320_p9 = pnand %p11318_p5, %p11315_p6 }
  0x90   : > { %11323 = shalt.err (!%p11320_p9)
}
  0x91   : > { %s11324_s20 = scalar_lea.vmem %s580_s26, 32  ;;  %p11332_p4 = scmp.lt.s32.totalorder %s580_s26, %s580_s26 }
  0x92   : > { %p11325_p10 = scmp.ne.s32.totalorder %s580_s26, %s11324_s20  ;;  %p11333_p7 = scmp.lt.s32.totalorder %s11324_s20, %s11324_s20 }
  0x94   : > { %p11327_p2 = pnand %p11325_p10, %p12041_p0  ;;  %p11334_p8 = por %p11333_p7, %p11332_p4 }
  0x96   : > { %p11328_p3 = pneg %p11327_p2 }
  0x98   : > { %p11335_p11 = pnand %p11334_p8, %p11328_p3 }
  0x9a   : > { %11338 = shalt.err (!%p11335_p11)
}
  0x9b   : > { %11075 = dma.hbm_to_vmem [thread:$0]  (!%p12025_p12), %s13572_s8, 32, %s580_s26, [#allocation15]  }
  0x9c   : > { %s13573_s10 = sld [smem:[#allocation60_spill]] }
  0xa2   : > { %s11339_s28 = scalar_lea.hbm %s13573_s10, 2560 }
  0xa3   : > { %p11340_p13 = scmp.ne.s32.totalorder %s13573_s10, %s11339_s28  ;;  %p11346_p5 = scmp.lt.u32.totalorder %s11339_s28, %s13573_s10 }
  0xa5   : > { %p11342_p1 = pnand %p11340_p13, %p12041_p0 }
  0xa7   : > { %p11343_p6 = pneg %p11342_p1 }
  0xa9   : > { %p11348_p9 = pnand %p11346_p5, %p11343_p6 }
  0xab   : > { %11351 = shalt.err (!%p11348_p9)
}
  0xac   : > { %s11352_s19 = scalar_lea.vmem %s603_s23, 2560  ;;  %p11360_p4 = scmp.lt.s32.totalorder %s603_s23, %s603_s23 }
  0xad   : > { %p11353_p10 = scmp.ne.s32.totalorder %s603_s23, %s11352_s19  ;;  %p11361_p7 = scmp.lt.s32.totalorder %s11352_s19, %s11352_s19 }
  0xaf   : > { %p11355_p2 = pnand %p11353_p10, %p12041_p0  ;;  %p11362_p8 = por %p11361_p7, %p11360_p4 }
  0xb1   : > { %p11356_p3 = pneg %p11355_p2 }
  0xb3   : > { %p11363_p11 = pnand %p11362_p8, %p11356_p3 }
  0xb5   : > { %11366 = shalt.err (!%p11363_p11)
}
  0xb6   : > { %11081 = dma.hbm_to_vmem [thread:$0]  (!%p12025_p12), %s13573_s10, 2560, %s603_s23, [#allocation18], %s13541_s21, %s13541_s21, %s13539_s1  }
  0xb7   : > { %s11842_s4 = smov [#allocation20]   ;;  %s11843_s27 = smov [#allocation23]  }
  0xb8   : > { %s627_s24 = sshll.u32 %s11842_s4, 4  ;;  %s651_s3 = sshll.u32 %s11843_s27, 4  ;;  %s628_s24 = int_to_ptr.vmem [resolvable:$true] %s627_s24  ;;  %s652_s3 = int_to_ptr.vmem [resolvable:$true] %s651_s3 }
  0xb9   : > { %s13574_s12 = sld [smem:[#allocation61_spill]] }
  0xbf   : > { %s11367_s0 = scalar_lea.hbm %s13574_s12, 128 }
  0xc0   : > { %p11368_p13 = scmp.ne.s32.totalorder %s13574_s12, %s11367_s0  ;;  %p11374_p5 = scmp.lt.u32.totalorder %s11367_s0, %s13574_s12 }
  0xc2   : > { %p11370_p1 = pnand %p11368_p13, %p12041_p0 }
  0xc4   : > { %p11371_p6 = pneg %p11370_p1 }
  0xc6   : > { %p11376_p9 = pnand %p11374_p5, %p11371_p6 }
  0xc8   : > { %11379 = shalt.err (!%p11376_p9)
}
  0xc9   : > { %s11380_s23 = scalar_lea.vmem %s628_s24, 128  ;;  %p11388_p4 = scmp.lt.s32.totalorder %s628_s24, %s628_s24 }
  0xca   : > { %p11381_p10 = scmp.ne.s32.totalorder %s628_s24, %s11380_s23  ;;  %p11389_p7 = scmp.lt.s32.totalorder %s11380_s23, %s11380_s23 }
  0xcc   : > { %p11383_p2 = pnand %p11381_p10, %p12041_p0  ;;  %p11390_p8 = por %p11389_p7, %p11388_p4 }
  0xce   : > { %p11384_p3 = pneg %p11383_p2 }
  0xd0   : > { %p11391_p11 = pnand %p11390_p8, %p11384_p3 }
  0xd2   : > { %11394 = shalt.err (!%p11391_p11)
}
  0xd3   : > { %11087 = dma.hbm_to_vmem [thread:$0]  (!%p12025_p12), %s13574_s12, 128, %s628_s24, [#allocation21]  }
  0xd4   : > { %s11395_s25 = scalar_lea.hbm %s13513_s14, 16 }
  0xd5   : > { %p11396_p13 = scmp.ne.s32.totalorder %s13513_s14, %s11395_s25  ;;  %p11402_p5 = scmp.lt.u32.totalorder %s11395_s25, %s13513_s14 }
  0xd7   : > { %p11398_p1 = pnand %p11396_p13, %p12041_p0 }
  0xd9   : > { %p11399_p6 = pneg %p11398_p1 }
  0xdb   : > { %p11404_p9 = pnand %p11402_p5, %p11399_p6 }
  0xdd   : > { %11407 = shalt.err (!%p11404_p9)
}
  0xde   : > { %s11408_s26 = scalar_lea.vmem %s652_s3, 16  ;;  %s11415_s24 = scalar_lea.vmem %s652_s3, 32 }
  0xdf   : > { %p11409_p10 = scmp.ne.s32.totalorder %s652_s3, %s11408_s26  ;;  %p11416_p4 = scmp.lt.s32.totalorder %s652_s3, %s652_s3 }
  0xe0   : > { %p11417_p7 = scmp.lt.s32.totalorder %s11415_s24, %s11408_s26 }
  0xe1   : > { %p11411_p2 = pnand %p11409_p10, %p12041_p0 }
  0xe2   : > { %p11418_p8 = por %p11417_p7, %p11416_p4 }
  0xe3   : > { %p11412_p3 = pneg %p11411_p2 }
  0xe5   : > { %p11419_p11 = pnand %p11418_p8, %p11412_p3 }
  0xe7   : > { %11422 = shalt.err (!%p11419_p11)
}
  0xe8   : > { %11093 = dma.hbm_to_vmem [thread:$0]  (!%p12025_p12), %s13513_s14, 16, %s652_s3, [#allocation24]  }
  0xe9   : > { %s11844_s4 = smov [#allocation26]   ;;  %s11845_s28 = smov [#allocation2]  }
  0xea   : > { %s675_s27 = sshll.u32 %s11844_s4, 4  ;;  %s489_s25 = sshll.u32 %s11845_s28, 4  ;;  %s676_s27 = int_to_ptr.vmem [resolvable:$true] %s675_s27  ;;  %s490_s25 = int_to_ptr.vmem [resolvable:$true] %s489_s25 }
  0xeb   : > { %s11423_s2 = scalar_lea.hbm %s13515_s16, 16 }
  0xec   : > { %p11424_p13 = scmp.ne.s32.totalorder %s13515_s16, %s11423_s2  ;;  %p11430_p5 = scmp.lt.u32.totalorder %s11423_s2, %s13515_s16 }
  0xee   : > { %p11426_p1 = pnand %p11424_p13, %p12041_p0 }
  0xf0   : > { %p11427_p6 = pneg %p11426_p1 }
  0xf2   : > { %p11432_p9 = pnand %p11430_p5, %p11427_p6 }
  0xf4   : > { %11435 = shalt.err (!%p11432_p9)
}
  0xf5   : > { %s11436_s3 = scalar_lea.vmem %s676_s27, 16  ;;  %s11443_s20 = scalar_lea.vmem %s676_s27, 32 }
  0xf6   : > { %p11437_p10 = scmp.ne.s32.totalorder %s676_s27, %s11436_s3  ;;  %p11444_p4 = scmp.lt.s32.totalorder %s676_s27, %s676_s27 }
  0xf7   : > { %p11445_p7 = scmp.lt.s32.totalorder %s11443_s20, %s11436_s3 }
  0xf8   : > { %p11439_p2 = pnand %p11437_p10, %p12041_p0 }
  0xf9   : > { %p11446_p8 = por %p11445_p7, %p11444_p4 }
  0xfa   : > { %p11440_p3 = pneg %p11439_p2 }
  0xfc   : > { %p11447_p11 = pnand %p11446_p8, %p11440_p3 }
  0xfe   : > { %11450 = shalt.err (!%p11447_p11)
}
  0xff   : > { %11099 = dma.hbm_to_vmem [thread:$0]  (!%p12025_p12), %s13515_s16, 16, %s676_s27, [#allocation27]  }
 0x100   : > { %s13575_s2 = sld [smem:[#allocation54_spill]] }
 0x106   : > { %s11451_s19 = scalar_lea.hbm %s13575_s2, 70400 }
 0x107   : > { %p11452_p13 = scmp.ne.s32.totalorder %s13575_s2, %s11451_s19  ;;  %p11458_p5 = scmp.lt.u32.totalorder %s11451_s19, %s13575_s2 }
 0x109   : > { %p11454_p1 = pnand %p11452_p13, %p12041_p0 }
 0x10b   : > { %p11455_p6 = pneg %p11454_p1 }
 0x10d   : > { %p11460_p9 = pnand %p11458_p5, %p11455_p6 }
 0x10f   : > { %11463 = shalt.err (!%p11460_p9)
}
 0x110   : > { %s11464_s20 = scalar_lea.vmem %s490_s25, 70400  ;;  %p11472_p4 = scmp.lt.s32.totalorder %s490_s25, %s490_s25 }
 0x111   : > { %p11465_p10 = scmp.ne.s32.totalorder %s490_s25, %s11464_s20  ;;  %p11473_p7 = scmp.lt.s32.totalorder %s11464_s20, %s11464_s20 }
 0x113   : > { %p11467_p2 = pnand %p11465_p10, %p12041_p0  ;;  %p11474_p8 = por %p11473_p7, %p11472_p4 }
 0x115   : > { %p11468_p3 = pneg %p11467_p2 }
 0x117   : > { %p11475_p11 = pnand %p11474_p8, %p11468_p3 }
 0x119   : > { %11478 = shalt.err (!%p11475_p11)
}
 0x11a   : > { %s11846_s27 = smov 256   ;;  %s11847_s4 = smov 16  }
 0x11b   : > { %11054 = dma.hbm_to_vmem [thread:$0]  (!%p12025_p12), %s13575_s2, 70400, %s490_s25, [#allocation3], %s11846_s27, %s11846_s27, %s11847_s4  }
 0x11c   : > { %s11848_s29 = smov [#allocation7]   ;;  %s11849_s26 = smov [#allocation10]  }
 0x11d   : > { %s513_s19 = sshll.u32 %s11848_s29, 4  ;;  %s539_s24 = sshll.u32 %s11849_s26, 4  ;;  %s514_s19 = int_to_ptr.vmem [resolvable:$true] %s513_s19  ;;  %s540_s24 = int_to_ptr.vmem [resolvable:$true] %s539_s24 }
 0x11e   : > { %s13576_s20 = sld [smem:[#allocation56_spill]] }
 0x124   : > { %s13577_s1 = smov %s13576_s20  ;;  %s11479_s21 = scalar_lea.hbm %s13576_s20, 2688 }
 0x125   : > { %p11480_p13 = scmp.ne.s32.totalorder %s13577_s1, %s11479_s21  ;;  %p11486_p5 = scmp.lt.u32.totalorder %s11479_s21, %s13577_s1 }
 0x127   : > { %p11482_p1 = pnand %p11480_p13, %p12041_p0 }
 0x129   : > { %p11483_p6 = pneg %p11482_p1 }
 0x12b   : > { %p11488_p9 = pnand %p11486_p5, %p11483_p6 }
 0x12d   : > { %11491 = shalt.err (!%p11488_p9)
}
 0x12e   : > { %s11492_s25 = scalar_lea.vmem %s514_s19, 2688  ;;  %p11500_p4 = scmp.lt.s32.totalorder %s514_s19, %s514_s19 }
 0x12f   : > { %p11493_p10 = scmp.ne.s32.totalorder %s514_s19, %s11492_s25  ;;  %p11501_p7 = scmp.lt.s32.totalorder %s11492_s25, %s11492_s25 }
 0x131   : > { %p11495_p2 = pnand %p11493_p10, %p12041_p0  ;;  %p11502_p8 = por %p11501_p7, %p11500_p4 }
 0x133   : > { %p11496_p3 = pneg %p11495_p2 }
 0x135   : > { %p11503_p11 = pnand %p11502_p8, %p11496_p3 }
 0x137   : > { %11506 = shalt.err (!%p11503_p11)
}
 0x138   : > { %s13578_s6 = smov 8   ;;  %s13579_s8 = smov 128  }
 0x139   : > { %11060 = dma.hbm_to_vmem [thread:$0]  (!%p12025_p12), %s13577_s1, 2688, %s514_s19, [#allocation6], %s13579_s8, %s13579_s8, %s13578_s6  }
 0x13a   : > { %s11507_s0 = scalar_lea.hbm %s13504_s5, 256 }
 0x13b   : > { %p11508_p13 = scmp.ne.s32.totalorder %s13504_s5, %s11507_s0  ;;  %p11514_p5 = scmp.lt.u32.totalorder %s11507_s0, %s13504_s5 }
 0x13d   : > { %p11510_p1 = pnand %p11508_p13, %p12041_p0 }
 0x13f   : > { %p11511_p6 = pneg %p11510_p1 }
 0x141   : > { %p11516_p9 = pnand %p11514_p5, %p11511_p6 }
 0x143   : > { %11519 = shalt.err (!%p11516_p9)
}
 0x144   : > { %s11520_s20 = scalar_lea.vmem %s540_s24, 256  ;;  %p11528_p4 = scmp.lt.s32.totalorder %s540_s24, %s540_s24 }
 0x145   : > { %p11521_p10 = scmp.ne.s32.totalorder %s540_s24, %s11520_s20  ;;  %p11529_p7 = scmp.lt.s32.totalorder %s11520_s20, %s11520_s20 }
 0x147   : > { %p11523_p2 = pnand %p11521_p10, %p12041_p0  ;;  %p11530_p8 = por %p11529_p7, %p11528_p4 }
 0x149   : > { %p11524_p3 = pneg %p11523_p2 }
 0x14b   : > { %p11531_p11 = pnand %p11530_p8, %p11524_p3 }
 0x14d   : > { %11534 = shalt.err (!%p11531_p11)
}
 0x14e   : > { %11066 = dma.hbm_to_vmem [thread:$0]  (!%p12025_p12), %s13504_s5, 256, %s540_s24, [#allocation9], %s13579_s8, %s13579_s8, %s13578_s6  }
 0x14f   : > { %s11850_s10 = smov [#allocation13]   ;;  %s11851_s21 = smov [#allocation16]  }
 0x150   : > { %s565_s12 = sshll.u32 %s11850_s10, 4  ;;  %s589_s28 = sshll.u32 %s11851_s21, 4  ;;  %s566_s12 = int_to_ptr.vmem [resolvable:$true] %s565_s12  ;;  %s590_s28 = int_to_ptr.vmem [resolvable:$true] %s589_s28 }
 0x151   : > { %s11535_s26 = scalar_lea.hbm %s13506_s7, 51200 }
 0x152   : > { %p11536_p13 = scmp.ne.s32.totalorder %s13506_s7, %s11535_s26  ;;  %p11542_p5 = scmp.lt.u32.totalorder %s11535_s26, %s13506_s7 }
 0x154   : > { %p11538_p1 = pnand %p11536_p13, %p12041_p0 }
 0x156   : > { %p11539_p6 = pneg %p11538_p1 }
 0x158   : > { %p11544_p9 = pnand %p11542_p5, %p11539_p6 }
 0x15a   : > { %11547 = shalt.err (!%p11544_p9)
}
 0x15b   : > { %s11548_s24 = scalar_lea.vmem %s566_s12, 51200  ;;  %p11556_p4 = scmp.lt.s32.totalorder %s566_s12, %s566_s12 }
 0x15c   : > { %p11549_p10 = scmp.ne.s32.totalorder %s566_s12, %s11548_s24  ;;  %p11557_p7 = scmp.lt.s32.totalorder %s11548_s24, %s11548_s24 }
 0x15e   : > { %p11551_p2 = pnand %p11549_p10, %p12041_p0  ;;  %p11558_p8 = por %p11557_p7, %p11556_p4 }
 0x160   : > { %p11552_p3 = pneg %p11551_p2 }
 0x162   : > { %p11559_p11 = pnand %p11558_p8, %p11552_p3 }
 0x164   : > { %11562 = shalt.err (!%p11559_p11)
}
 0x165   : > { %11072 = dma.hbm_to_vmem [thread:$0]  (!%p12025_p12), %s13506_s7, 51200, %s566_s12, [#allocation12], %s11846_s27, %s11846_s27, %s11847_s4  }
 0x166   : > { %s11563_s29 = scalar_lea.hbm %s13508_s9, 2560 }
 0x167   : > { %p11564_p13 = scmp.ne.s32.totalorder %s13508_s9, %s11563_s29  ;;  %p11570_p5 = scmp.lt.u32.totalorder %s11563_s29, %s13508_s9 }
 0x169   : > { %p11566_p1 = pnand %p11564_p13, %p12041_p0 }
 0x16b   : > { %p11567_p6 = pneg %p11566_p1 }
 0x16d   : > { %p11572_p9 = pnand %p11570_p5, %p11567_p6 }
 0x16f   : > { %11575 = shalt.err (!%p11572_p9)
}
 0x170   : > { %s11576_s19 = scalar_lea.vmem %s590_s28, 2560  ;;  %p11584_p4 = scmp.lt.s32.totalorder %s590_s28, %s590_s28 }
 0x171   : > { %p11577_p10 = scmp.ne.s32.totalorder %s590_s28, %s11576_s19  ;;  %p11585_p7 = scmp.lt.s32.totalorder %s11576_s19, %s11576_s19 }
 0x173   : > { %p11579_p2 = pnand %p11577_p10, %p12041_p0  ;;  %p11586_p8 = por %p11585_p7, %p11584_p4 }
 0x175   : > { %p11580_p3 = pneg %p11579_p2 }
 0x177   : > { %p11587_p11 = pnand %p11586_p8, %p11580_p3 }
 0x179   : > { %11590 = shalt.err (!%p11587_p11)
}
 0x17a   : > { %11078 = dma.hbm_to_vmem [thread:$0]  (!%p12025_p12), %s13508_s9, 2560, %s590_s28, [#allocation15], %s13579_s8, %s13579_s8, %s13578_s6  }
 0x17b   : > { %s11852_s12 = smov [#allocation19]   ;;  %s11853_s25 = smov [#allocation22]  }
 0x17c   : > { %s616_s24 = sshll.u32 %s11852_s12, 4  ;;  %s637_s10 = sshll.u32 %s11853_s25, 4  ;;  %s617_s24 = int_to_ptr.vmem [resolvable:$true] %s616_s24  ;;  %s638_s10 = int_to_ptr.vmem [resolvable:$true] %s637_s10 }
 0x17d   : > { %s11591_s29 = scalar_lea.hbm %s13510_s11, 128 }
 0x17e   : > { %p11592_p13 = scmp.ne.s32.totalorder %s13510_s11, %s11591_s29  ;;  %p11598_p5 = scmp.lt.u32.totalorder %s11591_s29, %s13510_s11 }
 0x180   : > { %p11594_p1 = pnand %p11592_p13, %p12041_p0 }
 0x182   : > { %p11595_p6 = pneg %p11594_p1 }
 0x184   : > { %p11600_p9 = pnand %p11598_p5, %p11595_p6 }
 0x186   : > { %11603 = shalt.err (!%p11600_p9)
}
 0x187   : > { %s11604_s28 = scalar_lea.vmem %s617_s24, 128  ;;  %p11612_p4 = scmp.lt.s32.totalorder %s617_s24, %s617_s24 }
 0x188   : > { %p11605_p10 = scmp.ne.s32.totalorder %s617_s24, %s11604_s28  ;;  %p11613_p7 = scmp.lt.s32.totalorder %s11604_s28, %s11604_s28 }
 0x18a   : > { %p11607_p2 = pnand %p11605_p10, %p12041_p0  ;;  %p11614_p8 = por %p11613_p7, %p11612_p4 }
 0x18c   : > { %p11608_p3 = pneg %p11607_p2 }
 0x18e   : > { %p11615_p11 = pnand %p11614_p8, %p11608_p3 }
 0x190   : > { %11618 = shalt.err (!%p11615_p11)
}
 0x191   : > { %11084 = dma.hbm_to_vmem [thread:$0]  (!%p12025_p12), %s13510_s11, 128, %s617_s24, [#allocation18]  }
 0x192   : > { %s11619_s25 = scalar_lea.hbm %s13512_s13, 6400 }
 0x193   : > { %p11620_p13 = scmp.ne.s32.totalorder %s13512_s13, %s11619_s25  ;;  %p11626_p5 = scmp.lt.u32.totalorder %s11619_s25, %s13512_s13 }
 0x195   : > { %p11622_p1 = pnand %p11620_p13, %p12041_p0 }
 0x197   : > { %p11623_p6 = pneg %p11622_p1 }
 0x199   : > { %p11628_p9 = pnand %p11626_p5, %p11623_p6 }
 0x19b   : > { %11631 = shalt.err (!%p11628_p9)
}
 0x19c   : > { %s11632_s23 = scalar_lea.vmem %s638_s10, 6400  ;;  %p11640_p4 = scmp.lt.s32.totalorder %s638_s10, %s638_s10 }
 0x19d   : > { %p11633_p10 = scmp.ne.s32.totalorder %s638_s10, %s11632_s23  ;;  %p11641_p7 = scmp.lt.s32.totalorder %s11632_s23, %s11632_s23 }
 0x19f   : > { %p11635_p2 = pnand %p11633_p10, %p12041_p0  ;;  %p11642_p8 = por %p11641_p7, %p11640_p4 }
 0x1a1   : > { %p11636_p3 = pneg %p11635_p2 }
 0x1a3   : > { %p11643_p11 = pnand %p11642_p8, %p11636_p3 }
 0x1a5   : > { %11646 = shalt.err (!%p11643_p11)
}
 0x1a6   : > { %11090 = dma.hbm_to_vmem [thread:$0]  (!%p12025_p12), %s13512_s13, 6400, %s638_s10, [#allocation21], %s13579_s8, %s13579_s8, %s13578_s6  }
 0x1a7   : > { %s11854_s20 = smov [#allocation25]   ;;  %s11855_s19 = smov [#allocation28]  }
 0x1a8   : > { %s661_s28 = sshll.u32 %s11854_s20, 4  ;;  %s685_s27 = sshll.u32 %s11855_s19, 4  ;;  %s662_s28 = int_to_ptr.vmem [resolvable:$true] %s661_s28  ;;  %s686_s27 = int_to_ptr.vmem [resolvable:$true] %s685_s27 }
 0x1a9   : > { %s11647_s25 = scalar_lea.hbm %s13514_s15, 1920 }
 0x1aa   : > { %p11648_p13 = scmp.ne.s32.totalorder %s13514_s15, %s11647_s25  ;;  %p11654_p5 = scmp.lt.u32.totalorder %s11647_s25, %s13514_s15 }
 0x1ac   : > { %p11650_p1 = pnand %p11648_p13, %p12041_p0 }
 0x1ae   : > { %p11651_p6 = pneg %p11650_p1 }
 0x1b0   : > { %p11656_p9 = pnand %p11654_p5, %p11651_p6 }
 0x1b2   : > { %11659 = shalt.err (!%p11656_p9)
}
 0x1b3   : > { %s11660_s10 = scalar_lea.vmem %s662_s28, 1920  ;;  %p11668_p4 = scmp.lt.s32.totalorder %s662_s28, %s662_s28 }
 0x1b4   : > { %p11661_p10 = scmp.ne.s32.totalorder %s662_s28, %s11660_s10  ;;  %p11669_p7 = scmp.lt.s32.totalorder %s11660_s10, %s11660_s10 }
 0x1b6   : > { %p11663_p2 = pnand %p11661_p10, %p12041_p0  ;;  %p11670_p8 = por %p11669_p7, %p11668_p4 }
 0x1b8   : > { %p11664_p3 = pneg %p11663_p2 }
 0x1ba   : > { %p11671_p11 = pnand %p11670_p8, %p11664_p3 }
 0x1bc   : > { %11674 = shalt.err (!%p11671_p11)
}
 0x1bd   : > { %11096 = dma.hbm_to_vmem [thread:$0]  (!%p12025_p12), %s13514_s15, 1920, %s662_s28, [#allocation24], %s13579_s8, %s13579_s8, %s13578_s6  }
 0x1be   : > { %s11675_s19 = scalar_lea.hbm %s13516_s17, 1408 }
 0x1bf   : > { %p11676_p13 = scmp.ne.s32.totalorder %s13516_s17, %s11675_s19  ;;  %p11682_p5 = scmp.lt.u32.totalorder %s11675_s19, %s13516_s17 }
 0x1c1   : > { %p11678_p1 = pnand %p11676_p13, %p12041_p0 }
 0x1c3   : > { %p11679_p6 = pneg %p11678_p1 }
 0x1c5   : > { %p11684_p9 = pnand %p11682_p5, %p11679_p6 }
 0x1c7   : > { %11687 = shalt.err (!%p11684_p9)
}
 0x1c8   : > { %s11688_s0 = scalar_lea.vmem %s686_s27, 1408  ;;  %p11696_p4 = scmp.lt.s32.totalorder %s686_s27, %s686_s27 }
 0x1c9   : > { %p11689_p10 = scmp.ne.s32.totalorder %s686_s27, %s11688_s0  ;;  %p11697_p7 = scmp.lt.s32.totalorder %s11688_s0, %s11688_s0 }
 0x1cb   : > { %p11691_p2 = pnand %p11689_p10, %p12041_p0  ;;  %p11698_p8 = por %p11697_p7, %p11696_p4 }
 0x1cd   : > { %p11692_p3 = pneg %p11691_p2 }
 0x1cf   : > { %p11699_p11 = pnand %p11698_p8, %p11692_p3 }
 0x1d1   : > { %11702 = shalt.err (!%p11699_p11)
}
 0x1d2   : > { %11102 = dma.hbm_to_vmem [thread:$0]  (!%p12025_p12), %s13516_s17, 1408, %s686_s27, [#allocation27], %s13579_s8, %s13579_s8, %s13578_s6  }
 0x1d3   : > { %s11856_s26 = smov [#allocation29]   ;;  %s11703_s3 = scalar_lea.hbm %s13517_s18, 16 }
 0x1d4   : > { %s699_s10 = sshll.u32 %s11856_s26, 4  ;;  %p11704_p13 = scmp.ne.s32.totalorder %s13517_s18, %s11703_s3  ;;  %s700_s10 = int_to_ptr.vmem [resolvable:$true] %s699_s10 }
 0x1d5   : > { %p11710_p5 = scmp.lt.u32.totalorder %s11703_s3, %s13517_s18 }
 0x1d6   : > { %p11706_p1 = pnand %p11704_p13, %p12041_p0 }
 0x1d8   : > { %p11707_p6 = pneg %p11706_p1 }
 0x1da   : > { %p11712_p9 = pnand %p11710_p5, %p11707_p6 }
 0x1dc   : > { %11715 = shalt.err (!%p11712_p9)
}
 0x1dd   : > { %s11716_s6 = scalar_lea.vmem %s700_s10, 16  ;;  %s11723_s8 = scalar_lea.vmem %s700_s10, 32 }
 0x1de   : > { %p11717_p10 = scmp.ne.s32.totalorder %s700_s10, %s11716_s6  ;;  %p11724_p4 = scmp.lt.s32.totalorder %s700_s10, %s700_s10 }
 0x1df   : > { %p11725_p7 = scmp.lt.s32.totalorder %s11723_s8, %s11716_s6 }
 0x1e0   : > { %p11719_p2 = pnand %p11717_p10, %p12041_p0 }
 0x1e1   : > { %p11726_p8 = por %p11725_p7, %p11724_p4 }
 0x1e2   : > { %p11720_p3 = pneg %p11719_p2 }
 0x1e4   : > { %p11727_p11 = pnand %p11726_p8, %p11720_p3 }
 0x1e6   : > { %11730 = shalt.err (!%p11727_p11)
}
 0x1e7   : > { %11105 = dma.hbm_to_vmem [thread:$0]  (!%p12025_p12), %s13517_s18, 16, %s700_s10, [#allocation30]  }
 0x1e8   : > { %s13580_s21 = sld [smem:[#allocation52_spill]] }
 0x1ee   : > { %p13581_p13 = scmp.ne.s32.totalorder %s13580_s21, 0 }
 0x1ef   : > { %s13582_s0 = sld [smem:[#allocation47_spill]] (!%p13581_p13) }
 0x1f0   : > { %720 = sbr.rel (%p13581_p13) target bundleno = 4126 (0x101e), region = 96 }
 0x1f5   : > { %p13583_p1 = scmp.eq.s32.totalorder (!%p13581_p13), %s13582_s0, 0 }
 0x1f7   : > { %11776 = dma.done.wait (%p13583_p1), [#allocation3], 70400   ;;  %p13584_p0 = pmov %p13583_p1 }
 0x1f9   : > { %11778 = vsyncadd (%p13584_p0), [#allocation3], 4294896896  ;;  %p13585_p6 = pmov %p13584_p0 }
 0x1fa   : > { %p13586_p5 = pmov %p13584_p0 }
 0x1fb   : > { %11780 = dma.done.wait (%p13585_p6), [#allocation6], 2720  }
 0x1fc   : > { %11782 = vsyncadd (%p13586_p5), [#allocation6], 4294964576  ;;  %p13587_p9 = pmov %p13584_p0 }
 0x1fd   : > { %p13588_p12 = pmov %p13584_p0 }
 0x1fe   : > { %11784 = dma.done.wait (%p13587_p9), [#allocation9], 2944  }
 0x1ff   : > { %11786 = vsyncadd (%p13588_p12), [#allocation9], 4294964352  ;;  %p13589_p10 = pmov %p13584_p0 }
 0x200   : > { %p13590_p2 = pmov %p13584_p0 }
 0x201   : > { %11788 = dma.done.wait (%p13589_p10), [#allocation12], 51456  }
 0x202   : > { %11790 = vsyncadd (%p13590_p2), [#allocation12], 4294915840  ;;  %p13591_p3 = pmov %p13584_p0 }
 0x203   : > { %p13592_p4 = pmov %p13584_p0 }
 0x204   : > { %11792 = dma.done.wait (%p13591_p3), [#allocation15], 2592  }
 0x205   : > { %11794 = vsyncadd (%p13592_p4), [#allocation15], 4294964704  ;;  %p13593_p7 = pmov %p13584_p0 }
 0x206   : > { %p13594_p8 = pmov %p13584_p0 }
 0x207   : > { %11796 = dma.done.wait (%p13593_p7), [#allocation18], 2688  }
 0x208   : > { %11798 = vsyncadd (%p13594_p8), [#allocation18], 4294964608  ;;  %p13595_p11 = pmov %p13584_p0 }
 0x209   : > { %p13596_p13 = pmov %p13584_p0 }
 0x20a   : > { %11800 = dma.done.wait (%p13595_p11), [#allocation21], 6528  }
 0x20b   : > { %11802 = vsyncadd (%p13596_p13), [#allocation21], 4294960768  ;;  %p13597_p1 = pmov %p13584_p0 }
 0x20d   : > { %11804 = dma.done.wait (%p13597_p1), [#allocation24], 1936  }
 0x20e   : > { %11806 = vsyncadd (%p13584_p0), [#allocation24], 4294965360  ;;  %p13598_p6 = pmov %p13584_p0 }
 0x20f   : > { %p13599_p5 = pmov %p13584_p0 }
 0x210   : > { %11808 = dma.done.wait (%p13598_p6), [#allocation27], 1424  }
 0x211   : > { %11810 = vsyncadd (%p13599_p5), [#allocation27], 4294965872  ;;  %p13600_p9 = pmov %p13584_p0 }
 0x212   : > { %p13601_p12 = pmov %p13584_p0 }
 0x213   : > { %11812 = dma.done.wait (%p13600_p9), [#allocation30], 16  }
 0x214   : > { %11814 = vsyncadd (%p13601_p12), [#allocation30], 4294967280  ;;  %p843_p10 = scmp.lt.s32.totalorder %s13582_s0, 1  ;;  %v11857_v0 = vmov 0.0   ;;  %s13602_s26 = sld [smem:[#allocation53_spill]]  ;;  %v876_v5 = vld [vmem:[#allocation2 + $0xb8] sm:$0xff] }
 0x215   : > { %989 = vmatprep.mubr.f32.mxu0 %v11857_v0  ;;  %s11858_s23 = smov 125   ;;  %v878_v6 = vld [vmem:[#allocation2 + $0xc8] sm:$0xff]  ;;  %v875_v8 = vld [vmem:[#allocation2 + $0xb0] sm:$0xff]  ;;  %v877_v9 = vld [vmem:[#allocation2 + $0xc0] sm:$0xff]  ;;  %s11859_s24 = smov 122   ;;  %vm918_vm0 = vcmask 1043456  }
 0x216   : > { %s844_s30 = scalar_select %p843_p10, %s13582_s0, 1  ;;  %v9472_v7 = vpack.c.bf16 %v878_v6, %v876_v5  ;;  %v880_v10 = vld [vmem:[#allocation2 + $0xd8] sm:$0xff]  ;;  %v9474_v11 = vpack.c.bf16 %v877_v9, %v875_v8  ;;  %v882_v12 = vld [vmem:[#allocation2 + $0xe8] sm:$0xff]  ;;  %v879_v13 = vld [vmem:[#allocation2 + $0xd0] sm:$0xff]  ;;  %vm909_vm1 = vcmask 687104   ;;  %vm4432_vm2 = vcmask 326656  }
 0x217   : > { %v881_v14 = vld [vmem:[#allocation2 + $0xe0] sm:$0xff]  ;;  %v9476_v15 = vpack.c.bf16 %v882_v12, %v880_v10  ;;  %v884_v16 = vld [vmem:[#allocation2 + $0xf8] sm:$0xff]  ;;  %v886_v17 = vld [vmem:[#allocation2 + $0x108] sm:$0xff]  ;;  %s11860_s3 = smov 119   ;;  %s11861_s20 = smov 116   ;;  %vm4642_vm3 = vcmask 228352  }
 0x218   : > { %s9161_s22 = sshll.u32 %s844_s30, 5  ;;  %9473 = vmatprep.subr.bf16.mxu0 %v9472_v7  ;;  %v9478_v18 = vpack.c.bf16 %v881_v14, %v879_v13  ;;  %v9480_v19 = vpack.c.bf16 %v886_v17, %v884_v16  ;;  %v883_v20 = vld [vmem:[#allocation2 + $0xf0] sm:$0xff]  ;;  %v885_v21 = vld [vmem:[#allocation2 + $0x100] sm:$0xff]  ;;  %v888_v22 = vld [vmem:[#allocation2 + $0x118] sm:$0xff]  ;;  %vm11863_vm4 = vmmov 1   ;;  %s11864_s19 = smov 110  }
 0x219   : > { %9475 = vmatpush1.bf16.msra.mxu0 %v9474_v11  ;;  %v890_v23 = vld [vmem:[#allocation2 + $0x128] sm:$0xff]  ;;  %v9482_v24 = vpack.c.bf16 %v885_v21, %v883_v20  ;;  %v887_v26 = vld [vmem:[#allocation2 + $0x110] sm:$0xff]  ;;  %v889_v27 = vld [vmem:[#allocation2 + $0x120] sm:$0xff]  ;;  %s11865_s4 = smov 104   ;;  %vm5379_vm6 = vcmask 1046528   ;;  %vm5939_vm7 = vcmask 1045504  }
 0x21a   : > { %s12450_s10 = scalar_lea.vmem %s13602_s26, %s9161_s22  ;;  %9477 = vmatprep.subr.bf16.mxu0 %v9476_v15  ;;  %v9484_v25 = vpack.c.bf16 %v890_v23, %v888_v22  ;;  %v892_v28 = vld [vmem:[#allocation2 + $0x138] sm:$0xff]  ;;  %v894_v29 = vld [vmem:[#allocation2 + $0x148] sm:$0xff]  ;;  %v9486_v30 = vpack.c.bf16 %v889_v27, %v887_v26  ;;  %v891_v32 = vld [vmem:[#allocation2 + $0x130] sm:$0xff]  ;;  %vm6499_vm8 = vcmask 1044480   ;;  %vm4851_vm9 = vcmask 490496   ;;  %s13605_s12 = sld [smem:[#allocation44_spill]] }
 0x21b   : > { %v12453_v1 = vld [vmem:[%s12450_s10] sm:$0xff]  ;;  %v12456_v2 = vld [vmem:[%s12450_s10 + $0x8] sm:$0xff]  ;;  %v12459_v3 = vld [vmem:[%s12450_s10 + $0x10] sm:$0xff]  ;;  %v9488_v31 = vpack.c.bf16 %v894_v29, %v892_v28  ;;  %vm7641_vm10 = vcmask 261120   ;;  %vm11866_vm11 = vmmov 0   ;;  %vm7825_vm12 = vcmask 1041408  }
 0x21c   : > { %901 = vrot.lane.b32.xlu0 %v12453_v1, %s11858_s23  ;;  %905 = vrot.lane.b32.xlu1 %v12459_v3, %s11858_s23  ;;  %v12466_v4 = vld [vmem:[%s12450_s10 + $0x18] sm:$0xf]  ;;  %v893_v33 = vld [vmem:[#allocation2 + $0x140] sm:$0xff]  ;;  %v853_v36 = vld [vmem:[#allocation2 + $0x8] sm:$0xff]  ;;  %vm7821_vm14 = vcmask 80896   ;;  %vm7985_vm15 = vcmask 654336  }
 0x21d   : > { %9479 = vmatpush1.bf16.msra.mxu0 %v9478_v18  ;;  %v9490_v34 = vpack.c.bf16 %v893_v33, %v891_v32  ;;  %v896_v35 = vld [vmem:[#allocation2 + $0x158] sm:$0xf]  ;;  %v895_v38 = vld [vmem:[#allocation2 + $0x150] sm:$0xf]  ;;  %v12499_v40 = vld [vmem:[%s12450_s10 + $0x1] sm:$0xff]  ;;  %s13606_s6 = sld [smem:[#allocation50_spill]] }
 0x21e   : > { %9481 = vmatprep.subr.bf16.mxu0 %v9480_v19  ;;  %v855_v37 = vld [vmem:[#allocation2 + $0x18] sm:$0xff]  ;;  %v12502_v41 = vld [vmem:[%s12450_s10 + $0x9] sm:$0xff]  ;;  %v852_v44 = vld [vmem:[#allocation2] sm:$0xff]  ;;  %s9158_s27 = sshll.u32 %s13582_s0, 4  ;;  %s13607_s28 = sld [smem:[#allocation62_spill]] }
 0x21f   : > { %v9492_v39 = vpack.c.bf16 %v855_v37, %v853_v36  ;;  %v12509_v42 = vld [vmem:[%s12450_s10 + $0x11] sm:$0xff]  ;;  %v12512_v43 = vld [vmem:[%s12450_s10 + $0x19] sm:$0xf]  ;;  %v857_v46 = vld [vmem:[#allocation2 + $0x28] sm:$0xff]  ;;  %s11867_s0 = smov [#allocation31]  }
 0x220   : > { %903 = vrot.lane.b32.xlu0 %v12456_v2, %s11858_s23  ;;  %907 = vrot.lane.b32.xlu1 %v12466_v4, %s11858_s23  ;;  %v854_v45 = vld [vmem:[#allocation2 + $0x10] sm:$0xff]  ;;  %v859_v47 = vld [vmem:[#allocation2 + $0x38] sm:$0xff]  ;;  %v856_v50 = vld [vmem:[#allocation2 + $0x20] sm:$0xff]  ;;  %s841_s8 = sand.u32 1, %s13605_s12  }
 0x221   : > { %9483 = vmatpush1.bf16.msra.mxu0 %v9482_v24  ;;  %v9494_v48 = vpack.c.bf16 %v854_v45, %v852_v44  ;;  %v9496_v49 = vpack.c.bf16 %v859_v47, %v857_v46  ;;  %v858_v51 = vld [vmem:[#allocation2 + $0x30] sm:$0xff]  ;;  %v861_v53 = vld [vmem:[#allocation2 + $0x48] sm:$0xff]  ;;  %v863_v54 = vld [vmem:[#allocation2 + $0x58] sm:$0xff]  ;;  %s842_s25 = scalar_lea.vmem [#allocation31], %s841_s8  ;;  %s8595_s26 = scalar_lea.sflag [#allocation4], %s841_s8 }
 0x222   : > { %9485 = vmatprep.subr.bf16.mxu0 %v9484_v25  ;;  %v12543_v55 = vld [vmem:[%s12450_s10 + $0x2] sm:$0xff]  ;;  %v9498_v56 = vpack.c.bf16 %v858_v51, %v856_v50  ;;  %v9500_v57 = vpack.c.bf16 %v863_v54, %v861_v53  ;;  %v862_v59 = vld [vmem:[#allocation2 + $0x50] sm:$0xff]  ;;  %v867_v62 = vld [vmem:[#allocation2 + $0x78] sm:$0xff]  ;;  %s8607_s21 = sshll.u32 %s842_s25, 4  ;;  %s13458_s21 = int_to_ptr.vmem [resolvable:$true] %s8607_s21 }
 0x223   : > { %v860_v58 = vld [vmem:[#allocation2 + $0x40] sm:$0xff]  ;;  %v865_v61 = vld [vmem:[#allocation2 + $0x68] sm:$0xff]  ;;  %v866_v8 = vld [vmem:[#allocation2 + $0x70] sm:$0xff]  ;;  %p13608_p3 = scmp.ne.s32.totalorder %s13606_s6, 0 }
 0x224   : > { %1140 = vrot.lane.b32.xlu0 %v12453_v1, %s11859_s24  ;;  %1142 = vrot.lane.b32.xlu1 %v12456_v2, %s11859_s24  ;;  %v9502_v5 = vpack.c.bf16 %v862_v59, %v860_v58  ;;  %v9504_v6 = vpack.c.bf16 %v867_v62, %v865_v61  ;;  %v864_v7 = vld [vmem:[#allocation2 + $0x60] sm:$0xff]  ;;  %v869_v9 = vld [vmem:[#allocation2 + $0x88] sm:$0xff]  ;;  %v871_v10 = vld [vmem:[#allocation2 + $0x98] sm:$0xff]  ;;  %s13456_s29 = scalar_lea.hbm %s13607_s28, %s9158_s27 }
 0x225   : > { %9487 = vmatpush1.bf16.msra.mxu0 %v9486_v30  ;;  %v9506_v11 = vpack.c.bf16 %v866_v8, %v864_v7  ;;  %v12554_v13 = vld [vmem:[%s12450_s10 + $0xa] sm:$0xff]  ;;  %v9508_v14 = vpack.c.bf16 %v871_v10, %v869_v9  ;;  %v868_v15 = vld [vmem:[#allocation2 + $0x80] sm:$0xff]  ;;  %v12561_v18 = vld [vmem:[%s12450_s10 + $0x12] sm:$0xff] }
 0x226   : > { %9489 = vmatprep.subr.bf16.mxu0 %v9488_v31  ;;  %v870_v16 = vld [vmem:[#allocation2 + $0x90] sm:$0xff]  ;;  %v873_v19 = vld [vmem:[#allocation2 + $0xa8] sm:$0xf]  ;;  %v1121_v21 = vld [vmem:[#allocation2 + $0x178] sm:$0xff] }
 0x227   : > { %v9510_v17 = vpack.c.bf16 %v870_v16, %v868_v15  ;;  %v1119_v20 = vld [vmem:[#allocation2 + $0x168] sm:$0xff]  ;;  %v1118_v22 = vld [vmem:[#allocation2 + $0x160] sm:$0xff]  ;;  %v1120_v23 = vld [vmem:[#allocation2 + $0x170] sm:$0xff] }
 0x228   : > { %1144 = vrot.lane.b32.xlu0 %v12459_v3, %s11859_s24  ;;  %1146 = vrot.lane.b32.xlu1 %v12466_v4, %s11859_s24  ;;  %v1123_v24 = vld [vmem:[#allocation2 + $0x188] sm:$0xff]  ;;  %v1125_v25 = vld [vmem:[#allocation2 + $0x198] sm:$0xff]  ;;  %v872_v27 = vld [vmem:[#allocation2 + $0xa0] sm:$0xf]  ;;  %v9512_v28 = vpack.c.bf16 %v1121_v21, %v1119_v20  ;;  %v9514_v29 = vpack.c.bf16 %v1120_v23, %v1118_v22 }
 0x229   : > { %9491 = vmatpush1.bf16.msra.mxu0 %v9490_v34  ;;  %v12566_v26 = vld [vmem:[%s12450_s10 + $0x1a] sm:$0xf]  ;;  %v9516_v30 = vpack.c.bf16 %v1125_v25, %v1123_v24  ;;  %v1122_v31 = vld [vmem:[#allocation2 + $0x180] sm:$0xff]  ;;  %v1124_v32 = vld [vmem:[#allocation2 + $0x190] sm:$0xff] }
 0x22a   : > { %8878 = vmatprep.subr.msk.mxu0 %vm918_vm0, %v896_v35  ;;  %v1127_v33 = vld [vmem:[#allocation2 + $0x1a8] sm:$0xff]  ;;  %v1129_v34 = vld [vmem:[#allocation2 + $0x1b8] sm:$0xff]  ;;  %v9518_v35 = vpack.c.bf16 %v1124_v32, %v1122_v31  ;;  %v1126_v37 = vld [vmem:[#allocation2 + $0x1a0] sm:$0xff] }
 0x22b   : > { %v9520_v36 = vpack.c.bf16 %v1129_v34, %v1127_v33  ;;  %v1133_v44 = vld [vmem:[#allocation2 + $0x1d8] sm:$0xff]  ;;  %v1130_v46 = vld [vmem:[#allocation2 + $0x1c0] sm:$0xff]  ;;  %v1132_v47 = vld [vmem:[#allocation2 + $0x1d0] sm:$0xff] }
 0x22c   : > { %1282 = vrot.lane.b32.xlu0 %v12453_v1, %s11860_s3  ;;  %1284 = vrot.lane.b32.xlu1 %v12456_v2, %s11860_s3  ;;  %v1134_v51 = vld [vmem:[#allocation2 + $0x1e0] sm:$0xff]  ;;  %v1261_v54 = vld [vmem:[#allocation2 + $0x218] sm:$0xff]  ;;  %v1271_v8 = vld [vmem:[#allocation2 + $0x268] sm:$0xff] }
 0x22d   : > { %8879 = vmatpush1.msk.msra.mxu0 %vm918_vm0, %v895_v38  ;;  %v1128_v38 = vld [vmem:[#allocation2 + $0x1b0] sm:$0xff]  ;;  %v1262_v58 = vld [vmem:[#allocation2 + $0x220] sm:$0xff]  ;;  %v1265_v59 = vld [vmem:[#allocation2 + $0x238] sm:$0xff] }
 0x22e   : > { %9493 = vmatprep.subr.bf16.mxu0 %v9492_v39  ;;  %v1131_v39 = vld [vmem:[#allocation2 + $0x1c8] sm:$0xff]  ;;  %v1269_v7 = vld [vmem:[#allocation2 + $0x258] sm:$0xff]  ;;  %v1274_v20 = vld [vmem:[#allocation2 + $0x280] sm:$0xff] }
 0x22f   : > { %v9524_v45 = vpack.c.bf16 %v1133_v44, %v1131_v39  ;;  %v1275_v15 = vld [vmem:[#allocation2 + $0x288] sm:$0xff]  ;;  %v1277_v21 = vld [vmem:[#allocation2 + $0x298] sm:$0xff]  ;;  %v1402_v32 = vld [vmem:[#allocation2 + $0x2c0] sm:$0xff] }
 0x230   : > { %1286 = vrot.lane.b32.xlu0 %v12459_v3, %s11860_s3  ;;  %1288 = vrot.lane.b32.xlu1 %v12466_v4, %s11860_s3  ;;  %v1279_v22 = vld [vmem:[#allocation2 + $0x2a8] sm:$0xff]  ;;  %v1405_v31 = vld [vmem:[#allocation2 + $0x2d8] sm:$0xff]  ;;  %v1404_v33 = vld [vmem:[#allocation2 + $0x2d0] sm:$0xff] }
 0x231   : > { %v9548_v25 = vpack.c.bf16 %v1279_v22, %v1277_v21  ;;  %v1407_v34 = vld [vmem:[#allocation2 + $0x2e8] sm:$0xff]  ;;  %v9554_v39 = vpack.c.bf16 %v1404_v33, %v1402_v32  ;;  %v1560_v32 = vld [vmem:[#allocation2 + $0x3d0] sm:$0xff]  ;;  %v1562_v33 = vld [vmem:[#allocation2 + $0x3e0] sm:$0xff] }
 0x232   : > { %v1559_v21 = vld [vmem:[#allocation2 + $0x3c8] sm:$0xff]  ;;  %vm13007_vm5 = vmpackc.low %vm918_vm0, %vm11863_vm4 }
 0x233   : > { %vm10564_vm13 = vmpackc.low %vm7825_vm12, %vm11863_vm4 }
 0x234   : > { %1424 = vrot.lane.b32.xlu0 %v12453_v1, %s11861_s20  ;;  %1426 = vrot.lane.b32.xlu1 %v12456_v2, %s11861_s20 }
 0x238   : > { %1428 = vrot.lane.b32.xlu0 %v12459_v3, %s11861_s20  ;;  %1430 = vrot.lane.b32.xlu1 %v12466_v4, %s11861_s20 }
 0x23c   : > { %1708 = vrot.lane.b32.xlu0 %v12499_v40, %s11858_s23  ;;  %1710 = vrot.lane.b32.xlu1 %v12502_v41, %s11858_s23 }
 0x240   : > { %1712 = vrot.lane.b32.xlu0 %v12509_v42, %s11858_s23  ;;  %1714 = vrot.lane.b32.xlu1 %v12512_v43, %s11858_s23 }
 0x244   : > { %1850 = vrot.lane.b32.xlu0 %v12499_v40, %s11859_s24  ;;  %1852 = vrot.lane.b32.xlu1 %v12502_v41, %s11859_s24 }
 0x248   : > { %1854 = vrot.lane.b32.xlu0 %v12509_v42, %s11859_s24  ;;  %1856 = vrot.lane.b32.xlu1 %v12512_v43, %s11859_s24 }
 0x24c   : > { %1992 = vrot.lane.b32.xlu0 %v12499_v40, %s11860_s3  ;;  %1994 = vrot.lane.b32.xlu1 %v12502_v41, %s11860_s3 }
 0x250   : > { %1996 = vrot.lane.b32.xlu0 %v12509_v42, %s11860_s3  ;;  %1998 = vrot.lane.b32.xlu1 %v12512_v43, %s11860_s3 }
 0x254   : > { %2134 = vrot.lane.b32.xlu0 %v12499_v40, %s11861_s20  ;;  %2136 = vrot.lane.b32.xlu1 %v12502_v41, %s11861_s20 }
 0x258   : > { %2138 = vrot.lane.b32.xlu0 %v12509_v42, %s11861_s20  ;;  %2140 = vrot.lane.b32.xlu1 %v12512_v43, %s11861_s20 }
 0x25c   : > { %2418 = vrot.lane.b32.xlu0 %v12543_v55, %s11858_s23  ;;  %2420 = vrot.lane.b32.xlu1 %v12554_v13, %s11858_s23 }
 0x260   : > { %2422 = vrot.lane.b32.xlu0 %v12561_v18, %s11858_s23  ;;  %2424 = vrot.lane.b32.xlu1 %v12566_v26, %s11858_s23 }
 0x264   : > { %2560 = vrot.lane.b32.xlu0 %v12543_v55, %s11859_s24  ;;  %2562 = vrot.lane.b32.xlu1 %v12554_v13, %s11859_s24 }
 0x268   : > { %2564 = vrot.lane.b32.xlu0 %v12561_v18, %s11859_s24  ;;  %2566 = vrot.lane.b32.xlu1 %v12566_v26, %s11859_s24 }
 0x26c   : > { %2702 = vrot.lane.b32.xlu0 %v12543_v55, %s11860_s3  ;;  %2704 = vrot.lane.b32.xlu1 %v12554_v13, %s11860_s3 }
 0x270   : > { %2706 = vrot.lane.b32.xlu0 %v12561_v18, %s11860_s3  ;;  %2708 = vrot.lane.b32.xlu1 %v12566_v26, %s11860_s3 }
 0x274   : > { %2844 = vrot.lane.b32.xlu0 %v12543_v55, %s11861_s20  ;;  %2846 = vrot.lane.b32.xlu1 %v12554_v13, %s11861_s20  ;;  %v1266_v55 = vld [vmem:[#allocation2 + $0x240] sm:$0xff] }
 0x275   : > { %v1270_v13 = vld [vmem:[#allocation2 + $0x260] sm:$0xff] }
 0x278   : > { %2848 = vrot.lane.b32.xlu0 %v12561_v18, %s11861_s20  ;;  %2850 = vrot.lane.b32.xlu1 %v12566_v26, %s11861_s20  ;;  %v1276_v26 = vld [vmem:[#allocation2 + $0x290] sm:$0xff] }
 0x28e   : > { %v902_v52 = vpop.permute.xlu0 %901  ;;  %v906_v63 = vpop.permute.xlu1 %905 }
 0x28f   : > { %8880 = vmatmul.mubr.msk.f32.vlgmr.msra.gmra.mrb[0].mxu0 %vm909_vm1, %v902_v52  ;;  %v1136_v52 = vld [vmem:[#allocation2 + $0x1f0] sm:$0xff] }
 0x290   : > { %9495 = vmatpush1.bf16.msra.mxu0 %v9494_v48  ;;  %995 = vmatprep.mubr.f32.mxu0 %v11857_v0  ;;  %v1135_v48 = vld [vmem:[#allocation2 + $0x1e8] sm:$0xff]  ;;  %v9530_v53 = vpack.c.bf16 %v1136_v52, %v1134_v51  ;;  %v1412_v51 = vld [vmem:[#allocation2 + $0x310] sm:$0xff] }
 0x291   : > { %9497 = vmatprep.subr.bf16.mxu0 %v9496_v49  ;;  %v1137_v49 = vld [vmem:[#allocation2 + $0x1f8] sm:$0xff]  ;;  %v1415_v52 = vld [vmem:[#allocation2 + $0x328] sm:$0xff] }
 0x292   : > { %v904_v60 = vpop.permute.xlu0 %903  ;;  %v908_v12 = vpop.permute.xlu1 %907  ;;  %v9528_v50 = vpack.c.bf16 %v1137_v49, %v1135_v48 }
 0x293   : > { %8881 = vmatmul.mubr.msk.f32.gmra.mrb[2].mxu0 %vm909_vm1, %v904_v60  ;;  %v1267_v60 = vld [vmem:[#allocation2 + $0x248] sm:$0xff] }
 0x294   : > { %9499 = vmatpush1.bf16.msra.mxu0 %v9498_v56  ;;  %1001 = vmatprep.mubr.f32.mxu0 %v11857_v0  ;;  %v1263_v56 = vld [vmem:[#allocation2 + $0x228] sm:$0xff] }
 0x295   : > { %9501 = vmatprep.subr.bf16.mxu0 %v9500_v57  ;;  %v1260_v57 = vld [vmem:[#allocation2 + $0x210] sm:$0xff]  ;;  %v9532_v61 = vpack.c.bf16 %v1263_v56, %v1261_v54 }
 0x296   : > { %v1141_v62 = vpop.permute.xlu0 %1140  ;;  %v1143_v10 = vpop.permute.xlu1 %1142 }
 0x297   : > { %8882 = vmatmul.mubr.msk.f32.gmra.mrb[4].mxu0 %vm909_vm1, %v906_v63  ;;  %v9534_v63 = vpack.c.bf16 %v1262_v58, %v1260_v57  ;;  %v1414_v57 = vld [vmem:[#allocation2 + $0x320] sm:$0xff]  ;;  %v1416_v58 = vld [vmem:[#allocation2 + $0x330] sm:$0xff] }
 0x298   : > { %9503 = vmatpush1.bf16.msra.mxu0 %v9502_v5  ;;  %1007 = vmatprep.mubr.f32.mxu0 %v11857_v0  ;;  %v9536_v5 = vpack.c.bf16 %v1267_v60, %v1265_v59  ;;  %v1419_v59 = vld [vmem:[#allocation2 + $0x348] sm:$0xff]  ;;  %v1421_v60 = vld [vmem:[#allocation2 + $0x358] sm:$0xff] }
 0x299   : > { %9505 = vmatprep.subr.bf16.mxu0 %v9504_v6  ;;  %v1264_v6 = vld [vmem:[#allocation2 + $0x230] sm:$0xff] }
 0x29a   : > { %v9538_v9 = vpack.c.bf16 %v1266_v55, %v1264_v6  ;;  %v1147_v24 = vpop.permute.xlu1 %1146  ;;  %v1423_v55 = vld [vmem:[#allocation2 + $0x368] sm:$0xf] }
 0x29b   : > { %8883 = vmatmul.mubr.msk.f32.gmra.mrb[6].mxu0 %vm909_vm1, %v908_v12  ;;  %v1268_v12 = vld [vmem:[#allocation2 + $0x250] sm:$0xff] }
 0x29c   : > { %9507 = vmatpush1.bf16.msra.mxu0 %v9506_v11  ;;  %1092 = vmatprep.mubr.f32.mxu0 %v11857_v0  ;;  %v9540_v11 = vpack.c.bf16 %v1271_v8, %v1269_v7  ;;  %v9542_v16 = vpack.c.bf16 %v1270_v13, %v1268_v12  ;;  %v1549_v7 = vld [vmem:[#allocation2 + $0x378] sm:$0xff]  ;;  %v1551_v8 = vld [vmem:[#allocation2 + $0x388] sm:$0xff]  ;;  %v1422_v13 = vld [vmem:[#allocation2 + $0x360] sm:$0xf] }
 0x29d   : > { %9509 = vmatprep.subr.bf16.mxu0 %v9508_v14  ;;  %v1273_v14 = vld [vmem:[#allocation2 + $0x278] sm:$0xff]  ;;  %v1555_v12 = vld [vmem:[#allocation2 + $0x3a8] sm:$0xff] }
 0x29e   : > { %v9544_v18 = vpack.c.bf16 %v1275_v15, %v1273_v14  ;;  %v1285_v49 = vpop.permute.xlu1 %1284  ;;  %v9572_v14 = vpack.c.bf16 %v1551_v8, %v1549_v7  ;;  %v1700_v7 = vld [vmem:[#allocation2 + $0x490] sm:$0xff]  ;;  %v1703_v8 = vld [vmem:[#allocation2 + $0x4a8] sm:$0xff] }
 0x2a0   : > { %9511 = vmatpush1.bf16.msra.mxu0 %v9510_v17  ;;  %v1145_v17 = vpop.permute.xlu0 %1144 }
 0x2a1   : > { %8884 = vmatprep.subr.msk.mxu0 %vm918_vm0, %v873_v19  ;;  %v1272_v19 = vld [vmem:[#allocation2 + $0x270] sm:$0xff] }
 0x2a2   : > { %v9546_v23 = vpack.c.bf16 %v1274_v20, %v1272_v19  ;;  %v1554_v19 = vld [vmem:[#allocation2 + $0x3a0] sm:$0xff]  ;;  %v1557_v20 = vld [vmem:[#allocation2 + $0x3b8] sm:$0xff] }
 0x2a4   : > { %8885 = vmatpush1.msk.msra.mxu0 %vm918_vm0, %v872_v27  ;;  %v1278_v27 = vld [vmem:[#allocation2 + $0x2a0] sm:$0xff] }
 0x2a5   : > { %9513 = vmatprep.subr.bf16.mxu0 %v9512_v28  ;;  %8886 = vmatmul.mubr.msk.f32.vlgmr.msra.gmra.mrb[0].mxu0 %vm909_vm1, %v12453_v1  ;;  %v9522_v1 = vpack.c.bf16 %v1128_v38, %v1126_v37  ;;  %v9550_v28 = vpack.c.bf16 %v1278_v27, %v1276_v26  ;;  %v1283_v38 = vpop.permute.xlu0 %1282  ;;  %v1558_v26 = vld [vmem:[#allocation2 + $0x3c0] sm:$0xff]  ;;  %v1561_v27 = vld [vmem:[#allocation2 + $0x3d8] sm:$0xff] }
 0x2a6   : > { %9515 = vmatpush1.bf16.msra.mxu0 %v9514_v29  ;;  %1098 = vmatprep.mubr.f32.mxu0 %v11857_v0  ;;  %v1281_v29 = vld [vmem:[#allocation2 + $0x2b8] sm:$0xf] }
 0x2a7   : > { %9517 = vmatprep.subr.bf16.mxu0 %v9516_v30  ;;  %v1403_v30 = vld [vmem:[#allocation2 + $0x2c8] sm:$0xff] }
 0x2a8   : > { %v9552_v37 = vpack.c.bf16 %v1405_v31, %v1403_v30 }
 0x2a9   : > { %8887 = vmatmul.mubr.msk.f32.gmra.mrb[2].mxu0 %vm909_vm1, %v12456_v2  ;;  %v9526_v2 = vpack.c.bf16 %v1132_v47, %v1130_v46  ;;  %v1411_v46 = vld [vmem:[#allocation2 + $0x308] sm:$0xff]  ;;  %v1413_v47 = vld [vmem:[#allocation2 + $0x318] sm:$0xff]  ;;  %v1287_v54 = vpop.permute.xlu0 %1286 }
 0x2aa   : > { %9519 = vmatpush1.bf16.msra.mxu0 %v9518_v35  ;;  %1104 = vmatprep.mubr.f32.mxu0 %v11857_v0  ;;  %v1409_v35 = vld [vmem:[#allocation2 + $0x2f8] sm:$0xff] }
 0x2ab   : > { %9521 = vmatprep.subr.bf16.mxu0 %v9520_v36  ;;  %v1280_v36 = vld [vmem:[#allocation2 + $0x2b0] sm:$0xf]  ;;  %v9556_v44 = vpack.c.bf16 %v1409_v35, %v1407_v34  ;;  %v1565_v34 = vld [vmem:[#allocation2 + $0x3f8] sm:$0xff]  ;;  %v1567_v35 = vld [vmem:[#allocation2 + $0x408] sm:$0xff] }
 0x2ad   : > { %8888 = vmatmul.mubr.msk.f32.gmra.mrb[4].mxu0 %vm909_vm1, %v12459_v3  ;;  %v1139_v3 = vld [vmem:[#allocation2 + $0x208] sm:$0xf]  ;;  %v1425_v15 = vpop.permute.xlu0 %1424 }
 0x2ae   : > { %9523 = vmatpush1.bf16.msra.mxu0 %v9522_v1  ;;  %1110 = vmatprep.mubr.f32.mxu0 %v11857_v0  ;;  %v1406_v1 = vld [vmem:[#allocation2 + $0x2e0] sm:$0xff] }
 0x2af   : > { %9525 = vmatprep.subr.bf16.mxu0 %v9524_v45  ;;  %v1408_v45 = vld [vmem:[#allocation2 + $0x2f0] sm:$0xff] }
 0x2b0   : > { %v9558_v48 = vpack.c.bf16 %v1408_v45, %v1406_v1  ;;  %v1569_v45 = vld [vmem:[#allocation2 + $0x418] sm:$0xf] }
 0x2b1   : > { %8889 = vmatmul.mubr.msk.f32.gmra.mrb[6].mxu0 %vm909_vm1, %v12466_v4  ;;  %v1138_v4 = vld [vmem:[#allocation2 + $0x200] sm:$0xf]  ;;  %v1429_v30 = vpop.permute.xlu0 %1428 }
 0x2b2   : > { %9527 = vmatpush1.bf16.msra.mxu0 %v9526_v2  ;;  %1226 = vmatprep.mubr.f32.mxu0 %v11857_v0  ;;  %v9560_v2 = vpack.c.bf16 %v1413_v47, %v1411_v46  ;;  %v1687_v46 = vld [vmem:[#allocation2 + $0x428] sm:$0xff]  ;;  %v1689_v47 = vld [vmem:[#allocation2 + $0x438] sm:$0xff] }
 0x2b3   : > { %9529 = vmatprep.subr.bf16.mxu0 %v9528_v50  ;;  %v1410_v50 = vld [vmem:[#allocation2 + $0x300] sm:$0xff] }
 0x2b6   : > { %9531 = vmatpush1.bf16.msra.mxu0 %v9530_v53  ;;  %v1417_v53 = vld [vmem:[#allocation2 + $0x338] sm:$0xff] }
 0x2b7   : > { %8890 = vmatprep.subr.msk.mxu0 %vm918_vm0, %v1139_v3  ;;  %v9562_v3 = vpack.c.bf16 %v1412_v51, %v1410_v50  ;;  %v9564_v56 = vpack.c.bf16 %v1417_v53, %v1415_v52  ;;  %v1693_v50 = vld [vmem:[#allocation2 + $0x458] sm:$0xff]  ;;  %v1568_v51 = vld [vmem:[#allocation2 + $0x410] sm:$0xf]  ;;  %v9592_v52 = vpack.c.bf16 %v1689_v47, %v1687_v46  ;;  %v1847_v47 = vld [vmem:[#allocation2 + $0x568] sm:$0xff] }
 0x2b8   : > { %v1845_v46 = vld [vmem:[#allocation2 + $0x558] sm:$0xff] }
 0x2ba   : > { %8891 = vmatpush1.msk.msra.mxu0 %vm918_vm0, %v1138_v4  ;;  %v9566_v4 = vpack.c.bf16 %v1416_v58, %v1414_v57  ;;  %v1695_v57 = vld [vmem:[#allocation2 + $0x468] sm:$0xff]  ;;  %v1697_v58 = vld [vmem:[#allocation2 + $0x478] sm:$0xff] }
 0x2bb   : > { %9533 = vmatprep.subr.bf16.mxu0 %v9532_v61  ;;  %8892 = vmatmul.mubr.msk.f32.vlgmr.msra.gmra.mrb[0].mxu0 %vm909_vm1, %v1141_v62  ;;  %v1289_v61 = vpop.permute.xlu1 %1288  ;;  %v9568_v62 = vpack.c.bf16 %v1421_v60, %v1419_v59  ;;  %v12641_v59 = vld [vmem:[%s12450_s10 + $0x3] sm:$0xff] }
 0x2bc   : > { %9535 = vmatpush1.bf16.msra.mxu0 %v9534_v63  ;;  %1232 = vmatprep.mubr.f32.mxu0 %v11857_v0  ;;  %v1418_v63 = vld [vmem:[#allocation2 + $0x340] sm:$0xff] }
 0x2bd   : > { %9537 = vmatprep.subr.bf16.mxu0 %v9536_v5  ;;  %v1420_v5 = vld [vmem:[#allocation2 + $0x350] sm:$0xff]  ;;  %3128 = vrot.lane.b32.xlu0 %v12641_v59, %s11858_s23 }
 0x2be   : > { %v9570_v6 = vpack.c.bf16 %v1420_v5, %v1418_v63  ;;  %v1699_v63 = vld [vmem:[#allocation2 + $0x488] sm:$0xff]  ;;  %v1701_v5 = vld [vmem:[#allocation2 + $0x498] sm:$0xff] }
 0x2bf   : > { %8893 = vmatmul.mubr.msk.f32.gmra.mrb[2].mxu0 %vm909_vm1, %v1143_v10  ;;  %v1550_v10 = vld [vmem:[#allocation2 + $0x380] sm:$0xff] }
 0x2c0   : > { %9539 = vmatpush1.bf16.msra.mxu0 %v9538_v9  ;;  %1238 = vmatprep.mubr.f32.mxu0 %v11857_v0  ;;  %v1548_v9 = vld [vmem:[#allocation2 + $0x370] sm:$0xff] }
 0x2c1   : > { %9541 = vmatprep.subr.bf16.mxu0 %v9540_v11  ;;  %v1553_v11 = vld [vmem:[#allocation2 + $0x398] sm:$0xff] }
 0x2c3   : > { %8894 = vmatmul.mubr.msk.f32.gmra.mrb[4].mxu0 %vm909_vm1, %v1145_v17  ;;  %v9576_v17 = vpack.c.bf16 %v1555_v12, %v1553_v11  ;;  %v12655_v11 = vld [vmem:[%s12450_s10 + $0xb] sm:$0xff]  ;;  %v1702_v12 = vld [vmem:[#allocation2 + $0x4a0] sm:$0xff] }
 0x2c4   : > { %9543 = vmatpush1.bf16.msra.mxu0 %v9542_v16  ;;  %1244 = vmatprep.mubr.f32.mxu0 %v11857_v0  ;;  %v9574_v16 = vpack.c.bf16 %v1550_v10, %v1548_v9  ;;  %v1705_v9 = vld [vmem:[#allocation2 + $0x4b8] sm:$0xff] }
 0x2c5   : > { %9545 = vmatprep.subr.bf16.mxu0 %v9544_v18  ;;  %v1552_v18 = vld [vmem:[#allocation2 + $0x390] sm:$0xff]  ;;  %3130 = vrot.lane.b32.xlu1 %v12655_v11, %s11858_s23 }
 0x2c6   : > { %v9578_v22 = vpack.c.bf16 %v1554_v19, %v1552_v18  ;;  %v1828_v18 = vld [vmem:[#allocation2 + $0x4d0] sm:$0xff]  ;;  %v1830_v19 = vld [vmem:[#allocation2 + $0x4e0] sm:$0xff] }
 0x2c7   : > { %8895 = vmatmul.mubr.msk.f32.gmra.mrb[6].mxu0 %vm909_vm1, %v1147_v24  ;;  %v9580_v24 = vpack.c.bf16 %v1559_v21, %v1557_v20  ;;  %v1833_v20 = vld [vmem:[#allocation2 + $0x4f8] sm:$0xff]  ;;  %v1835_v21 = vld [vmem:[#allocation2 + $0x508] sm:$0xff] }
 0x2c8   : > { %9547 = vmatpush1.bf16.msra.mxu0 %v9546_v23  ;;  %1368 = vmatprep.mubr.f32.mxu0 %v11857_v0  ;;  %v1427_v23 = vpop.permute.xlu1 %1426 }
 0x2c9   : > { %9549 = vmatprep.subr.bf16.mxu0 %v9548_v25  ;;  %v1556_v25 = vld [vmem:[#allocation2 + $0x3b0] sm:$0xff] }
 0x2cc   : > { %9551 = vmatpush1.bf16.msra.mxu0 %v9550_v28  ;;  %v1563_v28 = vld [vmem:[#allocation2 + $0x3e8] sm:$0xff] }
 0x2cd   : > { %8896 = vmatprep.subr.msk.mxu0 %vm918_vm0, %v1281_v29  ;;  %v9582_v29 = vpack.c.bf16 %v1558_v26, %v1556_v25  ;;  %v9584_v31 = vpack.c.bf16 %v1563_v28, %v1561_v27  ;;  %v9614_v25 = vpack.c.bf16 %v1830_v19, %v1828_v18  ;;  %v9616_v26 = vpack.c.bf16 %v1835_v21, %v1833_v20  ;;  %v1832_v27 = vld [vmem:[#allocation2 + $0x4f0] sm:$0xff]  ;;  %v1834_v28 = vld [vmem:[#allocation2 + $0x500] sm:$0xff]  ;;  %v1989_v18 = vld [vmem:[#allocation2 + $0x618] sm:$0xff] }
 0x2d0   : > { %8897 = vmatpush1.msk.msra.mxu0 %vm918_vm0, %v1280_v36  ;;  %v9586_v36 = vpack.c.bf16 %v1562_v33, %v1560_v32 }
 0x2d1   : > { %9553 = vmatprep.subr.bf16.mxu0 %v9552_v37  ;;  %8898 = vmatmul.mubr.msk.f32.vlgmr.msra.gmra.mrb[0].mxu0 %vm909_vm1, %v1283_v38  ;;  %v1431_v37 = vpop.permute.xlu1 %1430  ;;  %v9588_v38 = vpack.c.bf16 %v1567_v35, %v1565_v34  ;;  %v1836_v34 = vld [vmem:[#allocation2 + $0x510] sm:$0xff]  ;;  %v1838_v35 = vld [vmem:[#allocation2 + $0x520] sm:$0xff] }
 0x2d2   : > { %9555 = vmatpush1.bf16.msra.mxu0 %v9554_v39  ;;  %1374 = vmatprep.mubr.f32.mxu0 %v11857_v0  ;;  %v1564_v39 = vld [vmem:[#allocation2 + $0x3f0] sm:$0xff] }
 0x2d3   : > { %9557 = vmatprep.subr.bf16.mxu0 %v9556_v44  ;;  %v1566_v44 = vld [vmem:[#allocation2 + $0x400] sm:$0xff] }
 0x2d4   : > { %v9590_v1 = vpack.c.bf16 %v1566_v44, %v1564_v39 }
 0x2d5   : > { %8899 = vmatmul.mubr.msk.f32.gmra.mrb[2].mxu0 %vm909_vm1, %v1285_v49  ;;  %v1688_v49 = vld [vmem:[#allocation2 + $0x430] sm:$0xff]  ;;  %v1711_v32 = vpop.permute.xlu1 %1710 }
 0x2d6   : > { %9559 = vmatpush1.bf16.msra.mxu0 %v9558_v48  ;;  %1380 = vmatprep.mubr.f32.mxu0 %v11857_v0  ;;  %v1686_v48 = vld [vmem:[#allocation2 + $0x420] sm:$0xff] }
 0x2d7   : > { %9561 = vmatprep.subr.bf16.mxu0 %v9560_v2  ;;  %v1691_v2 = vld [vmem:[#allocation2 + $0x448] sm:$0xff]  ;;  %v9594_v53 = vpack.c.bf16 %v1688_v49, %v1686_v48 }
 0x2d9   : > { %8900 = vmatmul.mubr.msk.f32.gmra.mrb[4].mxu0 %vm909_vm1, %v1287_v54  ;;  %v1690_v54 = vld [vmem:[#allocation2 + $0x440] sm:$0xff]  ;;  %v1715_v49 = vpop.permute.xlu1 %1714 }
 0x2da   : > { %9563 = vmatpush1.bf16.msra.mxu0 %v9562_v3  ;;  %1386 = vmatprep.mubr.f32.mxu0 %v11857_v0  ;;  %v9596_v3 = vpack.c.bf16 %v1693_v50, %v1691_v2  ;;  %v9628_v2 = vpack.c.bf16 %v1847_v47, %v1845_v46  ;;  %v1844_v50 = vld [vmem:[#allocation2 + $0x550] sm:$0xff]  ;;  %v2122_v47 = vld [vmem:[#allocation2 + $0x680] sm:$0xff] }
 0x2db   : > { %9565 = vmatprep.subr.bf16.mxu0 %v9564_v56  ;;  %v1692_v56 = vld [vmem:[#allocation2 + $0x450] sm:$0xff] }
 0x2dc   : > { %v9598_v60 = vpack.c.bf16 %v1692_v56, %v1690_v54  ;;  %v1973_v54 = vld [vmem:[#allocation2 + $0x598] sm:$0xff]  ;;  %v1970_v56 = vld [vmem:[#allocation2 + $0x580] sm:$0xff]  ;;  %v2120_v46 = vld [vmem:[#allocation2 + $0x670] sm:$0xff] }
 0x2dd   : > { %8901 = vmatmul.mubr.msk.f32.gmra.mrb[6].mxu0 %vm909_vm1, %v1289_v61  ;;  %v1694_v61 = vld [vmem:[#allocation2 + $0x460] sm:$0xff] }
 0x2de   : > { %9567 = vmatpush1.bf16.msra.mxu0 %v9566_v4  ;;  %1510 = vmatprep.mubr.f32.mxu0 %v11857_v0  ;;  %v9600_v4 = vpack.c.bf16 %v1697_v58, %v1695_v57  ;;  %v1972_v57 = vld [vmem:[#allocation2 + $0x590] sm:$0xff]  ;;  %v1975_v58 = vld [vmem:[#allocation2 + $0x5a8] sm:$0xff] }
 0x2df   : > { %9569 = vmatprep.subr.bf16.mxu0 %v9568_v62  ;;  %v1696_v62 = vld [vmem:[#allocation2 + $0x470] sm:$0xff] }
 0x2e2   : > { %9571 = vmatpush1.bf16.msra.mxu0 %v9570_v6  ;;  %v9602_v6 = vpack.c.bf16 %v1696_v62, %v1694_v61 }
 0x2e3   : > { %8902 = vmatprep.subr.msk.mxu0 %vm918_vm0, %v1423_v55  ;;  %v1698_v55 = vld [vmem:[#allocation2 + $0x480] sm:$0xff] }
 0x2e4   : > { %v9606_v10 = vpack.c.bf16 %v1700_v7, %v1698_v55  ;;  %v1981_v55 = vld [vmem:[#allocation2 + $0x5d8] sm:$0xff] }
 0x2e6   : > { %8903 = vmatpush1.msk.msra.mxu0 %vm918_vm0, %v1422_v13  ;;  %v1704_v13 = vld [vmem:[#allocation2 + $0x4b0] sm:$0xff] }
 0x2e7   : > { %9573 = vmatprep.subr.bf16.mxu0 %v9572_v14  ;;  %8904 = vmatmul.mubr.msk.f32.vlgmr.msra.gmra.mrb[0].mxu0 %vm909_vm1, %v1425_v15  ;;  %v9610_v14 = vpack.c.bf16 %v1704_v13, %v1702_v12  ;;  %v1707_v15 = vld [vmem:[#allocation2 + $0x4c8] sm:$0xf]  ;;  %v1985_v12 = vld [vmem:[#allocation2 + $0x5f8] sm:$0xff] }
 0x2e8   : > { %9575 = vmatpush1.bf16.msra.mxu0 %v9574_v16  ;;  %1516 = vmatprep.mubr.f32.mxu0 %v11857_v0  ;;  %v1829_v16 = vld [vmem:[#allocation2 + $0x4d8] sm:$0xff] }
 0x2e9   : > { %9577 = vmatprep.subr.bf16.mxu0 %v9576_v17  ;;  %v1831_v17 = vld [vmem:[#allocation2 + $0x4e8] sm:$0xff] }
 0x2eb   : > { %8905 = vmatmul.mubr.msk.f32.gmra.mrb[2].mxu0 %vm909_vm1, %v1427_v23  ;;  %v9612_v23 = vpack.c.bf16 %v1831_v17, %v1829_v16  ;;  %v1984_v16 = vld [vmem:[#allocation2 + $0x5f0] sm:$0xff]  ;;  %v1987_v17 = vld [vmem:[#allocation2 + $0x608] sm:$0xff] }
 0x2ec   : > { %9579 = vmatpush1.bf16.msra.mxu0 %v9578_v22  ;;  %1522 = vmatprep.mubr.f32.mxu0 %v11857_v0  ;;  %v12668_v22 = vld [vmem:[%s12450_s10 + $0x1b] sm:$0xf]  ;;  %v9648_v21 = vpack.c.bf16 %v1989_v18, %v1987_v17  ;;  %v2266_v17 = vld [vmem:[#allocation2 + $0x720] sm:$0xff]  ;;  %v2268_v18 = vld [vmem:[#allocation2 + $0x730] sm:$0xff] }
 0x2ed   : > { %9581 = vmatprep.subr.bf16.mxu0 %v9580_v24  ;;  %3134 = vrot.lane.b32.xlu1 %v12668_v22, %s11858_s23  ;;  %v1709_v24 = vpop.permute.xlu0 %1708 }
 0x2ef   : > { %8906 = vmatmul.mubr.msk.f32.gmra.mrb[4].mxu0 %vm909_vm1, %v1429_v30  ;;  %v1839_v30 = vld [vmem:[#allocation2 + $0x528] sm:$0xff] }
 0x2f0   : > { %9583 = vmatpush1.bf16.msra.mxu0 %v9582_v29  ;;  %1528 = vmatprep.mubr.f32.mxu0 %v11857_v0  ;;  %v1837_v29 = vld [vmem:[#allocation2 + $0x518] sm:$0xff] }
 0x2f1   : > { %9585 = vmatprep.subr.bf16.mxu0 %v9584_v31  ;;  %v9618_v31 = vpack.c.bf16 %v1834_v28, %v1832_v27  ;;  %v9620_v33 = vpack.c.bf16 %v1839_v30, %v1837_v29  ;;  %3272 = vrot.lane.b32.xlu1 %v12655_v11, %s11859_s24  ;;  %v1713_v39 = vpop.permute.xlu0 %1712  ;;  %v2112_v27 = vld [vmem:[#allocation2 + $0x630] sm:$0xff]  ;;  %v2114_v28 = vld [vmem:[#allocation2 + $0x640] sm:$0xff]  ;;  %v2117_v29 = vld [vmem:[#allocation2 + $0x658] sm:$0xff] }
 0x2f2   : > { %v2119_v30 = vld [vmem:[#allocation2 + $0x668] sm:$0xff] }
 0x2f3   : > { %8907 = vmatmul.mubr.msk.f32.gmra.mrb[6].mxu0 %vm909_vm1, %v1431_v37  ;;  %v1843_v37 = vld [vmem:[#allocation2 + $0x548] sm:$0xff] }
 0x2f4   : > { %9587 = vmatpush1.bf16.msra.mxu0 %v9586_v36  ;;  %1652 = vmatprep.mubr.f32.mxu0 %v11857_v0  ;;  %v1841_v36 = vld [vmem:[#allocation2 + $0x538] sm:$0xff] }
 0x2f5   : > { %9589 = vmatprep.subr.bf16.mxu0 %v9588_v38  ;;  %v9622_v38 = vpack.c.bf16 %v1838_v35, %v1836_v34  ;;  %v9624_v44 = vpack.c.bf16 %v1843_v37, %v1841_v36  ;;  %3276 = vrot.lane.b32.xlu1 %v12668_v22, %s11859_s24  ;;  %v1851_v62 = vpop.permute.xlu0 %1850  ;;  %v9654_v34 = vpack.c.bf16 %v2114_v28, %v2112_v27  ;;  %v2116_v36 = vld [vmem:[#allocation2 + $0x650] sm:$0xff]  ;;  %v2118_v37 = vld [vmem:[#allocation2 + $0x660] sm:$0xff] }
 0x2f6   : > { %v9656_v35 = vpack.c.bf16 %v2119_v30, %v2117_v29  ;;  %v2274_v30 = vld [vmem:[#allocation2 + $0x760] sm:$0xff] }
 0x2f8   : > { %9591 = vmatpush1.bf16.msra.mxu0 %v9590_v1  ;;  %v1840_v1 = vld [vmem:[#allocation2 + $0x530] sm:$0xff] }
 0x2f9   : > { %8908 = vmatprep.subr.msk.mxu0 %vm918_vm0, %v1569_v45  ;;  %v1842_v45 = vld [vmem:[#allocation2 + $0x540] sm:$0xff]  ;;  %3414 = vrot.lane.b32.xlu1 %v12655_v11, %s11860_s3 }
 0x2fa   : > { %v9626_v48 = vpack.c.bf16 %v1842_v45, %v1840_v1 }
 0x2fc   : > { %8909 = vmatpush1.msk.msra.mxu0 %vm918_vm0, %v1568_v51  ;;  %v1846_v51 = vld [vmem:[#allocation2 + $0x560] sm:$0xff] }
 0x2fd   : > { %9593 = vmatprep.subr.bf16.mxu0 %v9592_v52  ;;  %8910 = vmatmul.mubr.msk.f32.vlgmr.msra.gmra.mrb[0].mxu0 %vm909_vm1, %v12499_v40  ;;  %v9604_v40 = vpack.c.bf16 %v1701_v5, %v1699_v63  ;;  %v9630_v52 = vpack.c.bf16 %v1846_v51, %v1844_v50  ;;  %v9634_v63 = vpack.c.bf16 %v1972_v57, %v1970_v56 }
 0x2fe   : > { %9595 = vmatpush1.bf16.msra.mxu0 %v9594_v53  ;;  %1658 = vmatprep.mubr.f32.mxu0 %v11857_v0  ;;  %v1849_v53 = vld [vmem:[#allocation2 + $0x578] sm:$0xf] }
 0x2ff   : > { %9597 = vmatprep.subr.bf16.mxu0 %v9596_v3  ;;  %3418 = vrot.lane.b32.xlu1 %v12668_v22, %s11860_s3  ;;  %v1971_v3 = vld [vmem:[#allocation2 + $0x588] sm:$0xff] }
 0x300   : > { %v9632_v61 = vpack.c.bf16 %v1973_v54, %v1971_v3  ;;  %v2129_v3 = vld [vmem:[#allocation2 + $0x6b8] sm:$0xff]  ;;  %v2131_v54 = vld [vmem:[#allocation2 + $0x6c8] sm:$0xff] }
 0x301   : > { %8911 = vmatmul.mubr.msk.f32.gmra.mrb[2].mxu0 %vm909_vm1, %v12502_v41  ;;  %v9608_v41 = vpack.c.bf16 %v1705_v9, %v1703_v8  ;;  %v1853_v8 = vpop.permute.xlu1 %1852 }
 0x302   : > { %9599 = vmatpush1.bf16.msra.mxu0 %v9598_v60  ;;  %1664 = vmatprep.mubr.f32.mxu0 %v11857_v0  ;;  %v1977_v60 = vld [vmem:[#allocation2 + $0x5b8] sm:$0xff] }
 0x303   : > { %9601 = vmatprep.subr.bf16.mxu0 %v9600_v4  ;;  %v1848_v4 = vld [vmem:[#allocation2 + $0x570] sm:$0xf]  ;;  %3556 = vrot.lane.b32.xlu1 %v12655_v11, %s11861_s20  ;;  %v9636_v5 = vpack.c.bf16 %v1977_v60, %v1975_v58  ;;  %v9668_v58 = vpack.c.bf16 %v2131_v54, %v2129_v3  ;;  %v2406_v54 = vld [vmem:[#allocation2 + $0x7e0] sm:$0xff] }
 0x304   : > { %v1980_v11 = vld [vmem:[#allocation2 + $0x5d0] sm:$0xff] }
 0x305   : > { %8912 = vmatmul.mubr.msk.f32.gmra.mrb[4].mxu0 %vm909_vm1, %v12509_v42  ;;  %v12663_v42 = vld [vmem:[%s12450_s10 + $0x13] sm:$0xff]  ;;  %v1857_v20 = vpop.permute.xlu1 %1856 }
 0x306   : > { %9603 = vmatpush1.bf16.msra.mxu0 %v9602_v6  ;;  %1670 = vmatprep.mubr.f32.mxu0 %v11857_v0  ;;  %v1974_v6 = vld [vmem:[#allocation2 + $0x5a0] sm:$0xff]  ;;  %v2128_v60 = vld [vmem:[#allocation2 + $0x6b0] sm:$0xff] }
 0x307   : > { %9605 = vmatprep.subr.bf16.mxu0 %v9604_v40  ;;  %3132 = vrot.lane.b32.xlu0 %v12663_v42, %s11858_s23  ;;  %v1979_v40 = vld [vmem:[#allocation2 + $0x5c8] sm:$0xff]  ;;  %v2404_v3 = vld [vmem:[#allocation2 + $0x7d0] sm:$0xff] }
 0x308   : > { %v9640_v9 = vpack.c.bf16 %v1981_v55, %v1979_v40  ;;  %3560 = vrot.lane.b32.xlu1 %v12668_v22, %s11861_s20  ;;  %v1986_v22 = vld [vmem:[#allocation2 + $0x600] sm:$0xff]  ;;  %v2263_v40 = vld [vmem:[#allocation2 + $0x708] sm:$0xff]  ;;  %v2265_v55 = vld [vmem:[#allocation2 + $0x718] sm:$0xff] }
 0x309   : > { %8913 = vmatmul.mubr.msk.f32.gmra.mrb[6].mxu0 %vm909_vm1, %v12512_v43  ;;  %v1706_v43 = vld [vmem:[#allocation2 + $0x4c0] sm:$0xf]  ;;  %v1995_v1 = vpop.permute.xlu1 %1994 }
 0x30a   : > { %9607 = vmatpush1.bf16.msra.mxu0 %v9606_v10  ;;  %1794 = vmatprep.mubr.f32.mxu0 %v11857_v0  ;;  %v1978_v10 = vld [vmem:[#allocation2 + $0x5c0] sm:$0xff] }
 0x30b   : > { %9609 = vmatprep.subr.bf16.mxu0 %v9608_v41  ;;  %3270 = vrot.lane.b32.xlu0 %v12641_v59, %s11859_s24  ;;  %v1983_v41 = vld [vmem:[#allocation2 + $0x5e8] sm:$0xff]  ;;  %v9642_v13 = vpack.c.bf16 %v1980_v11, %v1978_v10  ;;  %v9676_v11 = vpack.c.bf16 %v2265_v55, %v2263_v40 }
 0x30c   : > { %v12753_v40 = vld [vmem:[%s12450_s10 + $0xc] sm:$0xff] }
 0x30d   : > { %v1999_v57 = vpop.permute.xlu1 %1998  ;;  %3840 = vrot.lane.b32.xlu1 %v12753_v40, %s11858_s23 }
 0x30e   : > { %9611 = vmatpush1.bf16.msra.mxu0 %v9610_v14  ;;  %v1855_v14 = vpop.permute.xlu0 %1854 }
 0x30f   : > { %8914 = vmatprep.subr.msk.mxu0 %vm918_vm0, %v1707_v15  ;;  %3274 = vrot.lane.b32.xlu0 %v12663_v42, %s11859_s24  ;;  %v1982_v15 = vld [vmem:[#allocation2 + $0x5e0] sm:$0xff] }
 0x310   : > { %v9646_v19 = vpack.c.bf16 %v1984_v16, %v1982_v15 }
 0x311   : > { %v2137_v15 = vpop.permute.xlu1 %2136 }
 0x312   : > { %8915 = vmatpush1.msk.msra.mxu0 %vm918_vm0, %v1706_v43  ;;  %v1988_v43 = vld [vmem:[#allocation2 + $0x610] sm:$0xff] }
 0x313   : > { %9613 = vmatprep.subr.bf16.mxu0 %v9612_v23  ;;  %8916 = vmatmul.mubr.msk.f32.vlgmr.msra.gmra.mrb[0].mxu0 %vm909_vm1, %v1709_v24  ;;  %v9650_v23 = vpack.c.bf16 %v1988_v43, %v1986_v22  ;;  %v1991_v24 = vld [vmem:[#allocation2 + $0x628] sm:$0xf] }
 0x314   : > { %9615 = vmatpush1.bf16.msra.mxu0 %v9614_v25  ;;  %1800 = vmatprep.mubr.f32.mxu0 %v11857_v0  ;;  %v2113_v25 = vld [vmem:[#allocation2 + $0x638] sm:$0xff] }
 0x315   : > { %9617 = vmatprep.subr.bf16.mxu0 %v9616_v26  ;;  %3412 = vrot.lane.b32.xlu0 %v12641_v59, %s11860_s3  ;;  %v2115_v26 = vld [vmem:[#allocation2 + $0x648] sm:$0xff]  ;;  %v2141_v28 = vpop.permute.xlu1 %2140 }
 0x317   : > { %8917 = vmatmul.mubr.msk.f32.gmra.mrb[2].mxu0 %vm909_vm1, %v1711_v32  ;;  %v9652_v32 = vpack.c.bf16 %v2115_v26, %v2113_v25  ;;  %v2275_v25 = vld [vmem:[#allocation2 + $0x768] sm:$0xff]  ;;  %v2277_v26 = vld [vmem:[#allocation2 + $0x778] sm:$0xff] }
 0x318   : > { %9619 = vmatpush1.bf16.msra.mxu0 %v9618_v31  ;;  %1806 = vmatprep.mubr.f32.mxu0 %v11857_v0  ;;  %v1990_v31 = vld [vmem:[#allocation2 + $0x620] sm:$0xf]  ;;  %v9688_v29 = vpack.c.bf16 %v2277_v26, %v2275_v25  ;;  %v2549_v25 = vld [vmem:[#allocation2 + $0x898] sm:$0xff] }
 0x319   : > { %9621 = vmatprep.subr.bf16.mxu0 %v9620_v33  ;;  %3416 = vrot.lane.b32.xlu0 %v12663_v42, %s11860_s3  ;;  %v1993_v33 = vpop.permute.xlu0 %1992 }
 0x31b   : > { %8918 = vmatmul.mubr.msk.f32.gmra.mrb[4].mxu0 %vm909_vm1, %v1713_v39  ;;  %v2123_v39 = vld [vmem:[#allocation2 + $0x688] sm:$0xff] }
 0x31c   : > { %9623 = vmatpush1.bf16.msra.mxu0 %v9622_v38  ;;  %1812 = vmatprep.mubr.f32.mxu0 %v11857_v0  ;;  %v2121_v38 = vld [vmem:[#allocation2 + $0x678] sm:$0xff] }
 0x31d   : > { %9625 = vmatprep.subr.bf16.mxu0 %v9624_v44  ;;  %3554 = vrot.lane.b32.xlu0 %v12641_v59, %s11861_s20  ;;  %v1976_v59 = vld [vmem:[#allocation2 + $0x5b0] sm:$0xff]  ;;  %v9658_v44 = vpack.c.bf16 %v2118_v37, %v2116_v36  ;;  %v9660_v45 = vpack.c.bf16 %v2123_v39, %v2121_v38  ;;  %v1997_v50 = vpop.permute.xlu0 %1996  ;;  %v2398_v37 = vld [vmem:[#allocation2 + $0x7a0] sm:$0xff]  ;;  %v2401_v38 = vld [vmem:[#allocation2 + $0x7b8] sm:$0xff] }
 0x31e   : > { %v9638_v7 = vpack.c.bf16 %v1976_v59, %v1974_v6  ;;  %v2258_v6 = vld [vmem:[#allocation2 + $0x6e0] sm:$0xff]  ;;  %v2260_v59 = vld [vmem:[#allocation2 + $0x6f0] sm:$0xff]  ;;  %v2403_v39 = vld [vmem:[#allocation2 + $0x7c8] sm:$0xff] }
 0x31f   : > { %8919 = vmatmul.mubr.msk.f32.gmra.mrb[6].mxu0 %vm909_vm1, %v1715_v49  ;;  %v2127_v49 = vld [vmem:[#allocation2 + $0x6a8] sm:$0xff]  ;;  %v9674_v10 = vpack.c.bf16 %v2260_v59, %v2258_v6  ;;  %v2396_v36 = vld [vmem:[#allocation2 + $0x790] sm:$0xff] }
 0x320   : > { %9627 = vmatpush1.bf16.msra.mxu0 %v9626_v48  ;;  %1936 = vmatprep.mubr.f32.mxu0 %v11857_v0  ;;  %v2125_v48 = vld [vmem:[#allocation2 + $0x698] sm:$0xff] }
 0x321   : > { %9629 = vmatprep.subr.bf16.mxu0 %v9628_v2  ;;  %3558 = vrot.lane.b32.xlu0 %v12663_v42, %s11861_s20  ;;  %v9644_v42 = vpack.c.bf16 %v1985_v12, %v1983_v41  ;;  %v9662_v2 = vpack.c.bf16 %v2122_v47, %v2120_v46  ;;  %v9664_v51 = vpack.c.bf16 %v2127_v49, %v2125_v48  ;;  %v2262_v41 = vld [vmem:[#allocation2 + $0x700] sm:$0xff]  ;;  %v2264_v12 = vld [vmem:[#allocation2 + $0x710] sm:$0xff]  ;;  %v2405_v49 = vld [vmem:[#allocation2 + $0x7d8] sm:$0xff] }
 0x322   : > { %v9696_v46 = vpack.c.bf16 %v2403_v39, %v2401_v38  ;;  %v2400_v47 = vld [vmem:[#allocation2 + $0x7b0] sm:$0xff]  ;;  %v2402_v48 = vld [vmem:[#allocation2 + $0x7c0] sm:$0xff]  ;;  %v2555_v38 = vld [vmem:[#allocation2 + $0x8c8] sm:$0xff] }
 0x323   : > { %v11217_v6 = vld [vmem:[%s12450_s10 + $0x12] sm:$0xff] }
 0x324   : > { %9631 = vmatpush1.bf16.msra.mxu0 %v9630_v52  ;;  %v2124_v52 = vld [vmem:[#allocation2 + $0x690] sm:$0xff]  ;;  %v2557_v39 = vld [vmem:[#allocation2 + $0x8d8] sm:$0xff] }
 0x325   : > { %8920 = vmatprep.subr.msk.mxu0 %vm918_vm0, %v1849_v53  ;;  %v2126_v53 = vld [vmem:[#allocation2 + $0x6a0] sm:$0xff] }
 0x326   : > { %v9666_v56 = vpack.c.bf16 %v2126_v53, %v2124_v52  ;;  %v9698_v52 = vpack.c.bf16 %v2402_v48, %v2400_v47  ;;  %v2556_v47 = vld [vmem:[#allocation2 + $0x8d0] sm:$0xff] }
 0x328   : > { %8921 = vmatpush1.msk.msra.mxu0 %vm918_vm0, %v1848_v4  ;;  %v2130_v4 = vld [vmem:[#allocation2 + $0x6c0] sm:$0xff] }
 0x329   : > { %9633 = vmatprep.subr.bf16.mxu0 %v9632_v61  ;;  %8922 = vmatmul.mubr.msk.f32.vlgmr.msra.gmra.mrb[0].mxu0 %vm909_vm1, %v1851_v62  ;;  %v9670_v61 = vpack.c.bf16 %v2130_v4, %v2128_v60  ;;  %v2133_v62 = vld [vmem:[#allocation2 + $0x6d8] sm:$0xf]  ;;  %v9702_v60 = vpack.c.bf16 %v2406_v54, %v2404_v3  ;;  %v2687_v54 = vld [vmem:[#allocation2 + $0x928] sm:$0xff] }
 0x32a   : > { %9635 = vmatpush1.bf16.msra.mxu0 %v9634_v63  ;;  %1942 = vmatprep.mubr.f32.mxu0 %v11857_v0  ;;  %v2259_v63 = vld [vmem:[#allocation2 + $0x6e8] sm:$0xff]  ;;  %v2685_v3 = vld [vmem:[#allocation2 + $0x918] sm:$0xff] }
 0x32b   : > { %9637 = vmatprep.subr.bf16.mxu0 %v9636_v5  ;;  %v2261_v5 = vld [vmem:[#allocation2 + $0x6f8] sm:$0xff] }
 0x32d   : > { %8923 = vmatmul.mubr.msk.f32.gmra.mrb[2].mxu0 %vm909_vm1, %v1853_v8  ;;  %v9672_v8 = vpack.c.bf16 %v2261_v5, %v2259_v63  ;;  %v2413_v63 = vld [vmem:[#allocation2 + $0x818] sm:$0xff]  ;;  %v2415_v5 = vld [vmem:[#allocation2 + $0x828] sm:$0xff] }
 0x32e   : > { %9639 = vmatpush1.bf16.msra.mxu0 %v9638_v7  ;;  %1948 = vmatprep.mubr.f32.mxu0 %v11857_v0  ;;  %v2132_v7 = vld [vmem:[#allocation2 + $0x6d0] sm:$0xf]  ;;  %v9708_v55 = vpack.c.bf16 %v2415_v5, %v2413_v63  ;;  %v2691_v63 = vld [vmem:[#allocation2 + $0x948] sm:$0xff] }
 0x32f   : > { %9641 = vmatprep.subr.bf16.mxu0 %v9640_v9  ;;  %v2135_v9 = vpop.permute.xlu0 %2134 }
 0x331   : > { %8924 = vmatmul.mubr.msk.f32.gmra.mrb[4].mxu0 %vm909_vm1, %v1855_v14  ;;  %v2269_v14 = vld [vmem:[#allocation2 + $0x738] sm:$0xff] }
 0x332   : > { %9643 = vmatpush1.bf16.msra.mxu0 %v9642_v13  ;;  %1954 = vmatprep.mubr.f32.mxu0 %v11857_v0  ;;  %v2267_v13 = vld [vmem:[#allocation2 + $0x728] sm:$0xff] }
 0x333   : > { %9645 = vmatprep.subr.bf16.mxu0 %v9644_v42  ;;  %v9678_v42 = vpack.c.bf16 %v2264_v12, %v2262_v41  ;;  %v9680_v16 = vpack.c.bf16 %v2269_v14, %v2267_v13  ;;  %v2139_v22 = vpop.permute.xlu0 %2138  ;;  %v2417_v41 = vld [vmem:[#allocation2 + $0x838] sm:$0xf]  ;;  %v2539_v12 = vld [vmem:[#allocation2 + $0x848] sm:$0xff]  ;;  %v2538_v14 = vld [vmem:[#allocation2 + $0x840] sm:$0xff] }
 0x334   : > { %v2541_v13 = vld [vmem:[#allocation2 + $0x858] sm:$0xff] }
 0x335   : > { %8925 = vmatmul.mubr.msk.f32.gmra.mrb[6].mxu0 %vm909_vm1, %v1857_v20  ;;  %v2273_v20 = vld [vmem:[#allocation2 + $0x758] sm:$0xff] }
 0x336   : > { %9647 = vmatpush1.bf16.msra.mxu0 %v9646_v19  ;;  %2078 = vmatprep.mubr.f32.mxu0 %v11857_v0  ;;  %v2271_v19 = vld [vmem:[#allocation2 + $0x748] sm:$0xff] }
 0x337   : > { %9649 = vmatprep.subr.bf16.mxu0 %v9648_v21  ;;  %v9682_v21 = vpack.c.bf16 %v2268_v18, %v2266_v17  ;;  %v9684_v43 = vpack.c.bf16 %v2273_v20, %v2271_v19  ;;  %v12766_v17 = vld [vmem:[%s12450_s10 + $0x1c] sm:$0xf]  ;;  %v2416_v18 = vld [vmem:[#allocation2 + $0x830] sm:$0xf]  ;;  %v9712_v19 = vpack.c.bf16 %v2541_v13, %v2539_v12  ;;  %v2419_v20 = vpop.permute.xlu0 %2418  ;;  %v2694_v12 = vld [vmem:[#allocation2 + $0x960] sm:$0xff] }
 0x338   : > { %3844 = vrot.lane.b32.xlu1 %v12766_v17, %s11858_s23  ;;  %v2697_v13 = vld [vmem:[#allocation2 + $0x978] sm:$0xff] }
 0x33a   : > { %9651 = vmatpush1.bf16.msra.mxu0 %v9650_v23  ;;  %v2270_v23 = vld [vmem:[#allocation2 + $0x740] sm:$0xff] }
 0x33b   : > { %8926 = vmatprep.subr.msk.mxu0 %vm918_vm0, %v1991_v24  ;;  %v2272_v24 = vld [vmem:[#allocation2 + $0x750] sm:$0xff] }
 0x33c   : > { %v9686_v27 = vpack.c.bf16 %v2272_v24, %v2270_v23  ;;  %v2544_v23 = vld [vmem:[#allocation2 + $0x870] sm:$0xff]  ;;  %v2547_v24 = vld [vmem:[#allocation2 + $0x888] sm:$0xff]  ;;  %3982 = vrot.lane.b32.xlu1 %v12753_v40, %s11859_s24 }
 0x33e   : > { %8927 = vmatpush1.msk.msra.mxu0 %vm918_vm0, %v1990_v31  ;;  %v2276_v31 = vld [vmem:[#allocation2 + $0x770] sm:$0xff] }
 0x33f   : > { %9653 = vmatprep.subr.bf16.mxu0 %v9652_v32  ;;  %8928 = vmatmul.mubr.msk.f32.vlgmr.msra.gmra.mrb[0].mxu0 %vm909_vm1, %v1993_v33  ;;  %v9690_v32 = vpack.c.bf16 %v2276_v31, %v2274_v30  ;;  %v2279_v33 = vld [vmem:[#allocation2 + $0x788] sm:$0xf]  ;;  %v2548_v30 = vld [vmem:[#allocation2 + $0x890] sm:$0xff] }
 0x340   : > { %9655 = vmatpush1.bf16.msra.mxu0 %v9654_v34  ;;  %2084 = vmatprep.mubr.f32.mxu0 %v11857_v0  ;;  %v2397_v34 = vld [vmem:[#allocation2 + $0x798] sm:$0xff]  ;;  %v2551_v31 = vld [vmem:[#allocation2 + $0x8a8] sm:$0xff] }
 0x341   : > { %9657 = vmatprep.subr.bf16.mxu0 %v9656_v35  ;;  %v2399_v35 = vld [vmem:[#allocation2 + $0x7a8] sm:$0xff]  ;;  %3986 = vrot.lane.b32.xlu1 %v12766_v17, %s11859_s24 }
 0x343   : > { %8929 = vmatmul.mubr.msk.f32.gmra.mrb[2].mxu0 %vm909_vm1, %v1995_v1  ;;  %v9692_v1 = vpack.c.bf16 %v2399_v35, %v2397_v34  ;;  %v2423_v34 = vpop.permute.xlu0 %2422 }
 0x344   : > { %9659 = vmatpush1.bf16.msra.mxu0 %v9658_v44  ;;  %2090 = vmatprep.mubr.f32.mxu0 %v11857_v0  ;;  %v2278_v44 = vld [vmem:[#allocation2 + $0x780] sm:$0xf] }
 0x345   : > { %9661 = vmatprep.subr.bf16.mxu0 %v9660_v45  ;;  %v9694_v45 = vpack.c.bf16 %v2398_v37, %v2396_v36  ;;  %v2550_v36 = vld [vmem:[#allocation2 + $0x8a0] sm:$0xff]  ;;  %v2552_v37 = vld [vmem:[#allocation2 + $0x8b0] sm:$0xff]  ;;  %4124 = vrot.lane.b32.xlu1 %v12753_v40, %s11860_s3 }
 0x347   : > { %8930 = vmatmul.mubr.msk.f32.gmra.mrb[4].mxu0 %vm909_vm1, %v1997_v50  ;;  %v12739_v50 = vld [vmem:[%s12450_s10 + $0x4] sm:$0xff] }
 0x348   : > { %9663 = vmatpush1.bf16.msra.mxu0 %v9662_v2  ;;  %2096 = vmatprep.mubr.f32.mxu0 %v11857_v0  ;;  %v2407_v2 = vld [vmem:[#allocation2 + $0x7e8] sm:$0xff] }
 0x349   : > { %9665 = vmatprep.subr.bf16.mxu0 %v9664_v51  ;;  %v11215_v51 = vld [vmem:[%s12450_s10 + $0x2] sm:$0xff]  ;;  %v9700_v53 = vpack.c.bf16 %v2407_v2, %v2405_v49  ;;  %3838 = vrot.lane.b32.xlu0 %v12739_v50, %s11858_s23  ;;  %v2681_v2 = vld [vmem:[#allocation2 + $0x8f8] sm:$0xff] }
 0x34a   : > { %4128 = vrot.lane.b32.xlu1 %v12766_v17, %s11860_s3  ;;  %v2559_v49 = vld [vmem:[#allocation2 + $0x8e8] sm:$0xf] }
 0x34b   : > { %8931 = vmatmul.mubr.msk.f32.gmra.mrb[6].mxu0 %vm909_vm1, %v1999_v57  ;;  %v2411_v57 = vld [vmem:[#allocation2 + $0x808] sm:$0xff] }
 0x34c   : > { %9667 = vmatpush1.bf16.msra.mxu0 %v9666_v56  ;;  %2220 = vmatprep.mubr.f32.mxu0 %v11857_v0  ;;  %v2409_v56 = vld [vmem:[#allocation2 + $0x7f8] sm:$0xff] }
 0x34d   : > { %9669 = vmatprep.subr.bf16.mxu0 %v9668_v58  ;;  %v11216_v58 = vld [vmem:[%s12450_s10 + $0xa] sm:$0xff]  ;;  %v9704_v4 = vpack.c.bf16 %v2411_v57, %v2409_v56  ;;  %v2558_v56 = vld [vmem:[#allocation2 + $0x8e0] sm:$0xf] }
 0x34e   : > { %4266 = vrot.lane.b32.xlu1 %v12753_v40, %s11861_s20  ;;  %v2688_v40 = vld [vmem:[#allocation2 + $0x930] sm:$0xff] }
 0x350   : > { %9671 = vmatpush1.bf16.msra.mxu0 %v9670_v61  ;;  %v2408_v61 = vld [vmem:[#allocation2 + $0x7f0] sm:$0xff] }
 0x351   : > { %8932 = vmatprep.subr.msk.mxu0 %vm918_vm0, %v2133_v62  ;;  %v2410_v62 = vld [vmem:[#allocation2 + $0x800] sm:$0xff] }
 0x352   : > { %v9706_v59 = vpack.c.bf16 %v2410_v62, %v2408_v61  ;;  %v2684_v61 = vld [vmem:[#allocation2 + $0x910] sm:$0xff]  ;;  %v2689_v62 = vld [vmem:[#allocation2 + $0x938] sm:$0xff]  ;;  %4270 = vrot.lane.b32.xlu1 %v12766_v17, %s11861_s20 }
 0x353   : > { %v2696_v17 = vld [vmem:[#allocation2 + $0x970] sm:$0xff] }
 0x354   : > { %8933 = vmatpush1.msk.msra.mxu0 %vm918_vm0, %v2132_v7  ;;  %v2412_v7 = vld [vmem:[#allocation2 + $0x810] sm:$0xff] }
 0x355   : > { %9673 = vmatprep.subr.bf16.mxu0 %v9672_v8  ;;  %8934 = vmatmul.mubr.msk.f32.vlgmr.msra.gmra.mrb[0].mxu0 %vm909_vm1, %v2135_v9  ;;  %v2414_v8 = vld [vmem:[#allocation2 + $0x820] sm:$0xff]  ;;  %v11218_v9 = vld [vmem:[%s12450_s10 + $0x1a] sm:$0xf] }
 0x356   : > { %9675 = vmatpush1.bf16.msra.mxu0 %v9674_v10  ;;  %2226 = vmatprep.mubr.f32.mxu0 %v11857_v0  ;;  %v9710_v10 = vpack.c.bf16 %v2414_v8, %v2412_v7  ;;  %v2693_v7 = vld [vmem:[#allocation2 + $0x958] sm:$0xff]  ;;  %v2695_v8 = vld [vmem:[#allocation2 + $0x968] sm:$0xff] }
 0x357   : > { %9677 = vmatprep.subr.bf16.mxu0 %v9676_v11  ;;  %v12761_v11 = vld [vmem:[%s12450_s10 + $0x14] sm:$0xff] }
 0x358   : > { %3842 = vrot.lane.b32.xlu0 %v12761_v11, %s11858_s23  ;;  %s11735_s23 = sshll.u32 %s11867_s0, 4  ;;  %s11736_s23 = int_to_ptr.vmem [resolvable:$false] %s11735_s23 }
 0x359   : > { %8935 = vmatmul.mubr.msk.f32.gmra.mrb[2].mxu0 %vm909_vm1, %v2137_v15  ;;  %v2543_v15 = vld [vmem:[#allocation2 + $0x868] sm:$0xff]  ;;  %p11738_p8 = scmp.lt.s32.totalorder %s13458_s21, %s11736_s23 }
 0x35a   : > { %9679 = vmatpush1.bf16.msra.mxu0 %v9678_v42  ;;  %2232 = vmatprep.mubr.f32.mxu0 %v11857_v0  ;;  %v2540_v42 = vld [vmem:[#allocation2 + $0x850] sm:$0xff] }
 0x35b   : > { %9681 = vmatprep.subr.bf16.mxu0 %v9680_v16  ;;  %v2545_v16 = vld [vmem:[#allocation2 + $0x878] sm:$0xff] }
 0x35c   : > { %3980 = vrot.lane.b32.xlu0 %v12739_v50, %s11859_s24 }
 0x35d   : > { %8936 = vmatmul.mubr.msk.f32.gmra.mrb[4].mxu0 %vm909_vm1, %v2139_v22  ;;  %v9716_v22 = vpack.c.bf16 %v2545_v16, %v2543_v15 }
 0x35e   : > { %9683 = vmatpush1.bf16.msra.mxu0 %v9682_v21  ;;  %2238 = vmatprep.mubr.f32.mxu0 %v11857_v0  ;;  %v9714_v21 = vpack.c.bf16 %v2540_v42, %v2538_v14  ;;  %v2699_v14 = vld [vmem:[#allocation2 + $0x988] sm:$0xff] }
 0x35f   : > { %9685 = vmatprep.subr.bf16.mxu0 %v9684_v43  ;;  %v2542_v43 = vld [vmem:[#allocation2 + $0x860] sm:$0xff]  ;;  %v9748_v16 = vpack.c.bf16 %v2699_v14, %v2697_v13  ;;  %v2976_v13 = vld [vmem:[#allocation2 + $0xa90] sm:$0xff] }
 0x360   : > { %v9718_v26 = vpack.c.bf16 %v2544_v23, %v2542_v43  ;;  %3984 = vrot.lane.b32.xlu0 %v12761_v11, %s11859_s24  ;;  %v2822_v43 = vld [vmem:[#allocation2 + $0x9a0] sm:$0xff]  ;;  %v2824_v23 = vld [vmem:[#allocation2 + $0x9b0] sm:$0xff] }
 0x361   : > { %8937 = vmatmul.mubr.msk.f32.gmra.mrb[6].mxu0 %vm909_vm1, %v2141_v28  ;;  %v9720_v28 = vpack.c.bf16 %v2549_v25, %v2547_v24  ;;  %v2827_v24 = vld [vmem:[#allocation2 + $0x9c8] sm:$0xff]  ;;  %v2829_v25 = vld [vmem:[#allocation2 + $0x9d8] sm:$0xff]  ;;  %v2978_v14 = vld [vmem:[#allocation2 + $0xaa0] sm:$0xff] }
 0x362   : > { %9687 = vmatpush1.bf16.msra.mxu0 %v9686_v27  ;;  %2362 = vmatprep.mubr.f32.mxu0 %v11857_v0  ;;  %v2421_v27 = vpop.permute.xlu1 %2420 }
 0x363   : > { %9689 = vmatprep.subr.bf16.mxu0 %v9688_v29  ;;  %v2546_v29 = vld [vmem:[#allocation2 + $0x880] sm:$0xff] }
 0x364   : > { %4122 = vrot.lane.b32.xlu0 %v12739_v50, %s11860_s3 }
 0x366   : > { %9691 = vmatpush1.bf16.msra.mxu0 %v9690_v32  ;;  %v2553_v32 = vld [vmem:[#allocation2 + $0x8b8] sm:$0xff] }
 0x367   : > { %8938 = vmatprep.subr.msk.mxu0 %vm918_vm0, %v2279_v33  ;;  %v9722_v33 = vpack.c.bf16 %v2548_v30, %v2546_v29  ;;  %v9724_v35 = vpack.c.bf16 %v2553_v32, %v2551_v31  ;;  %v9754_v29 = vpack.c.bf16 %v2824_v23, %v2822_v43  ;;  %v9756_v30 = vpack.c.bf16 %v2829_v25, %v2827_v24  ;;  %v2826_v31 = vld [vmem:[#allocation2 + $0x9c0] sm:$0xff]  ;;  %v2828_v32 = vld [vmem:[#allocation2 + $0x9d0] sm:$0xff] }
 0x368   : > { %4126 = vrot.lane.b32.xlu0 %v12761_v11, %s11860_s3  ;;  %v2984_v25 = vld [vmem:[#allocation2 + $0xad0] sm:$0xff] }
 0x36a   : > { %8939 = vmatpush1.msk.msra.mxu0 %vm918_vm0, %v2278_v44  ;;  %v9726_v44 = vpack.c.bf16 %v2552_v37, %v2550_v36 }
 0x36b   : > { %9693 = vmatprep.subr.bf16.mxu0 %v9692_v1  ;;  %8940 = vmatmul.mubr.msk.f32.vlgmr.msra.gmra.mrb[0].mxu0 %vm909_vm1, %v11215_v51  ;;  %v2425_v1 = vpop.permute.xlu1 %2424  ;;  %v2683_v51 = vld [vmem:[#allocation2 + $0x908] sm:$0xff] }
 0x36c   : > { %9695 = vmatpush1.bf16.msra.mxu0 %v9694_v45  ;;  %2368 = vmatprep.mubr.f32.mxu0 %v11857_v0  ;;  %v9728_v45 = vpack.c.bf16 %v2557_v39, %v2555_v38  ;;  %v9732_v57 = vpack.c.bf16 %v2683_v51, %v2681_v2  ;;  %v2830_v38 = vld [vmem:[#allocation2 + $0x9e0] sm:$0xff]  ;;  %v2832_v39 = vld [vmem:[#allocation2 + $0x9f0] sm:$0xff]  ;;  %v2839_v2 = vld [vmem:[#allocation2 + $0xa28] sm:$0xff] }
 0x36d   : > { %9697 = vmatprep.subr.bf16.mxu0 %v9696_v46  ;;  %v2554_v46 = vld [vmem:[#allocation2 + $0x8c0] sm:$0xff]  ;;  %4264 = vrot.lane.b32.xlu0 %v12739_v50, %s11861_s20  ;;  %v2841_v51 = vld [vmem:[#allocation2 + $0xa38] sm:$0xff] }
 0x36e   : > { %v9730_v48 = vpack.c.bf16 %v2556_v47, %v2554_v46  ;;  %v2686_v50 = vld [vmem:[#allocation2 + $0x920] sm:$0xff] }
 0x36f   : > { %8941 = vmatmul.mubr.msk.f32.gmra.mrb[2].mxu0 %vm909_vm1, %v11216_v58  ;;  %v2561_v58 = vpop.permute.xlu0 %2560  ;;  %v9738_v5 = vpack.c.bf16 %v2686_v50, %v2684_v61  ;;  %v2968_v61 = vld [vmem:[#allocation2 + $0xa50] sm:$0xff]  ;;  %v2970_v50 = vld [vmem:[#allocation2 + $0xa60] sm:$0xff] }
 0x370   : > { %9699 = vmatpush1.bf16.msra.mxu0 %v9698_v52  ;;  %2374 = vmatprep.mubr.f32.mxu0 %v11857_v0  ;;  %v2680_v52 = vld [vmem:[#allocation2 + $0x8f0] sm:$0xff] }
 0x371   : > { %9701 = vmatprep.subr.bf16.mxu0 %v9700_v53  ;;  %v2682_v53 = vld [vmem:[#allocation2 + $0x900] sm:$0xff]  ;;  %4268 = vrot.lane.b32.xlu0 %v12761_v11, %s11861_s20  ;;  %v9744_v11 = vpack.c.bf16 %v2695_v8, %v2693_v7  ;;  %v2972_v7 = vld [vmem:[#allocation2 + $0xa70] sm:$0xff] }
 0x372   : > { %v2974_v8 = vld [vmem:[#allocation2 + $0xa80] sm:$0xff] }
 0x373   : > { %8942 = vmatmul.mubr.msk.f32.gmra.mrb[4].mxu0 %vm909_vm1, %v11217_v6  ;;  %v2563_v6 = vpop.permute.xlu1 %2562 }
 0x374   : > { %9703 = vmatpush1.bf16.msra.mxu0 %v9702_v60  ;;  %2380 = vmatprep.mubr.f32.mxu0 %v11857_v0  ;;  %v9734_v60 = vpack.c.bf16 %v2682_v53, %v2680_v52 }
 0x375   : > { %9705 = vmatprep.subr.bf16.mxu0 %v9704_v4  ;;  %v9736_v4 = vpack.c.bf16 %v2687_v54, %v2685_v3  ;;  %v9768_v3 = vpack.c.bf16 %v2841_v51, %v2839_v2  ;;  %v2838_v54 = vld [vmem:[#allocation2 + $0xa20] sm:$0xff]  ;;  %v3116_v2 = vld [vmem:[#allocation2 + $0xb50] sm:$0xff]  ;;  %v3119_v51 = vld [vmem:[#allocation2 + $0xb68] sm:$0xff] }
 0x377   : > { %8943 = vmatmul.mubr.msk.f32.gmra.mrb[6].mxu0 %vm909_vm1, %v11218_v9  ;;  %v2567_v15 = vpop.permute.xlu1 %2566 }
 0x378   : > { %9707 = vmatpush1.bf16.msra.mxu0 %v9706_v59  ;;  %2504 = vmatprep.mubr.f32.mxu0 %v11857_v0  ;;  %v9740_v59 = vpack.c.bf16 %v2691_v63, %v2689_v62  ;;  %v2973_v62 = vld [vmem:[#allocation2 + $0xa78] sm:$0xff]  ;;  %v2975_v63 = vld [vmem:[#allocation2 + $0xa88] sm:$0xff] }
 0x379   : > { %9709 = vmatprep.subr.bf16.mxu0 %v9708_v55  ;;  %v2690_v55 = vld [vmem:[#allocation2 + $0x940] sm:$0xff] }
 0x37a   : > { %v9742_v9 = vpack.c.bf16 %v2690_v55, %v2688_v40  ;;  %v9774_v40 = vpack.c.bf16 %v2970_v50, %v2968_v61  ;;  %v9776_v55 = vpack.c.bf16 %v2975_v63, %v2973_v62  ;;  %v3122_v62 = vld [vmem:[#allocation2 + $0xb80] sm:$0xff]  ;;  %v3124_v63 = vld [vmem:[#allocation2 + $0xb90] sm:$0xff] }
 0x37b   : > { %v2705_v36 = vpop.permute.xlu1 %2704 }
 0x37c   : > { %9711 = vmatpush1.bf16.msra.mxu0 %v9710_v10  ;;  %v2565_v10 = vpop.permute.xlu0 %2564 }
 0x37d   : > { %8944 = vmatprep.subr.msk.mxu0 %vm918_vm0, %v2417_v41  ;;  %v2692_v41 = vld [vmem:[#allocation2 + $0x950] sm:$0xff] }
 0x37e   : > { %v9746_v42 = vpack.c.bf16 %v2694_v12, %v2692_v41 }
 0x37f   : > { %v2709_v53 = vpop.permute.xlu1 %2708 }
 0x380   : > { %8945 = vmatpush1.msk.msra.mxu0 %vm918_vm0, %v2416_v18  ;;  %v2698_v18 = vld [vmem:[#allocation2 + $0x980] sm:$0xff] }
 0x381   : > { %9713 = vmatprep.subr.bf16.mxu0 %v9712_v19  ;;  %8946 = vmatmul.mubr.msk.f32.vlgmr.msra.gmra.mrb[0].mxu0 %vm909_vm1, %v2419_v20  ;;  %v9750_v19 = vpack.c.bf16 %v2698_v18, %v2696_v17  ;;  %v2701_v20 = vld [vmem:[#allocation2 + $0x998] sm:$0xf] }
 0x382   : > { %9715 = vmatpush1.bf16.msra.mxu0 %v9714_v21  ;;  %2510 = vmatprep.mubr.f32.mxu0 %v11857_v0  ;;  %v2823_v21 = vld [vmem:[#allocation2 + $0x9a8] sm:$0xff] }
 0x383   : > { %9717 = vmatprep.subr.bf16.mxu0 %v9716_v22  ;;  %v2825_v22 = vld [vmem:[#allocation2 + $0x9b8] sm:$0xff]  ;;  %v2847_v41 = vpop.permute.xlu1 %2846 }
 0x385   : > { %8947 = vmatmul.mubr.msk.f32.gmra.mrb[2].mxu0 %vm909_vm1, %v2421_v27  ;;  %v9752_v27 = vpack.c.bf16 %v2825_v22, %v2823_v21  ;;  %v2985_v21 = vld [vmem:[#allocation2 + $0xad8] sm:$0xff]  ;;  %v2987_v22 = vld [vmem:[#allocation2 + $0xae8] sm:$0xff] }
 0x386   : > { %9719 = vmatpush1.bf16.msra.mxu0 %v9718_v26  ;;  %2516 = vmatprep.mubr.f32.mxu0 %v11857_v0  ;;  %v2700_v26 = vld [vmem:[#allocation2 + $0x990] sm:$0xf]  ;;  %v9788_v24 = vpack.c.bf16 %v2987_v22, %v2985_v21  ;;  %v3258_v22 = vld [vmem:[#allocation2 + $0xc00] sm:$0xff] }
 0x387   : > { %9721 = vmatprep.subr.bf16.mxu0 %v9720_v28  ;;  %v2703_v28 = vpop.permute.xlu0 %2702  ;;  %v2851_v23 = vpop.permute.xlu1 %2850  ;;  %v3256_v21 = vld [vmem:[#allocation2 + $0xbf0] sm:$0xff] }
 0x389   : > { %8948 = vmatmul.mubr.msk.f32.gmra.mrb[4].mxu0 %vm909_vm1, %v2423_v34  ;;  %v2833_v34 = vld [vmem:[#allocation2 + $0x9f8] sm:$0xff] }
 0x38a   : > { %9723 = vmatpush1.bf16.msra.mxu0 %v9722_v33  ;;  %2522 = vmatprep.mubr.f32.mxu0 %v11857_v0  ;;  %v2831_v33 = vld [vmem:[#allocation2 + $0x9e8] sm:$0xff] }
 0x38b   : > { %9725 = vmatprep.subr.bf16.mxu0 %v9724_v35  ;;  %v9758_v35 = vpack.c.bf16 %v2828_v32, %v2826_v31  ;;  %v9760_v37 = vpack.c.bf16 %v2833_v34, %v2831_v33  ;;  %v2707_v46 = vpop.permute.xlu0 %2706  ;;  %v3106_v31 = vld [vmem:[#allocation2 + $0xb00] sm:$0xff]  ;;  %v3108_v32 = vld [vmem:[#allocation2 + $0xb10] sm:$0xff]  ;;  %v3111_v33 = vld [vmem:[#allocation2 + $0xb28] sm:$0xff] }
 0x38c   : > { %v3113_v34 = vld [vmem:[#allocation2 + $0xb38] sm:$0xff] }
 0x38d   : > { %8949 = vmatmul.mubr.msk.f32.gmra.mrb[6].mxu0 %vm909_vm1, %v2425_v1  ;;  %v2837_v1 = vld [vmem:[#allocation2 + $0xa18] sm:$0xff] }
 0x38e   : > { %9727 = vmatpush1.bf16.msra.mxu0 %v9726_v44  ;;  %2646 = vmatprep.mubr.f32.mxu0 %v11857_v0  ;;  %v2835_v44 = vld [vmem:[#allocation2 + $0xa08] sm:$0xff] }
 0x38f   : > { %9729 = vmatprep.subr.bf16.mxu0 %v9728_v45  ;;  %v9762_v45 = vpack.c.bf16 %v2832_v39, %v2830_v38  ;;  %v9764_v47 = vpack.c.bf16 %v2837_v1, %v2835_v44  ;;  %v9796_v38 = vpack.c.bf16 %v3113_v34, %v3111_v33  ;;  %v3110_v39 = vld [vmem:[#allocation2 + $0xb20] sm:$0xff]  ;;  %v3112_v44 = vld [vmem:[#allocation2 + $0xb30] sm:$0xff]  ;;  %v3115_v1 = vld [vmem:[#allocation2 + $0xb48] sm:$0xff] }
 0x390   : > { %v3264_v34 = vld [vmem:[#allocation2 + $0xc30] sm:$0xff] }
 0x392   : > { %9731 = vmatpush1.bf16.msra.mxu0 %v9730_v48  ;;  %v2834_v48 = vld [vmem:[#allocation2 + $0xa00] sm:$0xff] }
 0x393   : > { %8950 = vmatprep.subr.msk.mxu0 %vm918_vm0, %v2559_v49  ;;  %v2836_v49 = vld [vmem:[#allocation2 + $0xa10] sm:$0xff] }
 0x394   : > { %v9766_v52 = vpack.c.bf16 %v2836_v49, %v2834_v48  ;;  %v3114_v49 = vld [vmem:[#allocation2 + $0xb40] sm:$0xff] }
 0x396   : > { %8951 = vmatpush1.msk.msra.mxu0 %vm918_vm0, %v2558_v56  ;;  %v2840_v56 = vld [vmem:[#allocation2 + $0xa30] sm:$0xff] }
 0x397   : > { %9733 = vmatprep.subr.bf16.mxu0 %v9732_v57  ;;  %8952 = vmatmul.mubr.msk.f32.vlgmr.msra.gmra.mrb[0].mxu0 %vm909_vm1, %v2561_v58  ;;  %v9770_v57 = vpack.c.bf16 %v2840_v56, %v2838_v54  ;;  %v2843_v58 = vld [vmem:[#allocation2 + $0xa48] sm:$0xf]  ;;  %v3118_v56 = vld [vmem:[#allocation2 + $0xb60] sm:$0xff] }
 0x398   : > { %9735 = vmatpush1.bf16.msra.mxu0 %v9734_v60  ;;  %2652 = vmatprep.mubr.f32.mxu0 %v11857_v0  ;;  %v2969_v60 = vld [vmem:[#allocation2 + $0xa58] sm:$0xff] }
 0x399   : > { %9737 = vmatprep.subr.bf16.mxu0 %v9736_v4  ;;  %v2971_v4 = vld [vmem:[#allocation2 + $0xa68] sm:$0xff] }
 0x39b   : > { %8953 = vmatmul.mubr.msk.f32.gmra.mrb[2].mxu0 %vm909_vm1, %v2563_v6  ;;  %v9772_v6 = vpack.c.bf16 %v2971_v4, %v2969_v60  ;;  %v3125_v60 = vld [vmem:[#allocation2 + $0xb98] sm:$0xff] }
 0x39c   : > { %9739 = vmatpush1.bf16.msra.mxu0 %v9738_v5  ;;  %2658 = vmatprep.mubr.f32.mxu0 %v11857_v0  ;;  %v2842_v5 = vld [vmem:[#allocation2 + $0xa40] sm:$0xf]  ;;  %v11221_v4 = vld [vmem:[%s12450_s10 + $0x13] sm:$0xff] }
 0x39d   : > { %9741 = vmatprep.subr.bf16.mxu0 %v9740_v59  ;;  %v2845_v59 = vpop.permute.xlu0 %2844 }
 0x39f   : > { %8954 = vmatmul.mubr.msk.f32.gmra.mrb[4].mxu0 %vm909_vm1, %v2565_v10  ;;  %v2979_v10 = vld [vmem:[#allocation2 + $0xaa8] sm:$0xff] }
 0x3a0   : > { %9743 = vmatpush1.bf16.msra.mxu0 %v9742_v9  ;;  %2664 = vmatprep.mubr.f32.mxu0 %v11857_v0  ;;  %v2977_v9 = vld [vmem:[#allocation2 + $0xa98] sm:$0xff] }
 0x3a1   : > { %9745 = vmatprep.subr.bf16.mxu0 %v9744_v11  ;;  %v9778_v11 = vpack.c.bf16 %v2974_v8, %v2972_v7  ;;  %v9780_v12 = vpack.c.bf16 %v2979_v10, %v2977_v9  ;;  %v2849_v17 = vpop.permute.xlu0 %2848  ;;  %v3248_v7 = vld [vmem:[#allocation2 + $0xbb0] sm:$0xff]  ;;  %v3250_v8 = vld [vmem:[#allocation2 + $0xbc0] sm:$0xff]  ;;  %v3253_v9 = vld [vmem:[#allocation2 + $0xbd8] sm:$0xff] }
 0x3a2   : > { %v3255_v10 = vld [vmem:[#allocation2 + $0xbe8] sm:$0xff] }
 0x3a3   : > { %8955 = vmatmul.mubr.msk.f32.gmra.mrb[6].mxu0 %vm909_vm1, %v2567_v15  ;;  %v2983_v15 = vld [vmem:[#allocation2 + $0xac8] sm:$0xff] }
 0x3a4   : > { %9747 = vmatpush1.bf16.msra.mxu0 %v9746_v42  ;;  %2788 = vmatprep.mubr.f32.mxu0 %v11857_v0  ;;  %v2981_v42 = vld [vmem:[#allocation2 + $0xab8] sm:$0xff] }
 0x3a5   : > { %9749 = vmatprep.subr.bf16.mxu0 %v9748_v16  ;;  %v9782_v16 = vpack.c.bf16 %v2978_v14, %v2976_v13  ;;  %v9784_v18 = vpack.c.bf16 %v2983_v15, %v2981_v42  ;;  %v9814_v13 = vpack.c.bf16 %v3250_v8, %v3248_v7  ;;  %v9816_v14 = vpack.c.bf16 %v3255_v10, %v3253_v9  ;;  %v3252_v42 = vld [vmem:[#allocation2 + $0xbd0] sm:$0xff]  ;;  %v3254_v15 = vld [vmem:[#allocation2 + $0xbe0] sm:$0xff] }
 0x3a6   : > { %v3406_v10 = vld [vmem:[#allocation2 + $0xce0] sm:$0xff] }
 0x3a8   : > { %9751 = vmatpush1.bf16.msra.mxu0 %v9750_v19  ;;  %v2980_v19 = vld [vmem:[#allocation2 + $0xab0] sm:$0xff] }
 0x3a9   : > { %8956 = vmatprep.subr.msk.mxu0 %vm918_vm0, %v2701_v20  ;;  %v2982_v20 = vld [vmem:[#allocation2 + $0xac0] sm:$0xff] }
 0x3aa   : > { %v9786_v43 = vpack.c.bf16 %v2982_v20, %v2980_v19  ;;  %v3131_v19 = vpop.permute.xlu1 %3130 }
 0x3ac   : > { %8957 = vmatpush1.msk.msra.mxu0 %vm918_vm0, %v2700_v26  ;;  %v2986_v26 = vld [vmem:[#allocation2 + $0xae0] sm:$0xff] }
 0x3ad   : > { %9753 = vmatprep.subr.bf16.mxu0 %v9752_v27  ;;  %8958 = vmatmul.mubr.msk.f32.vlgmr.msra.gmra.mrb[0].mxu0 %vm909_vm1, %v2703_v28  ;;  %v9790_v27 = vpack.c.bf16 %v2986_v26, %v2984_v25  ;;  %v2989_v28 = vld [vmem:[#allocation2 + $0xaf8] sm:$0xf] }
 0x3ae   : > { %9755 = vmatpush1.bf16.msra.mxu0 %v9754_v29  ;;  %2794 = vmatprep.mubr.f32.mxu0 %v11857_v0  ;;  %v3107_v29 = vld [vmem:[#allocation2 + $0xb08] sm:$0xff] }
 0x3af   : > { %9757 = vmatprep.subr.bf16.mxu0 %v9756_v30  ;;  %v3109_v30 = vld [vmem:[#allocation2 + $0xb18] sm:$0xff] }
 0x3b1   : > { %8959 = vmatmul.mubr.msk.f32.gmra.mrb[2].mxu0 %vm909_vm1, %v2705_v36  ;;  %v9792_v36 = vpack.c.bf16 %v3109_v30, %v3107_v29  ;;  %v3265_v29 = vld [vmem:[#allocation2 + $0xc38] sm:$0xff]  ;;  %v3267_v30 = vld [vmem:[#allocation2 + $0xc48] sm:$0xff] }
 0x3b2   : > { %9759 = vmatpush1.bf16.msra.mxu0 %v9758_v35  ;;  %2800 = vmatprep.mubr.f32.mxu0 %v11857_v0  ;;  %v2988_v35 = vld [vmem:[#allocation2 + $0xaf0] sm:$0xf]  ;;  %v9828_v33 = vpack.c.bf16 %v3267_v30, %v3265_v29  ;;  %v3542_v30 = vld [vmem:[#allocation2 + $0xd60] sm:$0xff] }
 0x3b3   : > { %9761 = vmatprep.subr.bf16.mxu0 %v9760_v37  ;;  %v9794_v37 = vpack.c.bf16 %v3108_v32, %v3106_v31  ;;  %v3135_v32 = vpop.permute.xlu1 %3134  ;;  %v3540_v29 = vld [vmem:[#allocation2 + $0xd50] sm:$0xff] }
 0x3b5   : > { %8960 = vmatmul.mubr.msk.f32.gmra.mrb[4].mxu0 %vm909_vm1, %v2707_v46  ;;  %v11219_v46 = vld [vmem:[%s12450_s10 + $0x3] sm:$0xff] }
 0x3b6   : > { %9763 = vmatpush1.bf16.msra.mxu0 %v9762_v45  ;;  %2806 = vmatprep.mubr.f32.mxu0 %v11857_v0  ;;  %v3117_v45 = vld [vmem:[#allocation2 + $0xb58] sm:$0xff] }
 0x3b7   : > { %9765 = vmatprep.subr.bf16.mxu0 %v9764_v47  ;;  %v9798_v47 = vpack.c.bf16 %v3112_v44, %v3110_v39  ;;  %v9800_v48 = vpack.c.bf16 %v3117_v45, %v3115_v1  ;;  %v3393_v39 = vld [vmem:[#allocation2 + $0xc78] sm:$0xff]  ;;  %v3390_v44 = vld [vmem:[#allocation2 + $0xc60] sm:$0xff]  ;;  %v3392_v1 = vld [vmem:[#allocation2 + $0xc70] sm:$0xff] }
 0x3b8   : > { %v3395_v45 = vld [vmem:[#allocation2 + $0xc88] sm:$0xff] }
 0x3b9   : > { %8961 = vmatmul.mubr.msk.f32.gmra.mrb[6].mxu0 %vm909_vm1, %v2709_v53  ;;  %v11220_v53 = vld [vmem:[%s12450_s10 + $0xb] sm:$0xff] }
 0x3ba   : > { %9767 = vmatpush1.bf16.msra.mxu0 %v9766_v52  ;;  %2930 = vmatprep.mubr.f32.mxu0 %v11857_v0  ;;  %v3121_v52 = vld [vmem:[#allocation2 + $0xb78] sm:$0xff] }
 0x3bb   : > { %9769 = vmatprep.subr.bf16.mxu0 %v9768_v3  ;;  %v9802_v3 = vpack.c.bf16 %v3116_v2, %v3114_v49  ;;  %v9804_v54 = vpack.c.bf16 %v3121_v52, %v3119_v51  ;;  %v9834_v2 = vpack.c.bf16 %v3392_v1, %v3390_v44  ;;  %v3394_v52 = vld [vmem:[#allocation2 + $0xc80] sm:$0xff] }
 0x3be   : > { %9771 = vmatpush1.bf16.msra.mxu0 %v9770_v57  ;;  %v3120_v57 = vld [vmem:[#allocation2 + $0xb70] sm:$0xff] }
 0x3bf   : > { %8962 = vmatprep.subr.msk.mxu0 %vm918_vm0, %v2843_v58  ;;  %v3123_v58 = vld [vmem:[#allocation2 + $0xb88] sm:$0xff]  ;;  %v9806_v61 = vpack.c.bf16 %v3120_v57, %v3118_v56  ;;  %v3273_v57 = vpop.permute.xlu1 %3272 }
 0x3c0   : > { %v9808_v50 = vpack.c.bf16 %v3125_v60, %v3123_v58  ;;  %v3398_v60 = vld [vmem:[#allocation2 + $0xca0] sm:$0xff] }
 0x3c2   : > { %8963 = vmatpush1.msk.msra.mxu0 %vm918_vm0, %v2842_v5  ;;  %v11222_v5 = vld [vmem:[%s12450_s10 + $0x1b] sm:$0xf] }
 0x3c3   : > { %9773 = vmatprep.subr.bf16.mxu0 %v9772_v6  ;;  %8964 = vmatmul.mubr.msk.f32.vlgmr.msra.gmra.mrb[0].mxu0 %vm909_vm1, %v2845_v59  ;;  %v9810_v6 = vpack.c.bf16 %v3124_v63, %v3122_v62  ;;  %v3127_v59 = vld [vmem:[#allocation2 + $0xba8] sm:$0xf]  ;;  %v3277_v8 = vpop.permute.xlu1 %3276 }
 0x3c4   : > { %9775 = vmatpush1.bf16.msra.mxu0 %v9774_v40  ;;  %2936 = vmatprep.mubr.f32.mxu0 %v11857_v0  ;;  %v3249_v40 = vld [vmem:[#allocation2 + $0xbb8] sm:$0xff] }
 0x3c5   : > { %9777 = vmatprep.subr.bf16.mxu0 %v9776_v55  ;;  %v3251_v55 = vld [vmem:[#allocation2 + $0xbc8] sm:$0xff] }
 0x3c7   : > { %8965 = vmatmul.mubr.msk.f32.gmra.mrb[2].mxu0 %vm909_vm1, %v2847_v41  ;;  %v9812_v41 = vpack.c.bf16 %v3251_v55, %v3249_v40  ;;  %v3407_v40 = vld [vmem:[#allocation2 + $0xce8] sm:$0xff]  ;;  %v3409_v55 = vld [vmem:[#allocation2 + $0xcf8] sm:$0xff] }
 0x3c8   : > { %9779 = vmatpush1.bf16.msra.mxu0 %v9778_v11  ;;  %2942 = vmatprep.mubr.f32.mxu0 %v11857_v0  ;;  %v3126_v11 = vld [vmem:[#allocation2 + $0xba0] sm:$0xf]  ;;  %v9848_v9 = vpack.c.bf16 %v3409_v55, %v3407_v40  ;;  %v3684_v40 = vld [vmem:[#allocation2 + $0xdf0] sm:$0xff]  ;;  %v3687_v55 = vld [vmem:[#allocation2 + $0xe08] sm:$0xff] }
 0x3c9   : > { %9781 = vmatprep.subr.bf16.mxu0 %v9780_v12  ;;  %v3129_v12 = vpop.permute.xlu0 %3128 }
 0x3cb   : > { %8966 = vmatmul.mubr.msk.f32.gmra.mrb[4].mxu0 %vm909_vm1, %v2849_v17  ;;  %v3259_v17 = vld [vmem:[#allocation2 + $0xc08] sm:$0xff] }
 0x3cc   : > { %9783 = vmatpush1.bf16.msra.mxu0 %v9782_v16  ;;  %2948 = vmatprep.mubr.f32.mxu0 %v11857_v0  ;;  %v3257_v16 = vld [vmem:[#allocation2 + $0xbf8] sm:$0xff] }
 0x3cd   : > { %9785 = vmatprep.subr.bf16.mxu0 %v9784_v18  ;;  %v9818_v18 = vpack.c.bf16 %v3254_v15, %v3252_v42  ;;  %v9820_v20 = vpack.c.bf16 %v3259_v17, %v3257_v16  ;;  %v3133_v25 = vpop.permute.xlu0 %3132  ;;  %v3532_v42 = vld [vmem:[#allocation2 + $0xd10] sm:$0xff]  ;;  %v3534_v15 = vld [vmem:[#allocation2 + $0xd20] sm:$0xff]  ;;  %v3537_v16 = vld [vmem:[#allocation2 + $0xd38] sm:$0xff] }
 0x3ce   : > { %v3539_v17 = vld [vmem:[#allocation2 + $0xd48] sm:$0xff] }
 0x3cf   : > { %8967 = vmatmul.mubr.msk.f32.gmra.mrb[6].mxu0 %vm909_vm1, %v2851_v23  ;;  %v3263_v23 = vld [vmem:[#allocation2 + $0xc28] sm:$0xff] }
 0x3d0   : > { %9787 = vmatpush1.bf16.msra.mxu0 %v9786_v43  ;;  %3072 = vmatprep.mubr.f32.mxu0 %v11857_v0  ;;  %v3261_v43 = vld [vmem:[#allocation2 + $0xc18] sm:$0xff] }
 0x3d1   : > { %9789 = vmatprep.subr.bf16.mxu0 %v9788_v24  ;;  %v9822_v24 = vpack.c.bf16 %v3258_v22, %v3256_v21  ;;  %v9824_v26 = vpack.c.bf16 %v3263_v23, %v3261_v43  ;;  %v3271_v49 = vpop.permute.xlu0 %3270  ;;  %v9854_v21 = vpack.c.bf16 %v3534_v15, %v3532_v42  ;;  %v9856_v22 = vpack.c.bf16 %v3539_v17, %v3537_v16  ;;  %v3536_v43 = vld [vmem:[#allocation2 + $0xd30] sm:$0xff]  ;;  %v3538_v23 = vld [vmem:[#allocation2 + $0xd40] sm:$0xff]  ;;  %v3691_v42 = vld [vmem:[#allocation2 + $0xe28] sm:$0xff] }
 0x3d2   : > { %v3693_v16 = vld [vmem:[#allocation2 + $0xe38] sm:$0xff]  ;;  %v4417_v17 = vld [vmem:[#allocation7 + $0x30] sm:$0xff] }
 0x3d4   : > { %9791 = vmatpush1.bf16.msra.mxu0 %v9790_v27  ;;  %v3260_v27 = vld [vmem:[#allocation2 + $0xc10] sm:$0xff] }
 0x3d5   : > { %8968 = vmatprep.subr.msk.mxu0 %vm918_vm0, %v2989_v28  ;;  %v3262_v28 = vld [vmem:[#allocation2 + $0xc20] sm:$0xff]  ;;  %v3275_v63 = vpop.permute.xlu0 %3274 }
 0x3d6   : > { %v9826_v31 = vpack.c.bf16 %v3262_v28, %v3260_v27  ;;  %v3415_v27 = vpop.permute.xlu1 %3414 }
 0x3d8   : > { %8969 = vmatpush1.msk.msra.mxu0 %vm918_vm0, %v2988_v35  ;;  %v3266_v35 = vld [vmem:[#allocation2 + $0xc40] sm:$0xff] }
 0x3d9   : > { %9793 = vmatprep.subr.bf16.mxu0 %v9792_v36  ;;  %8970 = vmatmul.mubr.msk.f32.vlgmr.msra.gmra.mrb[0].mxu0 %vm909_vm1, %v11219_v46  ;;  %v9830_v36 = vpack.c.bf16 %v3266_v35, %v3264_v34  ;;  %v3397_v46 = vld [vmem:[#allocation2 + $0xc98] sm:$0xff] }
 0x3da   : > { %9795 = vmatpush1.bf16.msra.mxu0 %v9794_v37  ;;  %3078 = vmatprep.mubr.f32.mxu0 %v11857_v0  ;;  %v3269_v37 = vld [vmem:[#allocation2 + $0xc58] sm:$0xf]  ;;  %v9836_v51 = vpack.c.bf16 %v3397_v46, %v3395_v45  ;;  %v3419_v1 = vpop.permute.xlu1 %3418  ;;  %v3548_v46 = vld [vmem:[#allocation2 + $0xd90] sm:$0xff] }
 0x3db   : > { %9797 = vmatprep.subr.bf16.mxu0 %v9796_v38  ;;  %v3391_v38 = vld [vmem:[#allocation2 + $0xc68] sm:$0xff] }
 0x3dd   : > { %8971 = vmatmul.mubr.msk.f32.gmra.mrb[2].mxu0 %vm909_vm1, %v11220_v53  ;;  %v3396_v53 = vld [vmem:[#allocation2 + $0xc90] sm:$0xff] }
 0x3de   : > { %9799 = vmatpush1.bf16.msra.mxu0 %v9798_v47  ;;  %3084 = vmatprep.mubr.f32.mxu0 %v11857_v0  ;;  %v3268_v47 = vld [vmem:[#allocation2 + $0xc50] sm:$0xf]  ;;  %v9838_v56 = vpack.c.bf16 %v3396_v53, %v3394_v52  ;;  %v3678_v52 = vld [vmem:[#allocation2 + $0xdc0] sm:$0xff] }
 0x3df   : > { %9801 = vmatprep.subr.bf16.mxu0 %v9800_v48  ;;  %v9832_v48 = vpack.c.bf16 %v3393_v39, %v3391_v38  ;;  %v3549_v38 = vld [vmem:[#allocation2 + $0xd98] sm:$0xff]  ;;  %v3551_v39 = vld [vmem:[#allocation2 + $0xda8] sm:$0xff]  ;;  %v3680_v53 = vld [vmem:[#allocation2 + $0xdd0] sm:$0xff] }
 0x3e0   : > { %v9868_v45 = vpack.c.bf16 %v3551_v39, %v3549_v38  ;;  %v3699_v38 = vld [vmem:[#allocation2 + $0xe68] sm:$0xf]  ;;  %v3817_v39 = vld [vmem:[#allocation2 + $0xe78] sm:$0xff] }
 0x3e1   : > { %8972 = vmatmul.mubr.msk.f32.gmra.mrb[4].mxu0 %vm909_vm1, %v11221_v4  ;;  %v3400_v4 = vld [vmem:[#allocation2 + $0xcb0] sm:$0xff] }
 0x3e2   : > { %9803 = vmatpush1.bf16.msra.mxu0 %v9802_v3  ;;  %3090 = vmatprep.mubr.f32.mxu0 %v11857_v0  ;;  %v3399_v3 = vld [vmem:[#allocation2 + $0xca8] sm:$0xff]  ;;  %v9842_v62 = vpack.c.bf16 %v3400_v4, %v3398_v60 }
 0x3e3   : > { %9805 = vmatprep.subr.bf16.mxu0 %v9804_v54  ;;  %v3401_v54 = vld [vmem:[#allocation2 + $0xcb8] sm:$0xff]  ;;  %v4413_v4 = vld [vmem:[#allocation7 + $0x10] sm:$0xff] }
 0x3e4   : > { %v9840_v58 = vpack.c.bf16 %v3401_v54, %v3399_v3  ;;  %v3683_v3 = vld [vmem:[#allocation2 + $0xde8] sm:$0xff]  ;;  %v4411_v54 = vld [vmem:[#allocation7] sm:$0xff] }
 0x3e5   : > { %8973 = vmatmul.mubr.msk.f32.gmra.mrb[6].mxu0 %vm909_vm1, %v11222_v5 }
 0x3e6   : > { %9807 = vmatpush1.bf16.msra.mxu0 %v9806_v61  ;;  %3214 = vmatprep.mubr.f32.mxu0 %v11857_v0  ;;  %v3403_v61 = vld [vmem:[#allocation2 + $0xcc8] sm:$0xff] }
 0x3e7   : > { %9809 = vmatprep.subr.bf16.mxu0 %v9808_v50  ;;  %v3405_v50 = vld [vmem:[#allocation2 + $0xcd8] sm:$0xff] }
 0x3e8   : > { %v9844_v5 = vpack.c.bf16 %v3405_v50, %v3403_v61  ;;  %v4414_v61 = vld [vmem:[#allocation7 + $0x18] sm:$0xff] }
 0x3e9   : > { %v3552_v50 = vld [vmem:[#allocation2 + $0xdb0] sm:$0xf] }
 0x3ea   : > { %9811 = vmatpush1.bf16.msra.mxu0 %v9810_v6  ;;  %v3402_v6 = vld [vmem:[#allocation2 + $0xcc0] sm:$0xff] }
 0x3eb   : > { %8974 = vmatprep.subr.msk.mxu0 %vm918_vm0, %v3127_v59  ;;  %v3404_v59 = vld [vmem:[#allocation2 + $0xcd0] sm:$0xff] }
 0x3ec   : > { %v9846_v7 = vpack.c.bf16 %v3404_v59, %v3402_v6  ;;  %v3682_v59 = vld [vmem:[#allocation2 + $0xde0] sm:$0xff] }
 0x3ee   : > { %8975 = vmatpush1.msk.msra.mxu0 %vm918_vm0, %v3126_v11  ;;  %v3408_v11 = vld [vmem:[#allocation2 + $0xcf0] sm:$0xff] }
 0x3ef   : > { %9813 = vmatprep.subr.bf16.mxu0 %v9812_v41  ;;  %8976 = vmatmul.mubr.msk.f32.vlgmr.msra.gmra.mrb[0].mxu0 %vm909_vm1, %v3129_v12  ;;  %v9850_v41 = vpack.c.bf16 %v3408_v11, %v3406_v10  ;;  %v3411_v12 = vld [vmem:[#allocation2 + $0xd08] sm:$0xf]  ;;  %v4416_v10 = vld [vmem:[#allocation7 + $0x28] sm:$0xff]  ;;  %v9878_v11 = vpack.c.bf16 %v3684_v40, %v3682_v59 }
 0x3f0   : > { %9815 = vmatpush1.bf16.msra.mxu0 %v9814_v13  ;;  %3220 = vmatprep.mubr.f32.mxu0 %v11857_v0  ;;  %v3533_v13 = vld [vmem:[#allocation2 + $0xd18] sm:$0xff] }
 0x3f1   : > { %9817 = vmatprep.subr.bf16.mxu0 %v9816_v14  ;;  %v3535_v14 = vld [vmem:[#allocation2 + $0xd28] sm:$0xff]  ;;  %v3829_v59 = vld [vmem:[#allocation2 + $0xed8] sm:$0xff] }
 0x3f3   : > { %8977 = vmatmul.mubr.msk.f32.gmra.mrb[2].mxu0 %vm909_vm1, %v3131_v19  ;;  %v9852_v19 = vpack.c.bf16 %v3535_v14, %v3533_v13  ;;  %v3686_v13 = vld [vmem:[#allocation2 + $0xe00] sm:$0xff]  ;;  %v3688_v14 = vld [vmem:[#allocation2 + $0xe10] sm:$0xff] }
 0x3f4   : > { %9819 = vmatpush1.bf16.msra.mxu0 %v9818_v18  ;;  %3226 = vmatprep.mubr.f32.mxu0 %v11857_v0  ;;  %v3410_v18 = vld [vmem:[#allocation2 + $0xd00] sm:$0xf] }
 0x3f5   : > { %9821 = vmatprep.subr.bf16.mxu0 %v9820_v20  ;;  %v3413_v20 = vpop.permute.xlu0 %3412 }
 0x3f7   : > { %8978 = vmatmul.mubr.msk.f32.gmra.mrb[4].mxu0 %vm909_vm1, %v3133_v25  ;;  %v3543_v25 = vld [vmem:[#allocation2 + $0xd68] sm:$0xff] }
 0x3f8   : > { %9823 = vmatpush1.bf16.msra.mxu0 %v9822_v24  ;;  %3232 = vmatprep.mubr.f32.mxu0 %v11857_v0  ;;  %v3541_v24 = vld [vmem:[#allocation2 + $0xd58] sm:$0xff] }
 0x3f9   : > { %9825 = vmatprep.subr.bf16.mxu0 %v9824_v26  ;;  %v9858_v26 = vpack.c.bf16 %v3538_v23, %v3536_v43  ;;  %v9860_v28 = vpack.c.bf16 %v3543_v25, %v3541_v24  ;;  %v3417_v34 = vpop.permute.xlu0 %3416  ;;  %v3692_v43 = vld [vmem:[#allocation2 + $0xe30] sm:$0xff]  ;;  %v3695_v23 = vld [vmem:[#allocation2 + $0xe48] sm:$0xff]  ;;  %v3697_v25 = vld [vmem:[#allocation2 + $0xe58] sm:$0xff] }
 0x3fb   : > { %8979 = vmatmul.mubr.msk.f32.gmra.mrb[6].mxu0 %vm909_vm1, %v3135_v32  ;;  %v3547_v32 = vld [vmem:[#allocation2 + $0xd88] sm:$0xff] }
 0x3fc   : > { %9827 = vmatpush1.bf16.msra.mxu0 %v9826_v31  ;;  %3356 = vmatprep.mubr.f32.mxu0 %v11857_v0  ;;  %v3545_v31 = vld [vmem:[#allocation2 + $0xd78] sm:$0xff] }
 0x3fd   : > { %9829 = vmatprep.subr.bf16.mxu0 %v9828_v33  ;;  %v9862_v33 = vpack.c.bf16 %v3542_v30, %v3540_v29  ;;  %v9864_v35 = vpack.c.bf16 %v3547_v32, %v3545_v31  ;;  %v9888_v30 = vpack.c.bf16 %v3697_v25, %v3695_v23  ;;  %v3694_v31 = vld [vmem:[#allocation2 + $0xe40] sm:$0xff]  ;;  %v3696_v32 = vld [vmem:[#allocation2 + $0xe50] sm:$0xff]  ;;  %v3961_v23 = vld [vmem:[#allocation2 + $0xf38] sm:$0xff] }
 0x3fe   : > { %v3960_v25 = vld [vmem:[#allocation2 + $0xf30] sm:$0xff] }
 0x400   : > { %9831 = vmatpush1.bf16.msra.mxu0 %v9830_v36  ;;  %v3544_v36 = vld [vmem:[#allocation2 + $0xd70] sm:$0xff] }
 0x401   : > { %8980 = vmatprep.subr.msk.mxu0 %vm918_vm0, %v3269_v37  ;;  %v3546_v37 = vld [vmem:[#allocation2 + $0xd80] sm:$0xff] }
 0x402   : > { %v9866_v44 = vpack.c.bf16 %v3546_v37, %v3544_v36  ;;  %v9890_v36 = vpack.c.bf16 %v3696_v32, %v3694_v31 }
 0x404   : > { %8981 = vmatpush1.msk.msra.mxu0 %vm918_vm0, %v3268_v47  ;;  %v3550_v47 = vld [vmem:[#allocation2 + $0xda0] sm:$0xff] }
 0x405   : > { %9833 = vmatprep.subr.bf16.mxu0 %v9832_v48  ;;  %8982 = vmatmul.mubr.msk.f32.vlgmr.msra.gmra.mrb[0].mxu0 %vm909_vm1, %v3271_v49  ;;  %v9870_v48 = vpack.c.bf16 %v3550_v47, %v3548_v46  ;;  %v3553_v49 = vld [vmem:[#allocation2 + $0xdb8] sm:$0xf]  ;;  %v3823_v47 = vld [vmem:[#allocation2 + $0xea8] sm:$0xff] }
 0x406   : > { %9835 = vmatpush1.bf16.msra.mxu0 %v9834_v2  ;;  %3362 = vmatprep.mubr.f32.mxu0 %v11857_v0  ;;  %v3679_v2 = vld [vmem:[#allocation2 + $0xdc8] sm:$0xff]  ;;  %v3821_v46 = vld [vmem:[#allocation2 + $0xe98] sm:$0xff] }
 0x407   : > { %9837 = vmatprep.subr.bf16.mxu0 %v9836_v51  ;;  %v3681_v51 = vld [vmem:[#allocation2 + $0xdd8] sm:$0xff] }
 0x409   : > { %8983 = vmatmul.mubr.msk.f32.gmra.mrb[2].mxu0 %vm909_vm1, %v3273_v57  ;;  %v3685_v57 = vld [vmem:[#allocation2 + $0xdf8] sm:$0xff] }
 0x40a   : > { %9839 = vmatpush1.bf16.msra.mxu0 %v9838_v56  ;;  %3368 = vmatprep.mubr.f32.mxu0 %v11857_v0  ;;  %v4412_v56 = vld [vmem:[#allocation7 + $0x8] sm:$0xff]  ;;  %v9876_v6 = vpack.c.bf16 %v3685_v57, %v3683_v3  ;;  %v3820_v3 = vld [vmem:[#allocation2 + $0xe90] sm:$0xff] }
 0x40b   : > { %9841 = vmatprep.subr.bf16.mxu0 %v9840_v58  ;;  %v11862_v58 = vmov 0.0|0.0   ;;  %v9973_v60 = vpack.c.bf16 %v4412_v56, %v4411_v54  ;;  %v3822_v54 = vld [vmem:[#allocation2 + $0xea0] sm:$0xff]  ;;  %v3825_v56 = vld [vmem:[#allocation2 + $0xeb8] sm:$0xff] }
 0x40c   : > { %9972 = vmatprep.subr.bf16.mxu1 %v11862_v58 }
 0x40d   : > { %8984 = vmatmul.mubr.msk.f32.gmra.mrb[4].mxu0 %vm909_vm1, %v3275_v63  ;;  %v3555_v63 = vpop.permute.xlu0 %3554  ;;  %9974 = vmatpush1.bf16.msra.mxu1 %v9973_v60  ;;  %v3827_v60 = vld [vmem:[#allocation2 + $0xec8] sm:$0xff] }
 0x40e   : > { %9843 = vmatpush1.bf16.msra.mxu0 %v9842_v62  ;;  %3374 = vmatprep.mubr.f32.mxu0 %v11857_v0  ;;  %v9872_v62 = vpack.c.bf16 %v3681_v51, %v3679_v2  ;;  %v3698_v2 = vld [vmem:[#allocation2 + $0xe60] sm:$0xf] }
 0x40f   : > { %9845 = vmatprep.subr.bf16.mxu0 %v9844_v5  ;;  %v9874_v5 = vpack.c.bf16 %v3680_v53, %v3678_v52  ;;  %9975 = vmatprep.subr.bf16.mxu1 %v11862_v58  ;;  %v9896_v53 = vpack.c.bf16 %v3823_v47, %v3821_v46  ;;  %v3973_v46 = vld [vmem:[#allocation2 + $0xf98] sm:$0xff] }
 0x411   : > { %8985 = vmatmul.mubr.msk.f32.gmra.mrb[6].mxu0 %vm909_vm1, %v3277_v8  ;;  %v3689_v8 = vld [vmem:[#allocation2 + $0xe18] sm:$0xff] }
 0x412   : > { %9847 = vmatpush1.bf16.msra.mxu0 %v9846_v7  ;;  %3498 = vmatprep.mubr.f32.mxu0 %v11857_v0  ;;  %v9976_v7 = vpack.c.bf16 %v4414_v61, %v4413_v4  ;;  %v4425_v4 = vld [vmem:[#allocation7 + $0x70] sm:$0xff]  ;;  %v4426_v61 = vld [vmem:[#allocation7 + $0x78] sm:$0xff] }
 0x413   : > { %9849 = vmatprep.subr.bf16.mxu0 %v9848_v9  ;;  %v4415_v9 = vld [vmem:[#allocation7 + $0x20] sm:$0xff]  ;;  %v9994_v40 = vpack.c.bf16 %v4426_v61, %v4425_v4  ;;  %v3979_v61 = vld [vmem:[#allocation2 + $0xfc8] sm:$0xf] }
 0x414   : > { %9977 = vmatpush1.bf16.msra.mxu1 %v9976_v7  ;;  %v9979_v15 = vpack.c.bf16 %v4416_v10, %v4415_v9  ;;  %v4427_v7 = vld [vmem:[#allocation7 + $0x80] sm:$0xff] }
 0x415   : > { %9978 = vmatprep.subr.bf16.mxu1 %v11862_v58  ;;  %v11224_v9 = vld [vmem:[%s12450_s10 + $0xc] sm:$0xff] }
 0x416   : > { %9851 = vmatpush1.bf16.msra.mxu0 %v9850_v41  ;;  %v3557_v41 = vpop.permute.xlu1 %3556 }
 0x417   : > { %8986 = vmatprep.subr.msk.mxu0 %vm918_vm0, %v3411_v12  ;;  %v9880_v12 = vpack.c.bf16 %v3689_v8, %v3687_v55  ;;  %v3831_v55 = vld [vmem:[#allocation2 + $0xee8] sm:$0xff]  ;;  %v4428_v8 = vld [vmem:[#allocation7 + $0x88] sm:$0xff] }
 0x418   : > { %9980 = vmatpush1.bf16.msra.mxu1 %v9979_v15  ;;  %v11225_v15 = vld [vmem:[%s12450_s10 + $0x14] sm:$0xff] }
 0x419   : > { %9981 = vmatprep.subr.bf16.mxu1 %v11862_v58 }
 0x41a   : > { %8987 = vmatpush1.msk.msra.mxu0 %vm918_vm0, %v3410_v18  ;;  %v4418_v18 = vld [vmem:[#allocation7 + $0x38] sm:$0xff]  ;;  %v3561_v29 = vpop.permute.xlu1 %3560 }
 0x41b   : > { %9853 = vmatprep.subr.bf16.mxu0 %v9852_v19  ;;  %8988 = vmatmul.mubr.msk.f32.vlgmr.msra.gmra.mrb[0].mxu0 %vm909_vm1, %v3413_v20  ;;  %v9882_v19 = vpack.c.bf16 %v3688_v14, %v3686_v13  ;;  %v3559_v20 = vpop.permute.xlu0 %3558  ;;  %v9982_v24 = vpack.c.bf16 %v4418_v18, %v4417_v17  ;;  %v9997_v13 = vpack.c.bf16 %v4428_v8, %v4427_v7  ;;  %v3833_v14 = vld [vmem:[#allocation2 + $0xef8] sm:$0xff]  ;;  %v3832_v18 = vld [vmem:[#allocation2 + $0xef0] sm:$0xff] }
 0x41c   : > { %9855 = vmatpush1.bf16.msra.mxu0 %v9854_v21  ;;  %3504 = vmatprep.mubr.f32.mxu0 %v11857_v0  ;;  %v9884_v21 = vpack.c.bf16 %v3693_v16, %v3691_v42  ;;  %v3835_v42 = vld [vmem:[#allocation2 + $0xf08] sm:$0xff] }
 0x41d   : > { %9857 = vmatprep.subr.bf16.mxu0 %v9856_v22  ;;  %v3690_v22 = vld [vmem:[#allocation2 + $0xe20] sm:$0xff]  ;;  %9983 = vmatpush1.bf16.msra.mxu1 %v9982_v24  ;;  %v9908_v17 = vpack.c.bf16 %v3835_v42, %v3833_v14 }
 0x41e   : > { %9984 = vmatprep.subr.bf16.mxu1 %v11862_v58  ;;  %v3958_v24 = vld [vmem:[#allocation2 + $0xf20] sm:$0xff] }
 0x41f   : > { %8989 = vmatmul.mubr.msk.f32.gmra.mrb[2].mxu0 %vm909_vm1, %v3415_v27  ;;  %v4420_v27 = vld [vmem:[#allocation7 + $0x48] sm:$0xff]  ;;  %v9914_v31 = vpack.c.bf16 %v3960_v25, %v3958_v24  ;;  %v4119_v24 = vld [vmem:[#allocation2 + $0x1068] sm:$0xff] }
 0x420   : > { %9859 = vmatpush1.bf16.msra.mxu0 %v9858_v26  ;;  %3510 = vmatprep.mubr.f32.mxu0 %v11857_v0  ;;  %v4419_v26 = vld [vmem:[#allocation7 + $0x40] sm:$0xff] }
 0x421   : > { %9861 = vmatprep.subr.bf16.mxu0 %v9860_v28  ;;  %v9886_v28 = vpack.c.bf16 %v3692_v43, %v3690_v22  ;;  %v3837_v22 = vld [vmem:[#allocation2 + $0xf18] sm:$0xf]  ;;  %v3959_v43 = vld [vmem:[#allocation2 + $0xf28] sm:$0xff] }
 0x423   : > { %8990 = vmatmul.mubr.msk.f32.gmra.mrb[4].mxu0 %vm909_vm1, %v3417_v34  ;;  %v4421_v34 = vld [vmem:[#allocation7 + $0x50] sm:$0xff] }
 0x424   : > { %9863 = vmatpush1.bf16.msra.mxu0 %v9862_v33  ;;  %3516 = vmatprep.mubr.f32.mxu0 %v11857_v0  ;;  %v9985_v33 = vpack.c.bf16 %v4420_v27, %v4419_v26  ;;  %v3963_v26 = vld [vmem:[#allocation2 + $0xf48] sm:$0xff]  ;;  %v3965_v27 = vld [vmem:[#allocation2 + $0xf58] sm:$0xff] }
 0x425   : > { %9865 = vmatprep.subr.bf16.mxu0 %v9864_v35  ;;  %v4422_v35 = vld [vmem:[#allocation7 + $0x58] sm:$0xff]  ;;  %v9916_v32 = vpack.c.bf16 %v3965_v27, %v3963_v26 }
 0x426   : > { %9986 = vmatpush1.bf16.msra.mxu1 %v9985_v33  ;;  %v9988_v37 = vpack.c.bf16 %v4422_v35, %v4421_v34  ;;  %v3962_v33 = vld [vmem:[#allocation2 + $0xf40] sm:$0xff]  ;;  %v3964_v34 = vld [vmem:[#allocation2 + $0xf50] sm:$0xff]  ;;  %v3967_v35 = vld [vmem:[#allocation2 + $0xf68] sm:$0xff] }
 0x427   : > { %8991 = vmatmul.mubr.msk.f32.gmra.mrb[6].mxu0 %vm909_vm1, %v3419_v1  ;;  %9987 = vmatprep.subr.bf16.mxu1 %v11862_v58  ;;  %v3816_v1 = vld [vmem:[#allocation2 + $0xe70] sm:$0xff] }
 0x428   : > { %9867 = vmatpush1.bf16.msra.mxu0 %v9866_v44  ;;  %3640 = vmatprep.mubr.f32.mxu0 %v11857_v0  ;;  %v3819_v44 = vld [vmem:[#allocation2 + $0xe88] sm:$0xff] }
 0x429   : > { %9869 = vmatprep.subr.bf16.mxu0 %v9868_v45  ;;  %v3818_v45 = vld [vmem:[#allocation2 + $0xe80] sm:$0xff]  ;;  %v9892_v51 = vpack.c.bf16 %v3819_v44, %v3817_v39 }
 0x42a   : > { %9989 = vmatpush1.bf16.msra.mxu1 %v9988_v37  ;;  %v9894_v52 = vpack.c.bf16 %v3818_v45, %v3816_v1  ;;  %v9918_v37 = vpack.c.bf16 %v3964_v34, %v3962_v33  ;;  %v3966_v44 = vld [vmem:[#allocation2 + $0xf60] sm:$0xff]  ;;  %v3968_v1 = vld [vmem:[#allocation2 + $0xf70] sm:$0xff]  ;;  %v3971_v45 = vld [vmem:[#allocation2 + $0xf88] sm:$0xff] }
 0x42b   : > { %9990 = vmatprep.subr.bf16.mxu1 %v11862_v58  ;;  %v9922_v47 = vpack.c.bf16 %v3968_v1, %v3966_v44  ;;  %v4245_v33 = vld [vmem:[#allocation2 + $0x1098] sm:$0xff]  ;;  %v4242_v34 = vld [vmem:[#allocation2 + $0x1080] sm:$0xff] }
 0x42c   : > { %9871 = vmatpush1.bf16.msra.mxu0 %v9870_v48  ;;  %v4423_v48 = vld [vmem:[#allocation7 + $0x60] sm:$0xff] }
 0x42d   : > { %8992 = vmatprep.subr.msk.mxu0 %vm918_vm0, %v3553_v49  ;;  %v4424_v49 = vld [vmem:[#allocation7 + $0x68] sm:$0xff] }
 0x42e   : > { %v9991_v57 = vpack.c.bf16 %v4424_v49, %v4423_v48  ;;  %v9924_v49 = vpack.c.bf16 %v3973_v46, %v3971_v45  ;;  %v4246_v46 = vld [vmem:[#allocation2 + $0x10a0] sm:$0xff] }
 0x430   : > { %8993 = vmatpush1.msk.msra.mxu0 %vm918_vm0, %v3552_v50  ;;  %v11223_v50 = vld [vmem:[%s12450_s10 + $0x4] sm:$0xff]  ;;  %9992 = vmatpush1.bf16.msra.mxu1 %v9991_v57 }
 0x431   : > { %9873 = vmatprep.subr.bf16.mxu0 %v9872_v62  ;;  %8994 = vmatmul.mubr.msk.f32.vlgmr.msra.gmra.mrb[0].mxu0 %vm909_vm1, %v3555_v63  ;;  %v9898_v62 = vpack.c.bf16 %v3822_v54, %v3820_v3  ;;  %v9900_v63 = vpack.c.bf16 %v3827_v60, %v3825_v56  ;;  %v3974_v57 = vld [vmem:[#allocation2 + $0xfa0] sm:$0xff]  ;;  %v3976_v60 = vld [vmem:[#allocation2 + $0xfb0] sm:$0xff] }
 0x432   : > { %9875 = vmatpush1.bf16.msra.mxu0 %v9874_v5  ;;  %3646 = vmatprep.mubr.f32.mxu0 %v11857_v0  ;;  %v3824_v5 = vld [vmem:[#allocation2 + $0xeb0] sm:$0xff]  ;;  %v9930_v4 = vpack.c.bf16 %v3976_v60, %v3974_v57 }
 0x433   : > { %9877 = vmatprep.subr.bf16.mxu0 %v9876_v6  ;;  %v3826_v6 = vld [vmem:[#allocation2 + $0xec0] sm:$0xff]  ;;  %9993 = vmatprep.subr.bf16.mxu1 %v11862_v58 }
 0x434   : > { %v9902_v10 = vpack.c.bf16 %v3826_v6, %v3824_v5  ;;  %9995 = vmatpush1.bf16.msra.mxu1 %v9994_v40  ;;  %v4102_v5 = vld [vmem:[#allocation2 + $0xfe0] sm:$0xff]  ;;  %v4105_v6 = vld [vmem:[#allocation2 + $0xff8] sm:$0xff] }
 0x435   : > { %8995 = vmatmul.mubr.msk.f32.gmra.mrb[2].mxu0 %vm909_vm1, %v3557_v41  ;;  %v3828_v41 = vld [vmem:[#allocation2 + $0xed0] sm:$0xff]  ;;  %9996 = vmatprep.subr.bf16.mxu1 %v11862_v58  ;;  %v3978_v40 = vld [vmem:[#allocation2 + $0xfc0] sm:$0xf] }
 0x436   : > { %9879 = vmatpush1.bf16.msra.mxu0 %v9878_v11  ;;  %3652 = vmatprep.mubr.f32.mxu0 %v11857_v0  ;;  %v9904_v11 = vpack.c.bf16 %v3831_v55, %v3829_v59  ;;  %v4107_v59 = vld [vmem:[#allocation2 + $0x1008] sm:$0xff] }
 0x437   : > { %9881 = vmatprep.subr.bf16.mxu0 %v9880_v12  ;;  %v3830_v12 = vld [vmem:[#allocation2 + $0xee0] sm:$0xff] }
 0x438   : > { %v9906_v16 = vpack.c.bf16 %v3830_v12, %v3828_v41  ;;  %9998 = vmatpush1.bf16.msra.mxu1 %v9997_v13  ;;  %v4109_v41 = vld [vmem:[#allocation2 + $0x1018] sm:$0xff]  ;;  %v4111_v12 = vld [vmem:[#allocation2 + $0x1028] sm:$0xff] }
 0x439   : > { %8996 = vmatmul.mubr.msk.f32.gmra.mrb[4].mxu0 %vm909_vm1, %v3559_v20  ;;  %9999 = vmatprep.subr.bf16.mxu1 %v11862_v58  ;;  %v11226_v20 = vld [vmem:[%s12450_s10 + $0x1c] sm:$0xf]  ;;  %v9940_v42 = vpack.c.bf16 %v4111_v12, %v4109_v41  ;;  %s11731_s10 = scalar_lea.vmem %s13458_s21, 16 }
 0x43a   : > { %9883 = vmatpush1.bf16.msra.mxu0 %v9882_v19  ;;  %3658 = vmatprep.mubr.f32.mxu0 %v11857_v0  ;;  %v3834_v19 = vld [vmem:[#allocation2 + $0xf00] sm:$0xff]  ;;  %p11732_p2 = scmp.ne.s32.totalorder %s13458_s21, %s11731_s10 }
 0x43b   : > { %9885 = vmatprep.subr.bf16.mxu0 %v9884_v21  ;;  %v9910_v21 = vpack.c.bf16 %v3834_v19, %v3832_v18  ;;  %v4115_v18 = vld [vmem:[#allocation2 + $0x1048] sm:$0xff] }
 0x43c   : > { %p11733_p4 = pnand %p11732_p2, %p13608_p3 }
 0x43d   : > { %8997 = vmatmul.mubr.msk.f32.gmra.mrb[6].mxu0 %vm909_vm1, %v3561_v29  ;;  %v9912_v29 = vpack.c.bf16 %v3961_v23, %v3959_v43  ;;  %v4114_v43 = vld [vmem:[#allocation2 + $0x1040] sm:$0xff]  ;;  %v4117_v23 = vld [vmem:[#allocation2 + $0x1058] sm:$0xff] }
 0x43e   : > { %9887 = vmatpush1.bf16.msra.mxu0 %v9886_v28  ;;  %3782 = vmatprep.mubr.f32.mxu0 %v11857_v0  ;;  %v3836_v28 = vld [vmem:[#allocation2 + $0xf10] sm:$0xf]  ;;  %v9948_v27 = vpack.c.bf16 %v4119_v24, %v4117_v23  ;;  %p11734_p7 = pneg %p11733_p4 }
 0x43f   : > { %9889 = vmatprep.subr.bf16.mxu0 %v9888_v30  ;;  %v3839_v30 = vpop.permute.xlu0 %3838 }
 0x442   : > { %9891 = vmatpush1.bf16.msra.mxu0 %v9890_v36  ;;  %v3969_v36 = vld [vmem:[#allocation2 + $0xf78] sm:$0xff] }
 0x443   : > { %8998 = vmatprep.subr.msk.mxu0 %vm918_vm0, %v3699_v38  ;;  %v3841_v38 = vpop.permute.xlu1 %3840  ;;  %v9920_v39 = vpack.c.bf16 %v3969_v36, %v3967_v35  ;;  %v3843_v48 = vpop.permute.xlu0 %3842  ;;  %v4244_v35 = vld [vmem:[#allocation2 + $0x1090] sm:$0xff]  ;;  %v4247_v36 = vld [vmem:[#allocation2 + $0x10a8] sm:$0xff] }
 0x444   : > { %v9954_v1 = vpack.c.bf16 %v4244_v35, %v4242_v34  ;;  %v4532_v34 = vld [vmem:[#allocation8 + $0x10] sm:$0xff]  ;;  %v4533_v35 = vld [vmem:[#allocation8 + $0x18] sm:$0xff] }
 0x446   : > { %8999 = vmatpush1.msk.msra.mxu0 %vm918_vm0, %v3698_v2  ;;  %v3970_v2 = vld [vmem:[#allocation2 + $0xf80] sm:$0xff] }
 0x447   : > { %9893 = vmatprep.subr.bf16.mxu0 %v9892_v51  ;;  %9000 = vmatmul.mubr.msk.f32.vlgmr.msra.gmra.mrb[0].mxu0 %vm909_vm1, %v11223_v50  ;;  %v3972_v51 = vld [vmem:[#allocation2 + $0xf90] sm:$0xff]  ;;  %v3845_v54 = vpop.permute.xlu1 %3844  ;;  %v4101_v50 = vld [vmem:[#allocation2 + $0xfd8] sm:$0xff]  ;;  %v3981_v7 = vpop.permute.xlu0 %3980 }
 0x448   : > { %9895 = vmatpush1.bf16.msra.mxu0 %v9894_v52  ;;  %3788 = vmatprep.mubr.f32.mxu0 %v11857_v0  ;;  %v3975_v52 = vld [vmem:[#allocation2 + $0xfa8] sm:$0xff]  ;;  %v9926_v3 = vpack.c.bf16 %v3972_v51, %v3970_v2 }
 0x449   : > { %9897 = vmatprep.subr.bf16.mxu0 %v9896_v53  ;;  %v3977_v53 = vld [vmem:[#allocation2 + $0xfb8] sm:$0xff] }
 0x44a   : > { %v9928_v56 = vpack.c.bf16 %v3977_v53, %v3975_v52  ;;  %v4250_v53 = vld [vmem:[#allocation2 + $0x10c0] sm:$0xff] }
 0x44b   : > { %9001 = vmatmul.mubr.msk.f32.gmra.mrb[2].mxu0 %vm909_vm1, %v11224_v9  ;;  %v9936_v9 = vpack.c.bf16 %v4107_v59, %v4105_v6  ;;  %v3983_v14 = vpop.permute.xlu1 %3982 }
 0x44c   : > { %9899 = vmatpush1.bf16.msra.mxu0 %v9898_v62  ;;  %3794 = vmatprep.mubr.f32.mxu0 %v11857_v0  ;;  %v4103_v62 = vld [vmem:[#allocation2 + $0xfe8] sm:$0xff] }
 0x44d   : > { %9901 = vmatprep.subr.bf16.mxu0 %v9900_v63  ;;  %v4100_v63 = vld [vmem:[#allocation2 + $0xfd0] sm:$0xff]  ;;  %v9932_v55 = vpack.c.bf16 %v4103_v62, %v4101_v50  ;;  %v4259_v62 = vld [vmem:[#allocation2 + $0x1108] sm:$0xff] }
 0x44e   : > { %v9934_v8 = vpack.c.bf16 %v4102_v5, %v4100_v63  ;;  %v4256_v50 = vld [vmem:[#allocation2 + $0x10f0] sm:$0xff]  ;;  %v4261_v63 = vld [vmem:[#allocation2 + $0x1118] sm:$0xff] }
 0x44f   : > { %9002 = vmatmul.mubr.msk.f32.gmra.mrb[4].mxu0 %vm909_vm1, %v11225_v15  ;;  %v4108_v15 = vld [vmem:[#allocation2 + $0x1010] sm:$0xff]  ;;  %v3987_v26 = vpop.permute.xlu1 %3986  ;;  %v9968_v59 = vpack.c.bf16 %v4261_v63, %v4259_v62  ;;  %v4539_v62 = vld [vmem:[#allocation8 + $0x48] sm:$0xff] }
 0x450   : > { %9903 = vmatpush1.bf16.msra.mxu0 %v9902_v10  ;;  %3800 = vmatprep.mubr.f32.mxu0 %v11857_v0  ;;  %v4104_v10 = vld [vmem:[#allocation2 + $0xff0] sm:$0xff] }
 0x451   : > { %9905 = vmatprep.subr.bf16.mxu0 %v9904_v11  ;;  %v4106_v11 = vld [vmem:[#allocation2 + $0x1000] sm:$0xff] }
 0x452   : > { %v9938_v13 = vpack.c.bf16 %v4106_v11, %v4104_v10 }
 0x453   : > { %9003 = vmatmul.mubr.msk.f32.gmra.mrb[6].mxu0 %vm909_vm1, %v11226_v20  ;;  %v3985_v20 = vpop.permute.xlu0 %3984  ;;  %v4125_v51 = vpop.permute.xlu1 %4124 }
 0x454   : > { %9907 = vmatpush1.bf16.msra.mxu0 %v9906_v16  ;;  %3924 = vmatprep.mubr.f32.mxu0 %v11857_v0  ;;  %v4110_v16 = vld [vmem:[#allocation2 + $0x1020] sm:$0xff] }
 0x455   : > { %9909 = vmatprep.subr.bf16.mxu0 %v9908_v17  ;;  %v4113_v17 = vld [vmem:[#allocation2 + $0x1038] sm:$0xff]  ;;  %v9942_v19 = vpack.c.bf16 %v4110_v16, %v4108_v15  ;;  %v4385_v16 = vlaneseq }
 0x456   : > { %v4431_v15 = vld [vmem:[#allocation7 + $0xa0] sm:$0xff] }
 0x457   : > { %v4123_v44 = vpop.permute.xlu0 %4122  ;;  %v4129_v6 = vpop.permute.xlu1 %4128 }
 0x458   : > { %9911 = vmatpush1.bf16.msra.mxu0 %v9910_v21  ;;  %v9944_v21 = vpack.c.bf16 %v4115_v18, %v4113_v17  ;;  %v12953_v17 = vshrl.u32 %v4385_v16, 7  ;;  %v4640_v16 = vld [vmem:[#allocation10] sm:$0xff] }
 0x459   : > { %9004 = vmatprep.subr.msk.mxu0 %vm918_vm0, %v3837_v22  ;;  %v4112_v22 = vld [vmem:[#allocation2 + $0x1030] sm:$0xff] }
 0x45a   : > { %v9946_v25 = vpack.c.bf16 %v4114_v43, %v4112_v22  ;;  %v4387_v18 = vsub.s32 0, %v12953_v17 }
 0x45b   : > { %v4127_v60 = vpop.permute.xlu0 %4126  ;;  %v4267_v11 = vpop.permute.xlu1 %4266 }
 0x45c   : > { %9005 = vmatpush1.msk.msra.mxu0 %vm918_vm0, %v3836_v28  ;;  %v4116_v28 = vld [vmem:[#allocation2 + $0x1050] sm:$0xff] }
 0x45d   : > { %9913 = vmatprep.subr.bf16.mxu0 %v9912_v29  ;;  %9006 = vmatmul.mubr.msk.f32.vlgmr.msra.gmra.mrb[0].mxu0 %vm909_vm1, %v3839_v30  ;;  %v4118_v29 = vld [vmem:[#allocation2 + $0x1060] sm:$0xff] }
 0x45e   : > { %9915 = vmatpush1.bf16.msra.mxu0 %v9914_v31  ;;  %3930 = vmatprep.mubr.f32.mxu0 %v11857_v0  ;;  %v9950_v30 = vpack.c.bf16 %v4118_v29, %v4116_v28  ;;  %v4121_v31 = vld [vmem:[#allocation2 + $0x1078] sm:$0xf] }
 0x45f   : > { %9917 = vmatprep.subr.bf16.mxu0 %v9916_v32  ;;  %v4243_v32 = vld [vmem:[#allocation2 + $0x1088] sm:$0xff]  ;;  %v4265_v10 = vpop.permute.xlu0 %4264  ;;  %v4271_v12 = vpop.permute.xlu1 %4270 }
 0x461   : > { %9007 = vmatmul.mubr.msk.f32.gmra.mrb[2].mxu0 %vm909_vm1, %v3841_v38  ;;  %v4120_v38 = vld [vmem:[#allocation2 + $0x1070] sm:$0xf] }
 0x462   : > { %9919 = vmatpush1.bf16.msra.mxu0 %v9918_v37  ;;  %3936 = vmatprep.mubr.f32.mxu0 %v11857_v0  ;;  %v4249_v37 = vld [vmem:[#allocation2 + $0x10b8] sm:$0xff] }
 0x463   : > { %9921 = vmatprep.subr.bf16.mxu0 %v9920_v39  ;;  %v9952_v39 = vpack.c.bf16 %v4245_v33, %v4243_v32  ;;  %v9956_v45 = vpack.c.bf16 %v4249_v37, %v4247_v36  ;;  %v4269_v41 = vpop.permute.xlu0 %4268 }
 0x465   : > { %9008 = vmatmul.mubr.msk.f32.gmra.mrb[4].mxu0 %vm909_vm1, %v3843_v48  ;;  %v4251_v48 = vld [vmem:[#allocation2 + $0x10c8] sm:$0xff] }
 0x466   : > { %9923 = vmatpush1.bf16.msra.mxu0 %v9922_v47  ;;  %3942 = vmatprep.mubr.f32.mxu0 %v11857_v0  ;;  %v4248_v47 = vld [vmem:[#allocation2 + $0x10b0] sm:$0xff] }
 0x467   : > { %9925 = vmatprep.subr.bf16.mxu0 %v9924_v49  ;;  %v4253_v49 = vld [vmem:[#allocation2 + $0x10d8] sm:$0xff]  ;;  %v9958_v2 = vpack.c.bf16 %v4248_v47, %v4246_v46  ;;  %v4535_v47 = vld [vmem:[#allocation8 + $0x28] sm:$0xff] }
 0x468   : > { %v9960_v52 = vpack.c.bf16 %v4253_v49, %v4251_v48  ;;  %v4534_v46 = vld [vmem:[#allocation8 + $0x20] sm:$0xff] }
 0x469   : > { %9009 = vmatmul.mubr.msk.f32.gmra.mrb[6].mxu0 %vm909_vm1, %v3845_v54  ;;  %v4255_v54 = vld [vmem:[#allocation2 + $0x10e8] sm:$0xff] }
 0x46a   : > { %9927 = vmatpush1.bf16.msra.mxu0 %v9926_v3  ;;  %4066 = vmatprep.mubr.f32.mxu0 %v11857_v0  ;;  %v4252_v3 = vld [vmem:[#allocation2 + $0x10d0] sm:$0xff] }
 0x46b   : > { %9929 = vmatprep.subr.bf16.mxu0 %v9928_v56  ;;  %v4257_v56 = vld [vmem:[#allocation2 + $0x10f8] sm:$0xff]  ;;  %v9962_v57 = vpack.c.bf16 %v4252_v3, %v4250_v53 }
 0x46e   : > { %9931 = vmatpush1.bf16.msra.mxu0 %v9930_v4  ;;  %v9964_v4 = vpack.c.bf16 %v4257_v56, %v4255_v54  ;;  %v4536_v54 = vld [vmem:[#allocation8 + $0x30] sm:$0xff]  ;;  %v4537_v56 = vld [vmem:[#allocation8 + $0x38] sm:$0xff] }
 0x46f   : > { %9010 = vmatprep.subr.msk.mxu0 %vm918_vm0, %v3979_v61  ;;  %v4254_v61 = vld [vmem:[#allocation2 + $0x10e0] sm:$0xff] }
 0x470   : > { %v9966_v5 = vpack.c.bf16 %v4256_v50, %v4254_v61  ;;  %v4538_v50 = vld [vmem:[#allocation8 + $0x40] sm:$0xff] }
 0x471   : > { %v10015_v63 = vpack.c.bf16 %v4539_v62, %v4538_v50 }
 0x472   : > { %9011 = vmatpush1.msk.msra.mxu0 %vm918_vm0, %v3978_v40  ;;  %v4258_v40 = vld [vmem:[#allocation2 + $0x1100] sm:$0xff] }
 0x473   : > { %9933 = vmatprep.subr.bf16.mxu0 %v9932_v55  ;;  %9012 = vmatmul.mubr.msk.f32.vlgmr.msra.gmra.mrb[0].mxu0 %vm909_vm1, %v3981_v7  ;;  %v4260_v55 = vld [vmem:[#allocation2 + $0x1110] sm:$0xff] }
 0x474   : > { %9935 = vmatpush1.bf16.msra.mxu0 %v9934_v8  ;;  %4072 = vmatprep.mubr.f32.mxu0 %v11857_v0  ;;  %v9970_v7 = vpack.c.bf16 %v4260_v55, %v4258_v40  ;;  %v4263_v8 = vld [vmem:[#allocation2 + $0x1128] sm:$0xf]  ;;  %v4542_v40 = vld [vmem:[#allocation8 + $0x60] sm:$0xff] }
 0x475   : > { %9937 = vmatprep.subr.bf16.mxu0 %v9936_v9  ;;  %v4262_v9 = vld [vmem:[#allocation2 + $0x1120] sm:$0xf] }
 0x476   : > { %v4543_v55 = vld [vmem:[#allocation8 + $0x68] sm:$0xff] }
 0x477   : > { %9013 = vmatmul.mubr.msk.f32.gmra.mrb[2].mxu0 %vm909_vm1, %v3983_v14  ;;  %v4430_v14 = vld [vmem:[#allocation7 + $0x98] sm:$0xff] }
 0x478   : > { %9939 = vmatpush1.bf16.msra.mxu0 %v9938_v13  ;;  %4078 = vmatprep.mubr.f32.mxu0 %v11857_v0  ;;  %v4429_v13 = vld [vmem:[#allocation7 + $0x90] sm:$0xff] }
 0x479   : > { %9941 = vmatprep.subr.bf16.mxu0 %v9940_v42  ;;  %v10000_v42 = vpack.c.bf16 %v4430_v14, %v4429_v13  ;;  %v4548_v13 = vld [vmem:[#allocation8 + $0x90] sm:$0xff]  ;;  %v4549_v14 = vld [vmem:[#allocation8 + $0x98] sm:$0xff] }
 0x47b   : > { %9014 = vmatmul.mubr.msk.f32.gmra.mrb[4].mxu0 %vm909_vm1, %v3985_v20  ;;  %10001 = vmatpush1.bf16.msra.mxu1 %v10000_v42  ;;  %v4391_v20 = vsub.s32 1, %v12953_v17  ;;  %v10030_v42 = vpack.c.bf16 %v4549_v14, %v4548_v13 }
 0x47c   : > { %9943 = vmatpush1.bf16.msra.mxu0 %v9942_v19  ;;  %4084 = vmatprep.mubr.f32.mxu0 %v11857_v0  ;;  %v4383_v19 = vld [vmem:[#allocation5] sm:$0x3] }
 0x47d   : > { %9945 = vmatprep.subr.bf16.mxu0 %v9944_v21  ;;  %4485 = vmatprep.subr.mxu1 %v11857_v0  ;;  %v4388_v21 = vrot.slane %v4383_v19, %v4387_v18  ;;  %v4392_v22 = vrot.slane %v4383_v19, %v4391_v20  ;;  %v4727_v19 = vld [vmem:[#allocation11] sm:$0xff] }
 0x47f   : > { %9015 = vmatmul.mubr.msk.f32.gmra.mrb[6].mxu0 %vm909_vm1, %v3987_v26  ;;  %4486 = vmatpush1.msra.mxu1 %v4431_v15  ;;  %v4531_v26 = vld [vmem:[#allocation8 + $0x8] sm:$0xff]  ;;  %v4550_v15 = vld [vmem:[#allocation8 + $0xa0] sm:$0xff] }
 0x480   : > { %9947 = vmatpush1.bf16.msra.mxu0 %v9946_v25  ;;  %4208 = vmatprep.mubr.f32.mxu0 %v11857_v0  ;;  %v4530_v25 = vld [vmem:[#allocation8] sm:$0xff] }
 0x481   : > { %9949 = vmatprep.subr.bf16.mxu0 %v9948_v27  ;;  %10002 = vmatprep.subr.bf16.mxu1 %v11862_v58 }
 0x484   : > { %9951 = vmatpush1.bf16.msra.mxu0 %v9950_v30  ;;  %v10003_v30 = vpack.c.bf16 %v4531_v26, %v4530_v25 }
 0x485   : > { %9016 = vmatprep.subr.msk.mxu0 %vm918_vm0, %v4121_v31 }
 0x488   : > { %9017 = vmatpush1.msk.msra.mxu0 %vm918_vm0, %v4120_v38 }
 0x489   : > { %9953 = vmatprep.subr.bf16.mxu0 %v9952_v39  ;;  %9018 = vmatmul.mubr.msk.f32.vlgmr.msra.gmra.mrb[0].mxu0 %vm909_vm1, %v4123_v44  ;;  %v10006_v39 = vpack.c.bf16 %v4533_v35, %v4532_v34 }
 0x48a   : > { %9955 = vmatpush1.bf16.msra.mxu0 %v9954_v1  ;;  %4214 = vmatprep.mubr.f32.mxu0 %v11857_v0 }
 0x48b   : > { %9957 = vmatprep.subr.bf16.mxu0 %v9956_v45 }
 0x48d   : > { %9019 = vmatmul.mubr.msk.f32.gmra.mrb[2].mxu0 %vm909_vm1, %v4125_v51  ;;  %v10009_v51 = vpack.c.bf16 %v4535_v47, %v4534_v46  ;;  %v4641_v46 = vld [vmem:[#allocation10 + $0x8] sm:$0x3f]  ;;  %v4728_v47 = vld [vmem:[#allocation11 + $0x8] sm:$0x3f] }
 0x48e   : > { %9959 = vmatpush1.bf16.msra.mxu0 %v9958_v2  ;;  %4220 = vmatprep.mubr.f32.mxu0 %v11857_v0 }
 0x48f   : > { %9961 = vmatprep.subr.bf16.mxu0 %v9960_v52 }
 0x491   : > { %9020 = vmatmul.mubr.msk.f32.gmra.mrb[4].mxu0 %vm909_vm1, %v4127_v60 }
 0x492   : > { %9963 = vmatpush1.bf16.msra.mxu0 %v9962_v57  ;;  %4226 = vmatprep.mubr.f32.mxu0 %v11857_v0 }
 0x493   : > { %9965 = vmatprep.subr.bf16.mxu0 %v9964_v4  ;;  %v10012_v4 = vpack.c.bf16 %v4537_v56, %v4536_v54 }
 0x495   : > { %9021 = vmatmul.mubr.msk.f32.gmra.mrb[6].mxu0 %vm909_vm1, %v4129_v6  ;;  %v4541_v6 = vld [vmem:[#allocation8 + $0x58] sm:$0xff] }
 0x496   : > { %9967 = vmatpush1.bf16.msra.mxu0 %v9966_v5  ;;  %4350 = vmatprep.mubr.f32.mxu0 %v11857_v0  ;;  %v4540_v5 = vld [vmem:[#allocation8 + $0x50] sm:$0xff] }
 0x497   : > { %9969 = vmatprep.subr.bf16.mxu0 %v9968_v59  ;;  %v10018_v59 = vpack.c.bf16 %v4541_v6, %v4540_v5  ;;  %v4839_v5 = vld [vmem:[#allocation13 + $0xd0] sm:$0xff]  ;;  %v4842_v6 = vld [vmem:[#allocation13 + $0xe8] sm:$0xff] }
 0x49a   : > { %9971 = vmatpush1.bf16.msra.mxu0 %v9970_v7  ;;  %v10021_v7 = vpack.c.bf16 %v4543_v55, %v4542_v40 }
 0x49b   : > { %9022 = vmatprep.subr.msk.mxu0 %vm918_vm0, %v4263_v8  ;;  %v4544_v8 = vld [vmem:[#allocation8 + $0x70] sm:$0xff] }
 0x49e   : > { %9023 = vmatpush1.msk.msra.mxu0 %vm918_vm0, %v4262_v9  ;;  %v4545_v9 = vld [vmem:[#allocation8 + $0x78] sm:$0xff] }
 0x49f   : > { %9024 = vmatmul.mubr.msk.f32.vlgmr.msra.gmra.mrb[0].mxu0 %vm909_vm1, %v4265_v10  ;;  %v10024_v10 = vpack.c.bf16 %v4545_v9, %v4544_v8  ;;  %v4843_v8 = vld [vmem:[#allocation13 + $0xf0] sm:$0xf] }
 0x4a0   : > { %4356 = vmatprep.mubr.f32.mxu0 %v11857_v0 }
 0x4a3   : > { %9025 = vmatmul.mubr.msk.f32.gmra.mrb[2].mxu0 %vm909_vm1, %v4267_v11  ;;  %v4546_v11 = vld [vmem:[#allocation8 + $0x80] sm:$0xff] }
 0x4a4   : > { %4362 = vmatprep.mubr.f32.mxu0 %v11857_v0 }
 0x4a7   : > { %9026 = vmatmul.mubr.msk.f32.gmra.mrb[4].mxu0 %vm909_vm1, %v4269_v41  ;;  %v4547_v41 = vld [vmem:[#allocation8 + $0x88] sm:$0xff] }
 0x4a8   : > { %4368 = vmatprep.mubr.f32.mxu0 %v11857_v0 }
 0x4ab   : > { %9027 = vmatmul.mubr.msk.f32.gmra.mrb[6].mxu0 %vm909_vm1, %v4271_v12  ;;  %v10027_v12 = vpack.c.bf16 %v4547_v41, %v4546_v11  ;;  %v4815_v11 = vld [vmem:[#allocation13 + $0x18] sm:$0xff] }
 0x4ac   : > { %9271 = vmatprep.mubr.msk.f32.mxu0 %vm4642_vm3, %v4640_v16 }
 0x572   : > { %v4352_v43 = vpop.f32.mrb[0].mxu0 }
 0x573   : > { %v12961_v23 = vadd.f32 %v4388_v21, %v4352_v43  ;;  %v4354_v24 = vpop.f32.mrb[1].mxu0 }
 0x574   : > { %v4396_v27 = vadd.f32 %v4392_v22, %v4354_v24 }
 0x575   : > { %v4403_v31 = vmax.f32 %v12961_v23, 0.0 }
 0x576   : > { %v4404_v28 = vmax.f32 %v4396_v27, 0.0  ;;  %v4358_v29 = vpop.f32.mrb[2].mxu0 }
 0x577   : > { %v12964_v32 = vadd.f32 %v4388_v21, %v4358_v29  ;;  %v4360_v33 = vpop.f32.mrb[3].mxu0 }
 0x578   : > { %v12966_v36 = vadd.f32 %v4392_v22, %v4360_v33  ;;  %9028 = vmatprep.mubr.msk.f32.mxu1 %vm4432_vm2, %v4404_v28 }
 0x579   : > { %4510 = vmatmul.mubr.f32.vlgmr.msra.gmra.mrb[0].mxu1 %v4403_v31  ;;  %v4405_v44 = vmax.f32 %v12964_v32, 0.0 }
 0x57a   : > { %v4406_v37 = vmax.f32 %v12966_v36, 0.0  ;;  %10004 = vmatpush1.bf16.msra.mxu1 %v10003_v30  ;;  %v4364_v38 = vpop.f32.mrb[4].mxu0 }
 0x57b   : > { %v12973_v1 = vadd.f32 %v4388_v21, %v4364_v38  ;;  %v4366_v45 = vpop.f32.mrb[5].mxu0  ;;  %10005 = vmatprep.subr.bf16.mxu1 %v11862_v58 }
 0x57c   : > { %v4400_v48 = vadd.f32 %v4392_v22, %v4366_v45  ;;  %9029 = vmatprep.mubr.msk.f32.mxu1 %vm4432_vm2, %v4406_v37 }
 0x57d   : > { %4515 = vmatmul.mubr.f32.gmra.mrb[2].mxu1 %v4405_v44  ;;  %v4407_v52 = vmax.f32 %v12973_v1, 0.0 }
 0x57e   : > { %v4408_v49 = vmax.f32 %v4400_v48, 0.0  ;;  %10007 = vmatpush1.bf16.msra.mxu1 %v10006_v39  ;;  %v4370_v2 = vpop.f32.mrb[6].mxu0  ;;  %v4830_v48 = vld [vmem:[#allocation13 + $0x88] sm:$0xff] }
 0x57f   : > { %v4401_v53 = vadd.f32 %v4388_v21, %v4370_v2  ;;  %v4372_v3 = vpop.f32.mrb[7].mxu0  ;;  %10008 = vmatprep.subr.bf16.mxu1 %v11862_v58  ;;  %v4829_v2 = vld [vmem:[#allocation13 + $0x80] sm:$0xff] }
 0x580   : > { %v4402_v57 = vadd.f32 %v4392_v22, %v4372_v3  ;;  %9030 = vmatprep.mubr.msk.f32.mxu1 %vm4432_vm2, %v4408_v49  ;;  %v4836_v3 = vld [vmem:[#allocation13 + $0xb8] sm:$0xff] }
 0x581   : > { %4520 = vmatmul.mubr.f32.gmra.mrb[4].mxu1 %v4407_v52  ;;  %v4409_v61 = vmax.f32 %v4401_v53, 0.0  ;;  %v4834_v53 = vld [vmem:[#allocation13 + $0xa8] sm:$0xff] }
 0x582   : > { %v4410_v60 = vmax.f32 %v4402_v57, 0.0  ;;  %10010 = vmatpush1.bf16.msra.mxu1 %v10009_v51  ;;  %v10056_v56 = vpack.c.bf16 %v4836_v3, %v4834_v53  ;;  %v4833_v57 = vld [vmem:[#allocation13 + $0xa0] sm:$0xff] }
 0x583   : > { %10011 = vmatprep.subr.bf16.mxu1 %v11862_v58 }
 0x584   : > { %9031 = vmatprep.mubr.msk.f32.mxu1 %vm4432_vm2, %v4410_v60 }
 0x585   : > { %4525 = vmatmul.mubr.f32.gmra.mrb[6].mxu1 %v4409_v61 }
 0x586   : > { %10013 = vmatpush1.bf16.msra.mxu1 %v10012_v4  ;;  %9032 = vmatprep.mubr.msk.f32.mxu1 %vm4432_vm2, %v4404_v28  ;;  %v4838_v4 = vld [vmem:[#allocation13 + $0xc8] sm:$0xff] }
 0x587   : > { %10014 = vmatprep.subr.bf16.mxu1 %v11862_v58 }
 0x58a   : > { %10016 = vmatpush1.bf16.msra.mxu1 %v10015_v63  ;;  %v4837_v63 = vld [vmem:[#allocation13 + $0xc0] sm:$0xff] }
 0x58b   : > { %10017 = vmatprep.subr.bf16.mxu1 %v11862_v58  ;;  %v10062_v40 = vpack.c.bf16 %v4839_v5, %v4837_v63  ;;  %v5032_v63 = vld [vmem:[#allocation13 + $0x128] sm:$0xff]  ;;  %v5034_v5 = vld [vmem:[#allocation13 + $0x138] sm:$0xff] }
 0x58e   : > { %10019 = vmatpush1.bf16.msra.mxu1 %v10018_v59  ;;  %v4844_v59 = vld [vmem:[#allocation13 + $0xf8] sm:$0xf] }
 0x58f   : > { %10020 = vmatprep.subr.bf16.mxu1 %v11862_v58  ;;  %v10064_v55 = vpack.c.bf16 %v4844_v59, %v4842_v6  ;;  %v10092_v59 = vpack.c.bf16 %v5034_v5, %v5032_v63  ;;  %v5256_v63 = vld [vmem:[#allocation13 + $0x228] sm:$0xff]  ;;  %v5258_v5 = vld [vmem:[#allocation13 + $0x238] sm:$0xff] }
 0x592   : > { %10022 = vmatpush1.bf16.msra.mxu1 %v10021_v7  ;;  %v4841_v7 = vld [vmem:[#allocation13 + $0xe0] sm:$0xff] }
 0x593   : > { %10023 = vmatprep.subr.bf16.mxu1 %v11862_v58  ;;  %v10067_v9 = vpack.c.bf16 %v4843_v8, %v4841_v7  ;;  %v5036_v7 = vld [vmem:[#allocation13 + $0x148] sm:$0xff]  ;;  %v5038_v8 = vld [vmem:[#allocation13 + $0x158] sm:$0xff] }
 0x596   : > { %10025 = vmatpush1.bf16.msra.mxu1 %v10024_v10  ;;  %v4813_v10 = vld [vmem:[#allocation13 + $0x8] sm:$0xff] }
 0x597   : > { %10026 = vmatprep.subr.bf16.mxu1 %v11862_v58  ;;  %v10070_v41 = vpack.c.bf16 %v4815_v11, %v4813_v10  ;;  %v10096_v10 = vpack.c.bf16 %v5038_v8, %v5036_v7  ;;  %v5035_v11 = vld [vmem:[#allocation13 + $0x140] sm:$0xff]  ;;  %v5260_v8 = vld [vmem:[#allocation13 + $0x248] sm:$0xff] }
 0x59a   : > { %10028 = vmatpush1.bf16.msra.mxu1 %v10027_v12 }
 0x59b   : > { %10029 = vmatprep.subr.bf16.mxu1 %v11862_v58 }
 0x59e   : > { %10031 = vmatpush1.bf16.msra.mxu1 %v10030_v42 }
 0x59f   : > { %4591 = vmatprep.subr.mxu1 %v11857_v0 }
 0x5a2   : > { %4592 = vmatpush1.msra.mxu1 %v4550_v15 }
 0x5a3   : > { %4616 = vmatmul.mubr.f32.vlgmr.msra.gmra.mrb[8].mxu1 %v4403_v31 }
 0x5a4   : > { %9033 = vmatprep.mubr.msk.f32.mxu1 %vm4432_vm2, %v4406_v37 }
 0x5a7   : > { %4621 = vmatmul.mubr.f32.gmra.mrb[10].mxu1 %v4405_v44 }
 0x5a8   : > { %9034 = vmatprep.mubr.msk.f32.mxu1 %vm4432_vm2, %v4408_v49  ;;  %v4832_v49 = vld [vmem:[#allocation13 + $0x98] sm:$0xff] }
 0x5a9   : > { %v10052_v51 = vpack.c.bf16 %v4832_v49, %v4830_v48  ;;  %v4820_v48 = vld [vmem:[#allocation13 + $0x40] sm:$0xff]  ;;  %v4822_v49 = vld [vmem:[#allocation13 + $0x50] sm:$0xff] }
 0x5aa   : > { %v10080_v53 = vpack.c.bf16 %v4822_v49, %v4820_v48  ;;  %v5147_v48 = vld [vmem:[#allocation13 + $0x1c0] sm:$0xff]  ;;  %v5149_v49 = vld [vmem:[#allocation13 + $0x1d0] sm:$0xff] }
 0x5ab   : > { %4626 = vmatmul.mubr.f32.gmra.mrb[12].mxu1 %v4407_v52  ;;  %v4831_v52 = vld [vmem:[#allocation13 + $0x90] sm:$0xff] }
 0x5ac   : > { %9035 = vmatprep.mubr.msk.f32.mxu1 %vm4432_vm2, %v4410_v60  ;;  %v10054_v54 = vpack.c.bf16 %v4831_v52, %v4829_v2  ;;  %v4835_v60 = vld [vmem:[#allocation13 + $0xb0] sm:$0xff]  ;;  %v4827_v52 = vld [vmem:[#allocation13 + $0x78] sm:$0xf]  ;;  %vm8417_vm2 = vcmask 982016  }
 0x5ad   : > { %v10058_v50 = vpack.c.bf16 %v4835_v60, %v4833_v57  ;;  %v5028_v57 = vld [vmem:[#allocation13 + $0x108] sm:$0xff]  ;;  %v5030_v60 = vld [vmem:[#allocation13 + $0x118] sm:$0xff] }
 0x5af   : > { %4631 = vmatmul.mubr.f32.gmra.mrb[14].mxu1 %v4409_v61  ;;  %v4840_v61 = vld [vmem:[#allocation13 + $0xd8] sm:$0xff] }
 0x5b0   : > { %9282 = vmatprep.mubr.msk.f32.mxu1 %vm4642_vm3, %v4727_v19  ;;  %v10060_v62 = vpack.c.bf16 %v4840_v61, %v4838_v4  ;;  %v10088_v61 = vpack.c.bf16 %v5030_v60, %v5028_v57  ;;  %v5252_v57 = vld [vmem:[#allocation13 + $0x208] sm:$0xff]  ;;  %v5254_v60 = vld [vmem:[#allocation13 + $0x218] sm:$0xff] }
 0x64c   : > { %v4511_v21 = vpop.f32.mrb[0].mxu1 }
 0x64d   : > { %v4513_v22 = vpop.f32.mrb[1].mxu1 }
 0x650   : > { %v4516_v43 = vpop.f32.mrb[2].mxu1 }
 0x651   : > { %v4518_v23 = vpop.f32.mrb[3].mxu1 }
 0x654   : > { %v4521_v24 = vpop.f32.mrb[4].mxu1 }
 0x655   : > { %v4523_v25 = vpop.f32.mrb[5].mxu1 }
 0x658   : > { %v4526_v26 = vpop.f32.mrb[6].mxu1 }
 0x659   : > { %v4528_v27 = vpop.f32.mrb[7].mxu1 }
 0x676   : > { %v4617_v28 = vpop.f32.mrb[8].mxu1 }
 0x677   : > { %v4636_v29 = vmax.f32 %v4511_v21, %v4617_v28  ;;  %v4619_v30 = vpop.f32.mrb[9].mxu1 }
 0x67a   : > { %v4622_v31 = vpop.f32.mrb[10].mxu1 }
 0x67b   : > { %v4637_v32 = vmax.f32 %v4516_v43, %v4622_v31  ;;  %v4624_v33 = vpop.f32.mrb[11].mxu1  ;;  %v4812_v31 = vld [vmem:[#allocation13] sm:$0xff] }
 0x67c   : > { %v4817_v33 = vld [vmem:[#allocation13 + $0x28] sm:$0xff] }
 0x67d   : > { %v10032_v34 = vpack.c.bf16 %v4637_v32, %v4636_v29  ;;  %v4814_v32 = vld [vmem:[#allocation13 + $0x10] sm:$0xff] }
 0x67e   : > { %v4627_v35 = vpop.f32.mrb[12].mxu1 }
 0x67f   : > { %v4638_v36 = vmax.f32 %v4521_v24, %v4627_v35  ;;  %v4629_v37 = vpop.f32.mrb[13].mxu1  ;;  %10033 = vmatprep.subr.bf16.mxu0 %v10032_v34  ;;  %10043 = vmatprep.subr.bf16.mxu1 %v10032_v34  ;;  %v10072_v35 = vpack.c.bf16 %v4814_v32, %v4812_v31  ;;  %v5139_v32 = vld [vmem:[#allocation13 + $0x180] sm:$0xff] }
 0x680   : > { %10035 = vmatpush3.bf16.msra.mxu0 %v10032_v34  ;;  %10045 = vmatpush3.bf16.msra.mxu1 %v10032_v34  ;;  %v4819_v34 = vld [vmem:[#allocation13 + $0x38] sm:$0xff]  ;;  %v4816_v37 = vld [vmem:[#allocation13 + $0x20] sm:$0xff] }
 0x682   : > { %v4632_v38 = vpop.f32.mrb[14].mxu1 }
 0x683   : > { %v4639_v39 = vmax.f32 %v4526_v26, %v4632_v38  ;;  %v4634_v44 = vpop.f32.mrb[15].mxu1  ;;  %v4818_v38 = vld [vmem:[#allocation13 + $0x30] sm:$0xff] }
 0x684   : > { %v4821_v44 = vld [vmem:[#allocation13 + $0x48] sm:$0xff] }
 0x685   : > { %v10036_v45 = vpack.c.bf16 %v4639_v39, %v4638_v36  ;;  %v10074_v36 = vpack.c.bf16 %v4819_v34, %v4817_v33  ;;  %v5141_v33 = vld [vmem:[#allocation13 + $0x190] sm:$0xff]  ;;  %v5144_v34 = vld [vmem:[#allocation13 + $0x1a8] sm:$0xff] }
 0x687   : > { %10038 = vmatprep.subr.msk.bf16.mxu0 %vm13007_vm5, %v10036_v45  ;;  %10048 = vmatprep.subr.msk.bf16.mxu1 %vm13007_vm5, %v10036_v45 }
 0x688   : > { %10041 = vmatpush3.bf16.msk.msra.mxu0 %vm13007_vm5, %v10036_v45  ;;  %10051 = vmatpush3.bf16.msk.msra.mxu1 %vm13007_vm5, %v10036_v45  ;;  %v4823_v45 = vld [vmem:[#allocation13 + $0x58] sm:$0xff] }
 0x689   : > { %10562 = vmatprep.subr.bf16.mxu0 %v11862_v58  ;;  %10053 = vmatprep.subr.bf16.mxu1 %v10052_v51  ;;  %v4825_v51 = vld [vmem:[#allocation13 + $0x68] sm:$0xff] }
 0x68a   : > { %v10082_v3 = vpack.c.bf16 %v4827_v52, %v4825_v51  ;;  %v5152_v51 = vld [vmem:[#allocation13 + $0x1e8] sm:$0xff]  ;;  %v5154_v52 = vld [vmem:[#allocation13 + $0x1f8] sm:$0xf] }
 0x68b   : > { %9272 = vmatmul.mubr.msk.f32.vlgmr.msra.gmra.mrb[8].mxu0 %vm4642_vm3, %v4641_v46  ;;  %9283 = vmatmul.mubr.msk.f32.vlgmr.msra.gmra.mrb[16].mxu1 %vm4642_vm3, %v4728_v47  ;;  %v10076_v46 = vpack.c.bf16 %v4818_v38, %v4816_v37  ;;  %v10078_v47 = vpack.c.bf16 %v4823_v45, %v4821_v44  ;;  %v5143_v37 = vld [vmem:[#allocation13 + $0x1a0] sm:$0xff]  ;;  %v5145_v38 = vld [vmem:[#allocation13 + $0x1b0] sm:$0xff]  ;;  %v5148_v44 = vld [vmem:[#allocation13 + $0x1c8] sm:$0xff]  ;;  %vm8580_vm3 = vcmask 8192  }
 0x68c   : > { %4926 = vmatprep.mubr.f32.mxu1 %v11857_v0  ;;  %10055 = vmatpush1.bf16.msra.mxu1 %v10054_v54  ;;  %v4824_v54 = vld [vmem:[#allocation13 + $0x60] sm:$0xff]  ;;  %v5150_v45 = vld [vmem:[#allocation13 + $0x1d8] sm:$0xff] }
 0x68d   : > { %10057 = vmatprep.subr.bf16.mxu1 %v10056_v56  ;;  %v4826_v56 = vld [vmem:[#allocation13 + $0x70] sm:$0xf]  ;;  %9289 = vmatprep.mubr.msk.f32.mxu0 %vm11866_vm11, %v11857_v0 }
 0x68e   : > { %v10085_v4 = vpack.c.bf16 %v4826_v56, %v4824_v54  ;;  %v5151_v54 = vld [vmem:[#allocation13 + $0x1e0] sm:$0xff]  ;;  %v5153_v56 = vld [vmem:[#allocation13 + $0x1f0] sm:$0xf] }
 0x690   : > { %10059 = vmatpush1.bf16.msra.mxu1 %v10058_v50  ;;  %v5027_v50 = vld [vmem:[#allocation13 + $0x100] sm:$0xff] }
 0x691   : > { %10061 = vmatprep.subr.bf16.mxu1 %v10060_v62  ;;  %v5029_v62 = vld [vmem:[#allocation13 + $0x110] sm:$0xff] }
 0x692   : > { %v10090_v6 = vpack.c.bf16 %v5029_v62, %v5027_v50  ;;  %v5251_v50 = vld [vmem:[#allocation13 + $0x200] sm:$0xff]  ;;  %v5253_v62 = vld [vmem:[#allocation13 + $0x210] sm:$0xff] }
 0x694   : > { %10063 = vmatpush1.bf16.msra.mxu1 %v10062_v40  ;;  %v5031_v40 = vld [vmem:[#allocation13 + $0x120] sm:$0xff] }
 0x695   : > { %10066 = vmatprep.subr.msk.bf16.mxu1 %vm13007_vm5, %v10064_v55  ;;  %v5033_v55 = vld [vmem:[#allocation13 + $0x130] sm:$0xff] }
 0x698   : > { %10069 = vmatpush1.bf16.msk.msra.mxu1 %vm13007_vm5, %v10067_v9  ;;  %v10094_v9 = vpack.c.bf16 %v5033_v55, %v5031_v40  ;;  %v5255_v40 = vld [vmem:[#allocation13 + $0x220] sm:$0xff]  ;;  %v5257_v55 = vld [vmem:[#allocation13 + $0x230] sm:$0xff] }
 0x699   : > { %10071 = vmatprep.subr.bf16.mxu1 %v10070_v41  ;;  %v5037_v41 = vld [vmem:[#allocation13 + $0x150] sm:$0xff] }
 0x75e   : > { %v9273_v12 = vpop.f32.mrb[8].mxu0  ;;  %v9284_v13 = vpop.f32.mrb[16].mxu1 }
 0x75f   : > { %v13027_v14 = vmax.f32 %v9273_v12, %v9284_v13  ;;  %v4718_v42 = vpop.f32.mrb[9].mxu0  ;;  %v4801_v15 = vpop.f32.mrb[17].mxu1  ;;  %v5040_v12 = vld [vmem:[#allocation13 + $0x168] sm:$0xff]  ;;  %v5042_v13 = vld [vmem:[#allocation13 + $0x178] sm:$0xf] }
 0x760   : > { %v13029_v16 = vmax.f32 %v4718_v42, %v4801_v15  ;;  %v10098_v42 = vpack.c.bf16 %v5037_v41, %v5035_v11  ;;  %v10100_v15 = vpack.c.bf16 %v5042_v13, %v5040_v12  ;;  %v5259_v41 = vld [vmem:[#allocation13 + $0x240] sm:$0xff]  ;;  %v5261_v12 = vld [vmem:[#allocation13 + $0x250] sm:$0xff] }
 0x761   : > { %4849 = vrot.lane.b32.xlu1 %v13027_v14, %s11859_s24  ;;  %v13046_v19 = vrot.slane %v13027_v14, 1  ;;  %v13069_v43 = vrot.slane %v13027_v14, 2  ;;  %v13092_v25 = vrot.slane %v13027_v14, 3  ;;  %v13115_v28 = vrot.slane %v13027_v14, 4 }
 0x762   : > { %4847 = vrot.lane.b32.xlu0 %v13029_v16, %s11859_s24  ;;  %v5380_v21 = vrot.slane %v13029_v16, 1  ;;  %v5940_v23 = vrot.slane %v13029_v16, 2  ;;  %v6500_v26 = vrot.slane %v13029_v16, 3  ;;  %v7059_v29 = vrot.slane %v13029_v16, 4 }
 0x764   : > { %v13054_v22 = vsel %vm5379_vm6, %v5380_v21, %v13046_v19  ;;  %v13077_v24 = vsel %vm5939_vm7, %v5940_v23, %v13069_v43  ;;  %v13100_v27 = vsel %vm6499_vm8, %v6500_v26, %v13092_v25  ;;  %v13124_v30 = vsel %vm918_vm0, %v7059_v29, %v13115_v28  ;;  %v5041_v21 = vld [vmem:[#allocation13 + $0x170] sm:$0xf]  ;;  %v5140_v23 = vld [vmem:[#allocation13 + $0x188] sm:$0xff]  ;;  %v5142_v26 = vld [vmem:[#allocation13 + $0x198] sm:$0xff] }
 0x765   : > { %5045 = vrot.lane.b32.xlu1 %v13027_v14, %s11861_s20  ;;  %v10106_v31 = vpack.c.bf16 %v5142_v26, %v5140_v23  ;;  %v5263_v23 = vld [vmem:[#allocation13 + $0x260] sm:$0xff]  ;;  %v5265_v26 = vld [vmem:[#allocation13 + $0x270] sm:$0xf] }
 0x766   : > { %5043 = vrot.lane.b32.xlu0 %v13029_v16, %s11861_s20 }
 0x769   : > { %5157 = vrot.lane.b32.xlu1 %v13027_v14, %s11864_s19 }
 0x76a   : > { %5155 = vrot.lane.b32.xlu0 %v13029_v16, %s11864_s19 }
 0x76d   : > { %5269 = vrot.lane.b32.xlu1 %v13027_v14, %s11865_s4 }
 0x76e   : > { %5267 = vrot.lane.b32.xlu0 %v13029_v16, %s11865_s4 }
 0x771   : > { %5493 = vrot.lane.b32.xlu1 %v13046_v19, %s11859_s24 }
 0x772   : > { %5491 = vrot.lane.b32.xlu0 %v13054_v22, %s11859_s24 }
 0x775   : > { %5605 = vrot.lane.b32.xlu1 %v13046_v19, %s11861_s20 }
 0x776   : > { %5603 = vrot.lane.b32.xlu0 %v13054_v22, %s11861_s20 }
 0x779   : > { %5717 = vrot.lane.b32.xlu1 %v13046_v19, %s11864_s19 }
 0x77a   : > { %5715 = vrot.lane.b32.xlu0 %v13054_v22, %s11864_s19 }
 0x77d   : > { %5829 = vrot.lane.b32.xlu1 %v13046_v19, %s11865_s4 }
 0x77e   : > { %5827 = vrot.lane.b32.xlu0 %v13054_v22, %s11865_s4 }
 0x781   : > { %6053 = vrot.lane.b32.xlu1 %v13069_v43, %s11859_s24 }
 0x782   : > { %6051 = vrot.lane.b32.xlu0 %v13077_v24, %s11859_s24 }
 0x785   : > { %6165 = vrot.lane.b32.xlu1 %v13069_v43, %s11861_s20 }
 0x786   : > { %6163 = vrot.lane.b32.xlu0 %v13077_v24, %s11861_s20 }
 0x789   : > { %6277 = vrot.lane.b32.xlu1 %v13069_v43, %s11864_s19 }
 0x78a   : > { %6275 = vrot.lane.b32.xlu0 %v13077_v24, %s11864_s19 }
 0x78d   : > { %6389 = vrot.lane.b32.xlu1 %v13069_v43, %s11865_s4 }
 0x78e   : > { %6387 = vrot.lane.b32.xlu0 %v13077_v24, %s11865_s4 }
 0x791   : > { %6613 = vrot.lane.b32.xlu1 %v13092_v25, %s11859_s24 }
 0x792   : > { %6611 = vrot.lane.b32.xlu0 %v13100_v27, %s11859_s24 }
 0x795   : > { %6725 = vrot.lane.b32.xlu1 %v13092_v25, %s11861_s20 }
 0x796   : > { %6723 = vrot.lane.b32.xlu0 %v13100_v27, %s11861_s20 }
 0x799   : > { %6837 = vrot.lane.b32.xlu1 %v13092_v25, %s11864_s19 }
 0x79a   : > { %6835 = vrot.lane.b32.xlu0 %v13100_v27, %s11864_s19 }
 0x79d   : > { %6949 = vrot.lane.b32.xlu1 %v13092_v25, %s11865_s4 }
 0x79e   : > { %6947 = vrot.lane.b32.xlu0 %v13100_v27, %s11865_s4 }
 0x7a1   : > { %7172 = vrot.lane.b32.xlu1 %v13115_v28, %s11859_s24 }
 0x7a2   : > { %7170 = vrot.lane.b32.xlu0 %v13124_v30, %s11859_s24  ;;  %s11737_s24 = scalar_lea.vmem %s11736_s23, 32 }
 0x7a3   : > { %p11739_p11 = scmp.lt.s32.totalorder %s11737_s24, %s11731_s10 }
 0x7a5   : > { %7284 = vrot.lane.b32.xlu1 %v13115_v28, %s11861_s20  ;;  %p11740_p13 = por %p11739_p11, %p11738_p8 }
 0x7a6   : > { %7282 = vrot.lane.b32.xlu0 %v13124_v30, %s11861_s20 }
 0x7a7   : > { %p11741_p1 = pnand %p11740_p13, %p11734_p7 }
 0x7a9   : > { %7396 = vrot.lane.b32.xlu1 %v13115_v28, %s11864_s19 }
 0x7aa   : > { %7394 = vrot.lane.b32.xlu0 %v13124_v30, %s11864_s19 }
 0x7ad   : > { %7508 = vrot.lane.b32.xlu1 %v13115_v28, %s11865_s4 }
 0x7ae   : > { %7506 = vrot.lane.b32.xlu0 %v13124_v30, %s11865_s4 }
 0x7d3   : > { %v4850_v2 = vpop.permute.xlu1 %4849 }
 0x7d4   : > { %v4848_v39 = vpop.permute.xlu0 %4847 }
 0x7d5   : > { %9044 = vmatmul.mubr.msk.f32.vlgmr.msra.gmra.mrb[18].mxu1 %vm4851_vm9, %v4848_v39 }
 0x7d6   : > { %10073 = vmatpush1.bf16.msra.mxu1 %v10072_v35  ;;  %4932 = vmatprep.mubr.f32.mxu1 %v11857_v0  ;;  %v10108_v35 = vpack.c.bf16 %v5141_v33, %v5139_v32  ;;  %v10139_v32 = vpack.c.bf16 %v5265_v26, %v5263_v23  ;;  %v5489_v23 = vld [vmem:[#allocation13 + $0x370] sm:$0xf]  ;;  %v5588_v26 = vld [vmem:[#allocation13 + $0x388] sm:$0xff] }
 0x7d7   : > { %10075 = vmatprep.subr.bf16.mxu1 %v10074_v36 }
 0x7d8   : > { %v5044_v39 = vpop.permute.xlu0 %5043 }
 0x7d9   : > { %9045 = vmatmul.mubr.msk.f32.gmra.mrb[20].mxu1 %vm4851_vm9, %v4850_v2  ;;  %v5046_v2 = vpop.permute.xlu1 %5045 }
 0x7da   : > { %10077 = vmatpush1.bf16.msra.mxu1 %v10076_v46  ;;  %5013 = vmatprep.mubr.f32.mxu1 %v11857_v0  ;;  %v10112_v46 = vpack.c.bf16 %v5145_v38, %v5143_v37 }
 0x7db   : > { %10079 = vmatprep.subr.bf16.mxu1 %v10078_v47  ;;  %v10114_v47 = vpack.c.bf16 %v5150_v45, %v5148_v44  ;;  %v5369_v44 = vld [vmem:[#allocation13 + $0x2b0] sm:$0xff] }
 0x7dc   : > { %v5156_v7 = vpop.permute.xlu0 %5155 }
 0x7dd   : > { %v5158_v13 = vpop.permute.xlu1 %5157 }
 0x7de   : > { %10081 = vmatpush1.bf16.msra.mxu1 %v10080_v53  ;;  %v10116_v53 = vpack.c.bf16 %v5149_v49, %v5147_v48 }
 0x7df   : > { %10084 = vmatprep.subr.msk.bf16.mxu1 %vm13007_vm5, %v10082_v3  ;;  %v10118_v3 = vpack.c.bf16 %v5154_v52, %v5152_v51  ;;  %v5373_v51 = vld [vmem:[#allocation13 + $0x2d0] sm:$0xff] }
 0x7e0   : > { %v5268_v45 = vpop.permute.xlu0 %5267 }
 0x7e1   : > { %v5270_v52 = vpop.permute.xlu1 %5269 }
 0x7e2   : > { %10087 = vmatpush1.bf16.msk.msra.mxu1 %vm13007_vm5, %v10085_v4  ;;  %v10121_v4 = vpack.c.bf16 %v5153_v56, %v5151_v54 }
 0x7e3   : > { %10089 = vmatprep.subr.bf16.mxu1 %v10088_v61  ;;  %v10124_v61 = vpack.c.bf16 %v5254_v60, %v5252_v57  ;;  %v5375_v57 = vld [vmem:[#allocation13 + $0x2e0] sm:$0xff]  ;;  %v5377_v60 = vld [vmem:[#allocation13 + $0x2f0] sm:$0xf] }
 0x7e5   : > { %9048 = vmatmul.mubr.msk.f32.vlgmr.msra.gmra.mrb[18].mxu1 %vm4851_vm9, %v13029_v16  ;;  %v5039_v16 = vld [vmem:[#allocation13 + $0x160] sm:$0xff] }
 0x7e6   : > { %10091 = vmatpush1.bf16.msra.mxu1 %v10090_v6  ;;  %5019 = vmatprep.mubr.f32.mxu1 %v11857_v0  ;;  %v10103_v29 = vpack.c.bf16 %v5041_v21, %v5039_v16  ;;  %v10126_v6 = vpack.c.bf16 %v5253_v62, %v5251_v50  ;;  %v10134_v16 = vpack.c.bf16 %v5261_v12, %v5259_v41  ;;  %v5483_v12 = vld [vmem:[#allocation13 + $0x340] sm:$0xff] }
 0x7e7   : > { %10093 = vmatprep.subr.bf16.mxu1 %v10092_v59  ;;  %v10128_v59 = vpack.c.bf16 %v5258_v5, %v5256_v63  ;;  %v10157_v50 = vpack.c.bf16 %v5377_v60, %v5375_v57  ;;  %v5475_v63 = vld [vmem:[#allocation13 + $0x300] sm:$0xff]  ;;  %v5477_v5 = vld [vmem:[#allocation13 + $0x310] sm:$0xff]  ;;  %v5700_v57 = vld [vmem:[#allocation13 + $0x408] sm:$0xff] }
 0x7e8   : > { %v5702_v60 = vld [vmem:[#allocation13 + $0x418] sm:$0xff] }
 0x7e9   : > { %9049 = vmatmul.mubr.msk.f32.gmra.mrb[20].mxu1 %vm4851_vm9, %v13027_v14  ;;  %v5146_v14 = vld [vmem:[#allocation13 + $0x1b8] sm:$0xff] }
 0x7ea   : > { %10095 = vmatpush1.bf16.msra.mxu1 %v10094_v9  ;;  %5121 = vmatprep.mubr.f32.mxu1 %v11857_v0  ;;  %v10110_v36 = vpack.c.bf16 %v5146_v14, %v5144_v34  ;;  %v5262_v9 = vld [vmem:[#allocation13 + $0x258] sm:$0xff]  ;;  %v5363_v34 = vld [vmem:[#allocation13 + $0x280] sm:$0xff]  ;;  %v5365_v14 = vld [vmem:[#allocation13 + $0x290] sm:$0xff] }
 0x7eb   : > { %10097 = vmatprep.subr.bf16.mxu1 %v10096_v10  ;;  %v10130_v10 = vpack.c.bf16 %v5257_v55, %v5255_v40  ;;  %v10132_v11 = vpack.c.bf16 %v5262_v9, %v5260_v8  ;;  %v10144_v37 = vpack.c.bf16 %v5365_v14, %v5363_v34  ;;  %v10162_v40 = vpack.c.bf16 %v5477_v5, %v5475_v63  ;;  %v5481_v8 = vld [vmem:[#allocation13 + $0x330] sm:$0xff]  ;;  %v5484_v9 = vld [vmem:[#allocation13 + $0x348] sm:$0xff]  ;;  %v5706_v5 = vld [vmem:[#allocation13 + $0x438] sm:$0xff] }
 0x7ec   : > { %v5589_v34 = vld [vmem:[#allocation13 + $0x390] sm:$0xff]  ;;  %v5592_v14 = vld [vmem:[#allocation13 + $0x3a8] sm:$0xff] }
 0x7ed   : > { %v5704_v63 = vld [vmem:[#allocation13 + $0x428] sm:$0xff] }
 0x7ee   : > { %10099 = vmatpush1.bf16.msra.mxu1 %v10098_v42  ;;  %v5264_v42 = vld [vmem:[#allocation13 + $0x268] sm:$0xff] }
 0x7ef   : > { %10102 = vmatprep.subr.msk.bf16.mxu1 %vm13007_vm5, %v10100_v15  ;;  %v5266_v15 = vld [vmem:[#allocation13 + $0x278] sm:$0xf] }
 0x7f0   : > { %v10136_v21 = vpack.c.bf16 %v5266_v15, %v5264_v42  ;;  %v5488_v42 = vld [vmem:[#allocation13 + $0x368] sm:$0xff]  ;;  %v5490_v15 = vld [vmem:[#allocation13 + $0x378] sm:$0xf] }
 0x7f2   : > { %10105 = vmatpush1.bf16.msk.msra.mxu1 %vm13007_vm5, %v10103_v29  ;;  %v5364_v29 = vld [vmem:[#allocation13 + $0x288] sm:$0xff] }
 0x7f3   : > { %10107 = vmatprep.subr.bf16.mxu1 %v10106_v31  ;;  %v5366_v31 = vld [vmem:[#allocation13 + $0x298] sm:$0xff] }
 0x7f4   : > { %v10142_v33 = vpack.c.bf16 %v5366_v31, %v5364_v29  ;;  %v5590_v29 = vld [vmem:[#allocation13 + $0x398] sm:$0xff] }
 0x7f5   : > { %9052 = vmatmul.mubr.msk.f32.vlgmr.msra.gmra.mrb[18].mxu1 %vm4851_vm9, %v5044_v39  ;;  %v5367_v39 = vld [vmem:[#allocation13 + $0x2a0] sm:$0xff] }
 0x7f6   : > { %10109 = vmatpush1.bf16.msra.mxu1 %v10108_v35  ;;  %5127 = vmatprep.mubr.f32.mxu1 %v11857_v0  ;;  %v5368_v35 = vld [vmem:[#allocation13 + $0x2a8] sm:$0xff]  ;;  %v10148_v48 = vpack.c.bf16 %v5369_v44, %v5367_v39  ;;  %v5492_v39 = vpop.permute.xlu0 %5491 }
 0x7f7   : > { %10111 = vmatprep.subr.bf16.mxu1 %v10110_v36  ;;  %v5370_v36 = vld [vmem:[#allocation13 + $0x2b8] sm:$0xff]  ;;  %v5596_v44 = vld [vmem:[#allocation13 + $0x3c8] sm:$0xff] }
 0x7f8   : > { %v10146_v38 = vpack.c.bf16 %v5370_v36, %v5368_v35 }
 0x7f9   : > { %9053 = vmatmul.mubr.msk.f32.gmra.mrb[20].mxu1 %vm4851_vm9, %v5046_v2  ;;  %v5371_v2 = vld [vmem:[#allocation13 + $0x2c0] sm:$0xff] }
 0x7fa   : > { %10113 = vmatpush1.bf16.msra.mxu1 %v10112_v46  ;;  %5233 = vmatprep.mubr.f32.mxu1 %v11857_v0  ;;  %v5372_v46 = vld [vmem:[#allocation13 + $0x2c8] sm:$0xff]  ;;  %v10152_v54 = vpack.c.bf16 %v5373_v51, %v5371_v2  ;;  %v5494_v2 = vpop.permute.xlu1 %5493 }
 0x7fb   : > { %10115 = vmatprep.subr.bf16.mxu1 %v10114_v47  ;;  %v5374_v47 = vld [vmem:[#allocation13 + $0x2d8] sm:$0xff]  ;;  %v5600_v51 = vld [vmem:[#allocation13 + $0x3e8] sm:$0xff] }
 0x7fc   : > { %v10150_v49 = vpack.c.bf16 %v5374_v47, %v5372_v46 }
 0x7fe   : > { %10117 = vmatpush1.bf16.msra.mxu1 %v10116_v53  ;;  %v5376_v53 = vld [vmem:[#allocation13 + $0x2e8] sm:$0xff] }
 0x7ff   : > { %10120 = vmatprep.subr.msk.bf16.mxu1 %vm13007_vm5, %v10118_v3  ;;  %v5378_v3 = vld [vmem:[#allocation13 + $0x2f8] sm:$0xf] }
 0x800   : > { %v10154_v56 = vpack.c.bf16 %v5378_v3, %v5376_v53 }
 0x802   : > { %10123 = vmatpush1.bf16.msk.msra.mxu1 %vm13007_vm5, %v10121_v4  ;;  %v5476_v4 = vld [vmem:[#allocation13 + $0x308] sm:$0xff] }
 0x803   : > { %10125 = vmatprep.subr.bf16.mxu1 %v10124_v61  ;;  %v5478_v61 = vld [vmem:[#allocation13 + $0x318] sm:$0xff] }
 0x804   : > { %v10160_v62 = vpack.c.bf16 %v5478_v61, %v5476_v4  ;;  %v10196_v61 = vpack.c.bf16 %v5702_v60, %v5700_v57  ;;  %v5924_v57 = vld [vmem:[#allocation13 + $0x508] sm:$0xff]  ;;  %v5926_v60 = vld [vmem:[#allocation13 + $0x518] sm:$0xff] }
 0x805   : > { %9056 = vmatmul.mubr.msk.f32.vlgmr.msra.gmra.mrb[18].mxu1 %vm4851_vm9, %v5156_v7  ;;  %v5479_v7 = vld [vmem:[#allocation13 + $0x320] sm:$0xff] }
 0x806   : > { %10127 = vmatpush1.bf16.msra.mxu1 %v10126_v6  ;;  %5239 = vmatprep.mubr.f32.mxu1 %v11857_v0  ;;  %v5480_v6 = vld [vmem:[#allocation13 + $0x328] sm:$0xff] }
 0x807   : > { %10129 = vmatprep.subr.bf16.mxu1 %v10128_v59  ;;  %v5482_v59 = vld [vmem:[#allocation13 + $0x338] sm:$0xff] }
 0x808   : > { %v10164_v55 = vpack.c.bf16 %v5482_v59, %v5480_v6  ;;  %v10200_v59 = vpack.c.bf16 %v5706_v5, %v5704_v63  ;;  %v5928_v63 = vld [vmem:[#allocation13 + $0x528] sm:$0xff]  ;;  %v5930_v5 = vld [vmem:[#allocation13 + $0x538] sm:$0xff] }
 0x809   : > { %9057 = vmatmul.mubr.msk.f32.gmra.mrb[20].mxu1 %vm4851_vm9, %v5158_v13  ;;  %v5485_v13 = vld [vmem:[#allocation13 + $0x350] sm:$0xff] }
 0x80a   : > { %10131 = vmatpush1.bf16.msra.mxu1 %v10130_v10  ;;  %5345 = vmatprep.mubr.f32.mxu1 %v11857_v0  ;;  %v5486_v10 = vld [vmem:[#allocation13 + $0x358] sm:$0xff] }
 0x80b   : > { %10133 = vmatprep.subr.bf16.mxu1 %v10132_v11  ;;  %v10166_v11 = vpack.c.bf16 %v5481_v8, %v5479_v7  ;;  %v10168_v41 = vpack.c.bf16 %v5486_v10, %v5484_v9  ;;  %v5604_v7 = vpop.permute.xlu0 %5603  ;;  %v5708_v8 = vld [vmem:[#allocation13 + $0x448] sm:$0xff]  ;;  %v5710_v9 = vld [vmem:[#allocation13 + $0x458] sm:$0xff] }
 0x80e   : > { %10135 = vmatpush1.bf16.msra.mxu1 %v10134_v16  ;;  %v10170_v16 = vpack.c.bf16 %v5485_v13, %v5483_v12  ;;  %v5709_v12 = vld [vmem:[#allocation13 + $0x450] sm:$0xff]  ;;  %v5606_v13 = vpop.permute.xlu1 %5605 }
 0x80f   : > { %10138 = vmatprep.subr.msk.bf16.mxu1 %vm13007_vm5, %v10136_v21  ;;  %v10172_v21 = vpack.c.bf16 %v5490_v15, %v5488_v42  ;;  %v5712_v42 = vld [vmem:[#allocation13 + $0x468] sm:$0xff]  ;;  %v5714_v15 = vld [vmem:[#allocation13 + $0x478] sm:$0xf] }
 0x812   : > { %10141 = vmatpush1.bf16.msk.msra.mxu1 %vm13007_vm5, %v10139_v32  ;;  %v10178_v32 = vpack.c.bf16 %v5590_v29, %v5588_v26  ;;  %v5812_v26 = vld [vmem:[#allocation13 + $0x488] sm:$0xff]  ;;  %v5814_v29 = vld [vmem:[#allocation13 + $0x498] sm:$0xff] }
 0x813   : > { %10143 = vmatprep.subr.bf16.mxu1 %v10142_v33  ;;  %v5587_v33 = vld [vmem:[#allocation13 + $0x380] sm:$0xff] }
 0x814   : > { %v10180_v35 = vpack.c.bf16 %v5589_v34, %v5587_v33  ;;  %v5811_v33 = vld [vmem:[#allocation13 + $0x480] sm:$0xff]  ;;  %v5813_v34 = vld [vmem:[#allocation13 + $0x490] sm:$0xff] }
 0x815   : > { %9060 = vmatmul.mubr.msk.f32.vlgmr.msra.gmra.mrb[18].mxu1 %vm4851_vm9, %v5268_v45  ;;  %v5598_v45 = vld [vmem:[#allocation13 + $0x3d8] sm:$0xff] }
 0x816   : > { %10145 = vmatpush1.bf16.msra.mxu1 %v10144_v37  ;;  %5351 = vmatprep.mubr.f32.mxu1 %v11857_v0  ;;  %v5591_v37 = vld [vmem:[#allocation13 + $0x3a0] sm:$0xff]  ;;  %v10186_v47 = vpack.c.bf16 %v5598_v45, %v5596_v44  ;;  %v5820_v44 = vld [vmem:[#allocation13 + $0x4c8] sm:$0xff]  ;;  %v5822_v45 = vld [vmem:[#allocation13 + $0x4d8] sm:$0xff] }
 0x817   : > { %10147 = vmatprep.subr.bf16.mxu1 %v10146_v38  ;;  %v5593_v38 = vld [vmem:[#allocation13 + $0x3b0] sm:$0xff] }
 0x818   : > { %v10184_v46 = vpack.c.bf16 %v5593_v38, %v5591_v37  ;;  %v5815_v37 = vld [vmem:[#allocation13 + $0x4a0] sm:$0xff]  ;;  %v5817_v38 = vld [vmem:[#allocation13 + $0x4b0] sm:$0xff] }
 0x819   : > { %9061 = vmatmul.mubr.msk.f32.gmra.mrb[20].mxu1 %vm4851_vm9, %v5270_v52  ;;  %v5602_v52 = vld [vmem:[#allocation13 + $0x3f8] sm:$0xf] }
 0x81a   : > { %10149 = vmatpush1.bf16.msra.mxu1 %v10148_v48  ;;  %5457 = vmatprep.mubr.f32.mxu1 %v11857_v0  ;;  %v5595_v48 = vld [vmem:[#allocation13 + $0x3c0] sm:$0xff]  ;;  %v10190_v3 = vpack.c.bf16 %v5602_v52, %v5600_v51  ;;  %v5824_v51 = vld [vmem:[#allocation13 + $0x4e8] sm:$0xff]  ;;  %v5826_v52 = vld [vmem:[#allocation13 + $0x4f8] sm:$0xf] }
 0x81b   : > { %10151 = vmatprep.subr.bf16.mxu1 %v10150_v49  ;;  %v5597_v49 = vld [vmem:[#allocation13 + $0x3d0] sm:$0xff] }
 0x81c   : > { %v10188_v53 = vpack.c.bf16 %v5597_v49, %v5595_v48  ;;  %v5819_v48 = vld [vmem:[#allocation13 + $0x4c0] sm:$0xff]  ;;  %v5821_v49 = vld [vmem:[#allocation13 + $0x4d0] sm:$0xff] }
 0x81e   : > { %10153 = vmatpush1.bf16.msra.mxu1 %v10152_v54  ;;  %v5599_v54 = vld [vmem:[#allocation13 + $0x3e0] sm:$0xff] }
 0x81f   : > { %10156 = vmatprep.subr.msk.bf16.mxu1 %vm13007_vm5, %v10154_v56  ;;  %v5601_v56 = vld [vmem:[#allocation13 + $0x3f0] sm:$0xf] }
 0x820   : > { %v10193_v4 = vpack.c.bf16 %v5601_v56, %v5599_v54  ;;  %v5823_v54 = vld [vmem:[#allocation13 + $0x4e0] sm:$0xff]  ;;  %v5825_v56 = vld [vmem:[#allocation13 + $0x4f0] sm:$0xf] }
 0x822   : > { %10159 = vmatpush1.bf16.msk.msra.mxu1 %vm13007_vm5, %v10157_v50  ;;  %v5699_v50 = vld [vmem:[#allocation13 + $0x400] sm:$0xff] }
 0x823   : > { %10161 = vmatprep.subr.bf16.mxu1 %v10160_v62  ;;  %v5701_v62 = vld [vmem:[#allocation13 + $0x410] sm:$0xff] }
 0x824   : > { %v10198_v6 = vpack.c.bf16 %v5701_v62, %v5699_v50  ;;  %v5923_v50 = vld [vmem:[#allocation13 + $0x500] sm:$0xff]  ;;  %v5925_v62 = vld [vmem:[#allocation13 + $0x510] sm:$0xff] }
 0x825   : > { %9064 = vmatmul.mubr.msk.f32.vlgmr.msra.gmra.mrb[18].mxu1 %vm4851_vm9, %v13054_v22  ;;  %v5487_v22 = vld [vmem:[#allocation13 + $0x360] sm:$0xff] }
 0x826   : > { %10163 = vmatpush1.bf16.msra.mxu1 %v10162_v40  ;;  %5463 = vmatprep.mubr.f32.mxu1 %v11857_v0  ;;  %v10175_v31 = vpack.c.bf16 %v5489_v23, %v5487_v22  ;;  %v5703_v40 = vld [vmem:[#allocation13 + $0x420] sm:$0xff]  ;;  %v5713_v23 = vld [vmem:[#allocation13 + $0x470] sm:$0xf] }
 0x827   : > { %10165 = vmatprep.subr.bf16.mxu1 %v10164_v55  ;;  %v5705_v55 = vld [vmem:[#allocation13 + $0x430] sm:$0xff]  ;;  %v5711_v22 = vld [vmem:[#allocation13 + $0x460] sm:$0xff] }
 0x828   : > { %v10202_v10 = vpack.c.bf16 %v5705_v55, %v5703_v40  ;;  %v5927_v40 = vld [vmem:[#allocation13 + $0x520] sm:$0xff]  ;;  %v5929_v55 = vld [vmem:[#allocation13 + $0x530] sm:$0xff] }
 0x829   : > { %9065 = vmatmul.mubr.msk.f32.gmra.mrb[20].mxu1 %vm4851_vm9, %v13046_v19  ;;  %v5594_v19 = vld [vmem:[#allocation13 + $0x3b8] sm:$0xff] }
 0x82a   : > { %10167 = vmatpush1.bf16.msra.mxu1 %v10166_v11  ;;  %5569 = vmatprep.mubr.f32.mxu1 %v11857_v0  ;;  %v10182_v36 = vpack.c.bf16 %v5594_v19, %v5592_v14  ;;  %v10204_v11 = vpack.c.bf16 %v5710_v9, %v5708_v8  ;;  %v5816_v14 = vld [vmem:[#allocation13 + $0x4a8] sm:$0xff]  ;;  %v5818_v19 = vld [vmem:[#allocation13 + $0x4b8] sm:$0xff] }
 0x82b   : > { %10169 = vmatprep.subr.bf16.mxu1 %v10168_v41  ;;  %v5707_v41 = vld [vmem:[#allocation13 + $0x440] sm:$0xff]  ;;  %v5932_v8 = vld [vmem:[#allocation13 + $0x548] sm:$0xff]  ;;  %v5934_v9 = vld [vmem:[#allocation13 + $0x558] sm:$0xff] }
 0x82e   : > { %10171 = vmatpush1.bf16.msra.mxu1 %v10170_v16  ;;  %v10206_v16 = vpack.c.bf16 %v5709_v12, %v5707_v41  ;;  %v5931_v41 = vld [vmem:[#allocation13 + $0x540] sm:$0xff]  ;;  %v5933_v12 = vld [vmem:[#allocation13 + $0x550] sm:$0xff] }
 0x82f   : > { %10174 = vmatprep.subr.msk.bf16.mxu1 %vm13007_vm5, %v10172_v21  ;;  %v10208_v21 = vpack.c.bf16 %v5714_v15, %v5712_v42  ;;  %v5936_v42 = vld [vmem:[#allocation13 + $0x568] sm:$0xff]  ;;  %v5938_v15 = vld [vmem:[#allocation13 + $0x578] sm:$0xf] }
 0x832   : > { %10177 = vmatpush1.bf16.msk.msra.mxu1 %vm13007_vm5, %v10175_v31  ;;  %v10211_v31 = vpack.c.bf16 %v5713_v23, %v5711_v22  ;;  %v5935_v22 = vld [vmem:[#allocation13 + $0x560] sm:$0xff]  ;;  %v5937_v23 = vld [vmem:[#allocation13 + $0x570] sm:$0xf] }
 0x833   : > { %10179 = vmatprep.subr.bf16.mxu1 %v10178_v32  ;;  %v10214_v32 = vpack.c.bf16 %v5814_v29, %v5812_v26  ;;  %v6036_v26 = vld [vmem:[#allocation13 + $0x588] sm:$0xff]  ;;  %v6038_v29 = vld [vmem:[#allocation13 + $0x598] sm:$0xff] }
 0x835   : > { %9068 = vmatmul.mubr.msk.f32.vlgmr.msra.gmra.mrb[18].mxu1 %vm4851_vm9, %v5492_v39  ;;  %v5716_v39 = vpop.permute.xlu0 %5715 }
 0x836   : > { %10181 = vmatpush1.bf16.msra.mxu1 %v10180_v35  ;;  %5575 = vmatprep.mubr.f32.mxu1 %v11857_v0  ;;  %v10216_v35 = vpack.c.bf16 %v5813_v34, %v5811_v33  ;;  %v6035_v33 = vld [vmem:[#allocation13 + $0x580] sm:$0xff]  ;;  %v6037_v34 = vld [vmem:[#allocation13 + $0x590] sm:$0xff] }
 0x837   : > { %10183 = vmatprep.subr.bf16.mxu1 %v10182_v36  ;;  %v10218_v36 = vpack.c.bf16 %v5818_v19, %v5816_v14  ;;  %v6040_v14 = vld [vmem:[#allocation13 + $0x5a8] sm:$0xff]  ;;  %v6042_v19 = vld [vmem:[#allocation13 + $0x5b8] sm:$0xff] }
 0x839   : > { %9069 = vmatmul.mubr.msk.f32.gmra.mrb[20].mxu1 %vm4851_vm9, %v5494_v2  ;;  %v5718_v2 = vpop.permute.xlu1 %5717 }
 0x83a   : > { %10185 = vmatpush1.bf16.msra.mxu1 %v10184_v46  ;;  %5681 = vmatprep.mubr.f32.mxu1 %v11857_v0  ;;  %v10220_v46 = vpack.c.bf16 %v5817_v38, %v5815_v37  ;;  %v6039_v37 = vld [vmem:[#allocation13 + $0x5a0] sm:$0xff]  ;;  %v6041_v38 = vld [vmem:[#allocation13 + $0x5b0] sm:$0xff] }
 0x83b   : > { %10187 = vmatprep.subr.bf16.mxu1 %v10186_v47  ;;  %v10222_v47 = vpack.c.bf16 %v5822_v45, %v5820_v44  ;;  %v6046_v44 = vld [vmem:[#allocation13 + $0x5d8] sm:$0xff]  ;;  %v10256_v45 = vpack.c.bf16 %v6041_v38, %v6039_v37 }
 0x83c   : > { %v6270_v37 = vld [vmem:[#allocation13 + $0x6d8] sm:$0xff] }
 0x83e   : > { %10189 = vmatpush1.bf16.msra.mxu1 %v10188_v53  ;;  %v10224_v53 = vpack.c.bf16 %v5821_v49, %v5819_v48  ;;  %v6045_v48 = vld [vmem:[#allocation13 + $0x5d0] sm:$0xff]  ;;  %v6048_v49 = vld [vmem:[#allocation13 + $0x5e8] sm:$0xff] }
 0x83f   : > { %10192 = vmatprep.subr.msk.bf16.mxu1 %vm13007_vm5, %v10190_v3  ;;  %v10226_v3 = vpack.c.bf16 %v5826_v52, %v5824_v51 }
 0x842   : > { %10195 = vmatpush1.bf16.msk.msra.mxu1 %vm13007_vm5, %v10193_v4  ;;  %v10229_v4 = vpack.c.bf16 %v5825_v56, %v5823_v54  ;;  %v6150_v54 = vld [vmem:[#allocation13 + $0x618] sm:$0xff] }
 0x843   : > { %10197 = vmatprep.subr.bf16.mxu1 %v10196_v61  ;;  %v10232_v61 = vpack.c.bf16 %v5926_v60, %v5924_v57  ;;  %v6147_v60 = vld [vmem:[#allocation13 + $0x600] sm:$0xff] }
 0x845   : > { %9072 = vmatmul.mubr.msk.f32.vlgmr.msra.gmra.mrb[18].mxu1 %vm4851_vm9, %v5604_v7  ;;  %v5828_v7 = vpop.permute.xlu0 %5827 }
 0x846   : > { %10199 = vmatpush1.bf16.msra.mxu1 %v10198_v6  ;;  %5687 = vmatprep.mubr.f32.mxu1 %v11857_v0  ;;  %v10234_v6 = vpack.c.bf16 %v5925_v62, %v5923_v50 }
 0x847   : > { %10201 = vmatprep.subr.bf16.mxu1 %v10200_v59  ;;  %v10236_v59 = vpack.c.bf16 %v5930_v5, %v5928_v63  ;;  %v6151_v63 = vld [vmem:[#allocation13 + $0x620] sm:$0xff]  ;;  %v6153_v5 = vld [vmem:[#allocation13 + $0x630] sm:$0xff] }
 0x849   : > { %9073 = vmatmul.mubr.msk.f32.gmra.mrb[20].mxu1 %vm4851_vm9, %v5606_v13  ;;  %v5830_v13 = vpop.permute.xlu1 %5829 }
 0x84a   : > { %10203 = vmatpush1.bf16.msra.mxu1 %v10202_v10  ;;  %5793 = vmatprep.mubr.f32.mxu1 %v11857_v0  ;;  %v10238_v10 = vpack.c.bf16 %v5929_v55, %v5927_v40  ;;  %v6158_v40 = vld [vmem:[#allocation13 + $0x658] sm:$0xff]  ;;  %v10274_v55 = vpack.c.bf16 %v6153_v5, %v6151_v63  ;;  %v6380_v5 = vld [vmem:[#allocation13 + $0x748] sm:$0xff] }
 0x84b   : > { %10205 = vmatprep.subr.bf16.mxu1 %v10204_v11  ;;  %v10240_v11 = vpack.c.bf16 %v5934_v9, %v5932_v8  ;;  %v6155_v8 = vld [vmem:[#allocation13 + $0x640] sm:$0xff]  ;;  %v6157_v9 = vld [vmem:[#allocation13 + $0x650] sm:$0xff] }
 0x84e   : > { %10207 = vmatpush1.bf16.msra.mxu1 %v10206_v16  ;;  %v10242_v16 = vpack.c.bf16 %v5933_v12, %v5931_v41  ;;  %v6162_v41 = vld [vmem:[#allocation13 + $0x678] sm:$0xf]  ;;  %v10278_v12 = vpack.c.bf16 %v6157_v9, %v6155_v8  ;;  %v6384_v9 = vld [vmem:[#allocation13 + $0x768] sm:$0xff] }
 0x84f   : > { %10210 = vmatprep.subr.msk.bf16.mxu1 %vm13007_vm5, %v10208_v21  ;;  %v10244_v21 = vpack.c.bf16 %v5938_v15, %v5936_v42  ;;  %v6159_v42 = vld [vmem:[#allocation13 + $0x660] sm:$0xff]  ;;  %v6161_v15 = vld [vmem:[#allocation13 + $0x670] sm:$0xf] }
 0x852   : > { %10213 = vmatpush1.bf16.msk.msra.mxu1 %vm13007_vm5, %v10211_v31  ;;  %v10247_v31 = vpack.c.bf16 %v5937_v23, %v5935_v22  ;;  %v10283_v22 = vpack.c.bf16 %v6161_v15, %v6159_v42  ;;  %v6484_v42 = vld [vmem:[#allocation13 + $0x788] sm:$0xff]  ;;  %v6486_v15 = vld [vmem:[#allocation13 + $0x798] sm:$0xff] }
 0x853   : > { %10215 = vmatprep.subr.bf16.mxu1 %v10214_v32  ;;  %v10250_v32 = vpack.c.bf16 %v6038_v29, %v6036_v26  ;;  %v6259_v26 = vld [vmem:[#allocation13 + $0x680] sm:$0xff]  ;;  %v6261_v29 = vld [vmem:[#allocation13 + $0x690] sm:$0xff] }
 0x855   : > { %9076 = vmatmul.mubr.msk.f32.vlgmr.msra.gmra.mrb[18].mxu1 %vm4851_vm9, %v5716_v39  ;;  %v6044_v39 = vld [vmem:[#allocation13 + $0x5c8] sm:$0xff] }
 0x856   : > { %10217 = vmatpush1.bf16.msra.mxu1 %v10216_v35  ;;  %5799 = vmatprep.mubr.f32.mxu1 %v11857_v0  ;;  %v10252_v35 = vpack.c.bf16 %v6037_v34, %v6035_v33  ;;  %v10288_v33 = vpack.c.bf16 %v6261_v29, %v6259_v26  ;;  %v6488_v26 = vld [vmem:[#allocation13 + $0x7a8] sm:$0xff]  ;;  %v6490_v29 = vld [vmem:[#allocation13 + $0x7b8] sm:$0xff] }
 0x857   : > { %10219 = vmatprep.subr.bf16.mxu1 %v10218_v36  ;;  %v10254_v36 = vpack.c.bf16 %v6042_v19, %v6040_v14  ;;  %v6263_v14 = vld [vmem:[#allocation13 + $0x6a0] sm:$0xff]  ;;  %v6265_v19 = vld [vmem:[#allocation13 + $0x6b0] sm:$0xff] }
 0x858   : > { %v10292_v38 = vpack.c.bf16 %v6265_v19, %v6263_v14  ;;  %v6492_v19 = vld [vmem:[#allocation13 + $0x7c8] sm:$0xff] }
 0x859   : > { %9077 = vmatmul.mubr.msk.f32.gmra.mrb[20].mxu1 %vm4851_vm9, %v5718_v2  ;;  %v6050_v2 = vld [vmem:[#allocation13 + $0x5f8] sm:$0xf] }
 0x85a   : > { %10221 = vmatpush1.bf16.msra.mxu1 %v10220_v46  ;;  %5905 = vmatprep.mubr.f32.mxu1 %v11857_v0  ;;  %v10258_v46 = vpack.c.bf16 %v6046_v44, %v6044_v39  ;;  %v10262_v52 = vpack.c.bf16 %v6050_v2, %v6048_v49  ;;  %v6267_v44 = vld [vmem:[#allocation13 + $0x6c0] sm:$0xff] }
 0x85b   : > { %10223 = vmatprep.subr.bf16.mxu1 %v10222_v47  ;;  %v6043_v47 = vld [vmem:[#allocation13 + $0x5c0] sm:$0xff] }
 0x85c   : > { %v10260_v51 = vpack.c.bf16 %v6045_v48, %v6043_v47  ;;  %v6272_v47 = vld [vmem:[#allocation13 + $0x6e8] sm:$0xff]  ;;  %v6274_v48 = vld [vmem:[#allocation13 + $0x6f8] sm:$0xf] }
 0x85d   : > { %v10298_v2 = vpack.c.bf16 %v6274_v48, %v6272_v47 }
 0x85e   : > { %10225 = vmatpush1.bf16.msra.mxu1 %v10224_v53  ;;  %v6049_v53 = vld [vmem:[#allocation13 + $0x5f0] sm:$0xf] }
 0x85f   : > { %10228 = vmatprep.subr.msk.bf16.mxu1 %vm13007_vm5, %v10226_v3  ;;  %v6148_v3 = vld [vmem:[#allocation13 + $0x608] sm:$0xff] }
 0x860   : > { %v10268_v57 = vpack.c.bf16 %v6150_v54, %v6148_v3 }
 0x862   : > { %10231 = vmatpush1.bf16.msk.msra.mxu1 %vm13007_vm5, %v10229_v4  ;;  %v6149_v4 = vld [vmem:[#allocation13 + $0x610] sm:$0xff] }
 0x863   : > { %10233 = vmatprep.subr.bf16.mxu1 %v10232_v61  ;;  %v6152_v61 = vld [vmem:[#allocation13 + $0x628] sm:$0xff]  ;;  %v10270_v50 = vpack.c.bf16 %v6149_v4, %v6147_v60  ;;  %v6378_v4 = vld [vmem:[#allocation13 + $0x738] sm:$0xff] }
 0x864   : > { %v6376_v60 = vld [vmem:[#allocation13 + $0x728] sm:$0xff] }
 0x865   : > { %9080 = vmatmul.mubr.msk.f32.vlgmr.msra.gmra.mrb[18].mxu1 %vm4851_vm9, %v5828_v7 }
 0x866   : > { %10235 = vmatpush1.bf16.msra.mxu1 %v10234_v6  ;;  %5911 = vmatprep.mubr.f32.mxu1 %v11857_v0  ;;  %v6052_v6 = vpop.permute.xlu0 %6051 }
 0x867   : > { %10237 = vmatprep.subr.bf16.mxu1 %v10236_v59  ;;  %v6156_v59 = vld [vmem:[#allocation13 + $0x648] sm:$0xff] }
 0x868   : > { %v10276_v7 = vpack.c.bf16 %v6158_v40, %v6156_v59 }
 0x869   : > { %9081 = vmatmul.mubr.msk.f32.gmra.mrb[20].mxu1 %vm4851_vm9, %v5830_v13 }
 0x86a   : > { %10239 = vmatpush1.bf16.msra.mxu1 %v10238_v10  ;;  %6017 = vmatprep.mubr.f32.mxu1 %v11857_v0  ;;  %v6054_v10 = vpop.permute.xlu1 %6053 }
 0x86b   : > { %10241 = vmatprep.subr.bf16.mxu1 %v10240_v11  ;;  %v6160_v11 = vld [vmem:[#allocation13 + $0x668] sm:$0xff] }
 0x86c   : > { %v10280_v13 = vpack.c.bf16 %v6162_v41, %v6160_v11 }
 0x86e   : > { %10243 = vmatpush1.bf16.msra.mxu1 %v10242_v16  ;;  %v6260_v16 = vld [vmem:[#allocation13 + $0x688] sm:$0xff] }
 0x86f   : > { %10246 = vmatprep.subr.msk.bf16.mxu1 %vm13007_vm5, %v10244_v21  ;;  %v6262_v21 = vld [vmem:[#allocation13 + $0x698] sm:$0xff] }
 0x870   : > { %v10286_v23 = vpack.c.bf16 %v6262_v21, %v6260_v16  ;;  %v10322_v21 = vpack.c.bf16 %v6486_v15, %v6484_v42  ;;  %v6709_v42 = vld [vmem:[#allocation13 + $0x890] sm:$0xff]  ;;  %v6712_v15 = vld [vmem:[#allocation13 + $0x8a8] sm:$0xff] }
 0x872   : > { %10249 = vmatpush1.bf16.msk.msra.mxu1 %vm13007_vm5, %v10247_v31  ;;  %v6264_v31 = vld [vmem:[#allocation13 + $0x6a8] sm:$0xff] }
 0x873   : > { %10251 = vmatprep.subr.bf16.mxu1 %v10250_v32  ;;  %v6266_v32 = vld [vmem:[#allocation13 + $0x6b8] sm:$0xff] }
 0x874   : > { %v10290_v34 = vpack.c.bf16 %v6266_v32, %v6264_v31  ;;  %v10326_v32 = vpack.c.bf16 %v6490_v29, %v6488_v26  ;;  %v6716_v29 = vld [vmem:[#allocation13 + $0x8c8] sm:$0xff] }
 0x875   : > { %9084 = vmatmul.mubr.msk.f32.vlgmr.msra.gmra.mrb[18].mxu1 %vm4851_vm9, %v13077_v24  ;;  %v6047_v24 = vld [vmem:[#allocation13 + $0x5e0] sm:$0xff] }
 0x876   : > { %10253 = vmatpush1.bf16.msra.mxu1 %v10252_v35  ;;  %6023 = vmatprep.mubr.f32.mxu1 %v11857_v0  ;;  %v10265_v56 = vpack.c.bf16 %v6049_v53, %v6047_v24  ;;  %v6164_v35 = vpop.permute.xlu0 %6163  ;;  %v6372_v24 = vld [vmem:[#allocation13 + $0x708] sm:$0xff]  ;;  %v6374_v53 = vld [vmem:[#allocation13 + $0x718] sm:$0xff] }
 0x877   : > { %10255 = vmatprep.subr.bf16.mxu1 %v10254_v36  ;;  %v6268_v36 = vld [vmem:[#allocation13 + $0x6c8] sm:$0xff]  ;;  %v10304_v54 = vpack.c.bf16 %v6374_v53, %v6372_v24 }
 0x878   : > { %v10294_v39 = vpack.c.bf16 %v6270_v37, %v6268_v36 }
 0x879   : > { %9085 = vmatmul.mubr.msk.f32.gmra.mrb[20].mxu1 %vm4851_vm9, %v13069_v43  ;;  %v6154_v43 = vld [vmem:[#allocation13 + $0x638] sm:$0xff] }
 0x87a   : > { %10257 = vmatpush1.bf16.msra.mxu1 %v10256_v45  ;;  %6129 = vmatprep.mubr.f32.mxu1 %v11857_v0  ;;  %v10272_v62 = vpack.c.bf16 %v6154_v43, %v6152_v61  ;;  %v6269_v45 = vld [vmem:[#allocation13 + $0x6d0] sm:$0xff]  ;;  %v10308_v43 = vpack.c.bf16 %v6378_v4, %v6376_v60  ;;  %v6276_v63 = vpop.permute.xlu0 %6275 }
 0x87b   : > { %10259 = vmatprep.subr.bf16.mxu1 %v10258_v46  ;;  %v6166_v46 = vpop.permute.xlu1 %6165  ;;  %v10296_v49 = vpack.c.bf16 %v6269_v45, %v6267_v44  ;;  %v6496_v45 = vld [vmem:[#allocation13 + $0x7e8] sm:$0xff] }
 0x87e   : > { %10261 = vmatpush1.bf16.msra.mxu1 %v10260_v51  ;;  %v6271_v51 = vld [vmem:[#allocation13 + $0x6e0] sm:$0xff]  ;;  %v6388_v14 = vpop.permute.xlu0 %6387 }
 0x87f   : > { %10264 = vmatprep.subr.msk.bf16.mxu1 %vm13007_vm5, %v10262_v52  ;;  %v6273_v52 = vld [vmem:[#allocation13 + $0x6f0] sm:$0xf]  ;;  %v6278_v8 = vpop.permute.xlu1 %6277 }
 0x880   : > { %v10301_v3 = vpack.c.bf16 %v6273_v52, %v6271_v51  ;;  %v6596_v51 = vld [vmem:[#allocation13 + $0x808] sm:$0xff]  ;;  %v6598_v52 = vld [vmem:[#allocation13 + $0x818] sm:$0xff] }
 0x881   : > { %v10340_v53 = vpack.c.bf16 %v6598_v52, %v6596_v51  ;;  %v6824_v51 = vld [vmem:[#allocation13 + $0x928] sm:$0xff]  ;;  %v6826_v52 = vld [vmem:[#allocation13 + $0x938] sm:$0xff] }
 0x882   : > { %10267 = vmatpush1.bf16.msk.msra.mxu1 %vm13007_vm5, %v10265_v56  ;;  %v6371_v56 = vld [vmem:[#allocation13 + $0x700] sm:$0xff]  ;;  %v6612_v26 = vpop.permute.xlu0 %6611 }
 0x883   : > { %10269 = vmatprep.subr.bf16.mxu1 %v10268_v57  ;;  %v6373_v57 = vld [vmem:[#allocation13 + $0x710] sm:$0xff]  ;;  %v6390_v44 = vpop.permute.xlu1 %6389 }
 0x884   : > { %v10306_v61 = vpack.c.bf16 %v6373_v57, %v6371_v56  ;;  %v6600_v56 = vld [vmem:[#allocation13 + $0x828] sm:$0xff]  ;;  %v6602_v57 = vld [vmem:[#allocation13 + $0x838] sm:$0xff] }
 0x885   : > { %9088 = vmatmul.mubr.msk.f32.vlgmr.msra.gmra.mrb[18].mxu1 %vm4851_vm9, %v6052_v6  ;;  %v6382_v6 = vld [vmem:[#allocation13 + $0x758] sm:$0xff]  ;;  %v10344_v4 = vpack.c.bf16 %v6602_v57, %v6600_v56  ;;  %v6828_v57 = vld [vmem:[#allocation13 + $0x948] sm:$0xff] }
 0x886   : > { %10271 = vmatpush1.bf16.msra.mxu1 %v10270_v50  ;;  %6135 = vmatprep.mubr.f32.mxu1 %v11857_v0  ;;  %v6375_v50 = vld [vmem:[#allocation13 + $0x720] sm:$0xff]  ;;  %v10312_v40 = vpack.c.bf16 %v6382_v6, %v6380_v5  ;;  %v6724_v56 = vpop.permute.xlu0 %6723 }
 0x887   : > { %10273 = vmatprep.subr.bf16.mxu1 %v10272_v62  ;;  %v6377_v62 = vld [vmem:[#allocation13 + $0x730] sm:$0xff]  ;;  %v6603_v6 = vld [vmem:[#allocation13 + $0x840] sm:$0xff] }
 0x888   : > { %v10310_v59 = vpack.c.bf16 %v6377_v62, %v6375_v50  ;;  %v6604_v50 = vld [vmem:[#allocation13 + $0x848] sm:$0xff]  ;;  %v6606_v62 = vld [vmem:[#allocation13 + $0x858] sm:$0xff] }
 0x889   : > { %9089 = vmatmul.mubr.msk.f32.gmra.mrb[20].mxu1 %vm4851_vm9, %v6054_v10  ;;  %v6386_v10 = vld [vmem:[#allocation13 + $0x778] sm:$0xf]  ;;  %v10348_v5 = vpack.c.bf16 %v6606_v62, %v6604_v50  ;;  %v6829_v50 = vld [vmem:[#allocation13 + $0x950] sm:$0xff] }
 0x88a   : > { %10275 = vmatpush1.bf16.msra.mxu1 %v10274_v55  ;;  %6241 = vmatprep.mubr.f32.mxu1 %v11857_v0  ;;  %v6379_v55 = vld [vmem:[#allocation13 + $0x740] sm:$0xff]  ;;  %v10316_v41 = vpack.c.bf16 %v6386_v10, %v6384_v9  ;;  %v6609_v9 = vld [vmem:[#allocation13 + $0x870] sm:$0xf]  ;;  %v6708_v10 = vld [vmem:[#allocation13 + $0x888] sm:$0xff] }
 0x88b   : > { %10277 = vmatprep.subr.bf16.mxu1 %v10276_v7  ;;  %v6381_v7 = vld [vmem:[#allocation13 + $0x750] sm:$0xff] }
 0x88c   : > { %v10314_v11 = vpack.c.bf16 %v6381_v7, %v6379_v55  ;;  %v6610_v55 = vld [vmem:[#allocation13 + $0x878] sm:$0xf] }
 0x88e   : > { %10279 = vmatpush1.bf16.msra.mxu1 %v10278_v12  ;;  %v6383_v12 = vld [vmem:[#allocation13 + $0x760] sm:$0xff] }
 0x88f   : > { %10282 = vmatprep.subr.msk.bf16.mxu1 %vm13007_vm5, %v10280_v13  ;;  %v6385_v13 = vld [vmem:[#allocation13 + $0x770] sm:$0xf] }
 0x890   : > { %v10319_v16 = vpack.c.bf16 %v6385_v13, %v6383_v12  ;;  %v6707_v13 = vld [vmem:[#allocation13 + $0x880] sm:$0xff] }
 0x892   : > { %10285 = vmatpush1.bf16.msk.msra.mxu1 %vm13007_vm5, %v10283_v22  ;;  %v6483_v22 = vld [vmem:[#allocation13 + $0x780] sm:$0xff] }
 0x893   : > { %10287 = vmatprep.subr.bf16.mxu1 %v10286_v23  ;;  %v6485_v23 = vld [vmem:[#allocation13 + $0x790] sm:$0xff] }
 0x894   : > { %v10324_v31 = vpack.c.bf16 %v6485_v23, %v6483_v22  ;;  %v6711_v22 = vld [vmem:[#allocation13 + $0x8a0] sm:$0xff]  ;;  %v6713_v23 = vld [vmem:[#allocation13 + $0x8b0] sm:$0xff] }
 0x895   : > { %9092 = vmatmul.mubr.msk.f32.vlgmr.msra.gmra.mrb[18].mxu1 %vm4851_vm9, %v6164_v35  ;;  %v6494_v35 = vld [vmem:[#allocation13 + $0x7d8] sm:$0xff] }
 0x896   : > { %10289 = vmatpush1.bf16.msra.mxu1 %v10288_v33  ;;  %6247 = vmatprep.mubr.f32.mxu1 %v11857_v0  ;;  %v6487_v33 = vld [vmem:[#allocation13 + $0x7a0] sm:$0xff]  ;;  %v10330_v37 = vpack.c.bf16 %v6494_v35, %v6492_v19  ;;  %v6614_v19 = vpop.permute.xlu1 %6613  ;;  %v6720_v35 = vld [vmem:[#allocation13 + $0x8e8] sm:$0xff] }
 0x897   : > { %10291 = vmatprep.subr.bf16.mxu1 %v10290_v34  ;;  %v6489_v34 = vld [vmem:[#allocation13 + $0x7b0] sm:$0xff] }
 0x898   : > { %v10328_v36 = vpack.c.bf16 %v6489_v34, %v6487_v33  ;;  %v6715_v34 = vld [vmem:[#allocation13 + $0x8c0] sm:$0xff] }
 0x899   : > { %9093 = vmatmul.mubr.msk.f32.gmra.mrb[20].mxu1 %vm4851_vm9, %v6166_v46  ;;  %v6498_v46 = vld [vmem:[#allocation13 + $0x7f8] sm:$0xf] }
 0x89a   : > { %10293 = vmatpush1.bf16.msra.mxu1 %v10292_v38  ;;  %6353 = vmatprep.mubr.f32.mxu1 %v11857_v0  ;;  %v6491_v38 = vld [vmem:[#allocation13 + $0x7c0] sm:$0xff]  ;;  %v10334_v48 = vpack.c.bf16 %v6498_v46, %v6496_v45  ;;  %v6820_v45 = vld [vmem:[#allocation13 + $0x908] sm:$0xff]  ;;  %v6822_v46 = vld [vmem:[#allocation13 + $0x918] sm:$0xff]  ;;  %v6726_v62 = vpop.permute.xlu1 %6725 }
 0x89b   : > { %10295 = vmatprep.subr.bf16.mxu1 %v10294_v39  ;;  %v6493_v39 = vld [vmem:[#allocation13 + $0x7d0] sm:$0xff] }
 0x89c   : > { %v10332_v47 = vpack.c.bf16 %v6493_v39, %v6491_v38  ;;  %v6719_v39 = vld [vmem:[#allocation13 + $0x8e0] sm:$0xff] }
 0x89e   : > { %10297 = vmatpush1.bf16.msra.mxu1 %v10296_v49  ;;  %v6495_v49 = vld [vmem:[#allocation13 + $0x7e0] sm:$0xff] }
 0x89f   : > { %10300 = vmatprep.subr.msk.bf16.mxu1 %vm13007_vm5, %v10298_v2  ;;  %v6497_v2 = vld [vmem:[#allocation13 + $0x7f0] sm:$0xf] }
 0x8a0   : > { %v10337_v24 = vpack.c.bf16 %v6497_v2, %v6495_v49  ;;  %v6819_v49 = vld [vmem:[#allocation13 + $0x900] sm:$0xff]  ;;  %v6821_v2 = vld [vmem:[#allocation13 + $0x910] sm:$0xff] }
 0x8a2   : > { %10303 = vmatpush1.bf16.msk.msra.mxu1 %vm13007_vm5, %v10301_v3  ;;  %v6595_v3 = vld [vmem:[#allocation13 + $0x800] sm:$0xff] }
 0x8a3   : > { %10305 = vmatprep.subr.bf16.mxu1 %v10304_v54  ;;  %v6597_v54 = vld [vmem:[#allocation13 + $0x810] sm:$0xff] }
 0x8a4   : > { %v10342_v60 = vpack.c.bf16 %v6597_v54, %v6595_v3  ;;  %v6823_v3 = vld [vmem:[#allocation13 + $0x920] sm:$0xff]  ;;  %v6825_v54 = vld [vmem:[#allocation13 + $0x930] sm:$0xff] }
 0x8a5   : > { %9096 = vmatmul.mubr.msk.f32.vlgmr.msra.gmra.mrb[18].mxu1 %vm4851_vm9, %v6276_v63 }
 0x8a6   : > { %10307 = vmatpush1.bf16.msra.mxu1 %v10306_v61  ;;  %6359 = vmatprep.mubr.f32.mxu1 %v11857_v0  ;;  %v6599_v61 = vld [vmem:[#allocation13 + $0x820] sm:$0xff] }
 0x8a7   : > { %10309 = vmatprep.subr.bf16.mxu1 %v10308_v43  ;;  %v6601_v43 = vld [vmem:[#allocation13 + $0x830] sm:$0xff] }
 0x8a8   : > { %v10346_v63 = vpack.c.bf16 %v6601_v43, %v6599_v61  ;;  %v6827_v43 = vld [vmem:[#allocation13 + $0x940] sm:$0xff] }
 0x8a9   : > { %9097 = vmatmul.mubr.msk.f32.gmra.mrb[20].mxu1 %vm4851_vm9, %v6278_v8 }
 0x8aa   : > { %10311 = vmatpush1.bf16.msra.mxu1 %v10310_v59  ;;  %6465 = vmatprep.mubr.f32.mxu1 %v11857_v0  ;;  %v6605_v59 = vld [vmem:[#allocation13 + $0x850] sm:$0xff] }
 0x8ab   : > { %10313 = vmatprep.subr.bf16.mxu1 %v10312_v40  ;;  %v6608_v40 = vld [vmem:[#allocation13 + $0x868] sm:$0xff]  ;;  %v10350_v7 = vpack.c.bf16 %v6605_v59, %v6603_v6  ;;  %v10386_v6 = vpack.c.bf16 %v6829_v50, %v6827_v43  ;;  %v7058_v43 = vld [vmem:[#allocation13 + $0xa78] sm:$0xf] }
 0x8ac   : > { %v10352_v8 = vpack.c.bf16 %v6610_v55, %v6608_v40  ;;  %v6831_v40 = vld [vmem:[#allocation13 + $0x960] sm:$0xff]  ;;  %v6833_v55 = vld [vmem:[#allocation13 + $0x970] sm:$0xf] }
 0x8ae   : > { %10315 = vmatpush1.bf16.msra.mxu1 %v10314_v11  ;;  %v6710_v11 = vld [vmem:[#allocation13 + $0x898] sm:$0xff] }
 0x8af   : > { %10318 = vmatprep.subr.msk.bf16.mxu1 %vm13007_vm5, %v10316_v41  ;;  %v10358_v12 = vpack.c.bf16 %v6710_v11, %v6708_v10  ;;  %v6931_v10 = vld [vmem:[#allocation13 + $0x980] sm:$0xff]  ;;  %v6933_v11 = vld [vmem:[#allocation13 + $0x990] sm:$0xff] }
 0x8b2   : > { %10321 = vmatpush1.bf16.msk.msra.mxu1 %vm13007_vm5, %v10319_v16  ;;  %v10360_v16 = vpack.c.bf16 %v6709_v42, %v6707_v13  ;;  %v10396_v13 = vpack.c.bf16 %v6933_v11, %v6931_v10 }
 0x8b3   : > { %10323 = vmatprep.subr.bf16.mxu1 %v10322_v21 }
 0x8b5   : > { %9100 = vmatmul.mubr.msk.f32.vlgmr.msra.gmra.mrb[18].mxu1 %vm4851_vm9, %v6388_v14  ;;  %v6717_v14 = vld [vmem:[#allocation13 + $0x8d0] sm:$0xff] }
 0x8b6   : > { %10325 = vmatpush1.bf16.msra.mxu1 %v10324_v31  ;;  %6471 = vmatprep.mubr.f32.mxu1 %v11857_v0  ;;  %v6718_v31 = vld [vmem:[#allocation13 + $0x8d8] sm:$0xff] }
 0x8b7   : > { %10327 = vmatprep.subr.bf16.mxu1 %v10326_v32  ;;  %v10364_v32 = vpack.c.bf16 %v6713_v23, %v6711_v22  ;;  %v10366_v33 = vpack.c.bf16 %v6718_v31, %v6716_v29  ;;  %v6942_v22 = vld [vmem:[#allocation13 + $0x9d8] sm:$0xff]  ;;  %v6939_v29 = vld [vmem:[#allocation13 + $0x9c0] sm:$0xff]  ;;  %v6941_v31 = vld [vmem:[#allocation13 + $0x9d0] sm:$0xff] }
 0x8b9   : > { %9101 = vmatmul.mubr.msk.f32.gmra.mrb[20].mxu1 %vm4851_vm9, %v6390_v44  ;;  %v6721_v44 = vld [vmem:[#allocation13 + $0x8f0] sm:$0xf] }
 0x8ba   : > { %10329 = vmatpush1.bf16.msra.mxu1 %v10328_v36  ;;  %6577 = vmatprep.mubr.f32.mxu1 %v11857_v0  ;;  %v6722_v36 = vld [vmem:[#allocation13 + $0x8f8] sm:$0xf] }
 0x8bb   : > { %10331 = vmatprep.subr.bf16.mxu1 %v10330_v37  ;;  %v10368_v37 = vpack.c.bf16 %v6717_v14, %v6715_v34  ;;  %v10370_v38 = vpack.c.bf16 %v6722_v36, %v6720_v35  ;;  %v6946_v34 = vld [vmem:[#allocation13 + $0x9f8] sm:$0xf]  ;;  %v10404_v14 = vpack.c.bf16 %v6941_v31, %v6939_v29  ;;  %v6943_v35 = vld [vmem:[#allocation13 + $0x9e0] sm:$0xff]  ;;  %v6945_v36 = vld [vmem:[#allocation13 + $0x9f0] sm:$0xf] }
 0x8bc   : > { %v7168_v31 = vld [vmem:[#allocation13 + $0xaf0] sm:$0xf] }
 0x8be   : > { %10333 = vmatpush1.bf16.msra.mxu1 %v10332_v47  ;;  %v10373_v47 = vpack.c.bf16 %v6721_v44, %v6719_v39  ;;  %v10409_v39 = vpack.c.bf16 %v6945_v36, %v6943_v35  ;;  %v7268_v35 = vld [vmem:[#allocation13 + $0xb10] sm:$0xff]  ;;  %v7271_v36 = vld [vmem:[#allocation13 + $0xb28] sm:$0xff] }
 0x8bf   : > { %10336 = vmatprep.subr.msk.bf16.mxu1 %vm13007_vm5, %v10334_v48  ;;  %v10376_v48 = vpack.c.bf16 %v6822_v46, %v6820_v45  ;;  %v7043_v45 = vld [vmem:[#allocation13 + $0xa00] sm:$0xff]  ;;  %v7045_v46 = vld [vmem:[#allocation13 + $0xa10] sm:$0xff] }
 0x8c2   : > { %10339 = vmatpush1.bf16.msk.msra.mxu1 %vm13007_vm5, %v10337_v24  ;;  %v10378_v24 = vpack.c.bf16 %v6821_v2, %v6819_v49  ;;  %v10414_v49 = vpack.c.bf16 %v7045_v46, %v7043_v45  ;;  %v7275_v46 = vld [vmem:[#allocation13 + $0xb48] sm:$0xff] }
 0x8c3   : > { %10341 = vmatprep.subr.bf16.mxu1 %v10340_v53  ;;  %v10380_v53 = vpack.c.bf16 %v6826_v52, %v6824_v51  ;;  %v7047_v51 = vld [vmem:[#allocation13 + $0xa20] sm:$0xff]  ;;  %v7049_v52 = vld [vmem:[#allocation13 + $0xa30] sm:$0xff] }
 0x8c5   : > { %9104 = vmatmul.mubr.msk.f32.vlgmr.msra.gmra.mrb[18].mxu1 %vm4851_vm9, %v13100_v27  ;;  %v6607_v27 = vld [vmem:[#allocation13 + $0x860] sm:$0xff] }
 0x8c6   : > { %10343 = vmatpush1.bf16.msra.mxu1 %v10342_v60  ;;  %6583 = vmatprep.mubr.f32.mxu1 %v11857_v0  ;;  %v10355_v41 = vpack.c.bf16 %v6609_v9, %v6607_v27  ;;  %v6830_v60 = vld [vmem:[#allocation13 + $0x958] sm:$0xff]  ;;  %v10391_v27 = vpack.c.bf16 %v6833_v55, %v6831_v40 }
 0x8c7   : > { %10345 = vmatprep.subr.bf16.mxu1 %v10344_v4  ;;  %v10382_v4 = vpack.c.bf16 %v6825_v54, %v6823_v3  ;;  %v10384_v61 = vpack.c.bf16 %v6830_v60, %v6828_v57  ;;  %v7054_v3 = vld [vmem:[#allocation13 + $0xa58] sm:$0xff]  ;;  %v10418_v54 = vpack.c.bf16 %v7049_v52, %v7047_v51  ;;  %v7051_v57 = vld [vmem:[#allocation13 + $0xa40] sm:$0xff]  ;;  %v7053_v60 = vld [vmem:[#allocation13 + $0xa50] sm:$0xff] }
 0x8c8   : > { %v10422_v50 = vpack.c.bf16 %v7053_v60, %v7051_v57  ;;  %v7276_v51 = vld [vmem:[#allocation13 + $0xb50] sm:$0xff]  ;;  %v7379_v60 = vld [vmem:[#allocation13 + $0xb88] sm:$0xff] }
 0x8c9   : > { %9105 = vmatmul.mubr.msk.f32.gmra.mrb[20].mxu1 %vm4851_vm9, %v13092_v25  ;;  %v6714_v25 = vld [vmem:[#allocation13 + $0x8b8] sm:$0xff]  ;;  %v7280_v57 = vld [vmem:[#allocation13 + $0xb70] sm:$0xf] }
 0x8ca   : > { %10347 = vmatpush1.bf16.msra.mxu1 %v10346_v63  ;;  %6689 = vmatprep.mubr.f32.mxu1 %v11857_v0  ;;  %v10362_v21 = vpack.c.bf16 %v6714_v25, %v6712_v15  ;;  %v6832_v63 = vld [vmem:[#allocation13 + $0x968] sm:$0xff]  ;;  %v6935_v15 = vld [vmem:[#allocation13 + $0x9a0] sm:$0xff]  ;;  %v6937_v25 = vld [vmem:[#allocation13 + $0x9b0] sm:$0xff] }
 0x8cb   : > { %10349 = vmatprep.subr.bf16.mxu1 %v10348_v5  ;;  %v6834_v5 = vld [vmem:[#allocation13 + $0x978] sm:$0xf]  ;;  %v10400_v23 = vpack.c.bf16 %v6937_v25, %v6935_v15 }
 0x8cc   : > { %v10388_v59 = vpack.c.bf16 %v6834_v5, %v6832_v63  ;;  %v7055_v63 = vld [vmem:[#allocation13 + $0xa60] sm:$0xff]  ;;  %v7057_v5 = vld [vmem:[#allocation13 + $0xa70] sm:$0xf] }
 0x8cd   : > { %v10427_v40 = vpack.c.bf16 %v7057_v5, %v7055_v63  ;;  %v7383_v63 = vld [vmem:[#allocation13 + $0xba8] sm:$0xff]  ;;  %v7385_v5 = vld [vmem:[#allocation13 + $0xbb8] sm:$0xff] }
 0x8ce   : > { %10351 = vmatpush1.bf16.msra.mxu1 %v10350_v7  ;;  %v6932_v7 = vld [vmem:[#allocation13 + $0x988] sm:$0xff] }
 0x8cf   : > { %10354 = vmatprep.subr.msk.bf16.mxu1 %vm13007_vm5, %v10352_v8  ;;  %v6934_v8 = vld [vmem:[#allocation13 + $0x998] sm:$0xff] }
 0x8d0   : > { %v10394_v9 = vpack.c.bf16 %v6934_v8, %v6932_v7  ;;  %v7154_v7 = vld [vmem:[#allocation13 + $0xa80] sm:$0xff]  ;;  %v7156_v8 = vld [vmem:[#allocation13 + $0xa90] sm:$0xff] }
 0x8d1   : > { %v10432_v10 = vpack.c.bf16 %v7156_v8, %v7154_v7  ;;  %v7387_v8 = vld [vmem:[#allocation13 + $0xbc8] sm:$0xff] }
 0x8d2   : > { %10357 = vmatpush1.bf16.msk.msra.mxu1 %vm13007_vm5, %v10355_v41  ;;  %v6936_v41 = vld [vmem:[#allocation13 + $0x9a8] sm:$0xff] }
 0x8d3   : > { %10359 = vmatprep.subr.bf16.mxu1 %v10358_v12  ;;  %v6938_v12 = vld [vmem:[#allocation13 + $0x9b8] sm:$0xff] }
 0x8d4   : > { %v10398_v42 = vpack.c.bf16 %v6938_v12, %v6936_v41  ;;  %v7158_v41 = vld [vmem:[#allocation13 + $0xaa0] sm:$0xff]  ;;  %v7160_v12 = vld [vmem:[#allocation13 + $0xab0] sm:$0xff] }
 0x8d5   : > { %9108 = vmatmul.mubr.msk.f32.vlgmr.msra.gmra.mrb[18].mxu1 %vm4851_vm9, %v6612_v26  ;;  %v10436_v15 = vpack.c.bf16 %v7160_v12, %v7158_v41  ;;  %v7388_v41 = vld [vmem:[#allocation13 + $0xbd0] sm:$0xff] }
 0x8d6   : > { %10361 = vmatpush1.bf16.msra.mxu1 %v10360_v16  ;;  %6695 = vmatprep.mubr.f32.mxu1 %v11857_v0  ;;  %v6836_v16 = vpop.permute.xlu0 %6835 }
 0x8d7   : > { %10363 = vmatprep.subr.bf16.mxu1 %v10362_v21  ;;  %v6940_v21 = vld [vmem:[#allocation13 + $0x9c8] sm:$0xff] }
 0x8d8   : > { %v10402_v26 = vpack.c.bf16 %v6942_v22, %v6940_v21  ;;  %v7164_v21 = vld [vmem:[#allocation13 + $0xad0] sm:$0xff]  ;;  %v7167_v22 = vld [vmem:[#allocation13 + $0xae8] sm:$0xff] }
 0x8d9   : > { %9109 = vmatmul.mubr.msk.f32.gmra.mrb[20].mxu1 %vm4851_vm9, %v6614_v19 }
 0x8da   : > { %10365 = vmatpush1.bf16.msra.mxu1 %v10364_v32  ;;  %6801 = vmatprep.mubr.f32.mxu1 %v11857_v0  ;;  %v6838_v32 = vpop.permute.xlu1 %6837 }
 0x8db   : > { %10367 = vmatprep.subr.bf16.mxu1 %v10366_v33  ;;  %v6944_v33 = vld [vmem:[#allocation13 + $0x9e8] sm:$0xff] }
 0x8dc   : > { %v10406_v19 = vpack.c.bf16 %v6946_v34, %v6944_v33  ;;  %v7269_v33 = vld [vmem:[#allocation13 + $0xb18] sm:$0xff] }
 0x8de   : > { %10369 = vmatpush1.bf16.msra.mxu1 %v10368_v37  ;;  %v7044_v37 = vld [vmem:[#allocation13 + $0xa08] sm:$0xff] }
 0x8df   : > { %10372 = vmatprep.subr.msk.bf16.mxu1 %vm13007_vm5, %v10370_v38  ;;  %v7046_v38 = vld [vmem:[#allocation13 + $0xa18] sm:$0xff] }
 0x8e0   : > { %v10412_v44 = vpack.c.bf16 %v7046_v38, %v7044_v37 }
 0x8e2   : > { %10375 = vmatpush1.bf16.msk.msra.mxu1 %vm13007_vm5, %v10373_v47  ;;  %v7048_v47 = vld [vmem:[#allocation13 + $0xa28] sm:$0xff] }
 0x8e3   : > { %10377 = vmatprep.subr.bf16.mxu1 %v10376_v48  ;;  %v7050_v48 = vld [vmem:[#allocation13 + $0xa38] sm:$0xff] }
 0x8e4   : > { %v10416_v2 = vpack.c.bf16 %v7050_v48, %v7048_v47  ;;  %v7277_v47 = vld [vmem:[#allocation13 + $0xb58] sm:$0xff] }
 0x8e5   : > { %9112 = vmatmul.mubr.msk.f32.vlgmr.msra.gmra.mrb[18].mxu1 %vm4851_vm9, %v6724_v56 }
 0x8e6   : > { %10379 = vmatpush1.bf16.msra.mxu1 %v10378_v24  ;;  %6807 = vmatprep.mubr.f32.mxu1 %v11857_v0  ;;  %v6948_v24 = vpop.permute.xlu0 %6947 }
 0x8e7   : > { %10381 = vmatprep.subr.bf16.mxu1 %v10380_v53  ;;  %v7052_v53 = vld [vmem:[#allocation13 + $0xa48] sm:$0xff] }
 0x8e8   : > { %v10420_v56 = vpack.c.bf16 %v7054_v3, %v7052_v53  ;;  %v7281_v53 = vld [vmem:[#allocation13 + $0xb78] sm:$0xf] }
 0x8e9   : > { %9113 = vmatmul.mubr.msk.f32.gmra.mrb[20].mxu1 %vm4851_vm9, %v6726_v62 }
 0x8ea   : > { %10383 = vmatpush1.bf16.msra.mxu1 %v10382_v4  ;;  %6913 = vmatprep.mubr.f32.mxu1 %v11857_v0  ;;  %v6950_v4 = vpop.permute.xlu1 %6949  ;;  %v7171_v45 = vpop.permute.xlu0 %7170 }
 0x8eb   : > { %10385 = vmatprep.subr.bf16.mxu1 %v10384_v61  ;;  %v7056_v61 = vld [vmem:[#allocation13 + $0xa68] sm:$0xff] }
 0x8ec   : > { %v10424_v62 = vpack.c.bf16 %v7058_v43, %v7056_v61 }
 0x8ee   : > { %10387 = vmatpush1.bf16.msra.mxu1 %v10386_v6  ;;  %v7155_v6 = vld [vmem:[#allocation13 + $0xa88] sm:$0xff]  ;;  %v7173_v52 = vpop.permute.xlu1 %7172  ;;  %v7283_v7 = vpop.permute.xlu0 %7282 }
 0x8ef   : > { %10390 = vmatprep.subr.msk.bf16.mxu1 %vm13007_vm5, %v10388_v59  ;;  %v7157_v59 = vld [vmem:[#allocation13 + $0xa98] sm:$0xff] }
 0x8f0   : > { %v10430_v55 = vpack.c.bf16 %v7157_v59, %v7155_v6  ;;  %v10470_v59 = vpack.c.bf16 %v7385_v5, %v7383_v63  ;;  %v7628_v63 = vld [vmem:[#allocation16 + $0x38] sm:$0xff] }
 0x8f2   : > { %10393 = vmatpush1.bf16.msk.msra.mxu1 %vm13007_vm5, %v10391_v27  ;;  %v7159_v27 = vld [vmem:[#allocation13 + $0xaa8] sm:$0xff]  ;;  %v7285_v12 = vpop.permute.xlu1 %7284 }
 0x8f3   : > { %10395 = vmatprep.subr.bf16.mxu1 %v10394_v9  ;;  %v7161_v9 = vld [vmem:[#allocation13 + $0xab8] sm:$0xff] }
 0x8f4   : > { %v10434_v11 = vpack.c.bf16 %v7161_v9, %v7159_v27  ;;  %v7389_v27 = vld [vmem:[#allocation13 + $0xbd8] sm:$0xff] }
 0x8f5   : > { %9116 = vmatmul.mubr.msk.f32.vlgmr.msra.gmra.mrb[18].mxu1 %vm4851_vm9, %v6836_v16  ;;  %v7162_v16 = vld [vmem:[#allocation13 + $0xac0] sm:$0xff] }
 0x8f6   : > { %10397 = vmatpush1.bf16.msra.mxu1 %v10396_v13  ;;  %6919 = vmatprep.mubr.f32.mxu1 %v11857_v0  ;;  %v7163_v13 = vld [vmem:[#allocation13 + $0xac8] sm:$0xff] }
 0x8f7   : > { %10399 = vmatprep.subr.bf16.mxu1 %v10398_v42  ;;  %v7165_v42 = vld [vmem:[#allocation13 + $0xad8] sm:$0xff] }
 0x8f8   : > { %v10438_v25 = vpack.c.bf16 %v7165_v42, %v7163_v13  ;;  %v7391_v13 = vld [vmem:[#allocation13 + $0xbe8] sm:$0xff]  ;;  %v7393_v42 = vld [vmem:[#allocation13 + $0xbf8] sm:$0xf] }
 0x8f9   : > { %9117 = vmatmul.mubr.msk.f32.gmra.mrb[20].mxu1 %vm4851_vm9, %v6838_v32  ;;  %v7267_v32 = vld [vmem:[#allocation13 + $0xb08] sm:$0xff] }
 0x8fa   : > { %10401 = vmatpush1.bf16.msra.mxu1 %v10400_v23  ;;  %7025 = vmatprep.mubr.f32.mxu1 %v11857_v0  ;;  %v7169_v23 = vld [vmem:[#allocation13 + $0xaf8] sm:$0xf] }
 0x8fb   : > { %10403 = vmatprep.subr.bf16.mxu1 %v10402_v26  ;;  %v10440_v26 = vpack.c.bf16 %v7164_v21, %v7162_v16  ;;  %v10442_v29 = vpack.c.bf16 %v7169_v23, %v7167_v22  ;;  %v7390_v16 = vld [vmem:[#allocation13 + $0xbe0] sm:$0xff]  ;;  %v7392_v21 = vld [vmem:[#allocation13 + $0xbf0] sm:$0xf]  ;;  %v7491_v22 = vld [vmem:[#allocation13 + $0xc08] sm:$0xff] }
 0x8fc   : > { %v7493_v23 = vld [vmem:[#allocation13 + $0xc18] sm:$0xff] }
 0x8fe   : > { %10405 = vmatpush1.bf16.msra.mxu1 %v10404_v14  ;;  %v10448_v14 = vpack.c.bf16 %v7269_v33, %v7267_v32  ;;  %v7495_v32 = vld [vmem:[#allocation13 + $0xc28] sm:$0xff]  ;;  %v7497_v33 = vld [vmem:[#allocation13 + $0xc38] sm:$0xff] }
 0x8ff   : > { %10408 = vmatprep.subr.msk.bf16.mxu1 %vm13007_vm5, %v10406_v19  ;;  %v7266_v19 = vld [vmem:[#allocation13 + $0xb00] sm:$0xff] }
 0x900   : > { %v10450_v37 = vpack.c.bf16 %v7268_v35, %v7266_v19  ;;  %v7494_v19 = vld [vmem:[#allocation13 + $0xc20] sm:$0xff]  ;;  %v7496_v35 = vld [vmem:[#allocation13 + $0xc30] sm:$0xff] }
 0x902   : > { %10411 = vmatpush1.bf16.msk.msra.mxu1 %vm13007_vm5, %v10409_v39  ;;  %v7270_v39 = vld [vmem:[#allocation13 + $0xb20] sm:$0xff] }
 0x903   : > { %10413 = vmatprep.subr.bf16.mxu1 %v10412_v44  ;;  %v7272_v44 = vld [vmem:[#allocation13 + $0xb30] sm:$0xff] }
 0x904   : > { %v10454_v48 = vpack.c.bf16 %v7272_v44, %v7270_v39  ;;  %v7498_v44 = vld [vmem:[#allocation13 + $0xc40] sm:$0xff] }
 0x905   : > { %9120 = vmatmul.mubr.msk.f32.vlgmr.msra.gmra.mrb[18].mxu1 %vm4851_vm9, %v6948_v24  ;;  %v7279_v24 = vld [vmem:[#allocation13 + $0xb68] sm:$0xff] }
 0x906   : > { %10415 = vmatpush1.bf16.msra.mxu1 %v10414_v49  ;;  %7031 = vmatprep.mubr.f32.mxu1 %v11857_v0  ;;  %v10456_v49 = vpack.c.bf16 %v7277_v47, %v7275_v46  ;;  %v7397_v46 = vpop.permute.xlu1 %7396  ;;  %v7503_v47 = vld [vmem:[#allocation13 + $0xc68] sm:$0xff] }
 0x907   : > { %10417 = vmatprep.subr.bf16.mxu1 %v10416_v2  ;;  %v7274_v2 = vld [vmem:[#allocation13 + $0xb40] sm:$0xff] }
 0x908   : > { %v10458_v3 = vpack.c.bf16 %v7276_v51, %v7274_v2  ;;  %v7502_v51 = vld [vmem:[#allocation13 + $0xc60] sm:$0xff] }
 0x909   : > { %9121 = vmatmul.mubr.msk.f32.gmra.mrb[20].mxu1 %vm4851_vm9, %v6950_v4  ;;  %v7381_v4 = vld [vmem:[#allocation13 + $0xb98] sm:$0xff] }
 0x90a   : > { %10419 = vmatpush1.bf16.msra.mxu1 %v10418_v54  ;;  %7136 = vmatprep.mubr.f32.mxu1 %v11857_v0  ;;  %v10460_v54 = vpack.c.bf16 %v7281_v53, %v7279_v24  ;;  %v10466_v43 = vpack.c.bf16 %v7381_v4, %v7379_v60  ;;  %v7621_v53 = vld [vmem:[#allocation16] sm:$0xff] }
 0x90b   : > { %10421 = vmatprep.subr.bf16.mxu1 %v10420_v56  ;;  %v7278_v56 = vld [vmem:[#allocation13 + $0xb60] sm:$0xff] }
 0x90c   : > { %v10463_v61 = vpack.c.bf16 %v7280_v57, %v7278_v56  ;;  %v7623_v56 = vld [vmem:[#allocation16 + $0x10] sm:$0xff]  ;;  %v7624_v57 = vld [vmem:[#allocation16 + $0x18] sm:$0xff] }
 0x90d   : > { %v10506_v4 = vpack.c.bf16 %v7624_v57, %v7623_v56  ;;  %v7735_v56 = vld [vmem:[#allocation17 + $0x60] sm:$0xff]  ;;  %v7736_v57 = vld [vmem:[#allocation17 + $0x68] sm:$0xff] }
 0x90e   : > { %10423 = vmatpush1.bf16.msra.mxu1 %v10422_v50  ;;  %v7378_v50 = vld [vmem:[#allocation13 + $0xb80] sm:$0xff] }
 0x90f   : > { %10426 = vmatprep.subr.msk.bf16.mxu1 %vm13007_vm5, %v10424_v62  ;;  %v7380_v62 = vld [vmem:[#allocation13 + $0xb90] sm:$0xff] }
 0x910   : > { %v10468_v6 = vpack.c.bf16 %v7380_v62, %v7378_v50  ;;  %v7509_v50 = vpop.permute.xlu1 %7508  ;;  %v7627_v62 = vld [vmem:[#allocation16 + $0x30] sm:$0xff] }
 0x911   : > { %v10512_v5 = vpack.c.bf16 %v7628_v63, %v7627_v62  ;;  %v7741_v63 = vld [vmem:[#allocation17 + $0x90] sm:$0xff] }
 0x912   : > { %10429 = vmatpush1.bf16.msk.msra.mxu1 %vm13007_vm5, %v10427_v40  ;;  %v7382_v40 = vld [vmem:[#allocation13 + $0xba0] sm:$0xff] }
 0x913   : > { %10431 = vmatprep.subr.bf16.mxu1 %v10430_v55  ;;  %v7384_v55 = vld [vmem:[#allocation13 + $0xbb0] sm:$0xff] }
 0x914   : > { %v10472_v9 = vpack.c.bf16 %v7384_v55, %v7382_v40  ;;  %v7631_v55 = vld [vmem:[#allocation16 + $0x50] sm:$0xff] }
 0x915   : > { %9124 = vmatmul.mubr.msk.f32.vlgmr.msra.gmra.mrb[18].mxu1 %vm4851_vm9, %v13124_v30  ;;  %v7166_v30 = vld [vmem:[#allocation13 + $0xae0] sm:$0xff] }
 0x916   : > { %10433 = vmatpush1.bf16.msra.mxu1 %v10432_v10  ;;  %7142 = vmatprep.mubr.f32.mxu1 %v11857_v0  ;;  %v10445_v34 = vpack.c.bf16 %v7168_v31, %v7166_v30  ;;  %v10474_v10 = vpack.c.bf16 %v7389_v27, %v7387_v8  ;;  %v7490_v30 = vld [vmem:[#allocation13 + $0xc00] sm:$0xff]  ;;  %v7492_v31 = vld [vmem:[#allocation13 + $0xc10] sm:$0xff] }
 0x917   : > { %10435 = vmatprep.subr.bf16.mxu1 %v10434_v11  ;;  %v7386_v11 = vld [vmem:[#allocation13 + $0xbc0] sm:$0xff] }
 0x918   : > { %v7633_v27 = vld [vmem:[#allocation16 + $0x60] sm:$0xff] }
 0x919   : > { %9125 = vmatmul.mubr.msk.f32.gmra.mrb[20].mxu1 %vm4851_vm9, %v13115_v28  ;;  %v7273_v28 = vld [vmem:[#allocation13 + $0xb38] sm:$0xff] }
 0x91a   : > { %10437 = vmatpush1.bf16.msra.mxu1 %v10436_v15  ;;  %7248 = vmatprep.mubr.f32.mxu1 %v11857_v0  ;;  %v10452_v38 = vpack.c.bf16 %v7273_v28, %v7271_v36  ;;  %v10476_v15 = vpack.c.bf16 %v7388_v41, %v7386_v11  ;;  %v7395_v36 = vpop.permute.xlu0 %7394  ;;  %v7499_v28 = vld [vmem:[#allocation13 + $0xc48] sm:$0xff]  ;;  %v7635_v11 = vld [vmem:[#allocation16 + $0x70] sm:$0xff]  ;;  %v7636_v41 = vld [vmem:[#allocation16 + $0x78] sm:$0xff] }
 0x91b   : > { %10439 = vmatprep.subr.bf16.mxu1 %v10438_v25  ;;  %v10478_v25 = vpack.c.bf16 %v7393_v42, %v7391_v13  ;;  %v7637_v13 = vld [vmem:[#allocation16 + $0x80] sm:$0xff]  ;;  %v7638_v42 = vld [vmem:[#allocation16 + $0x88] sm:$0xff] }
 0x91e   : > { %10441 = vmatpush1.bf16.msra.mxu1 %v10440_v26  ;;  %v10481_v26 = vpack.c.bf16 %v7392_v21, %v7390_v16  ;;  %v7507_v60 = vpop.permute.xlu0 %7506  ;;  %v7640_v16 = vld [vmem:[#allocation16 + $0x98] sm:$0xff] }
 0x91f   : > { %10444 = vmatprep.subr.msk.bf16.mxu1 %vm13007_vm5, %v10442_v29  ;;  %v10484_v29 = vpack.c.bf16 %v7493_v23, %v7491_v22  ;;  %v7601_v22 = vld [vmem:[#allocation14] sm:$0x3] }
 0x920   : > { %v7606_v23 = vrot.slane %v7601_v22, %v4387_v18  ;;  %v7726_v18 = vld [vmem:[#allocation17 + $0x18] sm:$0xff] }
 0x922   : > { %10447 = vmatpush1.bf16.msk.msra.mxu1 %vm13007_vm5, %v10445_v34  ;;  %v10486_v34 = vpack.c.bf16 %v7492_v31, %v7490_v30 }
 0x923   : > { %10449 = vmatprep.subr.bf16.mxu1 %v10448_v14  ;;  %v10488_v14 = vpack.c.bf16 %v7497_v33, %v7495_v32  ;;  %v7723_v32 = vld [vmem:[#allocation17] sm:$0xff]  ;;  %v7724_v33 = vld [vmem:[#allocation17 + $0x8] sm:$0xff] }
 0x925   : > { %9128 = vmatmul.mubr.msk.f32.vlgmr.msra.gmra.mrb[18].mxu1 %vm4851_vm9, %v7171_v45  ;;  %v7500_v45 = vld [vmem:[#allocation13 + $0xc50] sm:$0xff] }
 0x926   : > { %10451 = vmatpush1.bf16.msra.mxu1 %v10450_v37  ;;  %7254 = vmatprep.mubr.f32.mxu1 %v11857_v0  ;;  %v7501_v37 = vld [vmem:[#allocation13 + $0xc58] sm:$0xff] }
 0x927   : > { %10453 = vmatprep.subr.bf16.mxu1 %v10452_v38  ;;  %v10490_v38 = vpack.c.bf16 %v7496_v35, %v7494_v19  ;;  %v10492_v39 = vpack.c.bf16 %v7501_v37, %v7499_v28  ;;  %v10533_v35 = vpack.c.bf16 %v7724_v33, %v7723_v32  ;;  %v7820_v32 = vld [vmem:[#allocation19] sm:$0x1f] }
 0x928   : > { %v8061_v33 = vld [vmem:[#allocation22 + $0x50] sm:$0xff] }
 0x929   : > { %9129 = vmatmul.mubr.msk.f32.gmra.mrb[20].mxu1 %vm4851_vm9, %v7173_v52  ;;  %v7504_v52 = vld [vmem:[#allocation13 + $0xc70] sm:$0xf] }
 0x92a   : > { %10455 = vmatpush1.bf16.msra.mxu1 %v10454_v48  ;;  %7360 = vmatprep.mubr.f32.mxu1 %v11857_v0  ;;  %v7505_v48 = vld [vmem:[#allocation13 + $0xc78] sm:$0xf]  ;;  %v10499_v24 = vpack.c.bf16 %v7504_v52, %v7502_v51  ;;  %v7731_v51 = vld [vmem:[#allocation17 + $0x40] sm:$0xff]  ;;  %v7732_v52 = vld [vmem:[#allocation17 + $0x48] sm:$0xff] }
 0x92b   : > { %10457 = vmatprep.subr.bf16.mxu1 %v10456_v49  ;;  %v10494_v49 = vpack.c.bf16 %v7500_v45, %v7498_v44  ;;  %v10496_v2 = vpack.c.bf16 %v7505_v48, %v7503_v47  ;;  %v7727_v45 = vld [vmem:[#allocation17 + $0x20] sm:$0xff]  ;;  %v7729_v48 = vld [vmem:[#allocation17 + $0x30] sm:$0xff] }
 0x92e   : > { %10459 = vmatpush1.bf16.msra.mxu1 %v10458_v3  ;;  %v7622_v3 = vld [vmem:[#allocation16 + $0x8] sm:$0xff] }
 0x92f   : > { %10462 = vmatprep.subr.msk.bf16.mxu1 %vm13007_vm5, %v10460_v54  ;;  %v10503_v54 = vpack.c.bf16 %v7622_v3, %v7621_v53  ;;  %v7733_v53 = vld [vmem:[#allocation17 + $0x50] sm:$0xff]  ;;  %v7734_v3 = vld [vmem:[#allocation17 + $0x58] sm:$0xff] }
 0x932   : > { %10465 = vmatpush1.bf16.msk.msra.mxu1 %vm13007_vm5, %v10463_v61  ;;  %v7625_v61 = vld [vmem:[#allocation16 + $0x20] sm:$0xff] }
 0x933   : > { %10467 = vmatprep.subr.bf16.mxu1 %v10466_v43  ;;  %v7626_v43 = vld [vmem:[#allocation16 + $0x28] sm:$0xff] }
 0x934   : > { %v10509_v1 = vpack.c.bf16 %v7626_v43, %v7625_v61  ;;  %v7738_v61 = vld [vmem:[#allocation17 + $0x78] sm:$0xff] }
 0x935   : > { %9132 = vmatmul.mubr.msk.f32.vlgmr.msra.gmra.mrb[18].mxu1 %vm4851_vm9, %v7283_v7  ;;  %v7632_v7 = vld [vmem:[#allocation16 + $0x58] sm:$0xff] }
 0x936   : > { %10469 = vmatpush1.bf16.msra.mxu1 %v10468_v6  ;;  %7366 = vmatprep.mubr.f32.mxu1 %v11857_v0  ;;  %v7629_v6 = vld [vmem:[#allocation16 + $0x40] sm:$0xff]  ;;  %v10518_v8 = vpack.c.bf16 %v7632_v7, %v7631_v55 }
 0x937   : > { %10471 = vmatprep.subr.bf16.mxu1 %v10470_v59  ;;  %v7630_v59 = vld [vmem:[#allocation16 + $0x48] sm:$0xff]  ;;  %v7977_v7 = vld [vmem:[#allocation22 + $0x10] sm:$0xff] }
 0x938   : > { %v10515_v40 = vpack.c.bf16 %v7630_v59, %v7629_v6  ;;  %v7975_v59 = vld [vmem:[#allocation22] sm:$0xff] }
 0x939   : > { %9133 = vmatmul.mubr.msk.f32.gmra.mrb[20].mxu1 %vm4851_vm9, %v7285_v12  ;;  %v10524_v12 = vpack.c.bf16 %v7636_v41, %v7635_v11  ;;  %v7981_v41 = vld [vmem:[#allocation22 + $0x30] sm:$0xff] }
 0x93a   : > { %10473 = vmatpush1.bf16.msra.mxu1 %v10472_v9  ;;  %7472 = vmatprep.mubr.f32.mxu1 %v11857_v0  ;;  %v7634_v9 = vld [vmem:[#allocation16 + $0x68] sm:$0xff] }
 0x93b   : > { %10475 = vmatprep.subr.bf16.mxu1 %v10474_v10  ;;  %v10521_v10 = vpack.c.bf16 %v7634_v9, %v7633_v27  ;;  %v7979_v9 = vld [vmem:[#allocation22 + $0x20] sm:$0xff] }
 0x93e   : > { %10477 = vmatpush1.bf16.msra.mxu1 %v10476_v15  ;;  %v10527_v15 = vpack.c.bf16 %v7638_v42, %v7637_v13 }
 0x93f   : > { %10480 = vmatprep.subr.msk.bf16.mxu1 %vm13007_vm5, %v10478_v25  ;;  %v7639_v25 = vld [vmem:[#allocation16 + $0x90] sm:$0xff] }
 0x940   : > { %v10530_v21 = vpack.c.bf16 %v7640_v16, %v7639_v25 }
 0x942   : > { %10483 = vmatpush1.bf16.msk.msra.mxu1 %vm13007_vm5, %v10481_v26  ;;  %v7610_v26 = vrot.slane %v7601_v22, %v4391_v20 }
 0x943   : > { %10485 = vmatprep.subr.bf16.mxu1 %v10484_v29 }
 0x945   : > { %9136 = vmatmul.mubr.msk.f32.vlgmr.msra.gmra.mrb[18].mxu1 %vm4851_vm9, %v7395_v36 }
 0x946   : > { %10487 = vmatpush1.bf16.msra.mxu1 %v10486_v34  ;;  %7478 = vmatprep.mubr.f32.mxu1 %v11857_v0 }
 0x947   : > { %10489 = vmatprep.subr.bf16.mxu1 %v10488_v14 }
 0x949   : > { %9137 = vmatmul.mubr.msk.f32.gmra.mrb[20].mxu1 %vm4851_vm9, %v7397_v46  ;;  %v7728_v46 = vld [vmem:[#allocation17 + $0x28] sm:$0xff] }
 0x94a   : > { %10491 = vmatpush1.bf16.msra.mxu1 %v10490_v38  ;;  %7584 = vmatprep.mubr.f32.mxu1 %v11857_v0  ;;  %v7725_v38 = vld [vmem:[#allocation17 + $0x10] sm:$0xff]  ;;  %v10539_v47 = vpack.c.bf16 %v7728_v46, %v7727_v45  ;;  %v7984_v45 = vld [vmem:[#allocation22 + $0x48] sm:$0xff] }
 0x94b   : > { %10493 = vmatprep.subr.bf16.mxu1 %v10492_v39  ;;  %v10536_v20 = vpack.c.bf16 %v7726_v18, %v7725_v38  ;;  %v8066_v38 = vld [vmem:[#allocation22 + $0x78] sm:$0xff] }
 0x94e   : > { %10495 = vmatpush1.bf16.msra.mxu1 %v10494_v49  ;;  %v7730_v49 = vld [vmem:[#allocation17 + $0x38] sm:$0xff] }
 0x94f   : > { %10498 = vmatprep.subr.msk.bf16.mxu1 %vm13007_vm5, %v10496_v2  ;;  %v10542_v2 = vpack.c.bf16 %v7730_v49, %v7729_v48  ;;  %v8070_v48 = vld [vmem:[#allocation22 + $0x98] sm:$0xff] }
 0x952   : > { %10501 = vmatpush1.bf16.msk.msra.mxu1 %vm13007_vm5, %v10499_v24  ;;  %v10545_v24 = vpack.c.bf16 %v7732_v52, %v7731_v51  ;;  %v8146_v52 = vld [vmem:[#allocation22 + $0xa0] sm:$0xff] }
 0x953   : > { %10502 = vmatprep.subr.bf16.mxu1 %v11862_v58 }
 0x955   : > { %9140 = vmatmul.mubr.msk.f32.vlgmr.msra.gmra.mrb[18].mxu1 %vm4851_vm9, %v7507_v60  ;;  %v10551_v60 = vpack.c.bf16 %v7736_v57, %v7735_v56 }
 0x956   : > { %7590 = vmatprep.mubr.f32.mxu1 %v11857_v0  ;;  %10504 = vmatpush1.bf16.msra.mxu1 %v10503_v54  ;;  %v10548_v54 = vpack.c.bf16 %v7734_v3, %v7733_v53 }
 0x957   : > { %10505 = vmatprep.subr.bf16.mxu1 %v11862_v58 }
 0x959   : > { %9141 = vmatmul.mubr.msk.f32.gmra.mrb[20].mxu1 %vm4851_vm9, %v7509_v50  ;;  %v7739_v50 = vld [vmem:[#allocation17 + $0x80] sm:$0xff] }
 0x95a   : > { %10507 = vmatpush1.bf16.msra.mxu1 %v10506_v4  ;;  %v7737_v4 = vld [vmem:[#allocation17 + $0x70] sm:$0xff] }
 0x95b   : > { %10508 = vmatprep.subr.bf16.mxu1 %v11862_v58  ;;  %v10554_v43 = vpack.c.bf16 %v7738_v61, %v7737_v4  ;;  %v8149_v4 = vld [vmem:[#allocation22 + $0xb8] sm:$0xff] }
 0x95e   : > { %10510 = vmatpush1.bf16.msra.mxu1 %v10509_v1  ;;  %v7740_v1 = vld [vmem:[#allocation17 + $0x88] sm:$0xff] }
 0x95f   : > { %10511 = vmatprep.subr.bf16.mxu1 %v11862_v58  ;;  %v10557_v62 = vpack.c.bf16 %v7740_v1, %v7739_v50  ;;  %v8151_v50 = vld [vmem:[#allocation22 + $0xc8] sm:$0xff] }
 0x962   : > { %10513 = vmatpush1.bf16.msra.mxu1 %v10512_v5  ;;  %v7742_v5 = vld [vmem:[#allocation17 + $0x98] sm:$0xff] }
 0x963   : > { %10514 = vmatprep.subr.bf16.mxu1 %v11862_v58  ;;  %v10560_v6 = vpack.c.bf16 %v7742_v5, %v7741_v63  ;;  %v8153_v63 = vld [vmem:[#allocation22 + $0xd8] sm:$0xff] }
 0x966   : > { %10516 = vmatpush1.bf16.msra.mxu1 %v10515_v40  ;;  %v7976_v40 = vld [vmem:[#allocation22 + $0x8] sm:$0xff] }
 0x967   : > { %10517 = vmatprep.subr.bf16.mxu1 %v11862_v58  ;;  %v10571_v55 = vpack.c.bf16 %v7976_v40, %v7975_v59  ;;  %v8155_v59 = vld [vmem:[#allocation22 + $0xe8] sm:$0xff] }
 0x96a   : > { %10519 = vmatpush1.bf16.msra.mxu1 %v10518_v8  ;;  %v7978_v8 = vld [vmem:[#allocation22 + $0x18] sm:$0xff] }
 0x96b   : > { %10520 = vmatprep.subr.bf16.mxu1 %v11862_v58  ;;  %v10574_v27 = vpack.c.bf16 %v7978_v8, %v7977_v7  ;;  %v8232_v7 = vld [vmem:[#allocation22 + $0xf8] sm:$0xff] }
 0x96e   : > { %10522 = vmatpush1.bf16.msra.mxu1 %v10521_v10  ;;  %v7980_v10 = vld [vmem:[#allocation22 + $0x28] sm:$0xff] }
 0x96f   : > { %10523 = vmatprep.subr.bf16.mxu1 %v11862_v58  ;;  %v10577_v11 = vpack.c.bf16 %v7980_v10, %v7979_v9  ;;  %v8233_v9 = vld [vmem:[#allocation22 + $0x100] sm:$0xff]  ;;  %v8234_v10 = vld [vmem:[#allocation22 + $0x108] sm:$0xff] }
 0x972   : > { %10525 = vmatpush1.bf16.msra.mxu1 %v10524_v12  ;;  %v7982_v12 = vld [vmem:[#allocation22 + $0x38] sm:$0xff] }
 0x973   : > { %10526 = vmatprep.subr.bf16.mxu1 %v11862_v58  ;;  %v10580_v13 = vpack.c.bf16 %v7982_v12, %v7981_v41  ;;  %v8235_v41 = vld [vmem:[#allocation22 + $0x110] sm:$0xff]  ;;  %v8236_v12 = vld [vmem:[#allocation22 + $0x118] sm:$0xff] }
 0x976   : > { %10528 = vmatpush1.bf16.msra.mxu1 %v10527_v15 }
 0x977   : > { %10529 = vmatprep.subr.bf16.mxu1 %v11862_v58 }
 0x97a   : > { %10531 = vmatpush1.bf16.msra.mxu1 %v10530_v21 }
 0x97b   : > { %10532 = vmatprep.subr.bf16.mxu1 %v11862_v58 }
 0xa28   : > { %v7586_v29 = vpop.f32.mrb[18].mxu1 }
 0xa29   : > { %v13360_v30 = vadd.f32 %v7606_v23, %v7586_v29  ;;  %v7588_v31 = vpop.f32.mrb[19].mxu1 }
 0xa2a   : > { %v7614_v34 = vadd.f32 %v7610_v26, %v7588_v31 }
 0xa2b   : > { %v7617_v36 = vmax.f32 %v13360_v30, 0.0 }
 0xa2c   : > { %v7618_v14 = vmax.f32 %v7614_v34, 0.0  ;;  %v7592_v19 = vpop.f32.mrb[20].mxu1  ;;  %v8062_v34 = vld [vmem:[#allocation22 + $0x58] sm:$0xff] }
 0xa2d   : > { %v7615_v28 = vadd.f32 %v7606_v23, %v7592_v19  ;;  %v7594_v37 = vpop.f32.mrb[21].mxu1  ;;  %v10586_v19 = vpack.c.bf16 %v8062_v34, %v8061_v33  ;;  %v8320_v34 = vld [vmem:[#allocation22 + $0x160] sm:$0xff] }
 0xa2e   : > { %v7616_v39 = vadd.f32 %v7610_v26, %v7594_v37  ;;  %9142 = vmatprep.mubr.msk.f32.mxu1 %vm7641_vm10, %v7618_v14  ;;  %v8065_v37 = vld [vmem:[#allocation22 + $0x70] sm:$0xff] }
 0xa2f   : > { %7713 = vmatmul.mubr.f32.vlgmr.msra.gmra.mrb[22].mxu1 %v7617_v36  ;;  %v7619_v44 = vmax.f32 %v7615_v28, 0.0  ;;  %v10592_v18 = vpack.c.bf16 %v8066_v38, %v8065_v37  ;;  %v8324_v37 = vld [vmem:[#allocation22 + $0x180] sm:$0xff]  ;;  %v8325_v38 = vld [vmem:[#allocation22 + $0x188] sm:$0xff] }
 0xa30   : > { %v7620_v17 = vmax.f32 %v7616_v39, 0.0  ;;  %10534 = vmatpush1.bf16.msra.mxu1 %v10533_v35  ;;  %v8063_v35 = vld [vmem:[#allocation22 + $0x60] sm:$0xff] }
 0xa31   : > { %10535 = vmatprep.subr.bf16.mxu1 %v11862_v58  ;;  %v8067_v39 = vld [vmem:[#allocation22 + $0x80] sm:$0xff] }
 0xa32   : > { %9143 = vmatprep.mubr.msk.f32.mxu1 %vm7641_vm10, %v7620_v17 }
 0xa33   : > { %7718 = vmatmul.mubr.f32.gmra.mrb[24].mxu1 %v7619_v44 }
 0xa34   : > { %10537 = vmatpush1.bf16.msra.mxu1 %v10536_v20  ;;  %9144 = vmatprep.mubr.msk.f32.mxu1 %vm7641_vm10, %v7618_v14  ;;  %v7899_v14 = vld [vmem:[#allocation20] sm:$0x1f] }
 0xa35   : > { %10538 = vmatprep.subr.bf16.mxu1 %v11862_v58 }
 0xa38   : > { %10540 = vmatpush1.bf16.msra.mxu1 %v10539_v47  ;;  %v8069_v47 = vld [vmem:[#allocation22 + $0x90] sm:$0xff] }
 0xa39   : > { %10541 = vmatprep.subr.bf16.mxu1 %v11862_v58  ;;  %v10598_v49 = vpack.c.bf16 %v8070_v48, %v8069_v47  ;;  %v8405_v48 = vld [vmem:[#allocation25 + $0x20] sm:$0xff] }
 0xa3c   : > { %10543 = vmatpush1.bf16.msra.mxu1 %v10542_v2 }
 0xa3d   : > { %10544 = vmatprep.subr.bf16.mxu1 %v11862_v58 }
 0xa40   : > { %10546 = vmatpush1.bf16.msra.mxu1 %v10545_v24  ;;  %v8147_v24 = vld [vmem:[#allocation22 + $0xa8] sm:$0xff] }
 0xa41   : > { %10547 = vmatprep.subr.bf16.mxu1 %v11862_v58  ;;  %v10601_v56 = vpack.c.bf16 %v8147_v24, %v8146_v52  ;;  %v8408_v52 = vld [vmem:[#allocation25 + $0x38] sm:$0xff] }
 0xa44   : > { %10549 = vmatpush1.bf16.msra.mxu1 %v10548_v54 }
 0xa45   : > { %10550 = vmatprep.subr.bf16.mxu1 %v11862_v58 }
 0xa48   : > { %10552 = vmatpush1.bf16.msra.mxu1 %v10551_v60  ;;  %v8148_v60 = vld [vmem:[#allocation22 + $0xb0] sm:$0xff] }
 0xa49   : > { %10553 = vmatprep.subr.bf16.mxu1 %v11862_v58  ;;  %v10604_v61 = vpack.c.bf16 %v8149_v4, %v8148_v60  ;;  %v8413_v4 = vld [vmem:[#allocation25 + $0x60] sm:$0xff] }
 0xa4c   : > { %10555 = vmatpush1.bf16.msra.mxu1 %v10554_v43  ;;  %v8150_v43 = vld [vmem:[#allocation22 + $0xc0] sm:$0xff] }
 0xa4d   : > { %10556 = vmatprep.subr.bf16.mxu1 %v11862_v58  ;;  %v10607_v1 = vpack.c.bf16 %v8151_v50, %v8150_v43  ;;  %v8415_v50 = vld [vmem:[#allocation25 + $0x70] sm:$0xff] }
 0xa50   : > { %10558 = vmatpush1.bf16.msra.mxu1 %v10557_v62  ;;  %v8152_v62 = vld [vmem:[#allocation22 + $0xd0] sm:$0xff] }
 0xa51   : > { %10559 = vmatprep.subr.bf16.mxu1 %v11862_v58  ;;  %v10610_v5 = vpack.c.bf16 %v8153_v63, %v8152_v62  ;;  %v7974_v63 = vld [vmem:[#allocation23] sm:$0x1] }
 0xa54   : > { %10561 = vmatpush1.bf16.msra.mxu1 %v10560_v6  ;;  %v8154_v6 = vld [vmem:[#allocation22 + $0xe0] sm:$0xff] }
 0xa55   : > { %10570 = vmatprep.subr.bf16.mxu1 %v11862_v58  ;;  %v10613_v40 = vpack.c.bf16 %v8155_v59, %v8154_v6  ;;  %v8492_v6 = vld [vmem:[#allocation28] sm:$0xff]  ;;  %v8493_v59 = vld [vmem:[#allocation28 + $0x8] sm:$0xff] }
 0xa57   : > { %7808 = vmatmul.mubr.f32.vlgmr.msra.gmra.mrb[26].mxu1 %v7617_v36  ;;  %v8064_v36 = vld [vmem:[#allocation22 + $0x68] sm:$0xff] }
 0xa58   : > { %9145 = vmatprep.mubr.msk.f32.mxu1 %vm7641_vm10, %v7620_v17  ;;  %10572 = vmatpush3.bf16.msra.mxu1 %v10571_v55  ;;  %v10589_v28 = vpack.c.bf16 %v8064_v36, %v8063_v35  ;;  %v8068_v17 = vld [vmem:[#allocation22 + $0x88] sm:$0xff]  ;;  %v8231_v55 = vld [vmem:[#allocation22 + $0xf0] sm:$0xff]  ;;  %v8323_v36 = vld [vmem:[#allocation22 + $0x178] sm:$0xff] }
 0xa59   : > { %10573 = vmatprep.subr.bf16.mxu1 %v11862_v58  ;;  %v10595_v20 = vpack.c.bf16 %v8068_v17, %v8067_v39  ;;  %v10616_v8 = vpack.c.bf16 %v8232_v7, %v8231_v55  ;;  %v8322_v35 = vld [vmem:[#allocation22 + $0x170] sm:$0xff] }
 0xa5a   : > { %v8401_v17 = vld [vmem:[#allocation25] sm:$0xff] }
 0xa5b   : > { %7813 = vmatmul.mubr.f32.gmra.mrb[28].mxu1 %v7619_v44  ;;  %v7983_v44 = vld [vmem:[#allocation22 + $0x40] sm:$0xff] }
 0xa5c   : > { %9319 = vmatprep.mubr.msk.f32.mxu1 %vm11866_vm11, %v11857_v0  ;;  %10575 = vmatpush3.bf16.msra.mxu1 %v10574_v27  ;;  %v10583_v46 = vpack.c.bf16 %v7984_v45, %v7983_v44  ;;  %v8403_v44 = vld [vmem:[#allocation25 + $0x10] sm:$0xff] }
 0xa5d   : > { %10576 = vmatprep.subr.bf16.mxu1 %v11862_v58 }
 0xa60   : > { %10578 = vmatpush3.bf16.msra.mxu1 %v10577_v11  ;;  %v10619_v11 = vpack.c.bf16 %v8234_v10, %v8233_v9  ;;  %v8494_v9 = vld [vmem:[#allocation28 + $0x10] sm:$0xff]  ;;  %v8495_v10 = vld [vmem:[#allocation28 + $0x18] sm:$0xff] }
 0xa61   : > { %10579 = vmatprep.subr.bf16.mxu1 %v11862_v58 }
 0xa64   : > { %10581 = vmatpush3.bf16.msra.mxu1 %v10580_v13  ;;  %v10622_v13 = vpack.c.bf16 %v8236_v12, %v8235_v41  ;;  %v8496_v41 = vld [vmem:[#allocation28 + $0x20] sm:$0xff]  ;;  %v8497_v12 = vld [vmem:[#allocation28 + $0x28] sm:$0xff] }
 0xa65   : > { %10582 = vmatprep.subr.bf16.mxu1 %v11862_v58 }
 0xa68   : > { %10584 = vmatpush3.bf16.msra.mxu1 %v10583_v46  ;;  %v8404_v46 = vld [vmem:[#allocation25 + $0x18] sm:$0xff] }
 0xa69   : > { %10645 = vmatprep.subr.bf16.mxu1 %v11862_v58  ;;  %v10649_v47 = vpack.c.bf16 %v8404_v46, %v8403_v44 }
 0xb02   : > { %v7714_v42 = vpop.f32.mrb[22].mxu1 }
 0xb03   : > { %v7716_v15 = vpop.f32.mrb[23].mxu1 }
 0xb04   : > { %v8238_v15 = vld [vmem:[#allocation22 + $0x128] sm:$0xff] }
 0xb06   : > { %v7719_v25 = vpop.f32.mrb[24].mxu1 }
 0xb07   : > { %v7721_v16 = vpop.f32.mrb[25].mxu1 }
 0xb08   : > { %v8239_v16 = vld [vmem:[#allocation22 + $0x130] sm:$0xff] }
 0xb2a   : > { %v7809_v21 = vpop.f32.mrb[26].mxu1 }
 0xb2b   : > { %v7818_v22 = vmax.f32 %v7714_v42, %v7809_v21  ;;  %v7811_v23 = vpop.f32.mrb[27].mxu1  ;;  %v8237_v42 = vld [vmem:[#allocation22 + $0x120] sm:$0xff]  ;;  %v8240_v21 = vld [vmem:[#allocation22 + $0x138] sm:$0xff] }
 0xb2c   : > { %v8316_v23 = vld [vmem:[#allocation22 + $0x140] sm:$0xff] }
 0xb2e   : > { %v7814_v26 = vpop.f32.mrb[28].mxu1 }
 0xb2f   : > { %v7819_v29 = vmax.f32 %v7719_v25, %v7814_v26  ;;  %v7816_v30 = vpop.f32.mrb[29].mxu1  ;;  %v10625_v25 = vpack.c.bf16 %v8238_v15, %v8237_v42  ;;  %v8317_v26 = vld [vmem:[#allocation22 + $0x148] sm:$0xff]  ;;  %v8498_v42 = vld [vmem:[#allocation28 + $0x30] sm:$0xff] }
 0xb30   : > { %v8499_v15 = vld [vmem:[#allocation28 + $0x38] sm:$0xff] }
 0xb31   : > { %v10563_v31 = vpack.c.bf16 %v7819_v29, %v7818_v22  ;;  %v10628_v22 = vpack.c.bf16 %v8240_v21, %v8239_v16  ;;  %v10631_v29 = vpack.c.bf16 %v8317_v26, %v8316_v23  ;;  %v8500_v16 = vld [vmem:[#allocation28 + $0x40] sm:$0xff]  ;;  %v8501_v21 = vld [vmem:[#allocation28 + $0x48] sm:$0xff]  ;;  %v8502_v23 = vld [vmem:[#allocation28 + $0x50] sm:$0xf] }
 0xb32   : > { %v8416_v26 = vld [vmem:[#allocation26] sm:$0x1] }
 0xb33   : > { %10565 = vmatpush3.bf16.msk.msra.mxu0 %vm10564_vm13, %v10563_v31 }
 0xb34   : > { %10566 = vmatprep.subr.bf16.mxu0 %v11862_v58 }
 0xb36   : > { %9290 = vmatmul.mubr.msk.f32.vlgmr.msra.gmra.mrb[10].mxu0 %vm7821_vm14, %v7820_v32  ;;  %v8319_v32 = vld [vmem:[#allocation22 + $0x158] sm:$0xff] }
 0xb37   : > { %10569 = vmatpush3.bf16.msk.msra.mxu0 %vm10564_vm13, %v10563_v31  ;;  %9296 = vmatprep.mubr.msk.f32.mxu0 %vm11866_vm11, %v11857_v0  ;;  %v8318_v31 = vld [vmem:[#allocation22 + $0x150] sm:$0xff] }
 0xb38   : > { %10585 = vmatprep.subr.bf16.mxu0 %v11862_v58  ;;  %v10634_v33 = vpack.c.bf16 %v8319_v32, %v8318_v31 }
 0xb3a   : > { %9297 = vmatmul.mubr.msk.f32.vlgmr.msra.gmra.mrb[12].mxu0 %vm7821_vm14, %v7899_v14  ;;  %v8321_v14 = vld [vmem:[#allocation22 + $0x168] sm:$0xff] }
 0xb3b   : > { %10587 = vmatpush3.bf16.msra.mxu0 %v10586_v19  ;;  %9342 = vmatprep.mubr.msk.f32.mxu0 %vm11866_vm11, %v11857_v0  ;;  %v10637_v19 = vpack.c.bf16 %v8321_v14, %v8320_v34 }
 0xb3c   : > { %10588 = vmatprep.subr.bf16.mxu0 %v11862_v58 }
 0xb3f   : > { %10590 = vmatpush3.bf16.msra.mxu0 %v10589_v28  ;;  %v10640_v28 = vpack.c.bf16 %v8323_v36, %v8322_v35 }
 0xb40   : > { %10591 = vmatprep.subr.bf16.mxu0 %v11862_v58 }
 0xb43   : > { %10593 = vmatpush3.bf16.msra.mxu0 %v10592_v18  ;;  %v10643_v18 = vpack.c.bf16 %v8325_v38, %v8324_v37 }
 0xb44   : > { %10594 = vmatprep.subr.bf16.mxu0 %v11862_v58 }
 0xb47   : > { %10596 = vmatpush3.bf16.msra.mxu0 %v10595_v20  ;;  %v8402_v20 = vld [vmem:[#allocation25 + $0x8] sm:$0xff] }
 0xb48   : > { %10597 = vmatprep.subr.bf16.mxu0 %v11862_v58  ;;  %v10646_v45 = vpack.c.bf16 %v8402_v20, %v8401_v17 }
 0xb4b   : > { %10599 = vmatpush3.bf16.msra.mxu0 %v10598_v49  ;;  %v8406_v49 = vld [vmem:[#allocation25 + $0x28] sm:$0xff] }
 0xb4c   : > { %10600 = vmatprep.subr.bf16.mxu0 %v11862_v58 }
 0xc09   : > { %v7895_v2 = vpop.f32.mrb[10].mxu0 }
 0xc0a   : > { %v9291_v51 = vpop.f32.mrb[11].mxu0 }
 0xc0b   : > { %v8407_v51 = vld [vmem:[#allocation25 + $0x30] sm:$0xff] }
 0xc0c   : > { %v10655_v24 = vpack.c.bf16 %v8408_v52, %v8407_v51 }
 0xc0d   : > { %v7969_v53 = vpop.f32.mrb[12].mxu0 }
 0xc0e   : > { %v13398_v3 = vmax.f32 %v7895_v2, %v7969_v53  ;;  %v9298_v54 = vpop.f32.mrb[13].mxu0  ;;  %v10652_v2 = vpack.c.bf16 %v8406_v49, %v8405_v48  ;;  %v8409_v53 = vld [vmem:[#allocation25 + $0x40] sm:$0xff] }
 0xc10   : > { %9320 = vmatmul.mubr.msk.f32.vlgmr.msra.gmra.mrb[30].mxu1 %vm7985_vm15, %v13398_v3  ;;  %v8071_v57 = vrot.slane %v13398_v3, 1  ;;  %v8156_v27 = vrot.slane %v13398_v3, 2  ;;  %v8241_v30 = vrot.slane %v13398_v3, 3  ;;  %v8326_v39 = vrot.slane %v13398_v3, 4  ;;  %v8410_v3 = vld [vmem:[#allocation25 + $0x48] sm:$0xff] }
 0xc11   : > { %9444 = vmatprep.mubr.msk.f32.mxu1 %vm11866_vm11, %v11857_v0  ;;  %10647 = vmatpush3.bf16.msra.mxu1 %v10646_v45  ;;  %v10658_v54 = vpack.c.bf16 %v8410_v3, %v8409_v53 }
 0xc12   : > { %9343 = vmatmul.mubr.msk.f32.vlgmr.msra.gmra.mrb[14].mxu0 %vm7985_vm15, %v8071_v57  ;;  %10648 = vmatprep.subr.bf16.mxu1 %v11862_v58  ;;  %v8412_v57 = vld [vmem:[#allocation25 + $0x58] sm:$0xff] }
 0xc13   : > { %10602 = vmatpush3.bf16.msra.mxu0 %v10601_v56  ;;  %9365 = vmatprep.mubr.msk.f32.mxu0 %vm11866_vm11, %v11857_v0  ;;  %v8411_v56 = vld [vmem:[#allocation25 + $0x50] sm:$0xff] }
 0xc14   : > { %10603 = vmatprep.subr.bf16.mxu0 %v11862_v58  ;;  %v10661_v60 = vpack.c.bf16 %v8412_v57, %v8411_v56 }
 0xc15   : > { %10650 = vmatpush3.bf16.msra.mxu1 %v10649_v47 }
 0xc16   : > { %10651 = vmatprep.subr.bf16.mxu1 %v11862_v58 }
 0xc17   : > { %10605 = vmatpush3.bf16.msra.mxu0 %v10604_v61  ;;  %v8414_v61 = vld [vmem:[#allocation25 + $0x68] sm:$0xff] }
 0xc18   : > { %10606 = vmatprep.subr.bf16.mxu0 %v11862_v58  ;;  %v10664_v43 = vpack.c.bf16 %v8414_v61, %v8413_v4 }
 0xc19   : > { %10653 = vmatpush3.bf16.msra.mxu1 %v10652_v2 }
 0xc1a   : > { %10654 = vmatprep.subr.bf16.mxu1 %v11862_v58 }
 0xc1b   : > { %10608 = vmatpush3.bf16.msra.mxu0 %v10607_v1 }
 0xc1c   : > { %10609 = vmatprep.subr.bf16.mxu0 %v11862_v58 }
 0xc1d   : > { %10656 = vmatpush3.bf16.msra.mxu1 %v10655_v24 }
 0xc1e   : > { %10657 = vmatprep.subr.bf16.mxu1 %v11862_v58 }
 0xc1f   : > { %10611 = vmatpush3.bf16.msra.mxu0 %v10610_v5 }
 0xc20   : > { %10612 = vmatprep.subr.bf16.mxu0 %v11862_v58 }
 0xc21   : > { %10659 = vmatpush3.bf16.msra.mxu1 %v10658_v54 }
 0xc22   : > { %10660 = vmatprep.subr.bf16.mxu1 %v11862_v58 }
 0xc23   : > { %10614 = vmatpush3.bf16.msra.mxu0 %v10613_v40 }
 0xc24   : > { %10615 = vmatprep.subr.bf16.mxu0 %v11862_v58 }
 0xc25   : > { %10662 = vmatpush3.bf16.msra.mxu1 %v10661_v60 }
 0xc26   : > { %9366 = vmatmul.mubr.msk.f32.vlgmr.msra.gmra.mrb[14].mxu0 %vm7985_vm15, %v8156_v27  ;;  %10663 = vmatprep.subr.bf16.mxu1 %v11862_v58 }
 0xc27   : > { %10617 = vmatpush3.bf16.msra.mxu0 %v10616_v8  ;;  %9388 = vmatprep.mubr.msk.f32.mxu0 %vm11866_vm11, %v11857_v0  ;;  %v10667_v8 = vpack.c.bf16 %v8493_v59, %v8492_v6 }
 0xc28   : > { %10618 = vmatprep.subr.bf16.mxu0 %v11862_v58 }
 0xc29   : > { %10665 = vmatpush3.bf16.msra.mxu1 %v10664_v43 }
 0xc2a   : > { %9442 = vmatprep.subr.mxu1 %v11857_v0 }
 0xc2b   : > { %10620 = vmatpush3.bf16.msra.mxu0 %v10619_v11  ;;  %v10670_v11 = vpack.c.bf16 %v8495_v10, %v8494_v9 }
 0xc2c   : > { %10621 = vmatprep.subr.bf16.mxu0 %v11862_v58 }
 0xc2d   : > { %9443 = vmatpush3.msra.mxu1 %v8415_v50 }
 0xc2e   : > { %10666 = vmatprep.subr.bf16.mxu1 %v11862_v58 }
 0xc2f   : > { %10623 = vmatpush3.bf16.msra.mxu0 %v10622_v13  ;;  %v10673_v13 = vpack.c.bf16 %v8497_v12, %v8496_v41 }
 0xc30   : > { %10624 = vmatprep.subr.bf16.mxu0 %v11862_v58 }
 0xc33   : > { %10626 = vmatpush3.bf16.msra.mxu0 %v10625_v25  ;;  %v10676_v25 = vpack.c.bf16 %v8499_v15, %v8498_v42 }
 0xc34   : > { %10627 = vmatprep.subr.bf16.mxu0 %v11862_v58 }
 0xc37   : > { %10629 = vmatpush3.bf16.msra.mxu0 %v10628_v22  ;;  %v10679_v22 = vpack.c.bf16 %v8501_v21, %v8500_v16 }
 0xc38   : > { %10630 = vmatprep.subr.bf16.mxu0 %v11862_v58 }
 0xc3a   : > { %9389 = vmatmul.mubr.msk.f32.vlgmr.msra.gmra.mrb[14].mxu0 %vm7985_vm15, %v8241_v30 }
 0xc3b   : > { %10632 = vmatpush3.bf16.msra.mxu0 %v10631_v29  ;;  %9411 = vmatprep.mubr.msk.f32.mxu0 %vm11866_vm11, %v11857_v0 }
 0xc3c   : > { %10633 = vmatprep.subr.bf16.mxu0 %v11862_v58 }
 0xc3f   : > { %10635 = vmatpush3.bf16.msra.mxu0 %v10634_v33  ;;  %v8503_v33 = vld [vmem:[#allocation29] sm:$0x1] }
 0xc40   : > { %10636 = vmatprep.subr.bf16.mxu0 %v11862_v58 }
 0xc43   : > { %10638 = vmatpush3.bf16.msra.mxu0 %v10637_v19 }
 0xc44   : > { %10639 = vmatprep.subr.bf16.mxu0 %v11862_v58 }
 0xc47   : > { %10641 = vmatpush3.bf16.msra.mxu0 %v10640_v28 }
 0xc48   : > { %10642 = vmatprep.subr.bf16.mxu0 %v11862_v58 }
 0xc4b   : > { %10644 = vmatpush3.bf16.msra.mxu0 %v10643_v18 }
 0xc4e   : > { %9412 = vmatmul.mubr.msk.f32.vlgmr.msra.gmra.mrb[14].mxu0 %vm7985_vm15, %v8326_v39 }
 0xce3   : > { %v8055_v1 = vpop.f32.mrb[30].mxu1 }
 0xce4   : > { %v9321_v62 = vpop.f32.mrb[31].mxu1  ;;  %v8059_v5 = vadd.f32 %v8055_v1, %v7974_v63 }
 0xd21   : > { %v8395_v40 = vpop.f32.mrb[14].mxu0 }
 0xd22   : > { %v10682_v55 = vadd.f32 %v8395_v40, %v8059_v5  ;;  %v9413_v7 = vpop.f32.mrb[15].mxu0 }
 0xd24   : > { %v8400_v27 = vmax.f32 %v10682_v55, 0.0 }
 0xd26   : > { %9445 = vmatmul.mubr.msk.f32.vlgmr.msra.gmra.mrb[32].mxu1 %vm8417_vm2, %v8400_v27 }
 0xd27   : > { %10668 = vmatpush3.bf16.msra.mxu1 %v10667_v8  ;;  %9469 = vmatprep.mubr.msk.f32.mxu1 %vm11866_vm11, %v11857_v0 }
 0xd28   : > { %10669 = vmatprep.subr.bf16.mxu1 %v11862_v58 }
 0xd2b   : > { %10671 = vmatpush3.bf16.msra.mxu1 %v10670_v11 }
 0xd2c   : > { %10672 = vmatprep.subr.bf16.mxu1 %v11862_v58 }
 0xd2f   : > { %10674 = vmatpush3.bf16.msra.mxu1 %v10673_v13 }
 0xd30   : > { %10675 = vmatprep.subr.bf16.mxu1 %v11862_v58 }
 0xd33   : > { %10677 = vmatpush3.bf16.msra.mxu1 %v10676_v25 }
 0xd34   : > { %10678 = vmatprep.subr.bf16.mxu1 %v11862_v58 }
 0xd37   : > { %10680 = vmatpush3.bf16.msra.mxu1 %v10679_v22 }
 0xd38   : > { %9467 = vmatprep.subr.mxu1 %v11857_v0 }
 0xd3b   : > { %9468 = vmatpush3.msk.msra.mxu1 %vm918_vm0, %v8502_v23 }
 0xdf9   : > { %v8487_v29 = vpop.f32.mrb[32].mxu1 }
 0xdfa   : > { %v8488_v30 = vadd.f32 %v8487_v29, %v8416_v26  ;;  %v9446_v31 = vpop.f32.mrb[33].mxu1 }
 0xdfc   : > { %v8491_v32 = vmax.f32 %v8488_v30, 0.0 }
 0xdfe   : > { %9470 = vmatmul.mubr.msk.f32.vlgmr.msra.gmra.mrb[34].mxu1 %vm909_vm1, %v8491_v32 }
 0xed1   : > { %v8576_v34 = vpop.f32.mrb[34].mxu1 }
 0xed2   : > { %v8577_v58 = vadd.f32 %v8576_v34, %v8503_v33  ;;  %v9471_v14 = vpop.f32.mrb[35].mxu1 }
 0xed4   : > { %v8581_v19 = vsel %vm8580_vm3, %v8577_v58, -inf }
 0xed5   : > { %8582 = vmax.xlane.f32.xlu0 %v8581_v19 }
 0xf62   : > { %v8583_v0 = vpop.xlane.xlu0 %8582 }
 0xf63   : > { %v8584_v35 = vsub.f32 %v8577_v58, %v8583_v0 }
 0xf65   : > { %v8585_v36 = vmul.f32 1.442695, %v8584_v35 }
 0xf67   : > { %11211 = vpow2.f32 %v8585_v36 }
 0xf71   : > { %v11212_v28 = vpop.eup %11211 }
 0xf72   : > { %v8587_v37 = vsel %vm8580_vm3, %v11212_v28, 0.0 }
 0xf73   : > { %8588 = vadd.xlane.f32.xlu1 %v8587_v37 }
0x1000   : > { %v8589_v38 = vpop.xlane.xlu1 %8588 }
0x1001   : > { %11213 = vlog2.f32 %v8589_v38 }
0x100b   : > { %v11214_v18 = vpop.eup %11213 }
0x100c   : > { %v8591_v39 = vmul.f32 0.6931472, %v11214_v18 }
0x100e   : > { %v8592_v17 = vsub.f32 %v8584_v35, %v8591_v39 }
0x1010   : > { %8593 = vst.msk [vmem:[%s842_s25] sm:$0x1] %vm8580_vm3, %v8592_v17 }
0x1011   : > { %11744 = shalt.err (!%p11741_p1)
}
0x1012   : > { %s11745_s3 = scalar_lea.hbm %s13456_s29, 16  ;;  %s11749_s4 = scalar_lea.hbm %s13607_s28, 32 }
0x1013   : > { %p11746_p0 = scmp.ne.s32.totalorder %s13456_s29, %s11745_s3  ;;  %p11750_p9 = scmp.lt.u32.totalorder %s13456_s29, %s13607_s28 }
0x1014   : > { %p11751_p12 = scmp.lt.u32.totalorder %s11749_s4, %s11745_s3  ;;  %p11753_p2 = scmp.lt.u32.totalorder %s11745_s3, %s13456_s29 }
0x1015   : > { %p11747_p6 = pnand %p11746_p0, %p13608_p3 }
0x1016   : > { %p11752_p10 = por %p11751_p12, %p11750_p9 }
0x1017   : > { %p11748_p5 = pneg %p11747_p6 }
0x1018   : > { %p11754_p4 = por %p11753_p2, %p11752_p10 }
0x101a   : > { %p11755_p7 = pnand %p11754_p4, %p11748_p5 }
0x101c   : > { %11758 = shalt.err (!%p11755_p7)
}
0x101d   : > { %11049 = dma.vmem_to_hbm [thread:$0]  (%p13608_p3), %s13458_s21, 16, %s13456_s29, %s8595_s26  }
0x101e PF: > { %s13609_s27 = sld [smem:[#allocation46_spill]]  ;;  %s13610_s25 = sld [smem:[#allocation43_spill]] }
0x101f   : > { %s13611_s30 = sld [smem:[#allocation51_spill]] }
0x1024   : > { %p11146_p8 = scmp.ge.s32.totalorder %s13609_s27, 2  ;;  %s8619_s22 = sand.u32 1, %s13610_s25  }
0x1025   : > { %p13612_p11 = scmp.ne.s32.totalorder %s13611_s30, 0  ;;  %s8620_s10 = scalar_lea.sflag [#allocation4], %s8619_s22 }
0x1027   : > { %p11107_p13 = pnand %p11146_p8, %p13612_p11 }
0x1029   : > { %11816 = dma.done.wait (!%p11107_p13), %s8620_s10, 16  }
0x102a   : > { %11818 = vsyncadd (!%p11107_p13), %s8620_s10, 4294967280  ;;  %s13613_s21 = sld [smem:[#allocation48_spill]]  ;;  %s13614_s0 = sld [smem:[#allocation44_spill]] }
0x102b   : > { %s13615_s30 = sld [smem:[#allocation45_spill]]  ;;  %s13616_s20 = sld [smem:[#allocation49_spill]] }
0x1030   : > { %p39_p1 = scmp.ge.s32.totalorder %s13613_s21, 4  }
0x1032   :  { %41 = sbr.rel (!%p39_p1) target bundleno = 24 (0x18), region = 256 }
0x1039   :  { %8624 = vsyncpa [#allocation3], 1 }
0x103a   :  { %8626 = vsyncpa [#allocation3 + $0x1], 1 }
0x103b   :  { %8627 = vsyncpa [#allocation6], 1 }
0x103c   :  { %8628 = vsyncpa [#allocation9], 1 }
0x103d   :  { %8629 = vsyncpa [#allocation12], 1 }
0x103e   :  { %8630 = vsyncpa [#allocation15], 1 }
0x103f   :  { %8631 = vsyncpa [#allocation18], 1 }
0x1040   :  { %8632 = vsyncpa [#allocation21], 1 }
0x1041   :  { %8633 = vsyncpa [#allocation24], 1 }
0x1042   :  { %8634 = vsyncpa [#allocation27], 1 }
0x1043   :  { %8635 = vsyncpa [#allocation30], 1 }
0x1044   :  { %8636 = vsyncpa [#allocation4], 1 }
0x1045   :  { %8638 = vsyncpa [#allocation4 + $0x1], 1 }

</bundles_post_ra>
